<compile_context>
chip_gen: v7x
topology: tpu7x:2x2x1
jax: 0.10.0
libtpu: 0.0.40
codegen_flags: <defaults>
</compile_context>

<pallas_src>
import functools

import jax
import jax.numpy as jnp
from jax.experimental import pallas as pl
from jax.experimental.pallas import tpu as pltpu


_LANES = 128  # packed channel width: 2 images x 64 body channels


# -----------------------------------------------------------------------------
# Fused ConvDown kernel (one PAIR of batch images per grid step)
# -----------------------------------------------------------------------------
def _convdown_kernel(
    x_ref,                       # (NR, K0P)  bf16  pair-packed layer-0 im2col
    mb_ref, mt_ref,              # (NR,128) / (NR2,128) f32 column masks
    w0_ref, b0_ref,              # (K0P,128) bf16, (1,128) f32
    w1_ref, b1_ref,              # (1152,128) bf16, (1,128) f32
    w2_ref, b2_ref,              # (1152,128) bf16, (1,128) f32
    w3_ref, b3_ref,              # (1152,128) bf16, (1,128) f32  (stride-2 conv)
    w4_ref, b4_ref,              # (1152,128) bf16, (1,128) f32  (64 -> ch_in)
    out_ref,                     # (NR2, 128) f32
    cA, cB, cT, stage,           # VMEM scratch
    *, H, WC,
):
    H2 = H // 2
    NR = H * WC                  # stride-1 compute rows
    NR2 = H2 * WC                # tail compute rows
    R0 = WC + 1                  # flat canvas offset of valid pixel (0, 0)

    # Border-only zeroing: rows [0, R0) and [R0+valid, end) are the top/bottom
    # zero padding and are never rewritten; the valid region (including its
    # garbage columns) is fully overwritten by the masked stores below.  Done
    # every grid step on purpose (each TensorCore owns its own scratch).
    for canv, n_valid in ((cA, NR), (cB, NR), (cT, NR2)):
        canv[pl.ds(0, R0), :] = jnp.zeros((R0, canv.shape[1]), jnp.bfloat16)
        n_tail = canv.shape[0] - R0 - n_valid
        canv[pl.ds(R0 + n_valid, n_tail), :] = jnp.zeros(
            (n_tail, canv.shape[1]), jnp.bfloat16)

    mb = mb_ref[...]             # hoisted masks (reused by several layers)
    mt = mt_ref[...]

    def conv3x3(src, w_ref, b_ref, n_rows):
        """3x3 conv as ONE MXU dot: 9 shifted canvas row-slices concatenated
        along the lane axis -> (n_rows, 9*128) slab, single K=1152 matmul."""
        parts = []
        for dy in (-1, 0, 1):
            for dx in (-1, 0, 1):
                parts.append(src[pl.ds(R0 + dy * WC + dx, n_rows), :])
        lhs = jnp.concatenate(parts, axis=-1)
        return jnp.dot(lhs, w_ref[...],
                       preferred_element_type=jnp.float32) + b_ref[...]

    def to_canvas(dst, vals, mask):
        # Re-zero the horizontal-padding / garbage columns, store bf16.
        dst[pl.ds(R0, vals.shape[0]), :] = (vals * mask).astype(dst.dtype)

    # body0 (+ReLU): the layer-0 im2col slab was built lane-dense in the
    # wrapper, so this is a single dot.
    v = jnp.dot(x_ref[...], w0_ref[...],
                preferred_element_type=jnp.float32) + b0_ref[...]
    to_canvas(cA, jnp.maximum(v, 0.0), mb)

    # body1, body2 (+ReLU)
    v = conv3x3(cA, w1_ref, b1_ref, NR)
    to_canvas(cB, jnp.maximum(v, 0.0), mb)
    v = conv3x3(cB, w2_ref, b2_ref, NR)
    to_canvas(cA, jnp.maximum(v, 0.0), mb)

    # tail0: 3x3 conv, stride 2, no activation.  Evaluated on the stride-1
    # grid, then parity-subsampled: stride-2 output pixel (oy, ox) == flat
    # tail row j has its 3x3 window centred at canvas offset R0 + 2*j, i.e.
    # the even rows of the dense result are exactly the strided conv; the
    # aliased garbage-column rows are zeroed by mask_t before cT is read.
    # TODO(synk): read the 9 taps with sublane stride 2 instead (halves the
    # tail0 MXU rows and removes this f32 staging buffer) once strided bf16
    # canvas reads are verified to lower on all target generations.
    v = conv3x3(cA, w3_ref, b3_ref, NR)
    stage[...] = v
    to_canvas(cT, stage[pl.ds(0, NR2, stride=2), :], mt)

    # tail1: 3x3 conv, 64 -> ch_in per image (Cout zero-padded to 128 lanes).
    v = conv3x3(cT, w4_ref, b4_ref, NR2)
    out_ref[...] = v.astype(out_ref.dtype)


# -----------------------------------------------------------------------------
# Parameter handling
# -----------------------------------------------------------------------------
def init_convdown_params(key, ch_in, dtype=jnp.float32):
    """Deterministic synthetic parameters, HWIO weight layout (f32)."""
    def conv_params(k, cin, cout):
        kw_key, kb_key = jax.random.split(k)
        fan_in = cin * 9
        scale = (1.0 / fan_in) ** 0.5
        w = jax.random.uniform(kw_key, (3, 3, cin, cout), dtype, -scale, scale)
        b = jax.random.uniform(kb_key, (cout,), dtype, -scale, scale)
        return w, b

    keys = jax.random.split(key, 5)
    return {
        "body0": conv_params(keys[0], ch_in, 64),
        "body1": conv_params(keys[1], 64, 64),
        "body2": conv_params(keys[2], 64, 64),
        "tail0": conv_params(keys[3], 64, 64),   # stride 2
        "tail1": conv_params(keys[4], 64, ch_in),
    }


def _pack_first_layer(w_hwio, b, k_pad):
    """HWIO (3,3,C,64) -> pair-packed block-diag (k_pad, 128) bf16 + (1,128) f32.

    The layer-0 im2col lanes are [img0's 9*C taps, img1's 9*C taps], so the
    packed weight is [[W, 0], [0, W]] with W = (9*C, 64)."""
    kh, kw, cin, co = w_hwio.shape
    wf = w_hwio.reshape(kh * kw * cin, co)
    z = jnp.zeros_like(wf)
    wp = jnp.concatenate([jnp.concatenate([wf, z], axis=1),
                          jnp.concatenate([z, wf], axis=1)], axis=0)
    if k_pad > wp.shape[0]:
        wp = jnp.pad(wp, ((0, k_pad - wp.shape[0]), (0, 0)))
    bp = jnp.concatenate([b, b])[None, :]
    return wp.astype(jnp.bfloat16), bp.astype(jnp.float32)


def _pack_canvas_layer(w_hwio, b, cout_pad=_LANES):
    """HWIO (3,3,64,co) -> per-tap block-diag pair-packed weight.

    Canvas lanes are [tap, (img0 64ch, img1 64ch)], so per tap the packed
    block is [[w_tap, 0], [0, w_tap]]; result (9*128, 2*co [padded to 128])."""
    kh, kw, cin, co = w_hwio.shape
    wt = w_hwio.reshape(kh * kw, cin, co)
    z = jnp.zeros_like(wt)
    wp = jnp.concatenate([jnp.concatenate([wt, z], axis=2),
                          jnp.concatenate([z, wt], axis=2)], axis=1)
    wp = wp.reshape(kh * kw * 2 * cin, 2 * co)
    bp = jnp.concatenate([b, b])
    if cout_pad > 2 * co:
        wp = jnp.pad(wp, ((0, 0), (0, cout_pad - 2 * co)))
        bp = jnp.pad(bp, ((0, cout_pad - 2 * co),))
    return wp.astype(jnp.bfloat16), bp[None, :].astype(jnp.float32)


# -----------------------------------------------------------------------------
# Public forward (NCHW in / NCHW out, like the PyTorch module)
# -----------------------------------------------------------------------------
def convdown_forward(params, x_nchw):
    N, C, H, W = x_nchw.shape
    assert H % 2 == 0 and W % 2 == 0, "even spatial dims expected (up_factor=2)"
    assert C <= 64
    H2, W2 = H // 2, W // 2
    WC = W + 2                       # canvas width (valid cols 1..W)
    LC = (H + 3) * WC                # body canvas rows
    LC2 = (H2 + 3) * WC              # tail canvas rows
    NR = H * WC
    NR2 = H2 * WC
    R0 = WC + 1

    # --- pair-pack the batch along the channel/lane axis ----------------------
    NPAD = N + (N % 2)
    NP = NPAD // 2
    x = x_nchw if NPAD == N else jnp.pad(
        x_nchw, ((0, NPAD - N), (0, 0), (0, 0), (0, 0)))

    # --- layer-0 im2col built host-side so the per-step input DMA is lane-dense
    x_nhwc = jnp.transpose(x, (0, 2, 3, 1))
    xp = jnp.pad(x_nhwc, ((0, 0), (1, 1), (1, WC - W - 1), (0, 0)))
    canv = xp.reshape(NPAD, (H + 2) * WC, C)
    canv = jnp.pad(canv, ((0, 0), (0, 2), (0, 0)))        # slack for (+1,+1) tap
    taps = []
    for dy in (-1, 0, 1):
        for dx in (-1, 0, 1):
            off = R0 + dy * WC + dx
            taps.append(jax.lax.slice_in_dim(canv, off, off + NR, axis=1))
    xim = jnp.concatenate(taps, axis=-1)                   # (NPAD, NR, 9C)
    xim = xim.reshape(NP, 2, NR, 9 * C).transpose(0, 2, 1, 3)
    xim = xim.reshape(NP, NR, 18 * C)                      # [img0 9C | img1 9C]
    K0 = 18 * C
    K0P = ((K0 + _LANES - 1) // _LANES) * _LANES
    if K0P != K0:
        xim = jnp.pad(xim, ((0, 0), (0, 0), (0, K0P - K0)))
    xim = xim.astype(jnp.bfloat16)

    # --- column-validity masks (computed once, constant index-map inputs) -----
    col_b = (jnp.arange(NR, dtype=jnp.int32) + 1) % WC
    mask_b = jnp.broadcast_to(
        ((col_b >= 1) & (col_b <= W)).astype(jnp.float32)[:, None], (NR, _LANES))
    col_t = (jnp.arange(NR2, dtype=jnp.int32) + 1) % WC
    mask_t = jnp.broadcast_to(
        ((col_t >= 1) & (col_t <= W2)).astype(jnp.float32)[:, None], (NR2, _LANES))

    # --- pair-packed (block-diagonal) weights ----------------------------------
    w0p, b0p = _pack_first_layer(*params["body0"], k_pad=K0P)
    w1p, b1p = _pack_canvas_layer(*params["body1"])
    w2p, b2p = _pack_canvas_layer(*params["body2"])
    w3p, b3p = _pack_canvas_layer(*params["tail0"])
    w4p, b4p = _pack_canvas_layer(*params["tail1"])

    kernel = functools.partial(_convdown_kernel, H=H, WC=WC)

    def _const(a):
        return pl.BlockSpec(a.shape, lambda n: (0,) * a.ndim)

    # --- VMEM budget: derive from the working set, clamp to chip capacity ------
    bf2, f4 = 2, 4
    wbytes = sum(int(w.size) * bf2 + int(b.size) * f4 for w, b in
                 ((w0p, b0p), (w1p, b1p), (w2p, b2p), (w3p, b3p), (w4p, b4p)))
    vmem_est = (
        2 * NR * K0P * bf2                 # double-buffered input block
        + 2 * (NR + NR2) * _LANES * f4     # masks
        + 2 * wbytes                       # weights
        + 2 * NR2 * _LANES * f4            # output block
        + (2 * LC + LC2) * _LANES * bf2    # canvases
        + NR * _LANES * f4                 # f32 stride-2 staging scratch
        + 3 * NR * 9 * _LANES * bf2        # im2col slab temporaries headroom
        + 4 * NR * _LANES * f4             # f32 accumulator temporaries
    )
    try:
        vmem_cap = int(pltpu.get_tpu_info().vmem_capacity_bytes)
    except Exception:
        vmem_cap = 64 * 1024 * 1024        # v7x per-core ceiling as safe fallback
    vmem_limit = int(min(max(2 * vmem_est, 32 * 1024 * 1024), 0.9 * vmem_cap))
    # TODO(synk): add H-strip tiling (grid over row strips with a 1-line halo)
    # once the (H+3)*(W+2)*128 B canvases no longer fit the per-core VMEM budget.

    out_wide = pl.pallas_call(
        kernel,
        out_shape=jax.ShapeDtypeStruct((NP, NR2, _LANES), jnp.float32),
        grid=(NP,),
        in_specs=[
            pl.BlockSpec((None, NR, K0P), lambda n: (n, 0, 0)),
            _const(mask_b), _const(mask_t),
            _const(w0p), _const(b0p),
            _const(w1p), _const(b1p),
            _const(w2p), _const(b2p),
            _const(w3p), _const(b3p),
            _const(w4p), _const(b4p),
        ],
        out_specs=pl.BlockSpec((None, NR2, _LANES), lambda n: (n, 0, 0)),
        scratch_shapes=[
            pltpu.VMEM((LC, _LANES), jnp.bfloat16),    # canvas A (pair-packed)
            pltpu.VMEM((LC, _LANES), jnp.bfloat16),    # canvas B
            pltpu.VMEM((LC2, _LANES), jnp.bfloat16),   # tail canvas
            pltpu.VMEM((NR, _LANES), jnp.float32),     # stride-2 staging
        ],
        compiler_params=pltpu.CompilerParams(
            # TODO(synk): switch the batch axis to pltpu.CORE_PARALLEL on v7x
            # (2 TC/chip); kept the portable "parallel" so the kernel compiles
            # on every generation.
            dimension_semantics=("parallel",),
            vmem_limit_bytes=vmem_limit,
        ),
    )(xim, mask_b, mask_t, w0p, b0p, w1p, b1p, w2p, b2p, w3p, b3p, w4p, b4p)

    # (NP, NR2, 128) -> (N, C, H/2, W/2): drop garbage columns, un-pack pairs.
    out = out_wide.reshape(NP, H2, WC, _LANES)[:, :, :W2, :]
    pairs = jnp.stack([out[..., :C], out[..., C:2 * C]], axis=1)  # (NP,2,H2,W2,C)
    y = pairs.reshape(NPAD, H2, W2, C)[:N]
    return jnp.transpose(y, (0, 3, 1, 2))


# -----------------------------------------------------------------------------
# Pure-JAX reference (f32) for a loose correctness check
# -----------------------------------------------------------------------------
def convdown_reference(params, x_nchw):
    def conv(x, w, b, stride, relu):
        y = jax.lax.conv_general_dilated(
            x, w, window_strides=(stride, stride),
            padding=((1, 1), (1, 1)),
            dimension_numbers=("NHWC", "HWIO", "NHWC"))
        y = y + b
        return jnp.maximum(y, 0.0) if relu else y

    x = jnp.transpose(x_nchw, (0, 2, 3, 1))
    x = conv(x, *params["body0"], 1, True)
    x = conv(x, *params["body1"], 1, True)
    x = conv(x, *params["body2"], 1, True)
    x = conv(x, *params["tail0"], 2, False)
    x = conv(x, *params["tail1"], 1, False)
    return jnp.transpose(x, (0, 3, 1, 2))


if __name__ == "__main__":
    key = jax.random.PRNGKey(0)
    k_param, k_x = jax.random.split(key)

    N, ch_in, H, W = 2, 4, 16, 16
    params = init_convdown_params(k_param, ch_in)
    x = jax.random.normal(k_x, (N, ch_in, H, W), dtype=jnp.float32)

    fwd = jax.jit(functools.partial(convdown_forward, params))
    out = fwd(x)
    jax.block_until_ready(out)

    # up_factor=2 downsamples spatial dims by 2.
    assert out.shape == (N, ch_in, H // 2, W // 2), out.shape
    assert out.dtype == jnp.float32

    # Loose check against an f32 XLA reference (kernel uses bf16 operands).
    ref = jax.jit(functools.partial(convdown_reference, params))(x)
    jax.block_until_ready(ref)
    err = float(jnp.max(jnp.abs(out - ref)))
    scale = float(jnp.max(jnp.abs(ref)))
    assert err <= 0.05 * scale + 1e-2, (err, scale)

    print("KERNEL_OK")
</pallas_src>

<mosaic_0001>
module attributes {stable_mosaic.version = 11 : i64} {
  func.func @_convdown_kernel(%arg0: i32, %arg1: memref<1x288x128xbf16, #tpu.memory_space<vmem>>, %arg2: memref<288x128xf32, #tpu.memory_space<vmem>>, %arg3: memref<144x128xf32, #tpu.memory_space<vmem>>, %arg4: memref<128x128xbf16, #tpu.memory_space<vmem>>, %arg5: memref<1x128xf32, #tpu.memory_space<vmem>>, %arg6: memref<1152x128xbf16, #tpu.memory_space<vmem>>, %arg7: memref<1x128xf32, #tpu.memory_space<vmem>>, %arg8: memref<1152x128xbf16, #tpu.memory_space<vmem>>, %arg9: memref<1x128xf32, #tpu.memory_space<vmem>>, %arg10: memref<1152x128xbf16, #tpu.memory_space<vmem>>, %arg11: memref<1x128xf32, #tpu.memory_space<vmem>>, %arg12: memref<1152x128xbf16, #tpu.memory_space<vmem>>, %arg13: memref<1x128xf32, #tpu.memory_space<vmem>>, %arg14: memref<1x144x128xf32, #tpu.memory_space<vmem>>, %arg15: memref<342x128xbf16, #tpu.memory_space<vmem>>, %arg16: memref<342x128xbf16, #tpu.memory_space<vmem>>, %arg17: memref<198x128xbf16, #tpu.memory_space<vmem>>, %arg18: memref<288x128xf32, #tpu.memory_space<vmem>>) attributes {dimension_semantics = [#tpu.dimension_semantics<parallel>], iteration_bounds = array<i64: 1>, scalar_prefetch = 0 : i64, scratch_operands = 4 : i64, tpu.core_type = #tpu.core_type<tc>, window_params = [{transform_indices = @transform_0, window_bounds = array<i64: 1, 288, 128>}, {pipeline_mode = #tpu.pipeline_mode<synchronous>, transform_indices = @transform_1, window_bounds = array<i64: 288, 128>}, {pipeline_mode = #tpu.pipeline_mode<synchronous>, transform_indices = @transform_2, window_bounds = array<i64: 144, 128>}, {pipeline_mode = #tpu.pipeline_mode<synchronous>, transform_indices = @transform_3, window_bounds = array<i64: 128, 128>}, {pipeline_mode = #tpu.pipeline_mode<synchronous>, transform_indices = @transform_4, window_bounds = array<i64: 1, 128>}, {pipeline_mode = #tpu.pipeline_mode<synchronous>, transform_indices = @transform_5, window_bounds = array<i64: 1152, 128>}, {pipeline_mode = #tpu.pipeline_mode<synchronous>, transform_indices = @transform_6, window_bounds = array<i64: 1, 128>}, {pipeline_mode = #tpu.pipeline_mode<synchronous>, transform_indices = @transform_7, window_bounds = array<i64: 1152, 128>}, {pipeline_mode = #tpu.pipeline_mode<synchronous>, transform_indices = @transform_8, window_bounds = array<i64: 1, 128>}, {pipeline_mode = #tpu.pipeline_mode<synchronous>, transform_indices = @transform_9, window_bounds = array<i64: 1152, 128>}, {pipeline_mode = #tpu.pipeline_mode<synchronous>, transform_indices = @transform_10, window_bounds = array<i64: 1, 128>}, {pipeline_mode = #tpu.pipeline_mode<synchronous>, transform_indices = @transform_11, window_bounds = array<i64: 1152, 128>}, {pipeline_mode = #tpu.pipeline_mode<synchronous>, transform_indices = @transform_12, window_bounds = array<i64: 1, 128>}, {transform_indices = @transform_13, window_bounds = array<i64: 1, 144, 128>}]} {
    %cst = arith.constant 0.000000e+00 : bf16
    %0 = vector.broadcast %cst : bf16 to vector<19x128xbf16>
    %c0 = arith.constant 0 : index
    %c0_0 = arith.constant 0 : index
    %1 = vector.load %arg15[%c0, %c0_0] : memref<342x128xbf16, #tpu.memory_space<vmem>>, vector<19x128xbf16>
    tpu.vector_store %arg15[%c0, %c0_0], %0 {strides = array<i32>} : memref<342x128xbf16, #tpu.memory_space<vmem>>, vector<19x128xbf16>,
    %cst_1 = arith.constant 0.000000e+00 : bf16
    %2 = vector.broadcast %cst_1 : bf16 to vector<35x128xbf16>
    %c307 = arith.constant 307 : index
    %c0_2 = arith.constant 0 : index
    %3 = vector.load %arg15[%c307, %c0_2] : memref<342x128xbf16, #tpu.memory_space<vmem>>, vector<35x128xbf16>
    tpu.vector_store %arg15[%c307, %c0_2], %2 {strides = array<i32>} : memref<342x128xbf16, #tpu.memory_space<vmem>>, vector<35x128xbf16>,
    %cst_3 = arith.constant 0.000000e+00 : bf16
    %4 = vector.broadcast %cst_3 : bf16 to vector<19x128xbf16>
    %c0_4 = arith.constant 0 : index
    %c0_5 = arith.constant 0 : index
    %5 = vector.load %arg16[%c0_4, %c0_5] : memref<342x128xbf16, #tpu.memory_space<vmem>>, vector<19x128xbf16>
    tpu.vector_store %arg16[%c0_4, %c0_5], %4 {strides = array<i32>} : memref<342x128xbf16, #tpu.memory_space<vmem>>, vector<19x128xbf16>,
    %cst_6 = arith.constant 0.000000e+00 : bf16
    %6 = vector.broadcast %cst_6 : bf16 to vector<35x128xbf16>
    %c307_7 = arith.constant 307 : index
    %c0_8 = arith.constant 0 : index
    %7 = vector.load %arg16[%c307_7, %c0_8] : memref<342x128xbf16, #tpu.memory_space<vmem>>, vector<35x128xbf16>
    tpu.vector_store %arg16[%c307_7, %c0_8], %6 {strides = array<i32>} : memref<342x128xbf16, #tpu.memory_space<vmem>>, vector<35x128xbf16>,
    %cst_9 = arith.constant 0.000000e+00 : bf16
    %8 = vector.broadcast %cst_9 : bf16 to vector<19x128xbf16>
    %c0_10 = arith.constant 0 : index
    %c0_11 = arith.constant 0 : index
    %9 = vector.load %arg17[%c0_10, %c0_11] : memref<198x128xbf16, #tpu.memory_space<vmem>>, vector<19x128xbf16>
    tpu.vector_store %arg17[%c0_10, %c0_11], %8 {strides = array<i32>} : memref<198x128xbf16, #tpu.memory_space<vmem>>, vector<19x128xbf16>,
    %cst_12 = arith.constant 0.000000e+00 : bf16
    %10 = vector.broadcast %cst_12 : bf16 to vector<35x128xbf16>
    %c163 = arith.constant 163 : index
    %c0_13 = arith.constant 0 : index
    %11 = vector.load %arg17[%c163, %c0_13] : memref<198x128xbf16, #tpu.memory_space<vmem>>, vector<35x128xbf16>
    tpu.vector_store %arg17[%c163, %c0_13], %10 {strides = array<i32>} : memref<198x128xbf16, #tpu.memory_space<vmem>>, vector<35x128xbf16>,
    %c0_14 = arith.constant 0 : index
    %c0_15 = arith.constant 0 : index
    %12 = vector.load %arg2[%c0_14, %c0_15] : memref<288x128xf32, #tpu.memory_space<vmem>>, vector<288x128xf32>
    %c0_16 = arith.constant 0 : index
    %c0_17 = arith.constant 0 : index
    %13 = vector.load %arg3[%c0_16, %c0_17] : memref<144x128xf32, #tpu.memory_space<vmem>>, vector<144x128xf32>
    %c0_18 = arith.constant 0 : index
    %c0_19 = arith.constant 0 : index
    %c0_20 = arith.constant 0 : index
    %14 = vector.load %arg1[%c0_18, %c0_19, %c0_20] : memref<1x288x128xbf16, #tpu.memory_space<vmem>>, vector<1x288x128xbf16>
    %15 = vector.shape_cast %14 : vector<1x288x128xbf16> to vector<288x128xbf16>
    %c0_21 = arith.constant 0 : index
    %c0_22 = arith.constant 0 : index
    %16 = vector.load %arg4[%c0_21, %c0_22] : memref<128x128xbf16, #tpu.memory_space<vmem>>, vector<128x128xbf16>
    %cst_23 = arith.constant dense<0.000000e+00> : vector<288x128xf32>
    %17 = tpu.matmul %15, %16, %cst_23 {dimension_numbers = #tpu.dot_dimension_numbers<[1], [0], [0], [1], [0, 0, 1, 1], [], []>} : vector<288x128xbf16>, vector<128x128xbf16>, vector<288x128xf32> -> vector<288x128xf32>
    %c0_24 = arith.constant 0 : index
    %c0_25 = arith.constant 0 : index
    %18 = vector.load %arg5[%c0_24, %c0_25] : memref<1x128xf32, #tpu.memory_space<vmem>>, vector<1x128xf32>
    %19 = vector.broadcast %18 : vector<1x128xf32> to vector<288x128xf32>
    %20 = arith.addf %17, %19 : vector<288x128xf32>
    %cst_26 = arith.constant 0.000000e+00 : f32
    %21 = vector.broadcast %cst_26 : f32 to vector<288x128xf32>
    %22 = arith.maximumf %20, %21 : vector<288x128xf32>
    %23 = arith.mulf %22, %12 : vector<288x128xf32>
    %24 = arith.truncf %23 : vector<288x128xf32> to vector<288x128xbf16>
    %c19 = arith.constant 19 : index
    %c0_27 = arith.constant 0 : index
    %25 = vector.load %arg15[%c19, %c0_27] : memref<342x128xbf16, #tpu.memory_space<vmem>>, vector<288x128xbf16>
    tpu.vector_store %arg15[%c19, %c0_27], %24 {strides = array<i32>} : memref<342x128xbf16, #tpu.memory_space<vmem>>, vector<288x128xbf16>,
    %c0_28 = arith.constant 0 : index
    %c0_29 = arith.constant 0 : index
    %26 = vector.load %arg15[%c0_28, %c0_29] : memref<342x128xbf16, #tpu.memory_space<vmem>>, vector<288x128xbf16>
    %c1 = arith.constant 1 : index
    %c0_30 = arith.constant 0 : index
    %27 = vector.load %arg15[%c1, %c0_30] : memref<342x128xbf16, #tpu.memory_space<vmem>>, vector<288x128xbf16>
    %c2 = arith.constant 2 : index
    %c0_31 = arith.constant 0 : index
    %28 = vector.load %arg15[%c2, %c0_31] : memref<342x128xbf16, #tpu.memory_space<vmem>>, vector<288x128xbf16>
    %c18 = arith.constant 18 : index
    %c0_32 = arith.constant 0 : index
    %29 = vector.load %arg15[%c18, %c0_32] : memref<342x128xbf16, #tpu.memory_space<vmem>>, vector<288x128xbf16>
    %c19_33 = arith.constant 19 : index
    %c0_34 = arith.constant 0 : index
    %30 = vector.load %arg15[%c19_33, %c0_34] : memref<342x128xbf16, #tpu.memory_space<vmem>>, vector<288x128xbf16>
    %c20 = arith.constant 20 : index
    %c0_35 = arith.constant 0 : index
    %31 = vector.load %arg15[%c20, %c0_35] : memref<342x128xbf16, #tpu.memory_space<vmem>>, vector<288x128xbf16>
    %c36 = arith.constant 36 : index
    %c0_36 = arith.constant 0 : index
    %32 = vector.load %arg15[%c36, %c0_36] : memref<342x128xbf16, #tpu.memory_space<vmem>>, vector<288x128xbf16>
    %c37 = arith.constant 37 : index
    %c0_37 = arith.constant 0 : index
    %33 = vector.load %arg15[%c37, %c0_37] : memref<342x128xbf16, #tpu.memory_space<vmem>>, vector<288x128xbf16>
    %c38 = arith.constant 38 : index
    %c0_38 = arith.constant 0 : index
    %34 = vector.load %arg15[%c38, %c0_38] : memref<342x128xbf16, #tpu.memory_space<vmem>>, vector<288x128xbf16>
    %35 = tpu.concatenate %26, %27, %28, %29, %30, %31, %32, %33, %34 in 1 : vector<288x128xbf16>, vector<288x128xbf16>, vector<288x128xbf16>, vector<288x128xbf16>, vector<288x128xbf16>, vector<288x128xbf16>, vector<288x128xbf16>, vector<288x128xbf16>, vector<288x128xbf16> -> vector<288x1152xbf16>
    %c0_39 = arith.constant 0 : index
    %c0_40 = arith.constant 0 : index
    %36 = vector.load %arg6[%c0_39, %c0_40] : memref<1152x128xbf16, #tpu.memory_space<vmem>>, vector<1152x128xbf16>
    %cst_41 = arith.constant dense<0.000000e+00> : vector<288x128xf32>
    %37 = tpu.matmul %35, %36, %cst_41 {dimension_numbers = #tpu.dot_dimension_numbers<[1], [0], [0], [1], [0, 0, 1, 1], [], []>} : vector<288x1152xbf16>, vector<1152x128xbf16>, vector<288x128xf32> -> vector<288x128xf32>
    %c0_42 = arith.constant 0 : index
    %c0_43 = arith.constant 0 : index
    %38 = vector.load %arg7[%c0_42, %c0_43] : memref<1x128xf32, #tpu.memory_space<vmem>>, vector<1x128xf32>
    %39 = vector.broadcast %38 : vector<1x128xf32> to vector<288x128xf32>
    %40 = arith.addf %37, %39 : vector<288x128xf32>
    %cst_44 = arith.constant 0.000000e+00 : f32
    %41 = vector.broadcast %cst_44 : f32 to vector<288x128xf32>
    %42 = arith.maximumf %40, %41 : vector<288x128xf32>
    %43 = arith.mulf %42, %12 : vector<288x128xf32>
    %44 = arith.truncf %43 : vector<288x128xf32> to vector<288x128xbf16>
    %c19_45 = arith.constant 19 : index
    %c0_46 = arith.constant 0 : index
    %45 = vector.load %arg16[%c19_45, %c0_46] : memref<342x128xbf16, #tpu.memory_space<vmem>>, vector<288x128xbf16>
    tpu.vector_store %arg16[%c19_45, %c0_46], %44 {strides = array<i32>} : memref<342x128xbf16, #tpu.memory_space<vmem>>, vector<288x128xbf16>,
    %c0_47 = arith.constant 0 : index
    %c0_48 = arith.constant 0 : index
    %46 = vector.load %arg16[%c0_47, %c0_48] : memref<342x128xbf16, #tpu.memory_space<vmem>>, vector<288x128xbf16>
    %c1_49 = arith.constant 1 : index
    %c0_50 = arith.constant 0 : index
    %47 = vector.load %arg16[%c1_49, %c0_50] : memref<342x128xbf16, #tpu.memory_space<vmem>>, vector<288x128xbf16>
    %c2_51 = arith.constant 2 : index
    %c0_52 = arith.constant 0 : index
    %48 = vector.load %arg16[%c2_51, %c0_52] : memref<342x128xbf16, #tpu.memory_space<vmem>>, vector<288x128xbf16>
    %c18_53 = arith.constant 18 : index
    %c0_54 = arith.constant 0 : index
    %49 = vector.load %arg16[%c18_53, %c0_54] : memref<342x128xbf16, #tpu.memory_space<vmem>>, vector<288x128xbf16>
    %c19_55 = arith.constant 19 : index
    %c0_56 = arith.constant 0 : index
    %50 = vector.load %arg16[%c19_55, %c0_56] : memref<342x128xbf16, #tpu.memory_space<vmem>>, vector<288x128xbf16>
    %c20_57 = arith.constant 20 : index
    %c0_58 = arith.constant 0 : index
    %51 = vector.load %arg16[%c20_57, %c0_58] : memref<342x128xbf16, #tpu.memory_space<vmem>>, vector<288x128xbf16>
    %c36_59 = arith.constant 36 : index
    %c0_60 = arith.constant 0 : index
    %52 = vector.load %arg16[%c36_59, %c0_60] : memref<342x128xbf16, #tpu.memory_space<vmem>>, vector<288x128xbf16>
    %c37_61 = arith.constant 37 : index
    %c0_62 = arith.constant 0 : index
    %53 = vector.load %arg16[%c37_61, %c0_62] : memref<342x128xbf16, #tpu.memory_space<vmem>>, vector<288x128xbf16>
    %c38_63 = arith.constant 38 : index
    %c0_64 = arith.constant 0 : index
    %54 = vector.load %arg16[%c38_63, %c0_64] : memref<342x128xbf16, #tpu.memory_space<vmem>>, vector<288x128xbf16>
    %55 = tpu.concatenate %46, %47, %48, %49, %50, %51, %52, %53, %54 in 1 : vector<288x128xbf16>, vector<288x128xbf16>, vector<288x128xbf16>, vector<288x128xbf16>, vector<288x128xbf16>, vector<288x128xbf16>, vector<288x128xbf16>, vector<288x128xbf16>, vector<288x128xbf16> -> vector<288x1152xbf16>
    %c0_65 = arith.constant 0 : index
    %c0_66 = arith.constant 0 : index
    %56 = vector.load %arg8[%c0_65, %c0_66] : memref<1152x128xbf16, #tpu.memory_space<vmem>>, vector<1152x128xbf16>
    %cst_67 = arith.constant dense<0.000000e+00> : vector<288x128xf32>
    %57 = tpu.matmul %55, %56, %cst_67 {dimension_numbers = #tpu.dot_dimension_numbers<[1], [0], [0], [1], [0, 0, 1, 1], [], []>} : vector<288x1152xbf16>, vector<1152x128xbf16>, vector<288x128xf32> -> vector<288x128xf32>
    %c0_68 = arith.constant 0 : index
    %c0_69 = arith.constant 0 : index
    %58 = vector.load %arg9[%c0_68, %c0_69] : memref<1x128xf32, #tpu.memory_space<vmem>>, vector<1x128xf32>
    %59 = vector.broadcast %58 : vector<1x128xf32> to vector<288x128xf32>
    %60 = arith.addf %57, %59 : vector<288x128xf32>
    %cst_70 = arith.constant 0.000000e+00 : f32
    %61 = vector.broadcast %cst_70 : f32 to vector<288x128xf32>
    %62 = arith.maximumf %60, %61 : vector<288x128xf32>
    %63 = arith.mulf %62, %12 : vector<288x128xf32>
    %64 = arith.truncf %63 : vector<288x128xf32> to vector<288x128xbf16>
    %c19_71 = arith.constant 19 : index
    %c0_72 = arith.constant 0 : index
    %65 = vector.load %arg15[%c19_71, %c0_72] : memref<342x128xbf16, #tpu.memory_space<vmem>>, vector<288x128xbf16>
    tpu.vector_store %arg15[%c19_71, %c0_72], %64 {strides = array<i32>} : memref<342x128xbf16, #tpu.memory_space<vmem>>, vector<288x128xbf16>,
    %c0_73 = arith.constant 0 : index
    %c0_74 = arith.constant 0 : index
    %66 = vector.load %arg15[%c0_73, %c0_74] : memref<342x128xbf16, #tpu.memory_space<vmem>>, vector<288x128xbf16>
    %c1_75 = arith.constant 1 : index
    %c0_76 = arith.constant 0 : index
    %67 = vector.load %arg15[%c1_75, %c0_76] : memref<342x128xbf16, #tpu.memory_space<vmem>>, vector<288x128xbf16>
    %c2_77 = arith.constant 2 : index
    %c0_78 = arith.constant 0 : index
    %68 = vector.load %arg15[%c2_77, %c0_78] : memref<342x128xbf16, #tpu.memory_space<vmem>>, vector<288x128xbf16>
    %c18_79 = arith.constant 18 : index
    %c0_80 = arith.constant 0 : index
    %69 = vector.load %arg15[%c18_79, %c0_80] : memref<342x128xbf16, #tpu.memory_space<vmem>>, vector<288x128xbf16>
    %c19_81 = arith.constant 19 : index
    %c0_82 = arith.constant 0 : index
    %70 = vector.load %arg15[%c19_81, %c0_82] : memref<342x128xbf16, #tpu.memory_space<vmem>>, vector<288x128xbf16>
    %c20_83 = arith.constant 20 : index
    %c0_84 = arith.constant 0 : index
    %71 = vector.load %arg15[%c20_83, %c0_84] : memref<342x128xbf16, #tpu.memory_space<vmem>>, vector<288x128xbf16>
    %c36_85 = arith.constant 36 : index
    %c0_86 = arith.constant 0 : index
    %72 = vector.load %arg15[%c36_85, %c0_86] : memref<342x128xbf16, #tpu.memory_space<vmem>>, vector<288x128xbf16>
    %c37_87 = arith.constant 37 : index
    %c0_88 = arith.constant 0 : index
    %73 = vector.load %arg15[%c37_87, %c0_88] : memref<342x128xbf16, #tpu.memory_space<vmem>>, vector<288x128xbf16>
    %c38_89 = arith.constant 38 : index
    %c0_90 = arith.constant 0 : index
    %74 = vector.load %arg15[%c38_89, %c0_90] : memref<342x128xbf16, #tpu.memory_space<vmem>>, vector<288x128xbf16>
    %75 = tpu.concatenate %66, %67, %68, %69, %70, %71, %72, %73, %74 in 1 : vector<288x128xbf16>, vector<288x128xbf16>, vector<288x128xbf16>, vector<288x128xbf16>, vector<288x128xbf16>, vector<288x128xbf16>, vector<288x128xbf16>, vector<288x128xbf16>, vector<288x128xbf16> -> vector<288x1152xbf16>
    %c0_91 = arith.constant 0 : index
    %c0_92 = arith.constant 0 : index
    %76 = vector.load %arg10[%c0_91, %c0_92] : memref<1152x128xbf16, #tpu.memory_space<vmem>>, vector<1152x128xbf16>
    %cst_93 = arith.constant dense<0.000000e+00> : vector<288x128xf32>
    %77 = tpu.matmul %75, %76, %cst_93 {dimension_numbers = #tpu.dot_dimension_numbers<[1], [0], [0], [1], [0, 0, 1, 1], [], []>} : vector<288x1152xbf16>, vector<1152x128xbf16>, vector<288x128xf32> -> vector<288x128xf32>
    %c0_94 = arith.constant 0 : index
    %c0_95 = arith.constant 0 : index
    %78 = vector.load %arg11[%c0_94, %c0_95] : memref<1x128xf32, #tpu.memory_space<vmem>>, vector<1x128xf32>
    %79 = vector.broadcast %78 : vector<1x128xf32> to vector<288x128xf32>
    %80 = arith.addf %77, %79 : vector<288x128xf32>
    %c0_96 = arith.constant 0 : index
    %c0_97 = arith.constant 0 : index
    %81 = vector.load %arg18[%c0_96, %c0_97] : memref<288x128xf32, #tpu.memory_space<vmem>>, vector<288x128xf32>
    tpu.vector_store %arg18[%c0_96, %c0_97], %80 {strides = array<i32>} : memref<288x128xf32, #tpu.memory_space<vmem>>, vector<288x128xf32>,
    %c0_98 = arith.constant 0 : index
    %c0_99 = arith.constant 0 : index
    %82 = tpu.strided_load %arg18[%c0_98, %c0_99] {strides = array<i32: 2, 1>} : memref<288x128xf32, #tpu.memory_space<vmem>>, vector<144x128xf32>
    %83 = arith.mulf %82, %13 : vector<144x128xf32>
    %84 = arith.truncf %83 : vector<144x128xf32> to vector<144x128xbf16>
    %c19_100 = arith.constant 19 : index
    %c0_101 = arith.constant 0 : index
    %85 = vector.load %arg17[%c19_100, %c0_101] : memref<198x128xbf16, #tpu.memory_space<vmem>>, vector<144x128xbf16>
    tpu.vector_store %arg17[%c19_100, %c0_101], %84 {strides = array<i32>} : memref<198x128xbf16, #tpu.memory_space<vmem>>, vector<144x128xbf16>,
    %c0_102 = arith.constant 0 : index
    %c0_103 = arith.constant 0 : index
    %86 = vector.load %arg17[%c0_102, %c0_103] : memref<198x128xbf16, #tpu.memory_space<vmem>>, vector<144x128xbf16>
    %c1_104 = arith.constant 1 : index
    %c0_105 = arith.constant 0 : index
    %87 = vector.load %arg17[%c1_104, %c0_105] : memref<198x128xbf16, #tpu.memory_space<vmem>>, vector<144x128xbf16>
    %c2_106 = arith.constant 2 : index
    %c0_107 = arith.constant 0 : index
    %88 = vector.load %arg17[%c2_106, %c0_107] : memref<198x128xbf16, #tpu.memory_space<vmem>>, vector<144x128xbf16>
    %c18_108 = arith.constant 18 : index
    %c0_109 = arith.constant 0 : index
    %89 = vector.load %arg17[%c18_108, %c0_109] : memref<198x128xbf16, #tpu.memory_space<vmem>>, vector<144x128xbf16>
    %c19_110 = arith.constant 19 : index
    %c0_111 = arith.constant 0 : index
    %90 = vector.load %arg17[%c19_110, %c0_111] : memref<198x128xbf16, #tpu.memory_space<vmem>>, vector<144x128xbf16>
    %c20_112 = arith.constant 20 : index
    %c0_113 = arith.constant 0 : index
    %91 = vector.load %arg17[%c20_112, %c0_113] : memref<198x128xbf16, #tpu.memory_space<vmem>>, vector<144x128xbf16>
    %c36_114 = arith.constant 36 : index
    %c0_115 = arith.constant 0 : index
    %92 = vector.load %arg17[%c36_114, %c0_115] : memref<198x128xbf16, #tpu.memory_space<vmem>>, vector<144x128xbf16>
    %c37_116 = arith.constant 37 : index
    %c0_117 = arith.constant 0 : index
    %93 = vector.load %arg17[%c37_116, %c0_117] : memref<198x128xbf16, #tpu.memory_space<vmem>>, vector<144x128xbf16>
    %c38_118 = arith.constant 38 : index
    %c0_119 = arith.constant 0 : index
    %94 = vector.load %arg17[%c38_118, %c0_119] : memref<198x128xbf16, #tpu.memory_space<vmem>>, vector<144x128xbf16>
    %95 = tpu.concatenate %86, %87, %88, %89, %90, %91, %92, %93, %94 in 1 : vector<144x128xbf16>, vector<144x128xbf16>, vector<144x128xbf16>, vector<144x128xbf16>, vector<144x128xbf16>, vector<144x128xbf16>, vector<144x128xbf16>, vector<144x128xbf16>, vector<144x128xbf16> -> vector<144x1152xbf16>
    %c0_120 = arith.constant 0 : index
    %c0_121 = arith.constant 0 : index
    %96 = vector.load %arg12[%c0_120, %c0_121] : memref<1152x128xbf16, #tpu.memory_space<vmem>>, vector<1152x128xbf16>
    %cst_122 = arith.constant dense<0.000000e+00> : vector<144x128xf32>
    %97 = tpu.matmul %95, %96, %cst_122 {dimension_numbers = #tpu.dot_dimension_numbers<[1], [0], [0], [1], [0, 0, 1, 1], [], []>} : vector<144x1152xbf16>, vector<1152x128xbf16>, vector<144x128xf32> -> vector<144x128xf32>
    %c0_123 = arith.constant 0 : index
    %c0_124 = arith.constant 0 : index
    %98 = vector.load %arg13[%c0_123, %c0_124] : memref<1x128xf32, #tpu.memory_space<vmem>>, vector<1x128xf32>
    %99 = vector.broadcast %98 : vector<1x128xf32> to vector<144x128xf32>
    %100 = arith.addf %97, %99 : vector<144x128xf32>
    %c0_125 = arith.constant 0 : index
    %c0_126 = arith.constant 0 : index
    %c0_127 = arith.constant 0 : index
    %101 = vector.load %arg14[%c0_125, %c0_126, %c0_127] : memref<1x144x128xf32, #tpu.memory_space<vmem>>, vector<1x144x128xf32>
    %102 = vector.shape_cast %101 : vector<1x144x128xf32> to vector<144x128xf32>
    %103 = vector.shape_cast %100 : vector<144x128xf32> to vector<1x144x128xf32>
    tpu.vector_store %arg14[%c0_125, %c0_126, %c0_127], %103 {strides = array<i32>} : memref<1x144x128xf32, #tpu.memory_space<vmem>>, vector<1x144x128xf32>,
    return
  }
  func.func @transform_0(%arg0: i32) -> (i32, i32, i32) {
    %c0_i32 = arith.constant 0 : i32
    %c0_i32_0 = arith.constant 0 : i32
    %c0_i32_1 = arith.constant 0 : i32
    return %arg0, %c0_i32, %c0_i32_0 : i32, i32, i32
  }
  func.func @transform_1(%arg0: i32) -> (i32, i32) {
    %c0_i32 = arith.constant 0 : i32
    %c0_i32_0 = arith.constant 0 : i32
    %c0_i32_1 = arith.constant 0 : i32
    return %c0_i32, %c0_i32_0 : i32, i32
  }
  func.func @transform_2(%arg0: i32) -> (i32, i32) {
    %c0_i32 = arith.constant 0 : i32
    %c0_i32_0 = arith.constant 0 : i32
    %c0_i32_1 = arith.constant 0 : i32
    return %c0_i32, %c0_i32_0 : i32, i32
  }
  func.func @transform_3(%arg0: i32) -> (i32, i32) {
    %c0_i32 = arith.constant 0 : i32
    %c0_i32_0 = arith.constant 0 : i32
    %c0_i32_1 = arith.constant 0 : i32
    return %c0_i32, %c0_i32_0 : i32, i32
  }
  func.func @transform_4(%arg0: i32) -> (i32, i32) {
    %c0_i32 = arith.constant 0 : i32
    %c0_i32_0 = arith.constant 0 : i32
    %c0_i32_1 = arith.constant 0 : i32
    return %c0_i32, %c0_i32_0 : i32, i32
  }
  func.func @transform_5(%arg0: i32) -> (i32, i32) {
    %c0_i32 = arith.constant 0 : i32
    %c0_i32_0 = arith.constant 0 : i32
    %c0_i32_1 = arith.constant 0 : i32
    return %c0_i32, %c0_i32_0 : i32, i32
  }
  func.func @transform_6(%arg0: i32) -> (i32, i32) {
    %c0_i32 = arith.constant 0 : i32
    %c0_i32_0 = arith.constant 0 : i32
    %c0_i32_1 = arith.constant 0 : i32
    return %c0_i32, %c0_i32_0 : i32, i32
  }
  func.func @transform_7(%arg0: i32) -> (i32, i32) {
    %c0_i32 = arith.constant 0 : i32
    %c0_i32_0 = arith.constant 0 : i32
    %c0_i32_1 = arith.constant 0 : i32
    return %c0_i32, %c0_i32_0 : i32, i32
  }
  func.func @transform_8(%arg0: i32) -> (i32, i32) {
    %c0_i32 = arith.constant 0 : i32
    %c0_i32_0 = arith.constant 0 : i32
    %c0_i32_1 = arith.constant 0 : i32
    return %c0_i32, %c0_i32_0 : i32, i32
  }
  func.func @transform_9(%arg0: i32) -> (i32, i32) {
    %c0_i32 = arith.constant 0 : i32
    %c0_i32_0 = arith.constant 0 : i32
    %c0_i32_1 = arith.constant 0 : i32
    return %c0_i32, %c0_i32_0 : i32, i32
  }
  func.func @transform_10(%arg0: i32) -> (i32, i32) {
    %c0_i32 = arith.constant 0 : i32
    %c0_i32_0 = arith.constant 0 : i32
    %c0_i32_1 = arith.constant 0 : i32
    return %c0_i32, %c0_i32_0 : i32, i32
  }
  func.func @transform_11(%arg0: i32) -> (i32, i32) {
    %c0_i32 = arith.constant 0 : i32
    %c0_i32_0 = arith.constant 0 : i32
    %c0_i32_1 = arith.constant 0 : i32
    return %c0_i32, %c0_i32_0 : i32, i32
  }
  func.func @transform_12(%arg0: i32) -> (i32, i32) {
    %c0_i32 = arith.constant 0 : i32
    %c0_i32_0 = arith.constant 0 : i32
    %c0_i32_1 = arith.constant 0 : i32
    return %c0_i32, %c0_i32_0 : i32, i32
  }
  func.func @transform_13(%arg0: i32) -> (i32, i32, i32) {
    %c0_i32 = arith.constant 0 : i32
    %c0_i32_0 = arith.constant 0 : i32
    %c0_i32_1 = arith.constant 0 : i32
    return %arg0, %c0_i32, %c0_i32_0 : i32, i32, i32
  }
}

</mosaic_0001>

<bundles_post_ra>
// kernel: convdown_forward.1
= control target key start
LH: loop header
LB: loop body
LE: loop exit
PB: predicated region body
PF: predicated region fallthrough
CT: control target
= control target key end

     0   :  { %18 = vsyncpa [#allocation7], 0  ;;  %s13724_s25 = smov [#allocation6]   ;;  %s18659_s0 = inlined_call_operand.vmem [shape: bf16[1,288,128], index: 0, kind: input, shape index: {}]   ;;  %s18660_s1 = inlined_call_operand.vmem [shape: f32[288,128], index: 1, kind: input, shape index: {}]   ;;  %s18661_s2 = inlined_call_operand.vmem [shape: f32[144,128], index: 2, kind: input, shape index: {}]   ;;  %s18662_s3 = inlined_call_operand.vmem [shape: bf16[128,128], index: 3, kind: input, shape index: {}]   ;;  %s18663_s4 = inlined_call_operand.vmem [shape: f32[1,128], index: 4, kind: input, shape index: {}]   ;;  %s18664_s5 = inlined_call_operand.hbm [shape: bf16[1152,128], index: 5, kind: input, shape index: {}]   ;;  %s18665_s6 = inlined_call_operand.vmem [shape: f32[1,128], index: 6, kind: input, shape index: {}]   ;;  %s18666_s7 = inlined_call_operand.vmem [shape: bf16[1152,128], index: 7, kind: input, shape index: {}]   ;;  %s18667_s8 = inlined_call_operand.vmem [shape: f32[1,128], index: 8, kind: input, shape index: {}]   ;;  %s18668_s9 = inlined_call_operand.vmem [shape: bf16[1152,128], index: 9, kind: input, shape index: {}]   ;;  %s18669_s10 = inlined_call_operand.vmem [shape: f32[1,128], index: 10, kind: input, shape index: {}]   ;;  %s18670_s11 = inlined_call_operand.vmem [shape: bf16[1152,128], index: 11, kind: input, shape index: {}]   ;;  %s18671_s12 = inlined_call_operand.vmem [shape: f32[1,128], index: 12, kind: input, shape index: {}]   ;;  %s18672_s13 = inlined_call_operand.vmem [shape: f32[1,144,128], index: 13, kind: output, shape index: {}]  }
   0x1   :  { %s34_s26 = sshll.u32 %s13724_s25, 4  ;;  %s13700_s29 = scalar_lea.hbm %s18664_s5, 9216  ;;  %s35_s26 = int_to_ptr.vmem [resolvable:$true] %s34_s26 }
   0x2   :  { %p13701_p0 = scmp.ne.s32.totalorder %s18664_s5, %s13700_s29  ;;  %p13704_p1 = scmp.lt.u32.totalorder %s13700_s29, %s18664_s5 }
   0x4   :  { %p13706_p2 = pnand %p13704_p1, %p13701_p0 }
   0x6   :  { %13709 = shalt.err (!%p13706_p2)
}
   0x7   :  { %s13710_s17 = scalar_lea.vmem %s35_s26, 9216  ;;  %p13715_p4 = scmp.lt.s32.totalorder %s35_s26, %s35_s26 }
   0x8   :  { %p13711_p3 = scmp.ne.s32.totalorder %s35_s26, %s13710_s17  ;;  %p13716_p5 = scmp.lt.s32.totalorder %s13710_s17, %s13710_s17 }
   0xa   :  { %p13717_p6 = por %p13716_p5, %p13715_p4 }
   0xc   :  { %p13718_p7 = pnand %p13717_p6, %p13711_p3 }
   0xe   :  { %13721 = shalt.err (!%p13718_p7)
}
   0xf   :  { %s13725_s18 = smov 64   ;;  %s13726_s19 = smov 4  }
  0x10   :  { %40 = dma.hbm_to_vmem [thread:$0]  %s18664_s5, 9216, %s35_s26, [#allocation7], %s13725_s18, %s13725_s18, %s13726_s19  }
  0x11   :  { %13722 = dma.done.wait [#allocation7], 9216  }
  0x12   :  { %13723 = vsyncadd [#allocation7], 4294958080  ;;  %v18674_v0 = vmov 0   ;;  %v13158_v1 = vld [vmem:[%s18662_s3] sm:$0xff]   ;;  %v13159_v2 = vld [vmem:[%s18662_s3 + $0x8] sm:$0xff]   ;;  %vm61_vm0 = vcmask 1041408  }
  0x13   :  { %59 = vst [vmem:[#allocation2] sm:$0xf] %v18674_v0  ;;  %60 = vst [vmem:[#allocation2 + $0x4] sm:$0xf] %v18674_v0  ;;  %12376 = vmatprep.subr.bf16.mxu1 %v18674_v0  ;;  %12116 = vmatprep.subr.bf16.mxu0 %v13158_v1  ;;  %v13160_v3 = vld [vmem:[%s18662_s3 + $0x10] sm:$0xff]   ;;  %v13161_v4 = vld [vmem:[%s18662_s3 + $0x18] sm:$0xff]  }
  0x14   :  { %73 = vst [vmem:[#allocation2 + $0x9c] sm:$0xf] %v18674_v0  ;;  %74 = vst [vmem:[#allocation2 + $0xa0] sm:$0xf] %v18674_v0  ;;  %12117 = vmatpush3.bf16.msra.mxu0 %v13158_v1  ;;  %v13166_v5 = vld [vmem:[%s18659_s0] sm:$0xff]   ;;  %v13163_v7 = vld [vmem:[%s18662_s3 + $0x28] sm:$0xff]  }
  0x15   :  { %77 = vst [vmem:[#allocation3] sm:$0xf] %v18674_v0  ;;  %78 = vst [vmem:[#allocation3 + $0x4] sm:$0xf] %v18674_v0  ;;  %12118 = vmatprep.subr.bf16.mxu0 %v13159_v2  ;;  %12132 = vmatprep.mubr.bf16.mxu0 %v13166_v5  ;;  %v13162_v6 = vld [vmem:[%s18662_s3 + $0x20] sm:$0xff]   ;;  %v13164_v8 = vld [vmem:[%s18662_s3 + $0x30] sm:$0xff]  }
  0x16   :  { %85 = vst [vmem:[#allocation3 + $0x9c] sm:$0xf] %v18674_v0  ;;  %86 = vst [vmem:[#allocation3 + $0xa0] sm:$0xf] %v18674_v0  ;;  %v13165_v9 = vld [vmem:[%s18662_s3 + $0x38] sm:$0xff]   ;;  %v13167_v11 = vld [vmem:[%s18659_s0 + $0x8] sm:$0xff]  }
  0x17   :  { %89 = vst [vmem:[#allocation4] sm:$0xf] %v18674_v0  ;;  %90 = vst [vmem:[#allocation4 + $0x4] sm:$0xf] %v18674_v0  ;;  %v13184_v10 = vld [vmem:[#allocation6] sm:$0xff]   ;;  %v13185_v12 = vld [vmem:[#allocation6 + $0x8] sm:$0xff]  }
  0x18   :  { %97 = vst [vmem:[#allocation4 + $0x54] sm:$0xf] %v18674_v0  ;;  %98 = vst [vmem:[#allocation4 + $0x58] sm:$0xf] %v18674_v0  ;;  %12119 = vmatpush3.bf16.msra.mxu0 %v13159_v2  ;;  %12392 = vmatpush1.bf16.msra.mxu1 %v13184_v10  ;;  %v13168_v13 = vld [vmem:[%s18659_s0 + $0x10] sm:$0xff]   ;;  %v13169_v15 = vld [vmem:[%s18659_s0 + $0x18] sm:$0xff]  }
  0x19   :  { %12120 = vmatprep.subr.bf16.mxu0 %v13160_v3  ;;  %12377 = vmatprep.subr.bf16.mxu1 %v18674_v0  ;;  %v13186_v14 = vld [vmem:[#allocation6 + $0x10] sm:$0xff]   ;;  %v13187_v16 = vld [vmem:[#allocation6 + $0x18] sm:$0xff]   ;;  %v13170_v17 = vld [vmem:[%s18659_s0 + $0x20] sm:$0xff]   ;;  %vm62_vm1 = vsmask.f32 1280  ;;  %v18756_v36 = vmov 0 }
  0x1a   :  { %v13188_v18 = vld [vmem:[#allocation6 + $0x20] sm:$0xff]   ;;  %v13171_v19 = vld [vmem:[%s18659_s0 + $0x28] sm:$0xff]   ;;  %v13172_v21 = vld [vmem:[%s18659_s0 + $0x30] sm:$0xff]   ;;  %vm67_vm3 = vcmask 1043457   ;;  %vm68_vm4 = vsmask.f32 7942 }
  0x1b   :  { %v13189_v20 = vld [vmem:[#allocation6 + $0x28] sm:$0xff]   ;;  %v13190_v22 = vld [vmem:[#allocation6 + $0x30] sm:$0xff]   ;;  %v13173_v23 = vld [vmem:[%s18659_s0 + $0x38] sm:$0xff]   ;;  %v18759_v40 = vmov 0  ;;  %vm727_vm6 = vsmask.f32 5392 }
  0x1c   :  { %12121 = vmatpush3.bf16.msra.mxu0 %v13160_v3  ;;  %12393 = vmatpush1.bf16.msra.mxu1 %v13185_v12  ;;  %v13174_v24 = vld [vmem:[%s18659_s0 + $0x40] sm:$0xff]   ;;  %v13175_v25 = vld [vmem:[%s18659_s0 + $0x48] sm:$0xff]   ;;  %v13176_v26 = vld [vmem:[%s18659_s0 + $0x50] sm:$0xff]   ;;  %vm1327_vm8 = vsmask.f32 7424  ;;  %vm1879_vm9 = vcmask 1044480  }
  0x1d   :  { %12122 = vmatprep.subr.bf16.mxu0 %v13161_v4  ;;  %12378 = vmatprep.subr.bf16.mxu1 %v18674_v0  ;;  %v13177_v27 = vld [vmem:[%s18659_s0 + $0x58] sm:$0xff]   ;;  %v13178_v28 = vld [vmem:[%s18659_s0 + $0x60] sm:$0xff]   ;;  %v13179_v29 = vld [vmem:[%s18659_s0 + $0x68] sm:$0xff]   ;;  %vm1576_vm10 = vsmask.f32 6400  ;;  %vm1497_vm11 = vcmask 1046528  }
  0x1e   :  { %v13180_v30 = vld [vmem:[%s18659_s0 + $0x70] sm:$0xff]   ;;  %v13181_v31 = vld [vmem:[%s18659_s0 + $0x78] sm:$0xff]   ;;  %v13182_v32 = vld [vmem:[%s18659_s0 + $0x80] sm:$0xff]   ;;  %vm1767_vm12 = vsmask.f32 5376  ;;  %vm1688_vm13 = vcmask 1045504  }
  0x1f   :  { %v13183_v33 = vld [vmem:[%s18659_s0 + $0x88] sm:$0xff]   ;;  %v13191_v34 = vld [vmem:[#allocation6 + $0x38] sm:$0xff]   ;;  %v13192_v35 = vld [vmem:[#allocation6 + $0x40] sm:$0xff]   ;;  %vm13729_vm14 = vmmov 0  }
  0x20   :  { %12123 = vmatpush3.bf16.msra.mxu0 %v13161_v4  ;;  %12394 = vmatpush1.bf16.msra.mxu1 %v13186_v14  ;;  %vm13923_vm2 = vmand %vm61_vm0, %vm62_vm1  ;;  %v64_v37 = vld [vmem:[#allocation2 + $0x8] sm:$0x3]  ;;  %v91_v41 = vld [vmem:[#allocation4 + $0x8] sm:$0x3] }
  0x21   :  { %12124 = vmatprep.subr.bf16.mxu0 %v13162_v6  ;;  %12379 = vmatprep.subr.bf16.mxu1 %v18674_v0  ;;  %v18757_v36 = vsel %vm13923_vm2, 4294967295, %v18756_v36  ;;  %v65_v38 = vsel %vm13923_vm2, 0, %v64_v37  ;;  %v13193_v39 = vld [vmem:[#allocation6 + $0x48] sm:$0xff]   ;;  %vm13931_vm5 = vmand %vm67_vm3, %vm68_vm4  ;;  %v92_v43 = vsel %vm13923_vm2, 0, %v91_v41  ;;  %v13194_v45 = vld [vmem:[#allocation6 + $0x50] sm:$0xff]  }
  0x22   :  { %18758 = vst [vmem:[#allocation9_spill] sm:$0xff] %v18757_v36  ;;  %66 = vst [vmem:[#allocation2 + $0x8] sm:$0x3] %v65_v38  ;;  %v18760_v40 = vsel %vm13931_vm5, 4294967295, %v18759_v40  ;;  %v94_v42 = vld [vmem:[#allocation4 + $0x50] sm:$0xe] }
  0x23   :  { %18761 = vst [vmem:[#allocation10_spill] sm:$0xff] %v18760_v40  ;;  %v95_v44 = vsel %vm13931_vm5, 0, %v94_v42  ;;  %93 = vst [vmem:[#allocation4 + $0x8] sm:$0x3] %v92_v43  ;;  %v13195_v46 = vld [vmem:[#allocation6 + $0x58] sm:$0xff]   ;;  %v13196_v47 = vld [vmem:[#allocation6 + $0x60] sm:$0xff]  }
  0x24   :  { %12125 = vmatpush3.bf16.msra.mxu0 %v13162_v6  ;;  %12395 = vmatpush1.bf16.msra.mxu1 %v13187_v16  ;;  %96 = vst [vmem:[#allocation4 + $0x50] sm:$0xe] %v95_v44  ;;  %v13197_v48 = vld [vmem:[#allocation6 + $0x68] sm:$0xff]   ;;  %v13198_v49 = vld [vmem:[#allocation6 + $0x70] sm:$0xff]   ;;  %v13199_v50 = vld [vmem:[#allocation6 + $0x78] sm:$0xff]  }
  0x25   :  { %12126 = vmatprep.subr.bf16.mxu0 %v13163_v7  ;;  %12380 = vmatprep.subr.bf16.mxu1 %v18674_v0  ;;  %v13950_v51 = vld [vmem:[#allocation6 + $0x200] sm:$0xff]   ;;  %v1167_v53 = vld [vmem:[#allocation2 + $0x4] sm:$0xf]  ;;  %v70_v56 = vld [vmem:[#allocation2 + $0x98] sm:$0xe] }
  0x26   :  { %v1166_v52 = vld [vmem:[#allocation2] sm:$0xf]  ;;  %v71_v57 = vsel %vm13931_vm5, 0, %v70_v56  ;;  %v103_v58 = vld [vmem:[%s18660_s1 + $0x10] sm:$0xff]  ;;  %v104_v2 = vld [vmem:[%s18660_s1 + $0x18] sm:$0xff] }
  0x27   :  { %v13956_v54 = vld [vmem:[%s18663_s4] ss:$0 sm:$0xff]  ;;  %v13958_v55 = vcombine.low %v1166_v52, %v1167_v53  ;;  %72 = vst [vmem:[#allocation2 + $0x98] sm:$0xe] %v71_v57  ;;  %v107_v43 = vld [vmem:[%s18660_s1 + $0x30] sm:$0xff]  ;;  %vm13992_vm7 = vmor %vm62_vm1, %vm727_vm6 }
  0x28   :  { %12127 = vmatpush3.bf16.msra.mxu0 %v13163_v7  ;;  %12396 = vmatpush1.bf16.msra.mxu1 %v13188_v18  ;;  %v101_v62 = vld [vmem:[%s18660_s1] sm:$0xff] }
  0x29   :  { %12128 = vmatprep.subr.bf16.mxu0 %v13164_v8  ;;  %12381 = vmatprep.subr.bf16.mxu1 %v18674_v0  ;;  %v1331_v60 = vshll.u32 %v13958_v55, 16  ;;  %v1329_v4 = vshrl.u32 %v13958_v55, 16 }
  0x2c   :  { %12129 = vmatpush3.bf16.msra.mxu0 %v13164_v8  ;;  %12397 = vmatpush1.bf16.msra.mxu1 %v13189_v20 }
  0x2d   :  { %12130 = vmatprep.subr.bf16.mxu0 %v13165_v9  ;;  %12382 = vmatprep.subr.bf16.mxu1 %v18674_v0 }
  0x30   :  { %12131 = vmatpush3.bf16.msra.mxu0 %v13165_v9  ;;  %12398 = vmatpush1.bf16.msra.mxu1 %v13190_v22 }
  0x31   :  { %2518 = vmatprep.subr.bf16.mxu0 %v18674_v0  ;;  %12383 = vmatprep.subr.bf16.mxu1 %v18674_v0 }
  0x33   :  { %12133 = vmatmul.mubr.bf16.vlgmr.msra.gmra.mrb[0].mxu0 %v13167_v11 }
  0x34   :  { %12136 = vmatprep.mubr.bf16.mxu0 %v13168_v13  ;;  %2519 = vmatpush1.bf16.msra.mxu0 %v13184_v10  ;;  %v1333_v10 = vrot.slane %v1331_v60, 1  ;;  %v102_v13 = vld [vmem:[%s18660_s1 + $0x8] sm:$0xff] }
  0x35   :  { %2520 = vmatprep.subr.bf16.mxu0 %v18674_v0  ;;  %12399 = vmatpush1.bf16.msra.mxu1 %v13191_v34 }
  0x36   :  { %12384 = vmatprep.subr.bf16.mxu1 %v18674_v0 }
  0x38   :  { %2521 = vmatpush1.bf16.msra.mxu0 %v13185_v12 }
  0x39   :  { %2522 = vmatprep.subr.bf16.mxu0 %v18674_v0  ;;  %12400 = vmatpush1.bf16.msra.mxu1 %v13192_v35 }
  0x3a   :  { %12385 = vmatprep.subr.bf16.mxu1 %v18674_v0 }
  0x3b   :  { %12137 = vmatmul.mubr.bf16.gmra.mrb[4].mxu0 %v13169_v15 }
  0x3c   :  { %12140 = vmatprep.mubr.bf16.mxu0 %v13170_v17  ;;  %2523 = vmatpush1.bf16.msra.mxu0 %v13186_v14 }
  0x3d   :  { %2524 = vmatprep.subr.bf16.mxu0 %v18674_v0  ;;  %12401 = vmatpush1.bf16.msra.mxu1 %v13193_v39 }
  0x3e   :  { %12386 = vmatprep.subr.bf16.mxu1 %v18674_v0 }
  0x40   :  { %2525 = vmatpush1.bf16.msra.mxu0 %v13187_v16 }
  0x41   :  { %2526 = vmatprep.subr.bf16.mxu0 %v18674_v0  ;;  %12402 = vmatpush1.bf16.msra.mxu1 %v13194_v45 }
  0x42   :  { %12387 = vmatprep.subr.bf16.mxu1 %v18674_v0 }
  0x43   :  { %12141 = vmatmul.mubr.bf16.gmra.mrb[8].mxu0 %v13171_v19 }
  0x44   :  { %12144 = vmatprep.mubr.bf16.mxu0 %v13172_v21  ;;  %2527 = vmatpush1.bf16.msra.mxu0 %v13188_v18  ;;  %v13980_v21 = vor.u32 %v1333_v10, %v1329_v4 }
  0x45   :  { %2528 = vmatprep.subr.bf16.mxu0 %v18674_v0  ;;  %12403 = vmatpush1.bf16.msra.mxu1 %v13195_v46 }
  0x46   :  { %12388 = vmatprep.subr.bf16.mxu1 %v18674_v0 }
  0x48   :  { %2529 = vmatpush1.bf16.msra.mxu0 %v13189_v20 }
  0x49   :  { %2530 = vmatprep.subr.bf16.mxu0 %v18674_v0  ;;  %12404 = vmatpush1.bf16.msra.mxu1 %v13196_v47 }
  0x4a   :  { %12389 = vmatprep.subr.bf16.mxu1 %v18674_v0 }
  0x4b   :  { %12145 = vmatmul.mubr.bf16.gmra.mrb[12].mxu0 %v13173_v23 }
  0x4c   :  { %12148 = vmatprep.mubr.bf16.mxu0 %v13174_v24  ;;  %2531 = vmatpush1.bf16.msra.mxu0 %v13190_v22 }
  0x4d   :  { %2532 = vmatprep.subr.bf16.mxu0 %v18674_v0  ;;  %12405 = vmatpush1.bf16.msra.mxu1 %v13197_v48 }
  0x4e   :  { %12390 = vmatprep.subr.bf16.mxu1 %v18674_v0 }
  0x50   :  { %2533 = vmatpush1.bf16.msra.mxu0 %v13191_v34 }
  0x51   :  { %2534 = vmatprep.subr.bf16.mxu0 %v18674_v0  ;;  %12406 = vmatpush1.bf16.msra.mxu1 %v13198_v49 }
  0x52   :  { %12391 = vmatprep.subr.bf16.mxu1 %v18674_v0 }
  0x53   :  { %12149 = vmatmul.mubr.bf16.gmra.mrb[16].mxu0 %v13175_v25 }
  0x54   :  { %12152 = vmatprep.mubr.bf16.mxu0 %v13176_v26  ;;  %2535 = vmatpush1.bf16.msra.mxu0 %v13192_v35 }
  0x55   :  { %2536 = vmatprep.subr.bf16.mxu0 %v18674_v0  ;;  %12407 = vmatpush1.bf16.msra.mxu1 %v13199_v50 }
  0x56   :  { %2695 = vmatprep.subr.bf16.mxu1 %v18674_v0 }
  0x58   :  { %2537 = vmatpush1.bf16.msra.mxu0 %v13193_v39 }
  0x59   :  { %2538 = vmatprep.subr.bf16.mxu0 %v18674_v0 }
  0x5b   :  { %12153 = vmatmul.mubr.bf16.gmra.mrb[20].mxu0 %v13177_v27 }
  0x5c   :  { %12156 = vmatprep.mubr.bf16.mxu0 %v13178_v28  ;;  %2539 = vmatpush1.bf16.msra.mxu0 %v13194_v45  ;;  %v1125_v45 = vld [vmem:[#allocation2 + $0x8] sm:$0xe] }
  0x5d   :  { %2540 = vmatprep.subr.bf16.mxu0 %v18674_v0 }
  0x60   :  { %2541 = vmatpush1.bf16.msra.mxu0 %v13195_v46 }
  0x61   :  { %2542 = vmatprep.subr.bf16.mxu0 %v18674_v0 }
  0x63   :  { %12157 = vmatmul.mubr.bf16.gmra.mrb[24].mxu0 %v13179_v29 }
  0x64   :  { %12160 = vmatprep.mubr.bf16.mxu0 %v13180_v30  ;;  %2543 = vmatpush1.bf16.msra.mxu0 %v13196_v47 }
  0x65   :  { %2544 = vmatprep.subr.bf16.mxu0 %v18674_v0 }
  0x68   :  { %2545 = vmatpush1.bf16.msra.mxu0 %v13197_v48 }
  0x69   :  { %2546 = vmatprep.subr.bf16.mxu0 %v18674_v0 }
  0x6b   :  { %12161 = vmatmul.mubr.bf16.gmra.mrb[28].mxu0 %v13181_v31 }
  0x6c   :  { %12164 = vmatprep.mubr.bf16.mxu0 %v13182_v32  ;;  %2547 = vmatpush1.bf16.msra.mxu0 %v13198_v49  ;;  %v105_v49 = vld [vmem:[%s18660_s1 + $0x20] sm:$0xff] }
  0x6d   :  { %2548 = vmatprep.subr.bf16.mxu0 %v18674_v0 }
  0x70   :  { %2549 = vmatpush1.bf16.msra.mxu0 %v13199_v50  ;;  %v18762_v50 = vmov 0 }
  0x71   :  { %12168 = vmatprep.subr.bf16.mxu0 %v13950_v51  ;;  %v18763_v50 = vsel %vm13992_vm7, 4294967295, %v18762_v50 }
  0x72   :  { %18764 = vst [vmem:[#allocation11_spill] sm:$0xff] %v18763_v50 }
  0x73   :  { %12165 = vmatmul.mubr.bf16.gmra.mrb[32].mxu0 %v13183_v33 }
 0x106   :  { %v12134_v59 = vpop.f32.mrb[0].mxu0 }
 0x107   :  { %v413_v61 = vadd.f32 %v12134_v59, %v13956_v54  ;;  %v404_v63 = vpop.f32.mrb[1].mxu0 }
 0x108   :  { %v405_v1 = vadd.f32 %v13956_v54, %v404_v63  ;;  %v12135_v3 = vpop.f32.mrb[2].mxu0 }
 0x109   :  { %v549_v5 = vmax.f32 %v413_v61, 0.0  ;;  %v416_v6 = vadd.f32 %v12135_v3, %v13956_v54  ;;  %v407_v7 = vpop.f32.mrb[3].mxu0  ;;  %v108_v3 = vld [vmem:[%s18660_s1 + $0x38] sm:$0xff] }
 0x10a   :  { %v547_v8 = vmax.f32 %v405_v1, 0.0  ;;  %v408_v9 = vadd.f32 %v13956_v54, %v407_v7 }
 0x10b   :  { %v585_v11 = vmul.f32 %v549_v5, %v103_v58  ;;  %v550_v12 = vmax.f32 %v416_v6, 0.0 }
 0x10c   :  { %v583_v14 = vmul.f32 %v547_v8, %v101_v62  ;;  %v548_v15 = vmax.f32 %v408_v9, 0.0 }
 0x10d   :  { %v11591_v16 = vpack.c.bf16 %v585_v11, %v585_v11  ;;  %v586_v17 = vmul.f32 %v550_v12, %v104_v2 }
 0x10e   :  { %v11589_v18 = vpack.c.bf16 %v583_v14, %v583_v14  ;;  %v584_v19 = vmul.f32 %v548_v15, %v102_v13  ;;  %v12138_v20 = vpop.f32.mrb[4].mxu0 }
 0x10f   :  { %v749_v22 = vshrl.u32 %v11591_v16, 16  ;;  %v752_v23 = vshll.u32 %v11591_v16, 16  ;;  %v11592_v24 = vpack.c.bf16 %v586_v17, %v586_v17  ;;  %v429_v25 = vadd.f32 %v12138_v20, %v13956_v54  ;;  %v420_v26 = vpop.f32.mrb[5].mxu0 }
 0x110   :  { %v730_v27 = vshrl.u32 %v11589_v18, 16  ;;  %v733_v28 = vshll.u32 %v11589_v18, 16  ;;  %v11590_v29 = vpack.c.bf16 %v584_v19, %v584_v19  ;;  %v421_v30 = vadd.f32 %v13956_v54, %v420_v26  ;;  %v12139_v31 = vpop.f32.mrb[6].mxu0  ;;  %v106_v18 = vld [vmem:[%s18660_s1 + $0x28] sm:$0xff]  ;;  %v111_v26 = vld [vmem:[%s18660_s1 + $0x50] sm:$0xff] }
 0x111   :  { %v751_v32 = vrot.slane %v749_v22, 6  ;;  %v754_v33 = vrot.slane %v752_v23, 7  ;;  %v759_v34 = vshrl.u32 %v11592_v24, 16  ;;  %v762_v35 = vshll.u32 %v11592_v24, 16  ;;  %v423_v37 = vpop.f32.mrb[7].mxu0 }
 0x112   :  { %v732_v38 = vrot.slane %v730_v27, 6  ;;  %v735_v39 = vrot.slane %v733_v28, 7  ;;  %v739_v41 = vshrl.u32 %v11590_v29, 16  ;;  %v742_v42 = vshll.u32 %v11590_v29, 16 }
 0x113   :  { %v755_v44 = vor.u32 %v754_v33, %v751_v32  ;;  %v761_v46 = vrot.slane %v759_v34, 6  ;;  %v764_v47 = vrot.slane %v762_v35, 7  ;;  %v553_v48 = vmax.f32 %v429_v25, 0.0 }
 0x114   :  { %v736_v52 = vor.u32 %v735_v39, %v732_v38  ;;  %v741_v53 = vrot.slane %v739_v41, 6  ;;  %v744_v56 = vrot.slane %v742_v42, 7  ;;  %v551_v57 = vmax.f32 %v421_v30, 0.0 }
 0x115   :  { %v757_v58 = vrot.slane %v755_v44, 4  ;;  %v765_v59 = vor.u32 %v764_v47, %v761_v46  ;;  %v589_v60 = vmul.f32 %v553_v48, %v107_v43  ;;  %v432_v61 = vadd.f32 %v12139_v31, %v13956_v54  ;;  %v109_v43 = vld [vmem:[%s18660_s1 + $0x40] sm:$0xff] }
 0x116   :  { %v737_v62 = vrot.slane %v736_v52, 4  ;;  %v1126_v63 = vsel %vm13931_vm5, %v736_v52, %v1125_v45  ;;  %v745_v1 = vor.u32 %v744_v56, %v741_v53  ;;  %v587_v2 = vmul.f32 %v551_v57, %v105_v49  ;;  %v12142_v4 = vpop.f32.mrb[8].mxu0 }
 0x117   :  { %1127 = vst [vmem:[#allocation2 + $0x8] sm:$0xe] %v1126_v63  ;;  %v766_v5 = vsel %vm13992_vm7, %v757_v58, %v765_v59  ;;  %v767_v6 = vrot.slane %v765_v59, 4  ;;  %v11595_v7 = vpack.c.bf16 %v589_v60, %v589_v60  ;;  %v554_v8 = vmax.f32 %v432_v61, 0.0  ;;  %v436_v9 = vpop.f32.mrb[9].mxu0 }
 0x118   :  { %1130 = vst [vmem:[#allocation2 + $0x14] sm:$0xf] %v766_v5  ;;  %v746_v10 = vsel %vm13992_vm7, %v737_v62, %v745_v1  ;;  %v747_v11 = vrot.slane %v745_v1, 4  ;;  %v11593_v12 = vpack.c.bf16 %v587_v2, %v587_v2  ;;  %v424_v13 = vadd.f32 %v13956_v54, %v423_v37  ;;  %v12143_v14 = vpop.f32.mrb[10].mxu0  ;;  %v112_v2 = vld [vmem:[%s18660_s1 + $0x58] sm:$0xff] }
 0x119   :  { %1128 = vst [vmem:[#allocation2 + $0xc] sm:$0xf] %v746_v10  ;;  %v789_v15 = vshrl.u32 %v11595_v7, 16  ;;  %v792_v16 = vshll.u32 %v11595_v7, 16  ;;  %v590_v17 = vmul.f32 %v554_v8, %v108_v3  ;;  %v445_v19 = vadd.f32 %v12142_v4, %v13956_v54  ;;  %v439_v20 = vpop.f32.mrb[11].mxu0 }
 0x11a   :  { %v756_v22 = vsel %vm13992_vm7, %v747_v11, %v755_v44  ;;  %v769_v23 = vshrl.u32 %v11593_v12, 16  ;;  %v772_v24 = vshll.u32 %v11593_v12, 16  ;;  %v552_v25 = vmax.f32 %v424_v13, 0.0 }
 0x11b   :  { %1129 = vst [vmem:[#allocation2 + $0x10] sm:$0xf] %v756_v22  ;;  %v791_v27 = vrot.slane %v789_v15, 6  ;;  %v794_v28 = vrot.slane %v792_v16, 7  ;;  %v11596_v29 = vpack.c.bf16 %v590_v17, %v590_v17  ;;  %v557_v30 = vmax.f32 %v445_v19, 0.0  ;;  %v110_v15 = vld [vmem:[%s18660_s1 + $0x48] sm:$0xff] }
 0x11c   :  { %v771_v31 = vrot.slane %v769_v23, 6  ;;  %v774_v32 = vrot.slane %v772_v24, 7  ;;  %v588_v33 = vmul.f32 %v552_v25, %v106_v18  ;;  %v437_v34 = vadd.f32 %v13956_v54, %v436_v9 }
 0x11d   :  { %v795_v35 = vor.u32 %v794_v28, %v791_v27  ;;  %v799_v37 = vshrl.u32 %v11596_v29, 16  ;;  %v802_v38 = vshll.u32 %v11596_v29, 16  ;;  %v593_v39 = vmul.f32 %v557_v30, %v111_v26  ;;  %v115_v26 = vld [vmem:[%s18660_s1 + $0x70] sm:$0xff] }
 0x11e   :  { %v775_v41 = vor.u32 %v774_v32, %v771_v31  ;;  %v11594_v42 = vpack.c.bf16 %v588_v33, %v588_v33  ;;  %v555_v44 = vmax.f32 %v437_v34, 0.0  ;;  %v448_v45 = vadd.f32 %v12143_v14, %v13956_v54  ;;  %v12146_v46 = vpop.f32.mrb[12].mxu0  ;;  %v113_v32 = vld [vmem:[%s18660_s1 + $0x60] sm:$0xff] }
 0x11f   :  { %v797_v47 = vrot.slane %v795_v35, 4  ;;  %v801_v48 = vrot.slane %v799_v37, 6  ;;  %v804_v49 = vrot.slane %v802_v38, 7  ;;  %v11599_v52 = vpack.c.bf16 %v593_v39, %v593_v39  ;;  %v452_v53 = vpop.f32.mrb[13].mxu0 }
 0x120   :  { %v776_v56 = vsel %vm13992_vm7, %v767_v6, %v775_v41  ;;  %v777_v57 = vrot.slane %v775_v41, 4  ;;  %v779_v58 = vshrl.u32 %v11594_v42, 16  ;;  %v782_v59 = vshll.u32 %v11594_v42, 16  ;;  %v12147_v60 = vpop.f32.mrb[14].mxu0 }
 0x121   :  { %1131 = vst [vmem:[#allocation2 + $0x18] sm:$0xf] %v776_v56  ;;  %v805_v61 = vor.u32 %v804_v49, %v801_v48  ;;  %v829_v62 = vshrl.u32 %v11599_v52, 16  ;;  %v832_v63 = vshll.u32 %v11599_v52, 16  ;;  %v591_v1 = vmul.f32 %v555_v44, %v109_v43  ;;  %v455_v3 = vpop.f32.mrb[15].mxu0  ;;  %v116_v49 = vld [vmem:[%s18660_s1 + $0x78] sm:$0xff] }
 0x122   :  { %v781_v4 = vrot.slane %v779_v58, 6  ;;  %v784_v5 = vrot.slane %v782_v59, 7  ;;  %v558_v7 = vmax.f32 %v448_v45, 0.0  ;;  %v440_v8 = vadd.f32 %v13956_v54, %v439_v20 }
 0x123   :  { %v806_v6 = vsel %vm13992_vm7, %v797_v47, %v805_v61  ;;  %v807_v9 = vrot.slane %v805_v61, 4  ;;  %v831_v10 = vrot.slane %v829_v62, 6  ;;  %v834_v11 = vrot.slane %v832_v63, 7 }
 0x124   :  { %1134 = vst [vmem:[#allocation2 + $0x24] sm:$0xf] %v806_v6  ;;  %v785_v12 = vor.u32 %v784_v5, %v781_v4  ;;  %v11597_v13 = vpack.c.bf16 %v591_v1, %v591_v1  ;;  %v594_v14 = vmul.f32 %v558_v7, %v112_v2  ;;  %v556_v16 = vmax.f32 %v440_v8, 0.0 }
 0x125   :  { %v14032_v17 = vor.u32 %v834_v11, %v831_v10  ;;  %v461_v18 = vadd.f32 %v12146_v46, %v13956_v54  ;;  %v453_v19 = vadd.f32 %v13956_v54, %v452_v53  ;;  %v464_v20 = vadd.f32 %v12147_v60, %v13956_v54 }
 0x126   :  { %v786_v22 = vsel %vm13992_vm7, %v777_v57, %v785_v12  ;;  %v787_v23 = vrot.slane %v785_v12, 4  ;;  %v809_v24 = vshrl.u32 %v11597_v13, 16  ;;  %v812_v25 = vshll.u32 %v11597_v13, 16  ;;  %v14042_v27 = vpop.f32.mrb[16].mxu0 }
 0x127   :  { %1132 = vst [vmem:[#allocation2 + $0x1c] sm:$0xf] %v786_v22  ;;  %v837_v28 = vrot.slane %v14032_v17, 4  ;;  %v11600_v29 = vpack.c.bf16 %v594_v14, %v594_v14  ;;  %v592_v30 = vmul.f32 %v556_v16, %v110_v15  ;;  %v561_v31 = vmax.f32 %v461_v18, 0.0  ;;  %v468_v33 = vpop.f32.mrb[17].mxu0 }
 0x128   :  { %v796_v34 = vsel %vm13992_vm7, %v787_v23, %v795_v35  ;;  %v811_v37 = vrot.slane %v809_v24, 6  ;;  %v814_v38 = vrot.slane %v812_v25, 7  ;;  %v559_v39 = vmax.f32 %v453_v19, 0.0  ;;  %v14050_v41 = vpop.f32.mrb[18].mxu0  ;;  %v114_v19 = vld [vmem:[%s18660_s1 + $0x68] sm:$0xff] }
 0x129   :  { %1133 = vst [vmem:[#allocation2 + $0x20] sm:$0xf] %v796_v34  ;;  %v839_v42 = vshrl.u32 %v11600_v29, 16  ;;  %v842_v43 = vshll.u32 %v11600_v29, 16  ;;  %v11598_v44 = vpack.c.bf16 %v592_v30, %v592_v30  ;;  %v597_v45 = vmul.f32 %v561_v31, %v115_v26  ;;  %v14052_v46 = vpop.f32.mrb[19].mxu0 }
 0x12a   :  { %v815_v47 = vor.u32 %v814_v38, %v811_v37  ;;  %v595_v48 = vmul.f32 %v559_v39, %v113_v32  ;;  %v562_v52 = vmax.f32 %v464_v20, 0.0  ;;  %v456_v35 = vadd.f32 %v13956_v54, %v455_v3  ;;  %v1169_v39 = vld [vmem:[#allocation2 + $0xc] sm:$0xf] }
 0x12b   :  { %v841_v53 = vrot.slane %v839_v42, 6  ;;  %v844_v56 = vrot.slane %v842_v43, 7  ;;  %v819_v57 = vshrl.u32 %v11598_v44, 16  ;;  %v822_v58 = vshll.u32 %v11598_v44, 16  ;;  %v1170_v42 = vld [vmem:[#allocation2 + $0x10] sm:$0xf] }
 0x12c   :  { %v816_v59 = vsel %vm13992_vm7, %v807_v9, %v815_v47  ;;  %v817_v60 = vrot.slane %v815_v47, 4  ;;  %v11603_v61 = vpack.c.bf16 %v597_v45, %v597_v45  ;;  %v11601_v62 = vpack.c.bf16 %v595_v48, %v595_v48 }
 0x12d   :  { %1135 = vst [vmem:[#allocation2 + $0x28] sm:$0xf] %v816_v59  ;;  %v845_v63 = vor.u32 %v844_v56, %v841_v53  ;;  %v821_v1 = vrot.slane %v819_v57, 6  ;;  %v824_v2 = vrot.slane %v822_v58, 7  ;;  %v598_v4 = vmul.f32 %v562_v52, %v116_v49  ;;  %v14100_v53 = vld [vmem:[#allocation2 + $0x14] sm:$0xf] }
 0x12e   :  { %v869_v5 = vshrl.u32 %v11603_v61, 16  ;;  %v872_v7 = vshll.u32 %v11603_v61, 16  ;;  %v849_v8 = vshrl.u32 %v11601_v62, 16  ;;  %v852_v6 = vshll.u32 %v11601_v62, 16  ;;  %v14060_v3 = vpop.f32.mrb[20].mxu0 }
 0x12f   :  { %v846_v10 = vsel %vm13992_vm7, %v837_v28, %v845_v63  ;;  %v847_v11 = vrot.slane %v845_v63, 4  ;;  %v825_v12 = vor.u32 %v824_v2, %v821_v1  ;;  %v11604_v9 = vpack.c.bf16 %v598_v4, %v598_v4  ;;  %v14064_v13 = vpop.f32.mrb[21].mxu0  ;;  %v120_v1 = vld [vmem:[%s18660_s1 + $0x98] sm:$0xff] }
 0x130   :  { %1138 = vst [vmem:[#allocation2 + $0x34] sm:$0xf] %v846_v10  ;;  %v871_v14 = vrot.slane %v869_v5, 6  ;;  %v874_v15 = vrot.slane %v872_v7, 7  ;;  %v851_v16 = vrot.slane %v849_v8, 6  ;;  %v854_v18 = vrot.slane %v852_v6, 7 }
 0x131   :  { %v14069_v20 = vpop.f32.mrb[22].mxu0  ;;  %v826_v22 = vsel %vm13992_vm7, %v817_v60, %v825_v12  ;;  %v827_v23 = vrot.slane %v825_v12, 4  ;;  %v879_v24 = vshrl.u32 %v11604_v9, 16  ;;  %v882_v25 = vshll.u32 %v11604_v9, 16 }
 0x132   :  { %v14073_v26 = vpop.f32.mrb[23].mxu0  ;;  %1136 = vst [vmem:[#allocation2 + $0x2c] sm:$0xf] %v826_v22  ;;  %v14075_v28 = vor.u32 %v874_v15, %v871_v14  ;;  %v14077_v29 = vor.u32 %v854_v18, %v851_v16  ;;  %v560_v30 = vmax.f32 %v456_v35, 0.0  ;;  %v477_v31 = vadd.f32 %v14042_v27, %v13956_v54  ;;  %v1168_v35 = vld [vmem:[#allocation2 + $0x8] sm:$0xf] }
 0x133   :  { %v836_v32 = vsel %vm13992_vm7, %v827_v23, %v14032_v17  ;;  %v881_v34 = vrot.slane %v879_v24, 6  ;;  %v884_v37 = vrot.slane %v882_v25, 7  ;;  %v469_v38 = vadd.f32 %v13956_v54, %v468_v33  ;;  %v119_v17 = vld [vmem:[%s18660_s1 + $0x90] sm:$0xff]  ;;  %v117_v33 = vld [vmem:[%s18660_s1 + $0x80] sm:$0xff] }
 0x134   :  { %1137 = vst [vmem:[#allocation2 + $0x30] sm:$0xf] %v836_v32  ;;  %v877_v43 = vrot.slane %v14075_v28, 4  ;;  %v856_v44 = vsel %vm13992_vm7, %v847_v11, %v14077_v29  ;;  %v857_v45 = vrot.slane %v14077_v29, 4  ;;  %v596_v27 = vmul.f32 %v560_v30, %v114_v19  ;;  %v118_v11 = vld [vmem:[%s18660_s1 + $0x88] sm:$0xff] }
 0x135   :  { %1139 = vst [vmem:[#allocation2 + $0x38] sm:$0xf] %v856_v44  ;;  %v14096_v47 = vor.u32 %v884_v37, %v881_v34  ;;  %v565_v48 = vmax.f32 %v477_v31, 0.0  ;;  %v563_v49 = vmax.f32 %v469_v38, 0.0  ;;  %v480_v52 = vadd.f32 %v14050_v41, %v13956_v54  ;;  %v13206_v34 = vld [vmem:[#allocation6 + $0x208] sm:$0xff]  }
 0x136   :  { %v11602_v56 = vpack.c.bf16 %v596_v27, %v596_v27  ;;  %v14102_v57 = vcombine.low %v1168_v35, %v1169_v39  ;;  %v472_v58 = vadd.f32 %v13956_v54, %v14052_v46  ;;  %v14107_v59 = vcombine.low %v1170_v42, %v14100_v53  ;;  %v14109_v60 = vpop.f32.mrb[24].mxu0 }
 0x137   :  { %v886_v61 = vsel %vm13992_vm7, %v877_v43, %v14096_v47  ;;  %v887_v41 = vrot.slane %v14096_v47, 4  ;;  %v601_v62 = vmul.f32 %v565_v48, %v119_v17  ;;  %v599_v63 = vmul.f32 %v563_v49, %v117_v33  ;;  %v14118_v2 = vpop.f32.mrb[25].mxu0 }
 0x138   :  { %1142 = vst [vmem:[#allocation2 + $0x44] sm:$0xf] %v886_v61  ;;  %v859_v46 = vshrl.u32 %v11602_v56, 16  ;;  %v862_v4 = vshll.u32 %v11602_v56, 16  ;;  %v566_v5 = vmax.f32 %v480_v52, 0.0  ;;  %v1336_v7 = vshll.u32 %v14102_v57, 16 }
 0x139   :  { %v14121_v8 = vpop.f32.mrb[26].mxu0  ;;  %v11607_v6 = vpack.c.bf16 %v601_v62, %v601_v62  ;;  %v11605_v10 = vpack.c.bf16 %v599_v63, %v599_v63  ;;  %v564_v12 = vmax.f32 %v472_v58, 0.0  ;;  %v1340_v9 = vshrl.u32 %v14102_v57, 16  ;;  %v13210_v58 = vld [vmem:[#allocation6 + $0x210] sm:$0xff]  }
 0x13a   :  { %v14127_v14 = vpop.f32.mrb[27].mxu0  ;;  %v861_v15 = vrot.slane %v859_v46, 6  ;;  %v864_v16 = vrot.slane %v862_v4, 7  ;;  %v602_v18 = vmul.f32 %v566_v5, %v120_v1  ;;  %v1338_v19 = vrot.slane %v1336_v7, 1  ;;  %v14156_v5 = vld [vmem:[#allocation2 + $0x18] sm:$0xff]  }
 0x13b   :  { %v909_v22 = vshrl.u32 %v11607_v6, 16  ;;  %v912_v23 = vshll.u32 %v11607_v6, 16  ;;  %v889_v24 = vshrl.u32 %v11605_v10, 16  ;;  %v892_v25 = vshll.u32 %v11605_v10, 16  ;;  %v123_v6 = vld [vmem:[%s18660_s1 + $0xb0] sm:$0xff] }
 0x13c   :  { %v865_v29 = vor.u32 %v864_v16, %v861_v15  ;;  %v11608_v30 = vpack.c.bf16 %v602_v18, %v602_v18  ;;  %v1339_v31 = vsel %vm1327_vm8, %v13980_v21, %v1338_v19  ;;  %v600_v32 = vmul.f32 %v564_v12, %v118_v11  ;;  %v121_v18 = vld [vmem:[%s18660_s1 + $0xa0] sm:$0xff] }
 0x13d   :  { %v911_v37 = vrot.slane %v909_v22, 6  ;;  %v914_v38 = vrot.slane %v912_v23, 7  ;;  %v891_v39 = vrot.slane %v889_v24, 6  ;;  %v894_v42 = vrot.slane %v892_v25, 7  ;;  %2550 = vmatprep.mubr.bf16.mxu0 %v1339_v31  ;;  %v122_v25 = vld [vmem:[%s18660_s1 + $0xa8] sm:$0xff] }
 0x13e   :  { %v866_v43 = vsel %vm13992_vm7, %v857_v45, %v865_v29  ;;  %v867_v44 = vrot.slane %v865_v29, 4  ;;  %v919_v27 = vshrl.u32 %v11608_v30, 16  ;;  %v922_v17 = vshll.u32 %v11608_v30, 16  ;;  %2551 = vmatmul.mubr.bf16.vlgmr.msra.gmra.mrb[36].mxu0 %v13958_v55  ;;  %v14134_v33 = vpop.f32.mrb[28].mxu0 }
 0x13f   :  { %1140 = vst [vmem:[#allocation2 + $0x3c] sm:$0xf] %v866_v43  ;;  %v14136_v47 = vor.u32 %v914_v38, %v911_v37  ;;  %v895_v21 = vor.u32 %v894_v42, %v891_v39  ;;  %v11606_v48 = vpack.c.bf16 %v600_v32, %v600_v32  ;;  %v1342_v49 = vor.u32 %v1340_v9, %v1338_v19  ;;  %v14139_v52 = vpop.f32.mrb[29].mxu0 }
 0x140   :  { %12169 = vmatpush3.bf16.msra.mxu0 %v13950_v51  ;;  %v876_v45 = vsel %vm13992_vm7, %v867_v44, %v14075_v28  ;;  %v921_v35 = vrot.slane %v919_v27, 6  ;;  %v924_v56 = vrot.slane %v922_v17, 7  ;;  %v1344_v55 = vshll.u32 %v14107_v59, 16  ;;  %v14145_v61 = vpop.f32.mrb[30].mxu0  ;;  %v14197_v17 = vld [vmem:[#allocation2 + $0x20] sm:$0xff]  }
 0x141   :  { %12170 = vmatprep.subr.bf16.mxu0 %v13206_v34  ;;  %1141 = vst [vmem:[#allocation2 + $0x40] sm:$0xf] %v876_v45  ;;  %v917_v62 = vrot.slane %v14136_v47, 4  ;;  %v896_v51 = vsel %vm13992_vm7, %v887_v41, %v895_v21  ;;  %v899_v63 = vshrl.u32 %v11606_v48, 16  ;;  %v14150_v1 = vpop.f32.mrb[31].mxu0  ;;  %v902_v28 = vshll.u32 %v11606_v48, 16 }
 0x142   :  { %1143 = vst [vmem:[#allocation2 + $0x48] sm:$0xf] %v896_v51  ;;  %v14152_v46 = vor.u32 %v924_v56, %v921_v35  ;;  %v1346_v4 = vrot.slane %v1344_v55, 1  ;;  %v493_v41 = vadd.f32 %v14060_v3, %v13956_v54  ;;  %v485_v10 = vadd.f32 %v13956_v54, %v14064_v13  ;;  %v124_v3 = vld [vmem:[%s18660_s1 + $0xb8] sm:$0xff] }
 0x143   :  { %v901_v7 = vrot.slane %v899_v63, 6  ;;  %v496_v11 = vadd.f32 %v14069_v20, %v13956_v54  ;;  %v897_v12 = vrot.slane %v895_v21, 4  ;;  %v904_v15 = vrot.slane %v902_v28, 7  ;;  %v13213_v13 = vld [vmem:[#allocation6 + $0x218] sm:$0xff]  }
 0x144   :  { %12171 = vmatpush3.bf16.msra.mxu0 %v13206_v34  ;;  %v926_v9 = vsel %vm13992_vm7, %v917_v62, %v14152_v46  ;;  %v1347_v16 = vsel %vm1327_vm8, %v1342_v49, %v1346_v4  ;;  %v569_v20 = vmax.f32 %v493_v41, 0.0  ;;  %v567_v19 = vmax.f32 %v485_v10, 0.0 }
 0x145   :  { %12172 = vmatprep.subr.bf16.mxu0 %v13210_v58  ;;  %1146 = vst [vmem:[#allocation2 + $0x54] sm:$0xf] %v926_v9  ;;  %2558 = vmatprep.mubr.bf16.mxu0 %v1347_v16  ;;  %v570_v22 = vmax.f32 %v496_v11, 0.0  ;;  %v488_v23 = vadd.f32 %v13956_v54, %v14073_v26  ;;  %v905_v24 = vor.u32 %v904_v15, %v901_v7  ;;  %v18673_v29 = vshrl.u32 %v14107_v59, 16  ;;  %v13215_v26 = vld [vmem:[#allocation6 + $0x220] sm:$0xff]  }
 0x146   :  { %2559 = vmatmul.mubr.bf16.gmra.mrb[40].mxu0 %v14102_v57  ;;  %v14185_v30 = vshll.u32 %v14156_v5, 16  ;;  %v14188_v31 = vshrl.u32 %v14156_v5, 16  ;;  %v605_v32 = vmul.f32 %v569_v20, %v123_v6  ;;  %v603_v34 = vmul.f32 %v567_v19, %v121_v18  ;;  %v14190_v39 = vpop.f32.mrb[32].mxu0 }
 0x147   :  { %v606_v37 = vmul.f32 %v570_v22, %v124_v3  ;;  %v568_v38 = vmax.f32 %v488_v23, 0.0  ;;  %v906_v42 = vsel %vm13992_vm7, %v897_v12, %v905_v24  ;;  %v907_v43 = vrot.slane %v905_v24, 4  ;;  %v14199_v21 = vpop.f32.mrb[33].mxu0 }
 0x148   :  { %12173 = vmatpush3.bf16.msra.mxu0 %v13210_v58  ;;  %v1350_v44 = vor.u32 %v18673_v29, %v1346_v4  ;;  %v1354_v27 = vrot.slane %v14185_v30, 1  ;;  %1144 = vst [vmem:[#allocation2 + $0x4c] sm:$0xf] %v906_v42  ;;  %v11611_v48 = vpack.c.bf16 %v605_v32, %v605_v32  ;;  %v11609_v49 = vpack.c.bf16 %v603_v34, %v603_v34  ;;  %v14201_v56 = vpop.f32.mrb[34].mxu0  ;;  %v14218_v32 = vld [vmem:[#allocation2 + $0x30] sm:$0xff]  }
 0x149   :  { %12174 = vmatprep.subr.bf16.mxu0 %v13213_v13  ;;  %v11612_v45 = vpack.c.bf16 %v606_v37, %v606_v37  ;;  %v604_v35 = vmul.f32 %v568_v38, %v122_v25  ;;  %v927_v58 = vrot.slane %v14152_v46, 4  ;;  %v916_v62 = vsel %vm13992_vm7, %v907_v43, %v14136_v47  ;;  %v14209_v28 = vpop.f32.mrb[35].mxu0  ;;  %v13218_v47 = vld [vmem:[#allocation6 + $0x228] sm:$0xff]   ;;  %v13219_v43 = vld [vmem:[#allocation6 + $0x230] sm:$0xff]  }
 0x14a   :  { %v1355_v51 = vsel %vm1327_vm8, %v1350_v44, %v1354_v27  ;;  %v1358_v63 = vor.u32 %v14188_v31, %v1354_v27  ;;  %1145 = vst [vmem:[#allocation2 + $0x50] sm:$0xf] %v916_v62  ;;  %v949_v4 = vshrl.u32 %v11611_v48, 16  ;;  %v952_v7 = vshll.u32 %v11611_v48, 16 }
 0x14b   :  { %v929_v6 = vshrl.u32 %v11609_v49, 16  ;;  %v932_v41 = vshll.u32 %v11609_v49, 16  ;;  %2566 = vmatprep.mubr.bf16.mxu0 %v1355_v51  ;;  %v959_v10 = vshrl.u32 %v11612_v45, 16  ;;  %v962_v11 = vshll.u32 %v11612_v45, 16  ;;  %v14234_v51 = vld [vmem:[#allocation2 + $0x38] sm:$0xff]  }
 0x14c   :  { %12175 = vmatpush3.bf16.msra.mxu0 %v13213_v13  ;;  %v11610_v46 = vpack.c.bf16 %v604_v35, %v604_v35  ;;  %v14212_v12 = vshll.u32 %v14197_v17, 16  ;;  %v951_v9 = vrot.slane %v949_v4, 6  ;;  %v954_v15 = vrot.slane %v952_v7, 7 }
 0x14d   :  { %12176 = vmatprep.subr.bf16.mxu0 %v13215_v26  ;;  %v931_v16 = vrot.slane %v929_v6, 6  ;;  %v934_v18 = vrot.slane %v932_v41, 7  ;;  %v961_v3 = vrot.slane %v959_v10, 6  ;;  %v964_v20 = vrot.slane %v962_v11, 7 }
 0x14e   :  { %v939_v19 = vshrl.u32 %v11610_v46, 16  ;;  %v942_v22 = vshll.u32 %v11610_v46, 16  ;;  %2567 = vmatmul.mubr.bf16.gmra.mrb[44].mxu0 %v14107_v59  ;;  %v955_v23 = vor.u32 %v954_v15, %v951_v9  ;;  %v1362_v24 = vrot.slane %v14212_v12, 1  ;;  %v128_v46 = vld [vmem:[%s18660_s1 + $0xd8] sm:$0xff] }
 0x14f   :  { %v935_v13 = vor.u32 %v934_v18, %v931_v16  ;;  %v509_v25 = vadd.f32 %v14109_v60, %v13956_v54  ;;  %v14220_v34 = vor.u32 %v964_v20, %v961_v3  ;;  %v501_v42 = vadd.f32 %v13956_v54, %v14118_v2  ;;  %v127_v60 = vld [vmem:[%s18660_s1 + $0xd0] sm:$0xff] }
 0x150   :  { %12177 = vmatpush3.bf16.msra.mxu0 %v13215_v26  ;;  %v941_v37 = vrot.slane %v939_v19, 6  ;;  %v944_v38 = vrot.slane %v942_v22, 7  ;;  %v957_v44 = vrot.slane %v955_v23, 4  ;;  %v1363_v49 = vsel %vm1327_vm8, %v1358_v63, %v1362_v24  ;;  %v125_v26 = vld [vmem:[%s18660_s1 + $0xc0] sm:$0xff] }
 0x151   :  { %12178 = vmatprep.subr.bf16.mxu0 %v13218_v47  ;;  %v936_v27 = vsel %vm13992_vm7, %v927_v58, %v935_v13  ;;  %v937_v48 = vrot.slane %v935_v13, 4  ;;  %v967_v2 = vrot.slane %v14220_v34, 4  ;;  %2574 = vmatprep.mubr.bf16.mxu0 %v1363_v49  ;;  %v573_v35 = vmax.f32 %v509_v25, 0.0 }
 0x152   :  { %1147 = vst [vmem:[#allocation2 + $0x58] sm:$0xf] %v936_v27  ;;  %v945_v45 = vor.u32 %v944_v38, %v941_v37  ;;  %v571_v62 = vmax.f32 %v501_v42, 0.0  ;;  %v966_v58 = vsel %vm13992_vm7, %v957_v44, %v14220_v34  ;;  %v512_v63 = vadd.f32 %v14121_v8, %v13956_v54  ;;  %v126_v8 = vld [vmem:[%s18660_s1 + $0xc8] sm:$0xff] }
 0x153   :  { %v504_v4 = vadd.f32 %v13956_v54, %v14127_v14  ;;  %v14244_v7 = vshll.u32 %v14218_v32, 16  ;;  %1150 = vst [vmem:[#allocation2 + $0x64] sm:$0xf] %v966_v58  ;;  %v609_v10 = vmul.f32 %v573_v35, %v127_v60  ;;  %v13223_v54 = vld [vmem:[#allocation6 + $0x238] sm:$0xff]   ;;  %v14256_v15 = vshrl.u32 %v14218_v32, 16  ;;  %v14270_v44 = vld [vmem:[#allocation2 + $0x28] sm:$0xff]  }
 0x154   :  { %12179 = vmatpush3.bf16.msra.mxu0 %v13218_v47  ;;  %v946_v6 = vsel %vm13992_vm7, %v937_v48, %v945_v45  ;;  %v947_v41 = vrot.slane %v945_v45, 4  ;;  %v607_v11 = vmul.f32 %v571_v62, %v125_v26  ;;  %v574_v14 = vmax.f32 %v512_v63, 0.0  ;;  %v13209_v58 = vld [vmem:[#allocation6 + $0x80] sm:$0xff]   ;;  %v13214_v34 = vld [vmem:[#allocation6 + $0x88] sm:$0xff]  }
 0x155   :  { %12180 = vmatprep.subr.bf16.mxu0 %v13219_v43  ;;  %1148 = vst [vmem:[#allocation2 + $0x5c] sm:$0xf] %v946_v6  ;;  %v572_v47 = vmax.f32 %v504_v4, 0.0  ;;  %v1378_v9 = vrot.slane %v14244_v7, 1  ;;  %v11615_v18 = vpack.c.bf16 %v609_v10, %v609_v10  ;;  %v14261_v20 = vshll.u32 %v14234_v51, 16  ;;  %v14274_v63 = vld [vmem:[#allocation2 + $0x40] sm:$0xff]  }
 0x156   :  { %v956_v16 = vsel %vm13992_vm7, %v947_v41, %v955_v23  ;;  %v11613_v3 = vpack.c.bf16 %v607_v11, %v607_v11  ;;  %2575 = vmatmul.mubr.bf16.gmra.mrb[48].mxu0 %v14156_v5  ;;  %v610_v19 = vmul.f32 %v574_v14, %v128_v46  ;;  %v14268_v25 = vshrl.u32 %v14197_v17, 16 }
 0x157   :  { %1149 = vst [vmem:[#allocation2 + $0x60] sm:$0xf] %v956_v16  ;;  %v608_v22 = vmul.f32 %v572_v47, %v126_v8  ;;  %v1382_v13 = vor.u32 %v14256_v15, %v1378_v9  ;;  %v989_v37 = vshrl.u32 %v11615_v18, 16  ;;  %v992_v23 = vshll.u32 %v11615_v18, 16 }
 0x158   :  { %12181 = vmatpush3.bf16.msra.mxu0 %v13219_v43  ;;  %v969_v38 = vshrl.u32 %v11613_v3, 16  ;;  %v972_v42 = vshll.u32 %v11613_v3, 16  ;;  %v11616_v27 = vpack.c.bf16 %v610_v19, %v610_v19  ;;  %v1386_v49 = vrot.slane %v14261_v20, 1 }
 0x159   :  { %12182 = vmatprep.subr.bf16.mxu0 %v13223_v54  ;;  %v11614_v48 = vpack.c.bf16 %v608_v22, %v608_v22  ;;  %v1366_v60 = vor.u32 %v14268_v25, %v1362_v24  ;;  %v991_v26 = vrot.slane %v989_v37, 6  ;;  %v994_v45 = vrot.slane %v992_v23, 7  ;;  %v14280_v24 = vld [vmem:[#allocation2 + $0x48] sm:$0xff]  }
 0x15a   :  { %v971_v35 = vrot.slane %v969_v38, 6  ;;  %v974_v62 = vrot.slane %v972_v42, 7  ;;  %v999_v43 = vshrl.u32 %v11616_v27, 16  ;;  %v1002_v4 = vshll.u32 %v11616_v27, 16 }
 0x15b   :  { %v979_v6 = vshrl.u32 %v11614_v48, 16  ;;  %v982_v41 = vshll.u32 %v11614_v48, 16  ;;  %v995_v10 = vor.u32 %v994_v45, %v991_v26  ;;  %v1387_v46 = vsel %vm1327_vm8, %v1382_v13, %v1386_v49 }
 0x15c   :  { %12183 = vmatpush3.bf16.msra.mxu0 %v13223_v54  ;;  %v975_v11 = vor.u32 %v974_v62, %v971_v35  ;;  %v14278_v8 = vshll.u32 %v14270_v44, 16  ;;  %v1001_v14 = vrot.slane %v999_v43, 6  ;;  %v1004_v47 = vrot.slane %v1002_v4, 7  ;;  %2598 = vmatprep.mubr.bf16.mxu1 %v1387_v46 }
 0x15d   :  { %5366 = vmatprep.subr.bf16.mxu0 %v18674_v0  ;;  %v981_v16 = vrot.slane %v979_v6, 6  ;;  %v984_v18 = vrot.slane %v982_v41, 7  ;;  %v997_v3 = vrot.slane %v995_v10, 4  ;;  %2599 = vmatmul.mubr.bf16.vlgmr.msra.gmra.mrb[0].mxu1 %v14218_v32  ;;  %v14292_v23 = vshrl.u32 %v14234_v51, 16  ;;  %v14319_v6 = vld [vmem:[#allocation2 + $0x50] sm:$0xff]  }
 0x15e   :  { %v976_v54 = vsel %vm13992_vm7, %v967_v2, %v975_v11  ;;  %v977_v19 = vrot.slane %v975_v11, 4  ;;  %v1370_v22 = vrot.slane %v14278_v8, 1  ;;  %v14289_v13 = vor.u32 %v1004_v47, %v1001_v14  ;;  %2696 = vmatpush1.bf16.msra.mxu1 %v13209_v58  ;;  %v14326_v11 = vld [vmem:[%s18663_s4] ss:$0 sm:$0xff]  ;;  %v13217_v47 = vld [vmem:[#allocation6 + $0x90] sm:$0xff]  }
 0x15f   :  { %1151 = vst [vmem:[#allocation2 + $0x68] sm:$0xf] %v976_v54  ;;  %v985_v37 = vor.u32 %v984_v18, %v981_v16  ;;  %v14295_v38 = vshll.u32 %v14274_v63, 16  ;;  %2697 = vmatprep.subr.bf16.mxu1 %v18674_v0  ;;  %v14300_v42 = vshrl.u32 %v14270_v44, 16  ;;  %v14303_v27 = vshrl.u32 %v14274_v63, 16 }
 0x160   :  { %v1371_v2 = vsel %vm1327_vm8, %v1366_v60, %v1370_v22  ;;  %v14306_v48 = vshll.u32 %v14280_v24, 16  ;;  %v1006_v26 = vsel %vm13992_vm7, %v997_v3, %v14289_v13  ;;  %v1007_v45 = vrot.slane %v14289_v13, 4  ;;  %v1215_v16 = vld [vmem:[#allocation2 + $0x10] sm:$0x8] }
 0x161   :  { %v986_v60 = vsel %vm13992_vm7, %v977_v19, %v985_v37  ;;  %v987_v35 = vrot.slane %v985_v37, 4  ;;  %2582 = vmatprep.mubr.bf16.mxu0 %v1371_v2  ;;  %1154 = vst [vmem:[#allocation2 + $0x74] sm:$0xf] %v1006_v26  ;;  %v1390_v62 = vor.u32 %v14292_v23, %v1386_v49  ;;  %v1394_v58 = vrot.slane %v14295_v38, 1  ;;  %v130_v37 = vld [vmem:[%s18660_s1 + $0xe8] sm:$0xff] }
 0x162   :  { %1152 = vst [vmem:[#allocation2 + $0x6c] sm:$0xf] %v986_v60  ;;  %2583 = vmatmul.mubr.bf16.gmra.mrb[52].mxu0 %v14197_v17  ;;  %v1374_v43 = vor.u32 %v14300_v42, %v1370_v22  ;;  %v1402_v4 = vrot.slane %v14306_v48, 1  ;;  %2698 = vmatpush1.bf16.msra.mxu1 %v13214_v34  ;;  %v525_v49 = vadd.f32 %v14326_v11, %v14134_v33  ;;  %v131_v33 = vld [vmem:[%s18660_s1 + $0xf0] sm:$0xff]  ;;  %v14355_v34 = vshrl.u32 %v14280_v24, 16 }
 0x163   :  { %v996_v41 = vsel %vm13992_vm7, %v987_v35, %v995_v10  ;;  %v517_v46 = vadd.f32 %v14326_v11, %v14139_v52  ;;  %v528_v14 = vadd.f32 %v14326_v11, %v14145_v61  ;;  %v1395_v10 = vsel %vm1327_vm8, %v1390_v62, %v1394_v58  ;;  %v129_v52 = vld [vmem:[%s18660_s1 + $0xe0] sm:$0xff]  ;;  %2699 = vmatprep.subr.bf16.mxu1 %v18674_v0  ;;  %v132_v61 = vld [vmem:[%s18660_s1 + $0xf8] sm:$0xff] }
 0x164   :  { %1153 = vst [vmem:[#allocation2 + $0x70] sm:$0xf] %v996_v41  ;;  %v1379_v18 = vsel %vm1327_vm8, %v1374_v43, %v1378_v9  ;;  %v1398_v3 = vor.u32 %v14303_v27, %v1394_v58  ;;  %v520_v54 = vadd.f32 %v14326_v11, %v14150_v1  ;;  %2606 = vmatprep.mubr.bf16.mxu1 %v1395_v10  ;;  %v577_v9 = vmax.f32 %v525_v49, 0.0  ;;  %v13222_v41 = vld [vmem:[#allocation6 + $0x98] sm:$0xff]  }
 0x165   :  { %2590 = vmatprep.mubr.bf16.mxu0 %v1379_v18  ;;  %v575_v19 = vmax.f32 %v517_v46, 0.0  ;;  %v578_v22 = vmax.f32 %v528_v14, 0.0  ;;  %2607 = vmatmul.mubr.bf16.gmra.mrb[4].mxu1 %v14234_v51  ;;  %v14360_v60 = vshll.u32 %v14319_v6, 16  ;;  %v11125_v1 = vcombine.low %v1215_v16, %v14100_v53 }
 0x166   :  { %v1403_v2 = vsel %vm1327_vm8, %v1398_v3, %v1402_v4  ;;  %v576_v26 = vmax.f32 %v520_v54, 0.0  ;;  %v613_v35 = vmul.f32 %v577_v9, %v131_v33  ;;  %2700 = vmatpush1.bf16.msra.mxu1 %v13217_v47  ;;  %v1881_v43 = vrot.slane %v14156_v5, 3  ;;  %v13224_v33 = vld [vmem:[#allocation6 + $0xa0] sm:$0xff]  }
 0x167   :  { %2614 = vmatprep.mubr.bf16.mxu1 %v1403_v2  ;;  %v611_v62 = vmul.f32 %v575_v19, %v129_v52  ;;  %v614_v58 = vmul.f32 %v578_v22, %v132_v61  ;;  %v1406_v46 = vor.u32 %v14355_v34, %v1402_v4  ;;  %v1410_v14 = vrot.slane %v14360_v60, 1  ;;  %2701 = vmatprep.subr.bf16.mxu1 %v18674_v0  ;;  %v14371_v52 = vld [vmem:[#allocation2 + $0x58] sm:$0xff]  }
 0x168   :  { %v612_v49 = vmul.f32 %v576_v26, %v130_v37  ;;  %v1880_v10 = vrot.slane %v11125_v1, 3  ;;  %v11619_v18 = vpack.c.bf16 %v613_v35, %v613_v35  ;;  %v1883_v53 = vrot.slane %v14197_v17, 3 }
 0x169   :  { %v11617_v3 = vpack.c.bf16 %v611_v62, %v611_v62  ;;  %v11620_v54 = vpack.c.bf16 %v614_v58, %v614_v58  ;;  %v1411_v47 = vsel %vm1327_vm8, %v1406_v46, %v1410_v14  ;;  %v14374_v4 = vshrl.u32 %v14319_v6, 16 }
 0x16a   :  { %v11618_v16 = vpack.c.bf16 %v612_v49, %v612_v49  ;;  %2591 = vmatmul.mubr.bf16.gmra.mrb[56].mxu0 %v14270_v44  ;;  %v1882_v5 = vsel %vm1879_vm9, %v1880_v10, %v1881_v43  ;;  %v1029_v61 = vshrl.u32 %v11619_v18, 16  ;;  %v1032_v9 = vshll.u32 %v11619_v18, 16  ;;  %2702 = vmatpush1.bf16.msra.mxu1 %v13222_v41 }
 0x16b   :  { %v1009_v19 = vshrl.u32 %v11617_v3, 16  ;;  %v1012_v22 = vshll.u32 %v11617_v3, 16  ;;  %12184 = vmatprep.mubr.bf16.mxu0 %v1882_v5  ;;  %v1039_v17 = vshrl.u32 %v11620_v54, 16  ;;  %v1042_v37 = vshll.u32 %v11620_v54, 16  ;;  %2703 = vmatprep.subr.bf16.mxu1 %v18674_v0 }
 0x16c   :  { %v1019_v2 = vshrl.u32 %v11618_v16, 16  ;;  %v1022_v26 = vshll.u32 %v11618_v16, 16  ;;  %v1031_v1 = vrot.slane %v1029_v61, 6  ;;  %v1034_v35 = vrot.slane %v1032_v9, 7 }
 0x16d   :  { %v1011_v62 = vrot.slane %v1009_v19, 6  ;;  %v1014_v58 = vrot.slane %v1012_v22, 7  ;;  %v1041_v49 = vrot.slane %v1039_v17, 6  ;;  %v1044_v46 = vrot.slane %v1042_v37, 7  ;;  %2615 = vmatmul.mubr.bf16.gmra.mrb[8].mxu1 %v14274_v63  ;;  %v13226_v19 = vld [vmem:[#allocation6 + $0xa8] sm:$0xff]  }
 0x16e   :  { %v1021_v10 = vrot.slane %v1019_v2, 6  ;;  %v1024_v29 = vrot.slane %v1022_v26, 7  ;;  %v1035_v18 = vor.u32 %v1034_v35, %v1031_v1  ;;  %2622 = vmatprep.mubr.bf16.mxu1 %v1411_v47  ;;  %2704 = vmatpush1.bf16.msra.mxu1 %v13224_v33  ;;  %v1884_v41 = vsel %vm1879_vm9, %v1881_v43, %v1883_v53  ;;  %v14392_v17 = vld [vmem:[#allocation2 + $0x60] sm:$0xff]   ;;  %v135_v26 = vld [vmem:[%s18660_s1 + $0x110] sm:$0xff] }
 0x16f   :  { %v1015_v3 = vor.u32 %v1014_v58, %v1011_v62  ;;  %v14380_v54 = vshll.u32 %v14371_v52, 16  ;;  %v14382_v16 = vor.u32 %v1044_v46, %v1041_v49  ;;  %v1414_v61 = vor.u32 %v14374_v4, %v1410_v14  ;;  %2705 = vmatprep.subr.bf16.mxu1 %v18674_v0  ;;  %v133_v35 = vld [vmem:[%s18660_s1 + $0x100] sm:$0xff]  ;;  %v13228_v49 = vld [vmem:[#allocation6 + $0xb0] sm:$0xff]   ;;  %v136_v46 = vld [vmem:[%s18660_s1 + $0x118] sm:$0xff] }
 0x170   :  { %v1025_v5 = vor.u32 %v1024_v29, %v1021_v10  ;;  %v1885_v9 = vrot.slane %v14270_v44, 3  ;;  %v1037_v22 = vrot.slane %v1035_v18, 4  ;;  %v541_v37 = vadd.f32 %v14326_v11, %v14190_v39  ;;  %v134_v10 = vld [vmem:[%s18660_s1 + $0x108] sm:$0xff] }
 0x171   :  { %18765 = vst [vmem:[#allocation12_spill] sm:$0xff] %v14380_v54  ;;  %v1016_v47 = vsel %vm13992_vm7, %v1007_v45, %v1015_v3  ;;  %v1017_v43 = vrot.slane %v1015_v3, 4  ;;  %v1418_v33 = vrot.slane %v14380_v54, 1  ;;  %v544_v62 = vadd.f32 %v14326_v11, %v14201_v56 }
 0x172   :  { %1155 = vst [vmem:[#allocation2 + $0x78] sm:$0xf] %v1016_v47  ;;  %v1027_v29 = vrot.slane %v1025_v5, 4  ;;  %12185 = vmatmul.mubr.bf16.vlgmr.msra.gmra.mrb[60].mxu0 %v1884_v41  ;;  %v1886_v14 = vsel %vm1879_vm9, %v1883_v53, %v1885_v9  ;;  %v1046_v13 = vsel %vm13992_vm7, %v1037_v22, %v14382_v16  ;;  %v533_v53 = vadd.f32 %v14326_v11, %v14199_v21 }
 0x173   :  { %v1026_v45 = vsel %vm13992_vm7, %v1017_v43, %v1025_v5  ;;  %v1419_v2 = vsel %vm1327_vm8, %v1414_v61, %v1418_v33  ;;  %12188 = vmatprep.mubr.bf16.mxu0 %v1886_v14  ;;  %1158 = vst [vmem:[#allocation2 + $0x84] sm:$0xf] %v1046_v13  ;;  %v581_v1 = vmax.f32 %v541_v37, 0.0  ;;  %v536_v58 = vadd.f32 %v14326_v11, %v14209_v28  ;;  %v13230_v14 = vld [vmem:[#allocation6 + $0xb8] sm:$0xff]  }
 0x174   :  { %v1036_v39 = vsel %vm13992_vm7, %v1027_v29, %v1035_v18  ;;  %1156 = vst [vmem:[#allocation2 + $0x7c] sm:$0xf] %v1026_v45  ;;  %2706 = vmatpush1.bf16.msra.mxu1 %v13226_v19  ;;  %v579_v21 = vmax.f32 %v533_v53, 0.0  ;;  %v1887_v18 = vrot.slane %v14218_v32, 3  ;;  %v14425_v3 = vshrl.u32 %v14371_v52, 16 }
 0x175   :  { %1157 = vst [vmem:[#allocation2 + $0x80] sm:$0xf] %v1036_v39  ;;  %v14428_v56 = vshll.u32 %v14392_v17, 16  ;;  %2707 = vmatprep.subr.bf16.mxu1 %v18674_v0  ;;  %2623 = vmatmul.mubr.bf16.gmra.mrb[12].mxu1 %v14280_v24  ;;  %v617_v28 = vmul.f32 %v581_v1, %v135_v26  ;;  %v582_v11 = vmax.f32 %v544_v62, 0.0  ;;  %v580_v41 = vmax.f32 %v536_v58, 0.0  ;;  %v13231_v39 = vld [vmem:[#allocation6 + $0xc0] sm:$0xff]  }
 0x176   :  { %v1889_v5 = vrot.slane %v14234_v51, 3  ;;  %2630 = vmatprep.mubr.bf16.mxu1 %v1419_v2  ;;  %v615_v61 = vmul.f32 %v579_v21, %v133_v35  ;;  %v1422_v19 = vor.u32 %v14425_v3, %v1418_v33  ;;  %v1047_v22 = vrot.slane %v14382_v16, 4  ;;  %v14440_v16 = vld [vmem:[#allocation2 + $0x68] sm:$0xff]  }
 0x177   :  { %18766 = vst [vmem:[#allocation13_spill] sm:$0xff] %v14428_v56  ;;  %v1426_v32 = vrot.slane %v14428_v56, 1  ;;  %v11623_v47 = vpack.c.bf16 %v617_v28, %v617_v28  ;;  %v618_v43 = vmul.f32 %v582_v11, %v136_v46  ;;  %v616_v29 = vmul.f32 %v580_v41, %v134_v10 }
 0x178   :  { %2708 = vmatpush1.bf16.msra.mxu1 %v13228_v49  ;;  %v11621_v37 = vpack.c.bf16 %v615_v61, %v615_v61  ;;  %v1888_v13 = vsel %vm1879_vm9, %v1885_v9, %v1887_v18  ;;  %v1890_v51 = vsel %vm1879_vm9, %v1887_v18, %v1889_v5  ;;  %v1891_v62 = vrot.slane %v14274_v63, 3 }
 0x179   :  { %v1427_v45 = vsel %vm1327_vm8, %v1422_v19, %v1426_v32  ;;  %2709 = vmatprep.subr.bf16.mxu1 %v18674_v0  ;;  %v1069_v2 = vshrl.u32 %v11623_v47, 16  ;;  %v1072_v33 = vshll.u32 %v11623_v47, 16  ;;  %v11624_v26 = vpack.c.bf16 %v618_v43, %v618_v43 }
 0x17a   :  { %v11622_v53 = vpack.c.bf16 %v616_v29, %v616_v29  ;;  %12189 = vmatmul.mubr.bf16.gmra.mrb[64].mxu0 %v1888_v13  ;;  %v1049_v1 = vshrl.u32 %v11621_v37, 16  ;;  %v1052_v35 = vshll.u32 %v11621_v37, 16  ;;  %v14444_v9 = vshrl.u32 %v14392_v17, 16 }
 0x17b   :  { %12192 = vmatprep.mubr.bf16.mxu0 %v1890_v51  ;;  %v1071_v58 = vrot.slane %v1069_v2, 6  ;;  %v1074_v49 = vrot.slane %v1072_v33, 7  ;;  %v1079_v21 = vshrl.u32 %v11624_v26, 16  ;;  %v1082_v46 = vshll.u32 %v11624_v26, 16  ;;  %v13233_v33 = vld [vmem:[#allocation6 + $0xc8] sm:$0xff]  }
 0x17c   :  { %18767 = vst [vmem:[#allocation14_spill] sm:$0xff] %v14444_v9  ;;  %2710 = vmatpush1.bf16.msra.mxu1 %v13230_v14  ;;  %v1051_v10 = vrot.slane %v1049_v1, 6  ;;  %v1054_v18 = vrot.slane %v1052_v35, 7  ;;  %v1059_v28 = vshrl.u32 %v11622_v53, 16  ;;  %v1062_v11 = vshll.u32 %v11622_v53, 16 }
 0x17d   :  { %2711 = vmatprep.subr.bf16.mxu1 %v18674_v0  ;;  %v1075_v41 = vor.u32 %v1074_v49, %v1071_v58  ;;  %v1081_v61 = vrot.slane %v1079_v21, 6  ;;  %v1084_v19 = vrot.slane %v1082_v46, 7  ;;  %2631 = vmatmul.mubr.bf16.gmra.mrb[16].mxu1 %v14319_v6  ;;  %v14449_v47 = vshll.u32 %v14440_v16, 16  ;;  %v1163_v1 = vld [vmem:[#allocation2 + $0x98] sm:$0x3]  ;;  %v14461_v21 = vld [vmem:[#allocation2 + $0x70] sm:$0xff]  }
 0x17e   :  { %v1055_v43 = vor.u32 %v1054_v18, %v1051_v10  ;;  %v1061_v29 = vrot.slane %v1059_v28, 6  ;;  %v1064_v37 = vrot.slane %v1062_v11, 7  ;;  %2638 = vmatprep.mubr.bf16.mxu1 %v1427_v45  ;;  %v1893_v14 = vrot.slane %v14280_v24, 3  ;;  %v13235_v10 = vld [vmem:[#allocation6 + $0xd0] sm:$0xff]  }
 0x17f   :  { %v1077_v13 = vrot.slane %v1075_v41, 4  ;;  %v1085_v51 = vor.u32 %v1084_v19, %v1081_v61  ;;  %v1892_v2 = vsel %vm1879_vm9, %v1889_v5, %v1891_v62  ;;  %v1430_v58 = vor.u32 %v14444_v9, %v1426_v32 }
 0x180   :  { %2712 = vmatpush1.bf16.msra.mxu1 %v13231_v39  ;;  %v1056_v26 = vsel %vm13992_vm7, %v1047_v22, %v1055_v43  ;;  %v1057_v53 = vrot.slane %v1055_v43, 4  ;;  %v1065_v35 = vor.u32 %v1064_v37, %v1061_v29  ;;  %v1434_v5 = vrot.slane %v14449_v47, 1 }
 0x181   :  { %2713 = vmatprep.subr.bf16.mxu1 %v18674_v0  ;;  %1159 = vst [vmem:[#allocation2 + $0x88] sm:$0xf] %v1056_v26  ;;  %v1086_v45 = vsel %vm13992_vm7, %v1077_v13, %v1085_v51  ;;  %v1087_v49 = vrot.slane %v1085_v51, 4  ;;  %v1894_v39 = vsel %vm1879_vm9, %v1891_v62, %v1893_v14  ;;  %v1895_v62 = vrot.slane %v14319_v6, 3  ;;  %v14485_v51 = vld [vmem:[#allocation2 + $0x78] sm:$0xff]  }
 0x182   :  { %12193 = vmatmul.mubr.bf16.gmra.mrb[68].mxu0 %v1892_v2  ;;  %1162 = vst [vmem:[#allocation2 + $0x94] sm:$0xf] %v1086_v45  ;;  %v1066_v22 = vsel %vm13992_vm7, %v1057_v53, %v1065_v35  ;;  %v1067_v46 = vrot.slane %v1065_v35, 4  ;;  %v1435_v28 = vsel %vm1327_vm8, %v1430_v58, %v1434_v5  ;;  %v14474_v11 = vshll.u32 %v14461_v21, 16  ;;  %v13238_v2 = vld [vmem:[#allocation6 + $0xe0] sm:$0xff]   ;;  %v13240_v35 = vld [vmem:[#allocation6 + $0xe8] sm:$0xff]  }
 0x183   :  { %12196 = vmatprep.mubr.bf16.mxu0 %v1894_v39  ;;  %v1164_v32 = vsel %vm13923_vm2, %v1087_v49, %v1163_v1  ;;  %1160 = vst [vmem:[#allocation2 + $0x8c] sm:$0xf] %v1066_v22  ;;  %v1897_v61 = vrot.slane %v14371_v52, 3  ;;  %v14478_v19 = vshrl.u32 %v14440_v16, 16  ;;  %v1896_v43 = vsel %vm1879_vm9, %v1893_v14, %v1895_v62  ;;  %v14503_v39 = vld [vmem:[#allocation2 + $0x80] sm:$0xff]   ;;  %v13244_v22 = vld [vmem:[#allocation6 + $0xf0] sm:$0xff]  }
 0x184   :  { %2714 = vmatpush1.bf16.msra.mxu1 %v13233_v33  ;;  %1165 = vst [vmem:[#allocation2 + $0x98] sm:$0x3] %v1164_v32  ;;  %v1076_v18 = vsel %vm13992_vm7, %v1067_v46, %v1075_v41  ;;  %v13237_v41 = vld [vmem:[#allocation6 + $0xd8] sm:$0xff]   ;;  %v1442_v37 = vrot.slane %v14474_v11, 1  ;;  %v1899_v33 = vrot.slane %v14392_v17, 3  ;;  %v14492_v26 = vshll.u32 %v14485_v51, 16 }
 0x185   :  { %2715 = vmatprep.subr.bf16.mxu1 %v18674_v0  ;;  %1161 = vst [vmem:[#allocation2 + $0x90] sm:$0xf] %v1076_v18  ;;  %2639 = vmatmul.mubr.bf16.gmra.mrb[20].mxu1 %v14371_v52  ;;  %v1438_v29 = vor.u32 %v14478_v19, %v1434_v5  ;;  %v1898_v13 = vsel %vm1879_vm9, %v1895_v62, %v1897_v61  ;;  %v1901_v53 = vrot.slane %v14440_v16, 3  ;;  %v14496_v1 = vshrl.u32 %v14461_v21, 16  ;;  %v1204_v62 = vld [vmem:[#allocation2 + $0x8] sm:$0xe] }
 0x186   :  { %2646 = vmatprep.mubr.bf16.mxu1 %v1435_v28  ;;  %v1900_v58 = vsel %vm1879_vm9, %v1897_v61, %v1899_v33  ;;  %v1450_v49 = vrot.slane %v14492_v26, 1  ;;  %v1903_v46 = vrot.slane %v14461_v21, 3  ;;  %v1905_v18 = vrot.slane %v14485_v51, 3  ;;  %v14513_v28 = vld [vmem:[#allocation2 + $0xc] sm:$0xf] }
 0x187   :  { %v1443_v14 = vsel %vm1327_vm8, %v1438_v29, %v1442_v37  ;;  %v1446_v45 = vor.u32 %v14496_v1, %v1442_v37  ;;  %v1902_v5 = vsel %vm1879_vm9, %v1899_v33, %v1901_v53  ;;  %v14516_v61 = vcombine.low %v1204_v62, %v14513_v28 }
 0x188   :  { %2716 = vmatpush1.bf16.msra.mxu1 %v13235_v10  ;;  %v14510_v10 = vshll.u32 %v14503_v39, 16  ;;  %v14523_v37 = vshrl.u32 %v14485_v51, 16  ;;  %v1629_v40 = vrot.slane %v14478_v19, 1 }
 0x189   :  { %2717 = vmatprep.subr.bf16.mxu1 %v18674_v0  ;;  %v1451_v32 = vsel %vm1327_vm8, %v1446_v45, %v1450_v49  ;;  %v1581_v45 = vshll.u32 %v14516_v61, 16 }
 0x18a   :  { %12197 = vmatmul.mubr.bf16.gmra.mrb[72].mxu0 %v1896_v43  ;;  %v18768_v43 = vshrl.u32 %v14107_v59, 16  ;;  %v1454_v33 = vor.u32 %v14523_v37, %v1450_v49 }
 0x18b   :  { %12200 = vmatprep.mubr.bf16.mxu0 %v1898_v13  ;;  %v13247_v13 = vld [vmem:[#allocation6 + $0xf8] sm:$0xff]   ;;  %v1583_v49 = vrot.slane %v1581_v45, 2 }
 0x18c   :  { %2718 = vmatpush1.bf16.msra.mxu1 %v13237_v41  ;;  %v1586_v41 = vrot.slane %v1344_v55, 2  ;;  %v1585_v29 = vrot.slane %v18768_v43, 1  ;;  %v14530_v55 = vld [vmem:[#allocation2 + $0x88] sm:$0xff]   ;;  %v14557_v45 = vld [vmem:[#allocation2 + $0x90] ss:$0 sps:$4 sm:$0x11]  }
 0x18d   :  { %2719 = vmatprep.subr.bf16.mxu1 %v18674_v0  ;;  %2647 = vmatmul.mubr.bf16.gmra.mrb[24].mxu1 %v14392_v17  ;;  %v1909_v62 = vrot.slane %v14530_v55, 3 }
 0x18e   :  { %2654 = vmatprep.mubr.bf16.mxu1 %v1443_v14  ;;  %v1458_v14 = vrot.slane %v14510_v10, 1 }
 0x190   :  { %2720 = vmatpush1.bf16.msra.mxu1 %v13238_v2  ;;  %v1904_v2 = vsel %vm1879_vm9, %v1901_v53, %v1903_v46  ;;  %v1907_v53 = vrot.slane %v14503_v39, 3 }
 0x191   :  { %2721 = vmatprep.subr.bf16.mxu1 %v18674_v0 }
 0x192   :  { %12201 = vmatmul.mubr.bf16.gmra.mrb[76].mxu0 %v1900_v58  ;;  %v1578_v58 = vshrl.u32 %v14516_v61, 16 }
 0x193   :  { %12204 = vmatprep.mubr.bf16.mxu0 %v1902_v5  ;;  %v14534_v5 = vor.u32 %v1586_v41, %v1585_v29  ;;  %v14545_v41 = vshrl.u32 %v14503_v39, 16  ;;  %v1908_v29 = vsel %vm1879_vm9, %v1905_v18, %v1907_v53 }
 0x194   :  { %2722 = vmatpush1.bf16.msra.mxu1 %v13240_v35  ;;  %v1906_v35 = vsel %vm1879_vm9, %v1903_v46, %v1905_v18  ;;  %v1459_v46 = vsel %vm1327_vm8, %v1454_v33, %v1458_v14 }
 0x195   :  { %2723 = vmatprep.subr.bf16.mxu1 %v18674_v0  ;;  %2655 = vmatmul.mubr.bf16.gmra.mrb[28].mxu1 %v14440_v16  ;;  %v1462_v33 = vor.u32 %v14545_v41, %v1458_v14  ;;  %v14564_v14 = vshrl.u32 %v14530_v55, 16 }
 0x196   :  { %2662 = vmatprep.mubr.bf16.mxu1 %v1451_v32  ;;  %v14541_v32 = vshll.u32 %v14530_v55, 16 }
 0x198   :  { %2724 = vmatpush1.bf16.msra.mxu1 %v13244_v22  ;;  %v1580_v22 = vrot.slane %v1578_v58, 1  ;;  %v1910_v58 = vsel %vm1879_vm9, %v1907_v53, %v1909_v62  ;;  %v13245_v53 = vld [vmem:[#allocation2 + $0xa0] ss:$0 sps:$4 sm:$0x77]  }
 0x199   :  { %2725 = vmatprep.subr.bf16.mxu1 %v18674_v0  ;;  %v1915_v36 = vrot.slane %v13245_v53, 3  ;;  %v1642_v53 = vrot.slane %v14510_v10, 2 }
 0x19a   :  { %12205 = vmatmul.mubr.bf16.gmra.mrb[80].mxu0 %v1904_v2  ;;  %v1584_v43 = vor.u32 %v1583_v49, %v1580_v22  ;;  %v13243_v22 = vld [vmem:[#allocation2 + $0x98] sm:$0xff]  }
 0x19b   :  { %12208 = vmatprep.mubr.bf16.mxu0 %v1906_v35  ;;  %v1466_v35 = vrot.slane %v14541_v32, 1 }
 0x19c   :  { %2726 = vmatpush1.bf16.msra.mxu1 %v13247_v13  ;;  %v14548_v13 = vld [vmem:[#allocation2 + $0x90] sm:$0xff]   ;;  %v14552_v2 = vsel %vm1576_vm10, %v1584_v43, %v14534_v5  ;;  %v1913_v43 = vrot.slane %v13243_v22, 3  ;;  %v1633_v22 = vrot.slane %v14496_v1, 1 }
 0x19d   :  { %2872 = vmatprep.subr.bf16.mxu1 %v18674_v0  ;;  %2663 = vmatmul.mubr.bf16.gmra.mrb[32].mxu1 %v14461_v21  ;;  %v1911_v49 = vrot.slane %v14548_v13, 3  ;;  %v1467_v18 = vsel %vm1327_vm8, %v1462_v33, %v1466_v35  ;;  %v1470_v0 = vor.u32 %v14564_v14, %v1466_v35  ;;  %v1630_v33 = vrot.slane %v14449_v47, 2 }
 0x19e   :  { %2670 = vmatprep.mubr.bf16.mxu1 %v1459_v46  ;;  %v1472_v46 = vshll.u32 %v14557_v45, 16  ;;  %v1916_v56 = vsel %vm1879_vm9, %v1913_v43, %v1915_v36 }
 0x19f   :  { %v1914_v50 = vsel %vm1879_vm9, %v1911_v49, %v1913_v43 }
 0x1a2   :  { %12209 = vmatmul.mubr.bf16.gmra.mrb[84].mxu0 %v1908_v29  ;;  %v1912_v29 = vsel %vm1879_vm9, %v1909_v62, %v1911_v49  ;;  %v1637_v49 = vrot.slane %v14523_v37, 1 }
 0x1a3   :  { %12212 = vmatprep.mubr.bf16.mxu0 %v1910_v58  ;;  %v1474_v58 = vrot.slane %v1472_v46, 1  ;;  %v1641_v46 = vrot.slane %v14545_v41, 1 }
 0x1a5   :  { %2671 = vmatmul.mubr.bf16.gmra.mrb[36].mxu1 %v14485_v51  ;;  %v1475_v62 = vsel %vm1327_vm8, %v1470_v0, %v1474_v58  ;;  %v1501_v0 = vrot.slane %v14107_v59, 1  ;;  %v1643_v58 = vor.u32 %v1642_v53, %v1641_v46  ;;  %v14605_v53 = vld [vmem:[#allocation2 + $0x18] sm:$0xff]  }
 0x1a6   :  { %2678 = vmatprep.mubr.bf16.mxu1 %v1467_v18  ;;  %v1634_v18 = vrot.slane %v14474_v11, 2 }
 0x1a8   :  { %v1635_v35 = vor.u32 %v1634_v18, %v1633_v22  ;;  %v1646_v22 = vrot.slane %v14541_v32, 2 }
 0x1aa   :  { %12213 = vmatmul.mubr.bf16.gmra.mrb[88].mxu0 %v1912_v29  ;;  %v14575_v29 = vor.u32 %v1630_v33, %v1629_v40  ;;  %v1203_v40 = vld [vmem:[#allocation2] sm:$0xe]  ;;  %v1645_v33 = vrot.slane %v14564_v14, 1 }
 0x1ab   :  { %12216 = vmatprep.mubr.bf16.mxu0 %v1914_v50  ;;  %v1638_v50 = vrot.slane %v14492_v26, 2 }
 0x1ac   :  { %v14584_v9 = vsel %vm1576_vm10, %v14575_v29, %v1635_v35  ;;  %v14596_v43 = vor.u32 %v1646_v22, %v1645_v33  ;;  %v13249_v33 = vld [vmem:[#allocation6 + $0x100] sm:$0xff]  }
 0x1ad   :  { %2679 = vmatmul.mubr.bf16.gmra.mrb[40].mxu1 %v14503_v39  ;;  %18769 = vst [vmem:[#allocation15_spill] sm:$0xff] %v14584_v9  ;;  %v1639_v54 = vor.u32 %v1638_v50, %v1637_v49  ;;  %v1829_v9 = vrot.slane %v14510_v10, 3  ;;  %v18776_v10 = vshll.u32 %v14548_v13, 16 }
 0x1ae   :  { %2686 = vmatprep.mubr.bf16.mxu1 %v1475_v62  ;;  %v1564_v62 = vrot.slane %v14516_v61, 1  ;;  %18772 = vst [vmem:[#allocation18_spill] sm:$0xff] %v14596_v43  ;;  %v14602_v46 = vsel %vm1576_vm10, %v1643_v58, %v14596_v43  ;;  %v1499_v61 = vrot.slane %v14102_v57, 1  ;;  %v1816_v57 = vrot.slane %v14478_v19, 2 }
 0x1af   :  { %v14590_v18 = vsel %vm1576_vm10, %v1635_v35, %v1639_v54  ;;  %v14594_v36 = vsel %vm1576_vm10, %v1639_v54, %v1643_v58  ;;  %18773 = vst [vmem:[#allocation19_spill] sm:$0xff] %v14602_v46  ;;  %v1503_v54 = vrot.slane %v14605_v53, 1  ;;  %v14611_v58 = vld [vmem:[#allocation2 + $0x20] sm:$0xff]   ;;  %v1821_v46 = vrot.slane %v14474_v11, 3  ;;  %v13252_v11 = vld [vmem:[#allocation6 + $0x118] sm:$0xff]  }
 0x1b0   :  { %18770 = vst [vmem:[#allocation16_spill] sm:$0xff] %v14590_v18  ;;  %18771 = vst [vmem:[#allocation17_spill] sm:$0xff] %v14594_v36  ;;  %v1565_v50 = vsel %vm1497_vm11, %v1564_v62, %v1501_v0  ;;  %v13250_v62 = vld [vmem:[#allocation6 + $0x108] sm:$0xff]   ;;  %v1824_v36 = vrot.slane %v14523_v37, 2  ;;  %v1502_v18 = vsel %vm1497_vm11, %v1499_v61, %v1501_v0  ;;  %v1828_v43 = vrot.slane %v14545_v41, 2 }
 0x1b2   :  { %12217 = vmatmul.mubr.bf16.gmra.mrb[92].mxu0 %v1916_v56  ;;  %v13585_v56 = vld [vmem:[#allocation2 + $0x4] sm:$0xf] }
 0x1b3   :  { %v11115_v49 = vcombine.low %v1203_v40, %v13585_v56  ;;  %v1504_v40 = vsel %vm1497_vm11, %v1501_v0, %v1503_v54  ;;  %v18774_v56 = vmov 0   ;;  %v1833_v0 = vrot.slane %v14541_v32, 3 }
 0x1b5   :  { %2687 = vmatmul.mubr.bf16.gmra.mrb[44].mxu1 %v14530_v55  ;;  %v1498_v35 = vrot.slane %v11115_v49, 1  ;;  %v1505_v49 = vrot.slane %v14611_v58, 1 }
 0x1b6   :  { %2727 = vmatprep.mubr.bf16.mxu1 %v1565_v50  ;;  %v13251_v50 = vld [vmem:[#allocation6 + $0x110] sm:$0xff]  }
 0x1b7   :  { %v1500_v22 = vsel %vm1497_vm11, %v1498_v35, %v1499_v61  ;;  %v1817_v35 = vrot.slane %v14449_v47, 3  ;;  %v1506_v19 = vsel %vm1497_vm11, %v1503_v54, %v1505_v49  ;;  %v18775_v61 = vshrl.u32 %v14548_v13, 16 }
 0x1b9   :  { %v14626_v47 = vor.u32 %v1817_v35, %v1816_v57 }
 0x1bd   :  { %2728 = vmatmul.mubr.bf16.vlgmr.msra.gmra.mrb[48].mxu1 %v1500_v22  ;;  %v1820_v22 = vrot.slane %v14496_v1, 2 }
 0x1be   :  { %2873 = vmatpush1.bf16.msra.mxu1 %v13249_v33  ;;  %2735 = vmatprep.mubr.bf16.mxu1 %v1504_v40  ;;  %v1832_v33 = vrot.slane %v14564_v14, 2  ;;  %v1837_v14 = vrot.slane %v18776_v10, 3  ;;  %v13260_v10 = vld [vmem:[#allocation6 + $0x158] sm:$0xff]  }
 0x1bf   :  { %2874 = vmatprep.subr.bf16.mxu1 %v18774_v56  ;;  %v1822_v1 = vor.u32 %v1821_v46, %v1820_v22  ;;  %v14659_v22 = vld [vmem:[#allocation2 + $0x30] sm:$0xff]  }
 0x1c0   :  { %v1834_v54 = vor.u32 %v1833_v0, %v1832_v33  ;;  %v1509_v33 = vrot.slane %v14659_v22, 1 }
 0x1c1   :  { %v14636_v41 = vsel %vm1767_vm12, %v14626_v47, %v1822_v1 }
 0x1c2   :  { %2875 = vmatpush1.bf16.msra.mxu1 %v13250_v62  ;;  %v1825_v62 = vrot.slane %v14492_v26, 3  ;;  %v1836_v26 = vrot.slane %v18775_v61, 2  ;;  %v1513_v61 = vrot.slane %v14274_v63, 1 }
 0x1c3   :  { %2876 = vmatprep.subr.bf16.mxu1 %v18774_v56 }
 0x1c4   :  { %v1826_v37 = vor.u32 %v1825_v62, %v1824_v36  ;;  %v1507_v36 = vrot.slane %v14270_v44, 1  ;;  %v14647_v57 = vor.u32 %v1837_v14, %v1836_v26  ;;  %v13254_v44 = vld [vmem:[#allocation6 + $0x128] sm:$0xff]   ;;  %v13255_v62 = vld [vmem:[#allocation6 + $0x130] sm:$0xff]   ;;  %v1515_v14 = vrot.slane %v14280_v24, 1 }
 0x1c5   :  { %2736 = vmatmul.mubr.bf16.gmra.mrb[52].mxu1 %v1502_v18  ;;  %v1830_v18 = vor.u32 %v1829_v9, %v1828_v43  ;;  %v13259_v26 = vld [vmem:[#allocation6 + $0x150] sm:$0xff]  }
 0x1c6   :  { %2743 = vmatprep.mubr.bf16.mxu1 %v1506_v19  ;;  %2877 = vmatpush1.bf16.msra.mxu1 %v13251_v50  ;;  %v14641_v46 = vsel %vm1767_vm12, %v1822_v1, %v1826_v37  ;;  %18777 = vst [vmem:[#allocation20_spill] sm:$0xff] %v14647_v57  ;;  %v13253_v50 = vld [vmem:[#allocation6 + $0x120] sm:$0xff]   ;;  %v14655_v9 = vsel %vm1767_vm12, %v1834_v54, %v14647_v57 }
 0x1c7   :  { %2878 = vmatprep.subr.bf16.mxu1 %v18774_v56  ;;  %v14645_v32 = vsel %vm1767_vm12, %v1826_v37, %v1830_v18  ;;  %v14650_v35 = vsel %vm1767_vm12, %v1830_v18, %v1834_v54  ;;  %v1508_v43 = vsel %vm1497_vm11, %v1505_v49, %v1507_v36  ;;  %v1510_v1 = vsel %vm1497_vm11, %v1507_v36, %v1509_v33  ;;  %v14665_v49 = vld [vmem:[#allocation2 + $0x38] sm:$0xff]   ;;  %v13262_v36 = vld [vmem:[#allocation6 + $0x168] sm:$0xff]  }
 0x1c8   :  { %v13257_v37 = vld [vmem:[#allocation6 + $0x140] sm:$0xff]   ;;  %v1516_v63 = vsel %vm1497_vm11, %v1513_v61, %v1515_v14 }
 0x1c9   :  { %v13261_v54 = vld [vmem:[#allocation6 + $0x160] sm:$0xff]  }
 0x1ca   :  { %2879 = vmatpush1.bf16.msra.mxu1 %v13252_v11  ;;  %v1511_v11 = vrot.slane %v14665_v49, 1 }
 0x1cb   :  { %2880 = vmatprep.subr.bf16.mxu1 %v18774_v56 }
 0x1cc   :  { %v1512_v0 = vsel %vm1497_vm11, %v1509_v33, %v1511_v11  ;;  %v1514_v18 = vsel %vm1497_vm11, %v1511_v11, %v1513_v61  ;;  %v1519_v33 = vrot.slane %v14371_v52, 1 }
 0x1cd   :  { %2744 = vmatmul.mubr.bf16.gmra.mrb[56].mxu1 %v1504_v40  ;;  %v13256_v40 = vld [vmem:[#allocation6 + $0x138] sm:$0xff]  }
 0x1ce   :  { %2751 = vmatprep.mubr.bf16.mxu1 %v1508_v43  ;;  %2881 = vmatpush1.bf16.msra.mxu1 %v13253_v50  ;;  %v1517_v50 = vrot.slane %v14319_v6, 1 }
 0x1cf   :  { %2882 = vmatprep.subr.bf16.mxu1 %v18774_v56 }
 0x1d0   :  { %v1518_v24 = vsel %vm1497_vm11, %v1515_v14, %v1517_v50  ;;  %v1520_v6 = vsel %vm1497_vm11, %v1517_v50, %v1519_v33 }
 0x1d2   :  { %2883 = vmatpush1.bf16.msra.mxu1 %v13254_v44  ;;  %v13265_v44 = vld [vmem:[#allocation6 + $0x178] sm:$0xff]  }
 0x1d3   :  { %2884 = vmatprep.subr.bf16.mxu1 %v18774_v56 }
 0x1d5   :  { %2752 = vmatmul.mubr.bf16.gmra.mrb[60].mxu1 %v1506_v19  ;;  %v13258_v19 = vld [vmem:[#allocation6 + $0x148] sm:$0xff]  }
 0x1d6   :  { %2759 = vmatprep.mubr.bf16.mxu1 %v1510_v1  ;;  %2885 = vmatpush1.bf16.msra.mxu1 %v13255_v62  ;;  %v1521_v62 = vrot.slane %v14392_v17, 1 }
 0x1d7   :  { %2886 = vmatprep.subr.bf16.mxu1 %v18774_v56 }
 0x1da   :  { %2887 = vmatpush1.bf16.msra.mxu1 %v13256_v40  ;;  %v1523_v40 = vrot.slane %v14440_v16, 1  ;;  %v1527_v16 = vrot.slane %v14485_v51, 1 }
 0x1db   :  { %2888 = vmatprep.subr.bf16.mxu1 %v18774_v56 }
 0x1dc   :  { %v1524_v11 = vsel %vm1497_vm11, %v1521_v62, %v1523_v40 }
 0x1dd   :  { %2760 = vmatmul.mubr.bf16.gmra.mrb[64].mxu1 %v1508_v43  ;;  %v13263_v43 = vld [vmem:[#allocation6 + $0x170] sm:$0xff]  }
 0x1de   :  { %2767 = vmatprep.mubr.bf16.mxu1 %v1512_v0  ;;  %2889 = vmatpush1.bf16.msra.mxu1 %v13257_v37  ;;  %v1525_v37 = vrot.slane %v14461_v21, 1 }
 0x1df   :  { %2890 = vmatprep.subr.bf16.mxu1 %v18774_v56 }
 0x1e0   :  { %v1526_v17 = vsel %vm1497_vm11, %v1523_v40, %v1525_v37 }
 0x1e2   :  { %2891 = vmatpush1.bf16.msra.mxu1 %v13258_v19 }
 0x1e3   :  { %2892 = vmatprep.subr.bf16.mxu1 %v18774_v56 }
 0x1e5   :  { %2768 = vmatmul.mubr.bf16.gmra.mrb[68].mxu1 %v1510_v1  ;;  %v1522_v1 = vsel %vm1497_vm11, %v1519_v33, %v1521_v62 }
 0x1e6   :  { %2775 = vmatprep.mubr.bf16.mxu1 %v1514_v18  ;;  %2893 = vmatpush1.bf16.msra.mxu1 %v13259_v26 }
 0x1e7   :  { %2894 = vmatprep.subr.bf16.mxu1 %v18774_v56 }
 0x1ea   :  { %2895 = vmatpush1.bf16.msra.mxu1 %v13260_v10 }
 0x1eb   :  { %2896 = vmatprep.subr.bf16.mxu1 %v18774_v56 }
 0x1ed   :  { %2776 = vmatmul.mubr.bf16.gmra.mrb[0].mxu1 %v1512_v0 }
 0x1ee   :  { %2783 = vmatprep.mubr.bf16.mxu1 %v1516_v63  ;;  %2897 = vmatpush1.bf16.msra.mxu1 %v13261_v54  ;;  %v1528_v54 = vsel %vm1497_vm11, %v1525_v37, %v1527_v16  ;;  %v1566_v37 = vrot.slane %v14548_v13, 1 }
 0x1ef   :  { %2898 = vmatprep.subr.bf16.mxu1 %v18774_v56 }
 0x1f2   :  { %2899 = vmatpush1.bf16.msra.mxu1 %v13262_v36  ;;  %v1529_v36 = vrot.slane %v14503_v39, 1 }
 0x1f3   :  { %2900 = vmatprep.subr.bf16.mxu1 %v18774_v56 }
 0x1f5   :  { %2784 = vmatmul.mubr.bf16.gmra.mrb[4].mxu1 %v1514_v18 }
 0x1f6   :  { %2791 = vmatprep.mubr.bf16.mxu1 %v1518_v24  ;;  %2901 = vmatpush1.bf16.msra.mxu1 %v13263_v43 }
 0x1f7   :  { %2902 = vmatprep.subr.bf16.mxu1 %v18774_v56 }
 0x1fa   :  { %2903 = vmatpush1.bf16.msra.mxu1 %v13265_v44  ;;  %v1530_v44 = vsel %vm1497_vm11, %v1527_v16, %v1529_v36  ;;  %v13264_v16 = vld [vmem:[#allocation2 + $0x98] ss:$0 sps:$4 sm:$0x11]  }
 0x1fb   :  { %3049 = vmatprep.subr.bf16.mxu1 %v18774_v56 }
 0x1fd   :  { %2792 = vmatmul.mubr.bf16.gmra.mrb[8].mxu1 %v1516_v63 }
 0x1fe   :  { %2799 = vmatprep.mubr.bf16.mxu1 %v1520_v6 }
 0x205   :  { %2800 = vmatmul.mubr.bf16.gmra.mrb[12].mxu1 %v1518_v24 }
 0x206   :  { %2807 = vmatprep.mubr.bf16.mxu1 %v1522_v1 }
 0x20d   :  { %2808 = vmatmul.mubr.bf16.gmra.mrb[16].mxu1 %v1520_v6  ;;  %v1531_v6 = vrot.slane %v14530_v55, 1 }
 0x20e   :  { %2815 = vmatprep.mubr.bf16.mxu1 %v1524_v11 }
 0x211   :  { %v14690_v52 = vpop.f32.mrb[36].mxu0 }
 0x212   :  { %18778 = vst [vmem:[#allocation21_spill] sm:$0xff] %v14690_v52  ;;  %v2554_v0 = vpop.f32.mrb[37].mxu0  ;;  %v1777_v52 = vrot.slane %v14185_v30, 3 }
 0x213   :  { %v14693_v19 = vpop.f32.mrb[38].mxu0 }
 0x214   :  { %18779 = vst [vmem:[#allocation22_spill] sm:$0xff] %v14693_v19  ;;  %v2557_v61 = vpop.f32.mrb[39].mxu0 }
 0x215   :  { %2816 = vmatmul.mubr.bf16.gmra.mrb[20].mxu1 %v1522_v1  ;;  %v1567_v61 = vsel %vm1497_vm11, %v1531_v6, %v1566_v37 }
 0x216   :  { %2823 = vmatprep.mubr.bf16.mxu1 %v1526_v17 }
 0x219   :  { %v14696_v26 = vpop.f32.mrb[40].mxu0 }
 0x21a   :  { %18780 = vst [vmem:[#allocation23_spill] sm:$0xff] %v14696_v26  ;;  %v2562_v18 = vpop.f32.mrb[41].mxu0 }
 0x21b   :  { %v14699_v10 = vpop.f32.mrb[42].mxu0 }
 0x21c   :  { %18781 = vst [vmem:[#allocation24_spill] sm:$0xff] %v14699_v10  ;;  %v2565_v14 = vpop.f32.mrb[43].mxu0 }
 0x21d   :  { %2824 = vmatmul.mubr.bf16.gmra.mrb[24].mxu1 %v1524_v11  ;;  %v1532_v11 = vsel %vm1497_vm11, %v1529_v36, %v1531_v6 }
 0x21e   :  { %2831 = vmatprep.mubr.bf16.mxu1 %v1528_v54 }
 0x221   :  { %v14702_v63 = vpop.f32.mrb[44].mxu0 }
 0x222   :  { %18782 = vst [vmem:[#allocation25_spill] sm:$0xff] %v14702_v63  ;;  %v2570_v50 = vpop.f32.mrb[45].mxu0 }
 0x223   :  { %v14705_v43 = vpop.f32.mrb[46].mxu0  ;;  %v1568_v50 = vrot.slane %v13264_v16, 1 }
 0x224   :  { %18783 = vst [vmem:[#allocation26_spill] sm:$0xff] %v14705_v43  ;;  %v2573_v24 = vpop.f32.mrb[47].mxu0 }
 0x225   :  { %2832 = vmatmul.mubr.bf16.gmra.mrb[28].mxu1 %v1526_v17 }
 0x226   :  { %2839 = vmatprep.mubr.bf16.mxu1 %v1530_v44 }
 0x229   :  { %v14708_v33 = vpop.f32.mrb[48].mxu0 }
 0x22a   :  { %18784 = vst [vmem:[#allocation27_spill] sm:$0xff] %v14708_v33  ;;  %v2578_v62 = vpop.f32.mrb[49].mxu0  ;;  %v1613_v33 = vrot.slane %v14355_v34, 1 }
 0x22b   :  { %v14711_v1 = vpop.f32.mrb[50].mxu0 }
 0x22c   :  { %18785 = vst [vmem:[#allocation28_spill] sm:$0xff] %v14711_v1  ;;  %v2581_v40 = vpop.f32.mrb[51].mxu0  ;;  %v1609_v1 = vrot.slane %v14303_v27, 1 }
 0x22d   :  { %2840 = vmatmul.mubr.bf16.gmra.mrb[32].mxu1 %v1528_v54  ;;  %v1569_v54 = vsel %vm1497_vm11, %v1566_v37, %v1568_v50  ;;  %v1209_v40 = vld [vmem:[#allocation2 + $0x8] sm:$0xc] }
 0x22e   :  { %2847 = vmatprep.mubr.bf16.mxu1 %v1532_v11 }
 0x235   :  { %v14715_v0 = vpop.f32.mrb[52].mxu0  ;;  %2848 = vmatmul.mubr.bf16.gmra.mrb[36].mxu1 %v1530_v44 }
 0x236   :  { %18786 = vst [vmem:[#allocation29_spill] sm:$0xff] %v14715_v0  ;;  %v2586_v17 = vpop.f32.mrb[53].mxu0  ;;  %2855 = vmatprep.mubr.bf16.mxu1 %v1567_v61  ;;  %v11120_v0 = vcombine.low %v1209_v40, %v14513_v28  ;;  %v1690_v61 = vrot.slane %v14107_v59, 2  ;;  %v14739_v28 = vrot.slane %v14605_v53, 2  ;;  %v13267_v59 = vld [vmem:[#allocation6 + $0x180] sm:$0xff]   ;;  %v13268_v53 = vld [vmem:[#allocation6 + $0x188] sm:$0xff]  }
 0x237   :  { %v14718_v18 = vpop.f32.mrb[54].mxu0  ;;  %v1533_v17 = vrot.slane %v14557_v45, 1 }
 0x238   :  { %18787 = vst [vmem:[#allocation30_spill] sm:$0xff] %v14718_v18  ;;  %v2589_v14 = vpop.f32.mrb[55].mxu0 }
 0x239   :  { %v1689_v14 = vrot.slane %v11120_v0, 2  ;;  %v1534_v16 = vsel %vm1497_vm11, %v1531_v6, %v1533_v17  ;;  %v1589_v6 = vrot.slane %v14188_v31, 1  ;;  %v1590_v0 = vrot.slane %v14185_v30, 2 }
 0x23d   :  { %v14720_v24 = vpop.f32.mrb[56].mxu0  ;;  %2856 = vmatmul.mubr.bf16.gmra.mrb[40].mxu1 %v1532_v11  ;;  %v1691_v11 = vsel %vm1688_vm13, %v1689_v14, %v1690_v61  ;;  %v1591_v14 = vor.u32 %v1590_v0, %v1589_v6  ;;  %v13270_v0 = vld [vmem:[#allocation6 + $0x198] sm:$0xff]  }
 0x23e   :  { %18788 = vst [vmem:[#allocation31_spill] sm:$0xff] %v14720_v24  ;;  %v2594_v36 = vpop.f32.mrb[57].mxu0  ;;  %2863 = vmatprep.mubr.bf16.mxu1 %v1569_v54 }
 0x23f   :  { %v14723_v62 = vpop.f32.mrb[58].mxu0  ;;  %v1693_v36 = vsel %vm1688_vm13, %v1690_v61, %v14739_v28 }
 0x240   :  { %18789 = vst [vmem:[#allocation32_spill] sm:$0xff] %v14723_v62  ;;  %v2597_v44 = vpop.f32.mrb[59].mxu0 }
 0x245   :  { %v14729_v24 = vpop.f32.mrb[60].mxu0  ;;  %2864 = vmatmul.mubr.bf16.gmra.mrb[44].mxu1 %v1534_v16  ;;  %v1694_v16 = vrot.slane %v14611_v58, 2 }
 0x246   :  { %18790 = vst [vmem:[#allocation33_spill] sm:$0xff] %v14729_v24  ;;  %v14732_v37 = vpop.f32.mrb[61].mxu0  ;;  %2904 = vmatprep.mubr.bf16.mxu1 %v1691_v11  ;;  %v13269_v11 = vld [vmem:[#allocation6 + $0x190] sm:$0xff]  }
 0x247   :  { %18791 = vst [vmem:[#allocation34_spill] sm:$0xff] %v14732_v37  ;;  %v14734_v50 = vpop.f32.mrb[62].mxu0  ;;  %v14765_v62 = vsel %vm1688_vm13, %v14739_v28, %v1694_v16  ;;  %v18835_v37 = vld [vmem:[#allocation18_spill] sm:$0xff] }
 0x248   :  { %18792 = vst [vmem:[#allocation35_spill] sm:$0xff] %v14734_v50  ;;  %v14736_v54 = vpop.f32.mrb[63].mxu0 }
 0x249   :  { %18793 = vst [vmem:[#allocation36_spill] sm:$0xff] %v14736_v54 }
 0x24d   :  { %v14741_v45 = vpop.f32.mrb[64].mxu0  ;;  %2905 = vmatmul.mubr.bf16.vlgmr.msra.gmra.mrb[48].mxu1 %v14552_v2  ;;  %v1592_v2 = vsel %vm1576_vm10, %v14534_v5, %v1591_v14 }
 0x24e   :  { %18794 = vst [vmem:[#allocation37_spill] sm:$0xff] %v14741_v45  ;;  %v14748_v40 = vpop.f32.mrb[65].mxu0  ;;  %3050 = vmatpush1.bf16.msra.mxu1 %v13267_v59  ;;  %2912 = vmatprep.mubr.bf16.mxu1 %v1693_v36  ;;  %v1593_v59 = vrot.slane %v14268_v25, 1  ;;  %v1594_v36 = vrot.slane %v14212_v12, 2  ;;  %v1597_v45 = vrot.slane %v14300_v42, 1 }
 0x24f   :  { %18795 = vst [vmem:[#allocation38_spill] sm:$0xff] %v14748_v40  ;;  %v14750_v44 = vpop.f32.mrb[66].mxu0  ;;  %3051 = vmatprep.subr.bf16.mxu1 %v18774_v56  ;;  %v18826_v40 = vld [vmem:[#allocation12_spill] sm:$0xff] }
 0x250   :  { %18796 = vst [vmem:[#allocation39_spill] sm:$0xff] %v14750_v44  ;;  %v14752_v17 = vpop.f32.mrb[67].mxu0 }
 0x251   :  { %18797 = vst [vmem:[#allocation40_spill] sm:$0xff] %v14752_v17  ;;  %v1617_v17 = vrot.slane %v14374_v4, 1 }
 0x252   :  { %3052 = vmatpush1.bf16.msra.mxu1 %v13268_v53  ;;  %v1595_v53 = vor.u32 %v1594_v36, %v1593_v59  ;;  %v13272_v59 = vld [vmem:[#allocation6 + $0x1a8] sm:$0xff]  }
 0x253   :  { %3053 = vmatprep.subr.bf16.mxu1 %v18774_v56 }
 0x254   :  { %v1596_v44 = vsel %vm1576_vm10, %v1591_v14, %v1595_v53 }
 0x255   :  { %v14759_v61 = vpop.f32.mrb[68].mxu0  ;;  %2913 = vmatmul.mubr.bf16.gmra.mrb[52].mxu1 %v1592_v2  ;;  %v13271_v2 = vld [vmem:[#allocation6 + $0x1a0] sm:$0xff]  }
 0x256   :  { %18798 = vst [vmem:[#allocation41_spill] sm:$0xff] %v14759_v61  ;;  %v14767_v6 = vpop.f32.mrb[69].mxu0  ;;  %2920 = vmatprep.mubr.bf16.mxu1 %v14765_v62  ;;  %3054 = vmatpush1.bf16.msra.mxu1 %v13269_v11  ;;  %v13590_v61 = vld [vmem:[#allocation2 + $0x28] sm:$0xff]   ;;  %v1598_v11 = vrot.slane %v14278_v8, 2 }
 0x257   :  { %18799 = vst [vmem:[#allocation42_spill] sm:$0xff] %v14767_v6  ;;  %v14770_v58 = vpop.f32.mrb[70].mxu0  ;;  %3055 = vmatprep.subr.bf16.mxu1 %v18774_v56  ;;  %v1696_v18 = vrot.slane %v13590_v61, 2 }
 0x258   :  { %18800 = vst [vmem:[#allocation43_spill] sm:$0xff] %v14770_v58  ;;  %v14772_v5 = vpop.f32.mrb[71].mxu0  ;;  %v1599_v14 = vor.u32 %v1598_v11, %v1597_v45  ;;  %v13274_v45 = vld [vmem:[#allocation6 + $0x1b8] sm:$0xff]  }
 0x259   :  { %18801 = vst [vmem:[#allocation44_spill] sm:$0xff] %v14772_v5  ;;  %v14782_v58 = vsel %vm1688_vm13, %v1694_v16, %v1696_v18 }
 0x25a   :  { %3056 = vmatpush1.bf16.msra.mxu1 %v13270_v0  ;;  %v1698_v0 = vrot.slane %v14659_v22, 2  ;;  %v1600_v16 = vsel %vm1576_vm10, %v1595_v53, %v1599_v14 }
 0x25b   :  { %3057 = vmatprep.subr.bf16.mxu1 %v18774_v56 }
 0x25d   :  { %v14777_v6 = vpop.f32.mrb[72].mxu0  ;;  %2921 = vmatmul.mubr.bf16.gmra.mrb[56].mxu1 %v1596_v44  ;;  %v13273_v44 = vld [vmem:[#allocation6 + $0x1b0] sm:$0xff]  }
 0x25e   :  { %18802 = vst [vmem:[#allocation45_spill] sm:$0xff] %v14777_v6  ;;  %v14784_v5 = vpop.f32.mrb[73].mxu0  ;;  %2928 = vmatprep.mubr.bf16.mxu1 %v14782_v58  ;;  %3058 = vmatpush1.bf16.msra.mxu1 %v13271_v2  ;;  %v1602_v2 = vrot.slane %v14244_v7, 2 }
 0x25f   :  { %18803 = vst [vmem:[#allocation46_spill] sm:$0xff] %v14784_v5  ;;  %v14787_v61 = vpop.f32.mrb[74].mxu0  ;;  %3059 = vmatprep.subr.bf16.mxu1 %v18774_v56  ;;  %v1601_v5 = vrot.slane %v14256_v15, 1 }
 0x260   :  { %18804 = vst [vmem:[#allocation47_spill] sm:$0xff] %v14787_v61  ;;  %v14789_v36 = vpop.f32.mrb[75].mxu0  ;;  %v14800_v61 = vsel %vm1688_vm13, %v1696_v18, %v1698_v0 }
 0x261   :  { %18805 = vst [vmem:[#allocation48_spill] sm:$0xff] %v14789_v36  ;;  %v1603_v53 = vor.u32 %v1602_v2, %v1601_v5  ;;  %v13276_v5 = vld [vmem:[#allocation6 + $0x1c8] sm:$0xff]  }
 0x262   :  { %3060 = vmatpush1.bf16.msra.mxu1 %v13272_v59  ;;  %v1700_v59 = vrot.slane %v14665_v49, 2 }
 0x263   :  { %3061 = vmatprep.subr.bf16.mxu1 %v18774_v56  ;;  %v1604_v18 = vsel %vm1576_vm10, %v1599_v14, %v1603_v53 }
 0x265   :  { %v14795_v6 = vpop.f32.mrb[76].mxu0  ;;  %2929 = vmatmul.mubr.bf16.gmra.mrb[60].mxu1 %v1600_v16  ;;  %v13275_v16 = vld [vmem:[#allocation6 + $0x1c0] sm:$0xff]  }
 0x266   :  { %18806 = vst [vmem:[#allocation49_spill] sm:$0xff] %v14795_v6  ;;  %v14802_v36 = vpop.f32.mrb[77].mxu0  ;;  %2936 = vmatprep.mubr.bf16.mxu1 %v14800_v61  ;;  %3062 = vmatpush1.bf16.msra.mxu1 %v13273_v44  ;;  %v1606_v44 = vrot.slane %v14261_v20, 2 }
 0x267   :  { %18807 = vst [vmem:[#allocation50_spill] sm:$0xff] %v14802_v36  ;;  %v14805_v22 = vpop.f32.mrb[78].mxu0  ;;  %3063 = vmatprep.subr.bf16.mxu1 %v18774_v56  ;;  %v1605_v36 = vrot.slane %v14292_v23, 1 }
 0x268   :  { %18808 = vst [vmem:[#allocation51_spill] sm:$0xff] %v14805_v22  ;;  %v14807_v11 = vpop.f32.mrb[79].mxu0  ;;  %v14818_v22 = vsel %vm1688_vm13, %v1698_v0, %v1700_v59 }
 0x269   :  { %18809 = vst [vmem:[#allocation52_spill] sm:$0xff] %v14807_v11  ;;  %v1607_v14 = vor.u32 %v1606_v44, %v1605_v36  ;;  %v13278_v44 = vld [vmem:[#allocation6 + $0x1d8] sm:$0xff]  }
 0x26a   :  { %3064 = vmatpush1.bf16.msra.mxu1 %v13274_v45  ;;  %v13591_v45 = vld [vmem:[#allocation2 + $0x40] sm:$0xff]  }
 0x26b   :  { %3065 = vmatprep.subr.bf16.mxu1 %v18774_v56  ;;  %v1608_v0 = vsel %vm1576_vm10, %v1603_v53, %v1607_v14 }
 0x26d   :  { %v14813_v6 = vpop.f32.mrb[80].mxu0  ;;  %2937 = vmatmul.mubr.bf16.gmra.mrb[64].mxu1 %v1604_v18  ;;  %v13277_v18 = vld [vmem:[#allocation6 + $0x1d0] sm:$0xff]  }
 0x26e   :  { %18810 = vst [vmem:[#allocation53_spill] sm:$0xff] %v14813_v6  ;;  %v14820_v11 = vpop.f32.mrb[81].mxu0  ;;  %2944 = vmatprep.mubr.bf16.mxu1 %v14818_v22  ;;  %3066 = vmatpush1.bf16.msra.mxu1 %v13275_v16  ;;  %v1702_v6 = vrot.slane %v13591_v45, 2  ;;  %v1610_v16 = vrot.slane %v14295_v38, 2  ;;  %v13592_v45 = vld [vmem:[#allocation2 + $0x48] sm:$0xff]  }
 0x26f   :  { %18811 = vst [vmem:[#allocation54_spill] sm:$0xff] %v14820_v11  ;;  %v14823_v49 = vpop.f32.mrb[82].mxu0  ;;  %3067 = vmatprep.subr.bf16.mxu1 %v18774_v56 }
 0x270   :  { %18812 = vst [vmem:[#allocation55_spill] sm:$0xff] %v14823_v49  ;;  %v14825_v2 = vpop.f32.mrb[83].mxu0  ;;  %v14835_v49 = vsel %vm1688_vm13, %v1700_v59, %v1702_v6  ;;  %v1611_v53 = vor.u32 %v1610_v16, %v1609_v1  ;;  %v13280_v16 = vld [vmem:[#allocation6 + $0x1e8] sm:$0xff]  }
 0x271   :  { %18813 = vst [vmem:[#allocation56_spill] sm:$0xff] %v14825_v2 }
 0x272   :  { %3068 = vmatpush1.bf16.msra.mxu1 %v13276_v5  ;;  %v1612_v59 = vsel %vm1576_vm10, %v1607_v14, %v1611_v53 }
 0x273   :  { %3069 = vmatprep.subr.bf16.mxu1 %v18774_v56 }
 0x275   :  { %v14830_v11 = vpop.f32.mrb[84].mxu0  ;;  %2945 = vmatmul.mubr.bf16.gmra.mrb[68].mxu1 %v1608_v0  ;;  %v13279_v0 = vld [vmem:[#allocation6 + $0x1e0] sm:$0xff]  }
 0x276   :  { %18814 = vst [vmem:[#allocation57_spill] sm:$0xff] %v14830_v11  ;;  %v14837_v2 = vpop.f32.mrb[85].mxu0  ;;  %2952 = vmatprep.mubr.bf16.mxu1 %v14835_v49  ;;  %3070 = vmatpush1.bf16.msra.mxu1 %v13277_v18  ;;  %v1704_v11 = vrot.slane %v13592_v45, 2  ;;  %v1614_v18 = vrot.slane %v14306_v48, 2  ;;  %v13593_v45 = vld [vmem:[#allocation2 + $0x50] sm:$0xff]  }
 0x277   :  { %18815 = vst [vmem:[#allocation58_spill] sm:$0xff] %v14837_v2  ;;  %v14840_v36 = vpop.f32.mrb[86].mxu0  ;;  %3071 = vmatprep.subr.bf16.mxu1 %v18774_v56 }
 0x278   :  { %18816 = vst [vmem:[#allocation59_spill] sm:$0xff] %v14840_v36  ;;  %v14842_v5 = vpop.f32.mrb[87].mxu0  ;;  %v14852_v36 = vsel %vm1688_vm13, %v1702_v6, %v1704_v11  ;;  %v1615_v14 = vor.u32 %v1614_v18, %v1613_v33  ;;  %v13283_v18 = vld [vmem:[#allocation6 + $0x1f8] sm:$0xff]  }
 0x279   :  { %18817 = vst [vmem:[#allocation60_spill] sm:$0xff] %v14842_v5 }
 0x27a   :  { %3072 = vmatpush1.bf16.msra.mxu1 %v13278_v44  ;;  %v1616_v6 = vsel %vm1576_vm10, %v1611_v53, %v1615_v14 }
 0x27b   :  { %3073 = vmatprep.subr.bf16.mxu1 %v18774_v56 }
 0x27d   :  { %v14847_v2 = vpop.f32.mrb[88].mxu0  ;;  %2953 = vmatmul.mubr.bf16.gmra.mrb[0].mxu1 %v1612_v59  ;;  %v13281_v59 = vld [vmem:[#allocation6 + $0x1f0] sm:$0xff]  }
 0x27e   :  { %18818 = vst [vmem:[#allocation61_spill] sm:$0xff] %v14847_v2  ;;  %v14854_v5 = vpop.f32.mrb[89].mxu0  ;;  %2960 = vmatprep.mubr.bf16.mxu1 %v14852_v36  ;;  %3074 = vmatpush1.bf16.msra.mxu1 %v13279_v0  ;;  %v1706_v2 = vrot.slane %v13593_v45, 2  ;;  %v1618_v0 = vrot.slane %v14360_v60, 2  ;;  %v13594_v45 = vld [vmem:[#allocation2 + $0x58] sm:$0xff]  }
 0x27f   :  { %18819 = vst [vmem:[#allocation62_spill] sm:$0xff] %v14854_v5  ;;  %v14857_v1 = vpop.f32.mrb[90].mxu0  ;;  %3075 = vmatprep.subr.bf16.mxu1 %v18774_v56 }
 0x280   :  { %18820 = vst [vmem:[#allocation63_spill] sm:$0xff] %v14857_v1  ;;  %v14859_v44 = vpop.f32.mrb[91].mxu0  ;;  %v14869_v1 = vsel %vm1688_vm13, %v1704_v11, %v1706_v2  ;;  %v1619_v53 = vor.u32 %v1618_v0, %v1617_v17  ;;  %v1621_v11 = vrot.slane %v14425_v3, 1  ;;  %v18827_v0 = vld [vmem:[#allocation14_spill] sm:$0xff] }
 0x281   :  { %18821 = vst [vmem:[#allocation64_spill] sm:$0xff] %v14859_v44 }
 0x282   :  { %3076 = vmatpush1.bf16.msra.mxu1 %v13280_v16 }
 0x283   :  { %3077 = vmatprep.subr.bf16.mxu1 %v18774_v56 }
 0x285   :  { %v14864_v5 = vpop.f32.mrb[92].mxu0  ;;  %2961 = vmatmul.mubr.bf16.gmra.mrb[4].mxu1 %v1616_v6  ;;  %v1620_v6 = vsel %vm1576_vm10, %v1615_v14, %v1619_v53 }
 0x286   :  { %18822 = vst [vmem:[#allocation65_spill] sm:$0xff] %v14864_v5  ;;  %v14871_v44 = vpop.f32.mrb[93].mxu0  ;;  %2968 = vmatprep.mubr.bf16.mxu1 %v14869_v1  ;;  %3078 = vmatpush1.bf16.msra.mxu1 %v13281_v59  ;;  %v1708_v5 = vrot.slane %v13594_v45, 2  ;;  %v1625_v45 = vrot.slane %v18827_v0, 1 }
 0x287   :  { %18823 = vst [vmem:[#allocation66_spill] sm:$0xff] %v14871_v44  ;;  %v14874_v33 = vpop.f32.mrb[94].mxu0  ;;  %3079 = vmatprep.subr.bf16.mxu1 %v18774_v56  ;;  %v1622_v44 = vrot.slane %v18826_v40, 2 }
 0x288   :  { %18824 = vst [vmem:[#allocation67_spill] sm:$0xff] %v14874_v33  ;;  %v14876_v16 = vpop.f32.mrb[95].mxu0  ;;  %v14883_v43 = vsel %vm1688_vm13, %v1706_v2, %v1708_v5  ;;  %v13595_v33 = vld [vmem:[#allocation2 + $0x60] sm:$0xff]   ;;  %v13596_v2 = vld [vmem:[#allocation2 + $0x68] sm:$0xff]  }
 0x289   :  { %18825 = vst [vmem:[#allocation68_spill] sm:$0xff] %v14876_v16  ;;  %v1623_v59 = vor.u32 %v1622_v44, %v1621_v11  ;;  %v1710_v16 = vrot.slane %v13595_v33, 2  ;;  %v1712_v50 = vrot.slane %v13596_v2, 2  ;;  %v1714_v33 = vrot.slane %v14461_v21, 2  ;;  %v18829_v11 = vld [vmem:[#allocation15_spill] sm:$0xff] }
 0x28a   :  { %3080 = vmatpush1.bf16.msra.mxu1 %v13283_v18  ;;  %v18828_v18 = vld [vmem:[#allocation13_spill] sm:$0xff]  ;;  %v1718_v21 = vrot.slane %v14503_v39, 2  ;;  %v1210_v39 = vld [vmem:[#allocation2 + $0x10] sm:$0xc]  ;;  %v18833_v2 = vshll.u32 %v14548_v13, 16 }
 0x28b   :  { %v1624_v17 = vsel %vm1576_vm10, %v1619_v53, %v1623_v59  ;;  %v1626_v63 = vrot.slane %v18828_v18, 2  ;;  %v14890_v14 = vsel %vm1688_vm13, %v1708_v5, %v1710_v16  ;;  %v14895_v44 = vsel %vm1688_vm13, %v1710_v16, %v1712_v50  ;;  %v18830_v16 = vld [vmem:[#allocation16_spill] sm:$0xff] }
 0x28c   :  { %v14902_v5 = vsel %vm1688_vm13, %v1712_v50, %v1714_v33  ;;  %v1720_v50 = vrot.slane %v14530_v55, 2 }
 0x28d   :  { %2969 = vmatmul.mubr.bf16.gmra.mrb[8].mxu1 %v1620_v6  ;;  %v1627_v6 = vor.u32 %v1626_v63, %v1625_v45  ;;  %v1716_v63 = vrot.slane %v14485_v51, 2  ;;  %v18832_v45 = vshrl.u32 %v14548_v13, 16 }
 0x28e   :  { %2976 = vmatprep.mubr.bf16.mxu1 %v14883_v43  ;;  %v14920_v51 = vsel %vm1688_vm13, %v1718_v21, %v1720_v50 }
 0x28f   :  { %v1628_v24 = vsel %vm1576_vm10, %v1623_v59, %v1627_v6  ;;  %v1632_v53 = vsel %vm1576_vm10, %v1627_v6, %v14575_v29  ;;  %v14914_v29 = vsel %vm1688_vm13, %v1716_v63, %v1718_v21  ;;  %v18831_v59 = vld [vmem:[#allocation17_spill] sm:$0xff]  ;;  %v1652_v6 = vrot.slane %v18832_v45, 1 }
 0x295   :  { %2977 = vmatmul.mubr.bf16.gmra.mrb[12].mxu1 %v1624_v17  ;;  %v14924_v17 = vrot.slane %v14548_v13, 2 }
 0x296   :  { %2984 = vmatprep.mubr.bf16.mxu1 %v14890_v14 }
 0x297   :  { %v14933_v55 = vsel %vm1688_vm13, %v1720_v50, %v14924_v17 }
 0x29d   :  { %2985 = vmatmul.mubr.bf16.gmra.mrb[16].mxu1 %v1628_v24  ;;  %v14908_v24 = vsel %vm1688_vm13, %v1714_v33, %v1716_v63  ;;  %v1655_v33 = vrot.slane %v18833_v2, 2  ;;  %v18834_v63 = vld [vmem:[#allocation19_spill] sm:$0xff] }
 0x29e   :  { %2992 = vmatprep.mubr.bf16.mxu1 %v14895_v44 }
 0x2a5   :  { %2993 = vmatmul.mubr.bf16.gmra.mrb[20].mxu1 %v1632_v53  ;;  %v13282_v53 = vld [vmem:[#allocation2 + $0x98] ss:$0 sps:$4 sm:$0x33]  }
 0x2a6   :  { %3000 = vmatprep.mubr.bf16.mxu1 %v14902_v5  ;;  %v1662_v10 = vshll.u32 %v13282_v53, 16  ;;  %v1724_v26 = vrot.slane %v13282_v53, 2 }
 0x2a8   :  { %v1664_v19 = vrot.slane %v1662_v10, 2  ;;  %v1725_v50 = vsel %vm1688_vm13, %v14924_v17, %v1724_v26  ;;  %v1780_v10 = vrot.slane %v14268_v25, 2 }
 0x2ad   :  { %3001 = vmatmul.mubr.bf16.gmra.mrb[24].mxu1 %v18829_v11  ;;  %v13597_v11 = vld [vmem:[#allocation2 + $0x14] sm:$0xf] }
 0x2ae   :  { %3008 = vmatprep.mubr.bf16.mxu1 %v14908_v24  ;;  %v11121_v21 = vcombine.low %v1210_v39, %v13597_v11 }
 0x2b0   :  { %v1769_v54 = vshrl.u32 %v11121_v21, 16  ;;  %v1772_v45 = vshll.u32 %v11121_v21, 16 }
 0x2b2   :  { %v1771_v39 = vrot.slane %v1769_v54, 2  ;;  %v1785_v54 = vrot.slane %v14278_v8, 3  ;;  %v13287_v8 = vld [vmem:[%s18666_s7 + $0x8] sm:$0xff]  }
 0x2b5   :  { %3009 = vmatmul.mubr.bf16.gmra.mrb[28].mxu1 %v18830_v16  ;;  %v1656_v16 = vor.u32 %v1655_v33, %v1652_v6  ;;  %v1774_v6 = vrot.slane %v1772_v45, 3 }
 0x2b6   :  { %3016 = vmatprep.mubr.bf16.mxu1 %v14914_v29 }
 0x2b7   :  { %v1657_v13 = vsel %vm1576_vm10, %v18835_v37, %v1656_v16  ;;  %v1775_v11 = vor.u32 %v1774_v6, %v1771_v39  ;;  %v1797_v39 = vrot.slane %v14295_v38, 3  ;;  %v13291_v6 = vld [vmem:[%s18666_s7 + $0x28] sm:$0xff]  }
 0x2bd   :  { %3017 = vmatmul.mubr.bf16.gmra.mrb[32].mxu1 %v18831_v59  ;;  %v1659_v59 = vshrl.u32 %v13282_v53, 16 }
 0x2be   :  { %3024 = vmatprep.mubr.bf16.mxu1 %v14920_v51 }
 0x2bf   :  { %v1661_v2 = vrot.slane %v1659_v59, 1  ;;  %v1781_v59 = vrot.slane %v14212_v12, 3  ;;  %v1788_v12 = vrot.slane %v14256_v15, 2 }
 0x2c1   :  { %v1665_v33 = vor.u32 %v1664_v19, %v1661_v2  ;;  %v1782_v26 = vor.u32 %v1781_v59, %v1780_v10  ;;  %v1793_v2 = vrot.slane %v14261_v20, 3 }
 0x2c3   :  { %v1666_v57 = vsel %vm1576_vm10, %v1656_v16, %v1665_v33 }
 0x2c5   :  { %3025 = vmatmul.mubr.bf16.gmra.mrb[36].mxu1 %v18834_v63  ;;  %v1776_v63 = vrot.slane %v14188_v31, 2  ;;  %v1755_v31 = vrot.slane %v11121_v21, 2  ;;  %v1789_v21 = vrot.slane %v14244_v7, 3  ;;  %v13288_v7 = vld [vmem:[%s18666_s7 + $0x10] sm:$0xff]  }
 0x2c6   :  { %3032 = vmatprep.mubr.bf16.mxu1 %v14933_v55 }
 0x2c7   :  { %v1778_v53 = vor.u32 %v1777_v52, %v1776_v63  ;;  %v1756_v30 = vsel %vm1688_vm13, %v1755_v31, %v14739_v28  ;;  %v1784_v52 = vrot.slane %v14300_v42, 2  ;;  %v13286_v28 = vld [vmem:[%s18666_s7] sm:$0xff]   ;;  %v79_v42 = vld [vmem:[#allocation3 + $0x8] sm:$0x3]  ;;  %v1790_v45 = vor.u32 %v1789_v21, %v1788_v12 }
 0x2c8   :  { %5367 = vmatpush1.bf16.msra.mxu0 %v13286_v28  ;;  %v80_v16 = vsel %vm13923_vm2, 0, %v79_v42  ;;  %v1809_v31 = vrot.slane %v18826_v40, 3  ;;  %v13285_v21 = vld [vmem:[#allocation2 + $0xa0] ss:$0 sps:$4 sm:$0x33]   ;;  %v13302_v42 = vld [vmem:[%s18666_s7 + $0x208] sm:$0xff]  }
 0x2c9   :  { %v1779_v37 = vsel %vm1767_vm12, %v1775_v11, %v1778_v53  ;;  %v1783_v19 = vsel %vm1767_vm12, %v1778_v53, %v1782_v26  ;;  %5368 = vmatprep.subr.bf16.mxu0 %v18774_v56  ;;  %81 = vst [vmem:[#allocation3 + $0x8] sm:$0x3] %v80_v16  ;;  %v1801_v53 = vrot.slane %v14306_v48, 3  ;;  %v13293_v11 = vld [vmem:[%s18666_s7 + $0x38] sm:$0xff]   ;;  %v1805_v48 = vrot.slane %v14360_v60, 3 }
 0x2ca   :  { %v1813_v60 = vrot.slane %v18828_v18, 3  ;;  %v13297_v18 = vld [vmem:[%s18666_s7 + $0x58] sm:$0xff]   ;;  %v1759_v16 = vrot.slane %v13285_v21, 2 }
 0x2cc   :  { %5369 = vmatpush1.bf16.msra.mxu0 %v13287_v8  ;;  %v13301_v8 = vld [vmem:[%s18666_s7 + $0x70] sm:$0xff]  }
 0x2cd   :  { %3033 = vmatmul.mubr.bf16.gmra.mrb[40].mxu1 %v1657_v13  ;;  %5370 = vmatprep.subr.bf16.mxu0 %v18774_v56  ;;  %v1792_v13 = vrot.slane %v14292_v23, 2  ;;  %v1796_v23 = vrot.slane %v14303_v27, 2  ;;  %v1800_v27 = vrot.slane %v14355_v34, 2  ;;  %v1804_v34 = vrot.slane %v14374_v4, 2 }
 0x2ce   :  { %3040 = vmatprep.mubr.bf16.mxu1 %v1725_v50  ;;  %v13289_v50 = vld [vmem:[%s18666_s7 + $0x18] sm:$0xff]   ;;  %v1812_v4 = vrot.slane %v18827_v0, 2 }
 0x2cf   :  { %v1794_v63 = vor.u32 %v1793_v2, %v1792_v13  ;;  %v1798_v33 = vor.u32 %v1797_v39, %v1796_v23  ;;  %v1806_v10 = vor.u32 %v1805_v48, %v1804_v34  ;;  %v13309_v13 = vld [vmem:[%s18666_s7 + $0x220] sm:$0xff]   ;;  %v13312_v2 = vld [vmem:[%s18666_s7 + $0x228] sm:$0xff]   ;;  %v18841_v48 = vld [vmem:[#allocation36_spill] sm:$0xff] }
 0x2d0   :  { %5371 = vmatpush1.bf16.msra.mxu0 %v13288_v7 }
 0x2d1   :  { %5372 = vmatprep.subr.bf16.mxu0 %v18774_v56  ;;  %v1795_v20 = vsel %vm1767_vm12, %v1790_v45, %v1794_v63  ;;  %v1799_v38 = vsel %vm1767_vm12, %v1794_v63, %v1798_v33  ;;  %v13316_v63 = vld [vmem:[%s18666_s7 + $0x238] sm:$0xff]  }
 0x2d4   :  { %5373 = vmatpush1.bf16.msra.mxu0 %v13289_v50  ;;  %v13313_v50 = vld [vmem:[%s18666_s7 + $0x230] sm:$0xff]  }
 0x2d5   :  { %3041 = vmatmul.mubr.bf16.gmra.mrb[44].mxu1 %v1666_v57  ;;  %v1786_v57 = vor.u32 %v1785_v54, %v1784_v52  ;;  %5374 = vmatprep.subr.bf16.mxu0 %v18774_v56  ;;  %v13299_v54 = vld [vmem:[%s18666_s7 + $0x68] sm:$0xff]  }
 0x2d6   :  { %3081 = vmatprep.mubr.bf16.mxu1 %v1779_v37  ;;  %v1802_v37 = vor.u32 %v1801_v53, %v1800_v27  ;;  %v18840_v53 = vld [vmem:[#allocation34_spill] sm:$0xff] }
 0x2d7   :  { %v1787_v25 = vsel %vm1767_vm12, %v1782_v26, %v1786_v57  ;;  %v1791_v15 = vsel %vm1767_vm12, %v1786_v57, %v1790_v45  ;;  %v1808_v26 = vrot.slane %v14425_v3, 2  ;;  %v13304_v45 = vld [vmem:[%s18666_s7 + $0x210] sm:$0xff]  }
 0x2d8   :  { %v1807_v59 = vsel %vm1767_vm12, %v1802_v37, %v1806_v10 }
 0x2dd   :  { %3082 = vmatmul.mubr.bf16.vlgmr.msra.gmra.mrb[48].mxu1 %v1756_v30  ;;  %v1810_v30 = vor.u32 %v1809_v31, %v1808_v26 }
 0x2de   :  { %3089 = vmatprep.mubr.bf16.mxu1 %v1783_v19  ;;  %v1814_v19 = vor.u32 %v1813_v60, %v1812_v4 }
 0x2e0   :  { %v1819_v3 = vsel %vm1767_vm12, %v1814_v19, %v14626_v47  ;;  %v13295_v47 = vld [vmem:[%s18666_s7 + $0x48] sm:$0xff]  }
 0x2e5   :  { %3090 = vmatmul.mubr.bf16.gmra.mrb[52].mxu1 %v14765_v62 }
 0x2e6   :  { %3097 = vmatprep.mubr.bf16.mxu1 %v1787_v25 }
 0x2ed   :  { %3098 = vmatmul.mubr.bf16.gmra.mrb[56].mxu1 %v14782_v58  ;;  %v13290_v58 = vld [vmem:[%s18666_s7 + $0x20] sm:$0xff]  }
 0x2ee   :  { %3105 = vmatprep.mubr.bf16.mxu1 %v1791_v15  ;;  %5375 = vmatpush1.bf16.msra.mxu0 %v13290_v58  ;;  %v13308_v15 = vld [vmem:[%s18666_s7 + $0x218] sm:$0xff]   ;;  %v15095_v58 = vld [vmem:[%s18665_s6] ss:$0 sm:$0xff] }
 0x2ef   :  { %5376 = vmatprep.subr.bf16.mxu0 %v18774_v56 }
 0x2f2   :  { %5377 = vmatpush1.bf16.msra.mxu0 %v13291_v6 }
 0x2f3   :  { %5378 = vmatprep.subr.bf16.mxu0 %v18774_v56 }
 0x2f5   :  { %3106 = vmatmul.mubr.bf16.gmra.mrb[60].mxu1 %v14800_v61  ;;  %v13292_v61 = vld [vmem:[%s18666_s7 + $0x30] sm:$0xff]  }
 0x2f6   :  { %3113 = vmatprep.mubr.bf16.mxu1 %v1795_v20  ;;  %5379 = vmatpush1.bf16.msra.mxu0 %v13292_v61  ;;  %v18838_v20 = vld [vmem:[#allocation21_spill] sm:$0xff]  ;;  %v18839_v61 = vld [vmem:[#allocation22_spill] sm:$0xff] }
 0x2f7   :  { %5380 = vmatprep.subr.bf16.mxu0 %v18774_v56  ;;  %v2553_v23 = vadd.f32 %v15095_v58, %v18838_v20 }
 0x2fa   :  { %5381 = vmatpush1.bf16.msra.mxu0 %v13293_v11 }
 0x2fb   :  { %5382 = vmatprep.subr.bf16.mxu0 %v18774_v56 }
 0x2fd   :  { %3114 = vmatmul.mubr.bf16.gmra.mrb[64].mxu1 %v14818_v22  ;;  %v1803_v22 = vsel %vm1767_vm12, %v1798_v33, %v1802_v37 }
 0x2fe   :  { %3121 = vmatprep.mubr.bf16.mxu1 %v1799_v38  ;;  %v2556_v38 = vadd.f32 %v15095_v58, %v18839_v61 }
 0x305   :  { %3122 = vmatmul.mubr.bf16.gmra.mrb[68].mxu1 %v14835_v49  ;;  %v1811_v49 = vsel %vm1767_vm12, %v1806_v10, %v1810_v30 }
 0x306   :  { %3129 = vmatprep.mubr.bf16.mxu1 %v1803_v22 }
 0x30d   :  { %3130 = vmatmul.mubr.bf16.gmra.mrb[0].mxu1 %v14852_v36  ;;  %v1815_v36 = vsel %vm1767_vm12, %v1810_v30, %v1814_v19  ;;  %v18842_v30 = vld [vmem:[#allocation23_spill] sm:$0xff] }
 0x30e   :  { %3137 = vmatprep.mubr.bf16.mxu1 %v1807_v59  ;;  %v13600_v59 = vld [vmem:[%s18660_s1] sm:$0xff]  ;;  %v13601_v19 = vld [vmem:[%s18660_s1 + $0x8] sm:$0xff] }
 0x315   :  { %3138 = vmatmul.mubr.bf16.gmra.mrb[4].mxu1 %v14869_v1 }
 0x316   :  { %3145 = vmatprep.mubr.bf16.mxu1 %v1811_v49  ;;  %v2561_v49 = vadd.f32 %v15095_v58, %v18842_v30  ;;  %v18851_v30 = vld [vmem:[#allocation40_spill] sm:$0xff] }
 0x31d   :  { %3146 = vmatmul.mubr.bf16.gmra.mrb[8].mxu1 %v14883_v43  ;;  %v13294_v43 = vld [vmem:[%s18666_s7 + $0x40] sm:$0xff]  }
 0x31e   :  { %3153 = vmatprep.mubr.bf16.mxu1 %v1815_v36  ;;  %5383 = vmatpush1.bf16.msra.mxu0 %v13294_v43 }
 0x31f   :  { %5384 = vmatprep.subr.bf16.mxu0 %v18774_v56 }
 0x322   :  { %5385 = vmatpush1.bf16.msra.mxu0 %v13295_v47  ;;  %v18843_v47 = vld [vmem:[#allocation24_spill] sm:$0xff] }
 0x323   :  { %5386 = vmatprep.subr.bf16.mxu0 %v18774_v56 }
 0x325   :  { %3154 = vmatmul.mubr.bf16.gmra.mrb[12].mxu1 %v14890_v14  ;;  %v13599_v14 = vld [vmem:[#allocation2 + $0xa0] ss:$0 sps:$4 sm:$0x77]  }
 0x326   :  { %3161 = vmatprep.mubr.bf16.mxu1 %v1819_v3 }
 0x32d   :  { %3162 = vmatmul.mubr.bf16.gmra.mrb[16].mxu1 %v14895_v44  ;;  %v1850_v44 = vshrl.u32 %v13599_v14, 16 }
 0x32e   :  { %3169 = vmatprep.mubr.bf16.mxu1 %v14636_v41  ;;  %v13598_v41 = vld [vmem:[#allocation2 + $0x98] sm:$0xff]  }
 0x32f   :  { %v1844_v40 = vshll.u32 %v13598_v41, 16  ;;  %v1852_v52 = vrot.slane %v1850_v44, 2  ;;  %v1757_v57 = vrot.slane %v13598_v41, 2  ;;  %v4020_v44 = vld [vmem:[#allocation3] sm:$0xf] }
 0x331   :  { %v1846_v0 = vrot.slane %v1844_v40, 3  ;;  %v1758_v12 = vsel %vm1688_vm13, %v14924_v17, %v1757_v57  ;;  %v13303_v17 = vld [vmem:[%s18666_s7 + $0x78] sm:$0xff]   ;;  %v1760_v7 = vsel %vm1688_vm13, %v1757_v57, %v1759_v16  ;;  %v18845_v57 = vld [vmem:[#allocation35_spill] sm:$0xff] }
 0x332   :  { %v13602_v16 = vld [vmem:[%s18660_s1 + $0x10] sm:$0xff] }
 0x335   :  { %3170 = vmatmul.mubr.bf16.gmra.mrb[20].mxu1 %v14902_v5  ;;  %v1853_v5 = vshll.u32 %v13599_v14, 16 }
 0x336   :  { %3177 = vmatprep.mubr.bf16.mxu1 %v14641_v46  ;;  %v1841_v46 = vshrl.u32 %v13598_v41, 16  ;;  %v2564_v41 = vadd.f32 %v15095_v58, %v18843_v47  ;;  %v13604_v47 = vld [vmem:[%s18660_s1 + $0x20] sm:$0xff] }
 0x338   :  { %v1843_v1 = vrot.slane %v1841_v46, 2 }
 0x33d   :  { %3178 = vmatmul.mubr.bf16.gmra.mrb[24].mxu1 %v14908_v24  ;;  %v13298_v24 = vld [vmem:[%s18666_s7 + $0x60] sm:$0xff]  }
 0x33e   :  { %3185 = vmatprep.mubr.bf16.mxu1 %v14645_v32  ;;  %v13296_v32 = vld [vmem:[%s18666_s7 + $0x50] sm:$0xff]  }
 0x33f   :  { %5387 = vmatpush1.bf16.msra.mxu0 %v13296_v32 }
 0x340   :  { %5388 = vmatprep.subr.bf16.mxu0 %v18774_v56 }
 0x343   :  { %5389 = vmatpush1.bf16.msra.mxu0 %v13297_v18 }
 0x344   :  { %5390 = vmatprep.subr.bf16.mxu0 %v18774_v56 }
 0x345   :  { %3186 = vmatmul.mubr.bf16.gmra.mrb[28].mxu1 %v14914_v29  ;;  %v18837_v29 = vld [vmem:[#allocation20_spill] sm:$0xff] }
 0x346   :  { %3193 = vmatprep.mubr.bf16.mxu1 %v14650_v35  ;;  %v1847_v35 = vor.u32 %v1846_v0, %v1843_v1  ;;  %v18844_v0 = vld [vmem:[#allocation33_spill] sm:$0xff] }
 0x347   :  { %5391 = vmatpush1.bf16.msra.mxu0 %v13298_v24 }
 0x348   :  { %5392 = vmatprep.subr.bf16.mxu0 %v18774_v56 }
 0x34b   :  { %5393 = vmatpush1.bf16.msra.mxu0 %v13299_v54 }
 0x34c   :  { %5394 = vmatprep.subr.bf16.mxu0 %v18774_v56 }
 0x34d   :  { %3194 = vmatmul.mubr.bf16.gmra.mrb[32].mxu1 %v14920_v51  ;;  %v1848_v51 = vsel %vm1767_vm12, %v18837_v29, %v1847_v35 }
 0x34e   :  { %3201 = vmatprep.mubr.bf16.mxu1 %v14655_v9  ;;  %v1855_v9 = vrot.slane %v1853_v5, 3  ;;  %v4021_v5 = vld [vmem:[#allocation3 + $0x4] sm:$0xf] }
 0x34f   :  { %5395 = vmatpush1.bf16.msra.mxu0 %v13301_v8 }
 0x350   :  { %v1856_v25 = vor.u32 %v1855_v9, %v1852_v52  ;;  %5396 = vmatprep.subr.bf16.mxu0 %v18774_v56  ;;  %v3979_v9 = vld [vmem:[#allocation3 + $0x8] sm:$0xe] }
 0x352   :  { %v1857_v28 = vsel %vm1767_vm12, %v1847_v35, %v1856_v25 }
 0x353   :  { %5397 = vmatpush1.bf16.msra.mxu0 %v13303_v17 }
 0x354   :  { %5543 = vmatprep.subr.bf16.mxu0 %v18774_v56 }
 0x355   :  { %3202 = vmatmul.mubr.bf16.gmra.mrb[36].mxu1 %v14933_v55  ;;  %v13300_v55 = vld [vmem:[%s18666_s7 + $0x200] sm:$0xff]  }
 0x356   :  { %3209 = vmatprep.mubr.bf16.mxu1 %v1848_v51  ;;  %12220 = vmatprep.subr.bf16.mxu1 %v13300_v55 }
 0x357   :  { %12221 = vmatpush3.bf16.msra.mxu1 %v13300_v55  ;;  %v18846_v55 = vld [vmem:[#allocation25_spill] sm:$0xff] }
 0x358   :  { %12222 = vmatprep.subr.bf16.mxu1 %v13302_v42 }
 0x35b   :  { %12223 = vmatpush3.bf16.msra.mxu1 %v13302_v42  ;;  %v15117_v42 = vcombine.low %v4020_v44, %v4021_v5  ;;  %v13605_v5 = vld [vmem:[%s18660_s1 + $0x28] sm:$0xff] }
 0x35c   :  { %12224 = vmatprep.subr.bf16.mxu1 %v13304_v45 }
 0x35d   :  { %3210 = vmatmul.mubr.bf16.gmra.mrb[40].mxu1 %v1758_v12  ;;  %v2569_v12 = vadd.f32 %v15095_v58, %v18846_v55 }
 0x35e   :  { %3217 = vmatprep.mubr.bf16.mxu1 %v1857_v28 }
 0x35f   :  { %12225 = vmatpush3.bf16.msra.mxu1 %v13304_v45 }
 0x360   :  { %12226 = vmatprep.subr.bf16.mxu1 %v13308_v15 }
 0x363   :  { %12227 = vmatpush3.bf16.msra.mxu1 %v13308_v15  ;;  %v18847_v15 = vld [vmem:[#allocation26_spill] sm:$0xff] }
 0x364   :  { %12228 = vmatprep.subr.bf16.mxu1 %v13309_v13 }
 0x365   :  { %3218 = vmatmul.mubr.bf16.gmra.mrb[44].mxu1 %v1760_v7 }
 0x367   :  { %12229 = vmatpush3.bf16.msra.mxu1 %v13309_v13  ;;  %v2572_v13 = vadd.f32 %v15095_v58, %v18847_v15 }
 0x368   :  { %12230 = vmatprep.subr.bf16.mxu1 %v13312_v2 }
 0x36b   :  { %12231 = vmatpush3.bf16.msra.mxu1 %v13312_v2 }
 0x36c   :  { %12232 = vmatprep.subr.bf16.mxu1 %v13313_v50 }
 0x36f   :  { %12233 = vmatpush3.bf16.msra.mxu1 %v13313_v50  ;;  %v15726_v50 = vld [vmem:[#allocation3 + $0xa0] ss:$0 sps:$4 sm:$0x77]  }
 0x370   :  { %12234 = vmatprep.subr.bf16.mxu1 %v13316_v63  ;;  %18897 = vst [vmem:[#allocation21_spill] sm:$0xff] %v15726_v50 }
 0x373   :  { %12235 = vmatpush3.bf16.msra.mxu1 %v13316_v63 }
 0x374   :  { %8214 = vmatprep.subr.bf16.mxu1 %v18774_v56 }
 0x3b0   :  { %v3083_v39 = vpop.f32.mrb[48].mxu1 }
 0x3b1   :  { %v12409_v6 = vadd.f32 %v3083_v39, %v2553_v23  ;;  %v3085_v33 = vpop.f32.mrb[49].mxu1 }
 0x3b2   :  { %v3086_v27 = vpop.f32.mrb[50].mxu1  ;;  %v13603_v33 = vld [vmem:[%s18660_s1 + $0x18] sm:$0xff] }
 0x3b3   :  { %v3261_v11 = vadd.f32 %v12409_v6, %v18840_v53  ;;  %v12411_v37 = vadd.f32 %v3086_v27, %v2556_v38  ;;  %v3088_v22 = vpop.f32.mrb[51].mxu1 }
 0x3b5   :  { %v3403_v34 = vmax.f32 %v3261_v11, 0.0  ;;  %v3264_v10 = vadd.f32 %v12411_v37, %v18841_v48  ;;  %v18850_v11 = vld [vmem:[#allocation38_spill] sm:$0xff]  ;;  %v4184_v48 = vshll.u32 %v15117_v42, 16 }
 0x3b7   :  { %v3439_v26 = vmul.f32 %v13600_v59, %v3403_v34  ;;  %v3404_v31 = vmax.f32 %v3264_v10, 0.0 }
 0x3b8   :  { %v3091_v4 = vpop.f32.mrb[52].mxu1 }
 0x3b9   :  { %v11625_v60 = vpack.c.bf16 %v3439_v26, %v3439_v26  ;;  %v3440_v36 = vmul.f32 %v13601_v19, %v3404_v31  ;;  %v12413_v3 = vadd.f32 %v3091_v4, %v2561_v49  ;;  %v3093_v43 = vpop.f32.mrb[53].mxu1  ;;  %v18852_v4 = vld [vmem:[#allocation27_spill] sm:$0xff] }
 0x3ba   :  { %v3094_v46 = vpop.f32.mrb[54].mxu1 }
 0x3bb   :  { %v3584_v40 = vshrl.u32 %v11625_v60, 16  ;;  %v3587_v32 = vshll.u32 %v11625_v60, 16  ;;  %v11626_v1 = vpack.c.bf16 %v3440_v36, %v3440_v36  ;;  %v3269_v18 = vadd.f32 %v12413_v3, %v18844_v0  ;;  %v3096_v35 = vpop.f32.mrb[55].mxu1 }
 0x3bc   :  { %v12415_v14 = vadd.f32 %v3094_v46, %v2564_v41  ;;  %v2577_v60 = vadd.f32 %v15095_v58, %v18852_v4 }
 0x3bd   :  { %v3586_v24 = vrot.slane %v3584_v40, 6  ;;  %v3589_v29 = vrot.slane %v3587_v32, 7  ;;  %v3593_v51 = vshrl.u32 %v11626_v1, 16  ;;  %v3596_v52 = vshll.u32 %v11626_v1, 16 }
 0x3be   :  { %v3405_v54 = vmax.f32 %v3269_v18, 0.0  ;;  %v3272_v25 = vadd.f32 %v12415_v14, %v18845_v57  ;;  %v4182_v40 = vshrl.u32 %v15117_v42, 16  ;;  %v4186_v32 = vrot.slane %v4184_v48, 1 }
 0x3bf   :  { %v3590_v21 = vor.u32 %v3589_v29, %v3586_v24  ;;  %v3595_v28 = vrot.slane %v3593_v51, 6  ;;  %v3598_v8 = vrot.slane %v3596_v52, 7  ;;  %v18853_v52 = vld [vmem:[#allocation28_spill] sm:$0xff] }
 0x3c0   :  { %v3441_v17 = vmul.f32 %v13602_v16, %v3405_v54  ;;  %v3406_v45 = vmax.f32 %v3272_v25, 0.0  ;;  %v3099_v7 = vpop.f32.mrb[56].mxu1 }
 0x3c1   :  { %v3591_v2 = vrot.slane %v3590_v21, 4  ;;  %v3980_v63 = vsel %vm13931_vm5, %v3590_v21, %v3979_v9  ;;  %v3599_v20 = vor.u32 %v3598_v8, %v3595_v28  ;;  %v12417_v23 = vadd.f32 %v3099_v7, %v2569_v12  ;;  %v3101_v39 = vpop.f32.mrb[57].mxu1  ;;  %v18854_v12 = vld [vmem:[#allocation29_spill] sm:$0xff] }
 0x3c2   :  { %3981 = vst [vmem:[#allocation3 + $0x8] sm:$0xe] %v3980_v63  ;;  %v11627_v6 = vpack.c.bf16 %v3441_v17, %v3441_v17  ;;  %v3442_v61 = vmul.f32 %v13603_v33, %v3406_v45  ;;  %v3102_v38 = vpop.f32.mrb[58].mxu1  ;;  %v2580_v9 = vadd.f32 %v15095_v58, %v18853_v52  ;;  %v2585_v21 = vadd.f32 %v15095_v58, %v18854_v12  ;;  %v18855_v45 = vld [vmem:[#allocation37_spill] sm:$0xff]  ;;  %v82_v39 = vld [vmem:[#allocation3 + $0x98] sm:$0xe] }
 0x3c3   :  { %v3600_v53 = vsel %vm13992_vm7, %v3591_v2, %v3599_v20  ;;  %v3277_v37 = vadd.f32 %v12417_v23, %v18850_v11  ;;  %v12419_v22 = vadd.f32 %v3102_v38, %v2572_v13  ;;  %v3104_v34 = vpop.f32.mrb[59].mxu1  ;;  %v3601_v1 = vrot.slane %v3599_v20, 4 }
 0x3c4   :  { %3982 = vst [vmem:[#allocation3 + $0xc] sm:$0xf] %v3600_v53  ;;  %v3603_v10 = vshrl.u32 %v11627_v6, 16  ;;  %v3606_v59 = vshll.u32 %v11627_v6, 16  ;;  %v11628_v26 = vpack.c.bf16 %v3442_v61, %v3442_v61  ;;  %v4187_v23 = vor.u32 %v4186_v32, %v4182_v40  ;;  %v13307_v40 = vld [vmem:[%s18666_s7 + $0x80] sm:$0xff]  }
 0x3c5   :  { %v3407_v31 = vmax.f32 %v3277_v37, 0.0  ;;  %v3280_v49 = vadd.f32 %v12419_v22, %v18851_v30  ;;  %v18856_v37 = vld [vmem:[#allocation39_spill] sm:$0xff] }
 0x3c6   :  { %v3605_v19 = vrot.slane %v3603_v10, 6  ;;  %v3608_v36 = vrot.slane %v3606_v59, 7  ;;  %v3613_v3 = vshrl.u32 %v11628_v26, 16  ;;  %v3616_v43 = vshll.u32 %v11628_v26, 16 }
 0x3c7   :  { %v3443_v41 = vmul.f32 %v13604_v47, %v3407_v31  ;;  %v3408_v46 = vmax.f32 %v3280_v49, 0.0  ;;  %v83_v26 = vsel %vm13931_vm5, 0, %v82_v39  ;;  %v13606_v31 = vld [vmem:[%s18660_s1 + $0x30] sm:$0xff] }
 0x3c8   :  { %v3609_v0 = vor.u32 %v3608_v36, %v3605_v19  ;;  %v3615_v18 = vrot.slane %v3613_v3, 6  ;;  %v3618_v35 = vrot.slane %v3616_v43, 7  ;;  %v3107_v14 = vpop.f32.mrb[60].mxu1  ;;  %84 = vst [vmem:[#allocation3 + $0x98] sm:$0xe] %v83_v26 }
 0x3c9   :  { %v11629_v44 = vpack.c.bf16 %v3443_v41, %v3443_v41  ;;  %v3444_v24 = vmul.f32 %v13605_v5, %v3408_v46  ;;  %v12421_v29 = vadd.f32 %v3107_v14, %v2577_v60  ;;  %v3109_v51 = vpop.f32.mrb[61].mxu1  ;;  %v4022_v28 = vld [vmem:[#allocation3 + $0x8] sm:$0xf]  ;;  %v18857_v60 = vld [vmem:[#allocation30_spill] sm:$0xff] }
 0x3ca   :  { %v3610_v54 = vsel %vm13992_vm7, %v3601_v1, %v3609_v0  ;;  %v3611_v57 = vrot.slane %v3609_v0, 4  ;;  %v3619_v25 = vor.u32 %v3618_v35, %v3615_v18  ;;  %v3110_v55 = vpop.f32.mrb[62].mxu1  ;;  %v2588_v19 = vadd.f32 %v15095_v58, %v18857_v60  ;;  %v13607_v1 = vld [vmem:[%s18660_s1 + $0x38] sm:$0xff]  ;;  %v18859_v51 = vld [vmem:[#allocation31_spill] sm:$0xff] }
 0x3cb   :  { %3983 = vst [vmem:[#allocation3 + $0x10] sm:$0xf] %v3610_v54  ;;  %v3623_v8 = vshrl.u32 %v11629_v44, 16  ;;  %v3626_v16 = vshll.u32 %v11629_v44, 16  ;;  %v11630_v17 = vpack.c.bf16 %v3444_v24, %v3444_v24  ;;  %v3285_v7 = vadd.f32 %v12421_v29, %v18855_v45  ;;  %v3112_v15 = vpop.f32.mrb[63].mxu1  ;;  %v18858_v44 = vld [vmem:[#allocation42_spill] sm:$0xff] }
 0x3cc   :  { %v4023_v13 = vld [vmem:[#allocation3 + $0xc] sm:$0xf]  ;;  %v3620_v2 = vsel %vm13992_vm7, %v3611_v57, %v3619_v25  ;;  %v12423_v63 = vadd.f32 %v3110_v55, %v2580_v9  ;;  %v3621_v53 = vrot.slane %v3619_v25, 4  ;;  %v2593_v52 = vadd.f32 %v15095_v58, %v18859_v51 }
 0x3cd   :  { %v15152_v20 = vcombine.low %v4022_v28, %v4023_v13  ;;  %3984 = vst [vmem:[#allocation3 + $0x14] sm:$0xf] %v3620_v2  ;;  %v3625_v6 = vrot.slane %v3623_v8, 6  ;;  %v3628_v33 = vrot.slane %v3626_v16, 7  ;;  %v3633_v61 = vshrl.u32 %v11630_v17, 16  ;;  %v18860_v25 = vld [vmem:[#allocation32_spill] sm:$0xff] }
 0x3ce   :  { %v3636_v38 = vshll.u32 %v11630_v17, 16  ;;  %v3409_v11 = vmax.f32 %v3285_v7, 0.0  ;;  %v3288_v22 = vadd.f32 %v12423_v63, %v18856_v37  ;;  %v2596_v55 = vadd.f32 %v15095_v58, %v18860_v25  ;;  %v18861_v8 = vld [vmem:[#allocation44_spill] sm:$0xff]  ;;  %v13311_v7 = vld [vmem:[%s18666_s7 + $0x88] sm:$0xff]  }
 0x3cf   :  { %v4189_v34 = vshll.u32 %v15152_v20, 16  ;;  %v3629_v48 = vor.u32 %v3628_v33, %v3625_v6  ;;  %v3635_v10 = vrot.slane %v3633_v61, 6  ;;  %v4193_v45 = vshrl.u32 %v15152_v20, 16 }
 0x3d0   :  { %v3638_v59 = vrot.slane %v3636_v38, 7  ;;  %v3445_v30 = vmul.f32 %v13606_v31, %v3409_v11  ;;  %v3410_v49 = vmax.f32 %v3288_v22, 0.0  ;;  %v3115_v4 = vpop.f32.mrb[64].mxu1 }
 0x3d1   :  { %v4191_v36 = vrot.slane %v4189_v34, 1  ;;  %v3630_v3 = vsel %vm13992_vm7, %v3621_v53, %v3629_v48  ;;  %v3631_v43 = vrot.slane %v3629_v48, 4  ;;  %v12425_v41 = vadd.f32 %v3115_v4, %v2585_v21  ;;  %v3117_v46 = vpop.f32.mrb[65].mxu1  ;;  %v13609_v48 = vld [vmem:[%s18660_s1 + $0x48] sm:$0xff] }
 0x3d2   :  { %v3639_v47 = vor.u32 %v3638_v59, %v3635_v10  ;;  %3985 = vst [vmem:[#allocation3 + $0x18] sm:$0xf] %v3630_v3  ;;  %v11631_v32 = vpack.c.bf16 %v3445_v30, %v3445_v30  ;;  %v3446_v0 = vmul.f32 %v13607_v1, %v3410_v49  ;;  %v3118_v18 = vpop.f32.mrb[66].mxu1  ;;  %v4024_v12 = vld [vmem:[#allocation3 + $0x10] sm:$0xf]  ;;  %v13317_v30 = vld [vmem:[%s18666_s7 + $0x90] sm:$0xff]  }
 0x3d3   :  { %v4192_v35 = vsel %vm1327_vm8, %v4187_v23, %v4191_v36  ;;  %v3293_v5 = vadd.f32 %v12425_v41, %v18858_v44  ;;  %v12427_v24 = vadd.f32 %v3118_v18, %v2588_v19  ;;  %v3120_v29 = vpop.f32.mrb[67].mxu1  ;;  %v13608_v23 = vld [vmem:[%s18660_s1 + $0x40] sm:$0xff]  ;;  %v4069_v61 = vld [vmem:[#allocation3 + $0x10] sm:$0x8]  ;;  %v4195_v3 = vor.u32 %v4193_v45, %v4191_v36 }
 0x3d4   :  { %v3640_v14 = vsel %vm13992_vm7, %v3631_v43, %v3639_v47  ;;  %5398 = vmatprep.mubr.bf16.mxu0 %v4192_v35  ;;  %v3643_v9 = vshrl.u32 %v11631_v32, 16  ;;  %v3646_v54 = vshll.u32 %v11631_v32, 16  ;;  %v11632_v57 = vpack.c.bf16 %v3446_v0, %v3446_v0  ;;  %v4025_v21 = vld [vmem:[#allocation3 + $0x14] sm:$0xf]  ;;  %v13319_v29 = vld [vmem:[%s18666_s7 + $0x98] sm:$0xff]  }
 0x3d5   :  { %3986 = vst [vmem:[#allocation3 + $0x1c] sm:$0xf] %v3640_v14  ;;  %5399 = vmatmul.mubr.bf16.vlgmr.msra.gmra.mrb[96].mxu0 %v15117_v42  ;;  %v3411_v28 = vmax.f32 %v3293_v5, 0.0  ;;  %v3296_v16 = vadd.f32 %v12427_v24, %v18861_v8  ;;  %v15181_v17 = vcombine.low %v4024_v12, %v4025_v21  ;;  %v3641_v63 = vrot.slane %v3639_v47, 4  ;;  %v18862_v46 = vld [vmem:[#allocation41_spill] sm:$0xff] }
 0x3d6   :  { %5544 = vmatpush1.bf16.msra.mxu0 %v13307_v40  ;;  %v3645_v15 = vrot.slane %v3643_v9, 6  ;;  %v3648_v13 = vrot.slane %v3646_v54, 7  ;;  %v3653_v42 = vshrl.u32 %v11632_v57, 16  ;;  %v3656_v2 = vshll.u32 %v11632_v57, 16  ;;  %v18863_v9 = vld [vmem:[#allocation43_spill] sm:$0xff] }
 0x3d7   :  { %5545 = vmatprep.subr.bf16.mxu0 %v18774_v56  ;;  %v3447_v39 = vmul.f32 %v13608_v23, %v3411_v28  ;;  %v3412_v6 = vmax.f32 %v3296_v16, 0.0  ;;  %v4197_v33 = vshll.u32 %v15181_v17, 16  ;;  %v11264_v22 = vcombine.low %v4069_v61, %v4025_v21  ;;  %v13610_v28 = vld [vmem:[%s18660_s1 + $0x50] sm:$0xff]  ;;  %v13611_v61 = vld [vmem:[%s18660_s1 + $0x58] sm:$0xff] }
 0x3d8   :  { %v3649_v38 = vor.u32 %v3648_v13, %v3645_v15  ;;  %v3655_v53 = vrot.slane %v3653_v42, 6  ;;  %v3658_v11 = vrot.slane %v3656_v2, 7  ;;  %v3123_v37 = vpop.f32.mrb[68].mxu1  ;;  %v4201_v15 = vshrl.u32 %v15181_v17, 16 }
 0x3d9   :  { %v11633_v34 = vpack.c.bf16 %v3447_v39, %v3447_v39  ;;  %v3448_v10 = vmul.f32 %v13609_v48, %v3412_v6  ;;  %v12429_v59 = vadd.f32 %v3123_v37, %v2593_v52  ;;  %v3125_v26 = vpop.f32.mrb[69].mxu1  ;;  %v4199_v31 = vrot.slane %v4197_v33, 1  ;;  %v13321_v39 = vld [vmem:[%s18666_s7 + $0xa0] sm:$0xff]  }
 0x3da   :  { %5546 = vmatpush1.bf16.msra.mxu0 %v13311_v7  ;;  %v3650_v49 = vsel %vm13992_vm7, %v3641_v63, %v3649_v38  ;;  %v3651_v4 = vrot.slane %v3649_v38, 4  ;;  %v3659_v60 = vor.u32 %v3658_v11, %v3655_v53  ;;  %v3126_v19 = vpop.f32.mrb[70].mxu1  ;;  %v4728_v14 = vrot.slane %v11264_v22, 3 }
 0x3db   :  { %5547 = vmatprep.subr.bf16.mxu0 %v18774_v56  ;;  %3987 = vst [vmem:[#allocation3 + $0x20] sm:$0xf] %v3650_v49  ;;  %v3663_v43 = vshrl.u32 %v11633_v34, 16  ;;  %v3666_v47 = vshll.u32 %v11633_v34, 16  ;;  %v11634_v41 = vpack.c.bf16 %v3448_v10, %v3448_v10  ;;  %v3301_v40 = vadd.f32 %v12429_v59, %v18862_v46  ;;  %v3128_v32 = vpop.f32.mrb[71].mxu1  ;;  %v18864_v34 = vld [vmem:[#allocation46_spill] sm:$0xff] }
 0x3dc   :  { %v15204_v1 = vld [vmem:[#allocation3 + $0x18] sm:$0xff]   ;;  %v3660_v0 = vsel %vm13992_vm7, %v3651_v4, %v3659_v60  ;;  %v12431_v18 = vadd.f32 %v3126_v19, %v2596_v55  ;;  %v4200_v35 = vsel %vm1327_vm8, %v4195_v3, %v4199_v31  ;;  %v3661_v51 = vrot.slane %v3659_v60, 4  ;;  %v18865_v3 = vld [vmem:[#allocation48_spill] sm:$0xff] }
 0x3dd   :  { %3988 = vst [vmem:[#allocation3 + $0x24] sm:$0xf] %v3660_v0  ;;  %v3665_v36 = vrot.slane %v3663_v43, 6  ;;  %v3668_v44 = vrot.slane %v3666_v47, 7  ;;  %v3673_v5 = vshrl.u32 %v11634_v41, 16  ;;  %v3676_v24 = vshll.u32 %v11634_v41, 16  ;;  %5406 = vmatprep.mubr.bf16.mxu0 %v4200_v35 }
 0x3de   :  { %5548 = vmatpush1.bf16.msra.mxu0 %v13317_v30  ;;  %v3413_v52 = vmax.f32 %v3301_v40, 0.0  ;;  %v3304_v54 = vadd.f32 %v12431_v18, %v18863_v9  ;;  %v4729_v57 = vrot.slane %v15204_v1, 3  ;;  %v15217_v21 = vshll.u32 %v15204_v1, 16  ;;  %v13323_v41 = vld [vmem:[%s18666_s7 + $0xa8] sm:$0xff]   ;;  %v13612_v18 = vld [vmem:[%s18660_s1 + $0x60] sm:$0xff] }
 0x3df   :  { %5407 = vmatmul.mubr.bf16.gmra.mrb[100].mxu0 %v15152_v20  ;;  %5549 = vmatprep.subr.bf16.mxu0 %v18774_v56  ;;  %v3669_v25 = vor.u32 %v3668_v44, %v3665_v36  ;;  %v3675_v55 = vrot.slane %v3673_v5, 6  ;;  %v3678_v12 = vrot.slane %v3676_v24, 7  ;;  %v4203_v11 = vor.u32 %v4201_v15, %v4199_v31 }
 0x3e0   :  { %v3449_v8 = vmul.f32 %v13610_v28, %v3413_v52  ;;  %v3414_v16 = vmax.f32 %v3304_v54, 0.0  ;;  %v3131_v45 = vpop.f32.mrb[0].mxu1  ;;  %v4730_v7 = vsel %vm1879_vm9, %v4728_v14, %v4729_v57  ;;  %v4207_v37 = vrot.slane %v15217_v21, 1  ;;  %v13613_v54 = vld [vmem:[%s18660_s1 + $0x68] sm:$0xff] }
 0x3e1   :  { %v3670_v13 = vsel %vm13992_vm7, %v3661_v51, %v3669_v25  ;;  %v3671_v42 = vrot.slane %v3669_v25, 4  ;;  %v3679_v2 = vor.u32 %v3678_v12, %v3675_v55  ;;  %v12432_v63 = vadd.f32 %v15095_v58, %v3131_v45  ;;  %v3133_v23 = vpop.f32.mrb[1].mxu1  ;;  %12236 = vmatprep.mubr.bf16.mxu1 %v4730_v7 }
 0x3e2   :  { %5550 = vmatpush1.bf16.msra.mxu0 %v13319_v29  ;;  %3989 = vst [vmem:[#allocation3 + $0x28] sm:$0xf] %v3670_v13  ;;  %v11635_v6 = vpack.c.bf16 %v3449_v8, %v3449_v8  ;;  %v3450_v38 = vmul.f32 %v13611_v61, %v3414_v16  ;;  %v3134_v53 = vpop.f32.mrb[2].mxu1  ;;  %v4208_v4 = vsel %vm1327_vm8, %v4203_v11, %v4207_v37  ;;  %v15248_v47 = vshrl.u32 %v15204_v1, 16  ;;  %v13326_v8 = vld [vmem:[%s18666_s7 + $0xb0] sm:$0xff]   ;;  %v18866_v23 = vld [vmem:[#allocation45_spill] sm:$0xff] }
 0x3e3   :  { %5551 = vmatprep.subr.bf16.mxu0 %v18774_v56  ;;  %v3680_v22 = vsel %vm13992_vm7, %v3671_v42, %v3679_v2  ;;  %v3309_v48 = vadd.f32 %v12432_v63, %v18864_v34  ;;  %v12433_v10 = vadd.f32 %v15095_v58, %v3134_v53  ;;  %v3136_v59 = vpop.f32.mrb[3].mxu1  ;;  %v3681_v31 = vrot.slane %v3679_v2, 4  ;;  %5414 = vmatprep.mubr.bf16.mxu0 %v4208_v4 }
 0x3e4   :  { %3990 = vst [vmem:[#allocation3 + $0x2c] sm:$0xf] %v3680_v22  ;;  %v3683_v26 = vshrl.u32 %v11635_v6, 16  ;;  %v3686_v30 = vshll.u32 %v11635_v6, 16  ;;  %v11636_v49 = vpack.c.bf16 %v3450_v38, %v3450_v38  ;;  %v15244_v60 = vld [vmem:[#allocation3 + $0x20] sm:$0xff]   ;;  %v4211_v52 = vor.u32 %v15248_v47, %v4207_v37 }
 0x3e5   :  { %v3415_v19 = vmax.f32 %v3309_v48, 0.0  ;;  %v3312_v43 = vadd.f32 %v12433_v10, %v18865_v3  ;;  %v4731_v36 = vrot.slane %v15244_v60, 3  ;;  %v15260_v44 = vshll.u32 %v15244_v60, 16  ;;  %v13328_v10 = vld [vmem:[%s18666_s7 + $0xb8] sm:$0xff]  }
 0x3e6   :  { %5552 = vmatpush1.bf16.msra.mxu0 %v13321_v39  ;;  %v3685_v46 = vrot.slane %v3683_v26, 6  ;;  %v3688_v40 = vrot.slane %v3686_v30, 7  ;;  %v3693_v32 = vshrl.u32 %v11636_v49, 16  ;;  %v3696_v0 = vshll.u32 %v11636_v49, 16  ;;  %v18867_v30 = vld [vmem:[#allocation47_spill] sm:$0xff] }
 0x3e7   :  { %5415 = vmatmul.mubr.bf16.gmra.mrb[104].mxu0 %v15181_v17  ;;  %5553 = vmatprep.subr.bf16.mxu0 %v18774_v56  ;;  %v3451_v35 = vmul.f32 %v13612_v18, %v3415_v19  ;;  %v3416_v14 = vmax.f32 %v3312_v43, 0.0  ;;  %v4732_v28 = vsel %vm1879_vm9, %v4729_v57, %v4731_v36  ;;  %v4215_v42 = vrot.slane %v15260_v44, 1 }
 0x3e8   :  { %v3689_v5 = vor.u32 %v3688_v40, %v3685_v46  ;;  %v3695_v24 = vrot.slane %v3693_v32, 6  ;;  %v3698_v29 = vrot.slane %v3696_v0, 7  ;;  %v3139_v51 = vpop.f32.mrb[4].mxu1  ;;  %12237 = vmatmul.mubr.bf16.vlgmr.msra.gmra.mrb[72].mxu1 %v4732_v28  ;;  %v15301_v0 = vshrl.u32 %v15244_v60, 16 }
 0x3e9   :  { %v11637_v9 = vpack.c.bf16 %v3451_v35, %v3451_v35  ;;  %v3452_v25 = vmul.f32 %v13613_v54, %v3416_v14  ;;  %v12434_v55 = vadd.f32 %v15095_v58, %v3139_v51  ;;  %v3141_v12 = vpop.f32.mrb[5].mxu1  ;;  %v4216_v11 = vsel %vm1327_vm8, %v4211_v52, %v4215_v42 }
 0x3ea   :  { %5554 = vmatpush1.bf16.msra.mxu0 %v13323_v41  ;;  %v3690_v16 = vsel %vm13992_vm7, %v3681_v31, %v3689_v5  ;;  %v3691_v45 = vrot.slane %v3689_v5, 4  ;;  %v3699_v7 = vor.u32 %v3698_v29, %v3695_v24  ;;  %v3142_v13 = vpop.f32.mrb[6].mxu1  ;;  %5422 = vmatprep.mubr.bf16.mxu0 %v4216_v11  ;;  %v13614_v41 = vld [vmem:[%s18660_s1 + $0x70] sm:$0xff]  ;;  %v13330_v29 = vld [vmem:[%s18666_s7 + $0xc0] sm:$0xff]   ;;  %v4219_v54 = vor.u32 %v15301_v0, %v4215_v42 }
 0x3eb   :  { %5555 = vmatprep.subr.bf16.mxu0 %v18774_v56  ;;  %3991 = vst [vmem:[#allocation3 + $0x30] sm:$0xf] %v3690_v16  ;;  %v3703_v2 = vshrl.u32 %v11637_v9, 16  ;;  %v3706_v63 = vshll.u32 %v11637_v9, 16  ;;  %v11638_v57 = vpack.c.bf16 %v3452_v25, %v3452_v25  ;;  %v3317_v39 = vadd.f32 %v12434_v55, %v18866_v23  ;;  %v3144_v6 = vpop.f32.mrb[7].mxu1  ;;  %v15278_v61 = vld [vmem:[#allocation3 + $0x28] sm:$0xff]  }
 0x3ec   :  { %v3700_v38 = vsel %vm13992_vm7, %v3691_v45, %v3699_v7  ;;  %v12435_v53 = vadd.f32 %v15095_v58, %v3142_v13  ;;  %v3701_v59 = vrot.slane %v3699_v7, 4  ;;  %v4733_v4 = vrot.slane %v15278_v61, 3  ;;  %v18868_v12 = vld [vmem:[#allocation50_spill] sm:$0xff]  ;;  %v18869_v23 = vld [vmem:[#allocation52_spill] sm:$0xff] }
 0x3ed   :  { %3992 = vst [vmem:[#allocation3 + $0x34] sm:$0xf] %v3700_v38  ;;  %v3705_v37 = vrot.slane %v3703_v2, 6  ;;  %v3708_v22 = vrot.slane %v3706_v63, 7  ;;  %v3713_v34 = vshrl.u32 %v11638_v57, 16  ;;  %v3716_v48 = vshll.u32 %v11638_v57, 16 }
 0x3ee   :  { %5556 = vmatpush1.bf16.msra.mxu0 %v13326_v8  ;;  %v3417_v26 = vmax.f32 %v3317_v39, 0.0  ;;  %v3320_v49 = vadd.f32 %v12435_v53, %v18867_v30  ;;  %v15292_v43 = vshll.u32 %v15278_v61, 16  ;;  %v15324_v6 = vshrl.u32 %v15278_v61, 16  ;;  %v13332_v38 = vld [vmem:[%s18666_s7 + $0xc8] sm:$0xff]  }
 0x3ef   :  { %5423 = vmatmul.mubr.bf16.gmra.mrb[108].mxu0 %v15204_v1  ;;  %5557 = vmatprep.subr.bf16.mxu0 %v18774_v56  ;;  %v3709_v31 = vor.u32 %v3708_v22, %v3705_v37  ;;  %v3715_v19 = vrot.slane %v3713_v34, 6  ;;  %v3718_v3 = vrot.slane %v3716_v48, 7  ;;  %v4734_v1 = vsel %vm1879_vm9, %v4731_v36, %v4733_v4  ;;  %v13615_v36 = vld [vmem:[%s18660_s1 + $0x78] sm:$0xff]  ;;  %v13616_v34 = vld [vmem:[%s18660_s1 + $0x80] sm:$0xff] }
 0x3f0   :  { %v3453_v46 = vmul.f32 %v13614_v41, %v3417_v26  ;;  %v3418_v40 = vmax.f32 %v3320_v49, 0.0  ;;  %v3147_v32 = vpop.f32.mrb[8].mxu1  ;;  %12240 = vmatprep.mubr.bf16.mxu1 %v4734_v1  ;;  %v4223_v25 = vrot.slane %v15292_v43, 1  ;;  %v13617_v41 = vld [vmem:[%s18660_s1 + $0x88] sm:$0xff] }
 0x3f1   :  { %v3710_v18 = vsel %vm13992_vm7, %v3701_v59, %v3709_v31  ;;  %v3711_v35 = vrot.slane %v3709_v31, 4  ;;  %v3719_v14 = vor.u32 %v3718_v3, %v3715_v19  ;;  %v12436_v5 = vadd.f32 %v15095_v58, %v3147_v32  ;;  %v3149_v24 = vpop.f32.mrb[9].mxu1 }
 0x3f2   :  { %5558 = vmatpush1.bf16.msra.mxu0 %v13328_v10  ;;  %3993 = vst [vmem:[#allocation3 + $0x38] sm:$0xf] %v3710_v18  ;;  %v11639_v51 = vpack.c.bf16 %v3453_v46, %v3453_v46  ;;  %v3454_v52 = vmul.f32 %v13615_v36, %v3418_v40  ;;  %v3150_v9 = vpop.f32.mrb[10].mxu1  ;;  %v4224_v2 = vsel %vm1327_vm8, %v4219_v54, %v4223_v25  ;;  %v13334_v18 = vld [vmem:[%s18666_s7 + $0xd0] sm:$0xff]  }
 0x3f3   :  { %5559 = vmatprep.subr.bf16.mxu0 %v18774_v56  ;;  %v3720_v55 = vsel %vm13992_vm7, %v3711_v35, %v3719_v14  ;;  %v3325_v28 = vadd.f32 %v12436_v5, %v18868_v12  ;;  %v12437_v8 = vadd.f32 %v15095_v58, %v3150_v9  ;;  %v3152_v16 = vpop.f32.mrb[11].mxu1  ;;  %v3721_v42 = vrot.slane %v3719_v14, 4  ;;  %5430 = vmatprep.mubr.bf16.mxu0 %v4224_v2 }
 0x3f4   :  { %3994 = vst [vmem:[#allocation3 + $0x3c] sm:$0xf] %v3720_v55  ;;  %v3723_v45 = vshrl.u32 %v11639_v51, 16  ;;  %v3726_v7 = vshll.u32 %v11639_v51, 16  ;;  %v11640_v13 = vpack.c.bf16 %v3454_v52, %v3454_v52  ;;  %v15320_v63 = vld [vmem:[#allocation3 + $0x30] sm:$0xff]   ;;  %v4227_v3 = vor.u32 %v15324_v6, %v4223_v25 }
 0x3f5   :  { %v3419_v57 = vmax.f32 %v3325_v28, 0.0  ;;  %v3328_v39 = vadd.f32 %v12437_v8, %v18869_v23  ;;  %v4735_v59 = vrot.slane %v15320_v63, 3  ;;  %v15336_v26 = vshll.u32 %v15320_v63, 16  ;;  %v18870_v52 = vld [vmem:[#allocation49_spill] sm:$0xff] }
 0x3f6   :  { %5560 = vmatpush1.bf16.msra.mxu0 %v13330_v29  ;;  %v3725_v53 = vrot.slane %v3723_v45, 6  ;;  %v3728_v11 = vrot.slane %v3726_v7, 7  ;;  %v3733_v37 = vshrl.u32 %v11640_v13, 16  ;;  %v3736_v22 = vshll.u32 %v11640_v13, 16  ;;  %v13336_v13 = vld [vmem:[%s18666_s7 + $0xd8] sm:$0xff]  }
 0x3f7   :  { %5431 = vmatmul.mubr.bf16.gmra.mrb[112].mxu0 %v15244_v60  ;;  %5561 = vmatprep.subr.bf16.mxu0 %v18774_v56  ;;  %v3455_v48 = vmul.f32 %v13616_v34, %v3419_v57  ;;  %v3420_v10 = vmax.f32 %v3328_v39, 0.0  ;;  %v4736_v1 = vsel %vm1879_vm9, %v4733_v4, %v4735_v59  ;;  %v4231_v29 = vrot.slane %v15336_v26, 1  ;;  %v18871_v57 = vld [vmem:[#allocation51_spill] sm:$0xff] }
 0x3f8   :  { %v3729_v30 = vor.u32 %v3728_v11, %v3725_v53  ;;  %v3735_v49 = vrot.slane %v3733_v37, 6  ;;  %v3738_v31 = vrot.slane %v3736_v22, 7  ;;  %v3155_v19 = vpop.f32.mrb[12].mxu1  ;;  %12241 = vmatmul.mubr.bf16.gmra.mrb[76].mxu1 %v4736_v1  ;;  %v13618_v22 = vld [vmem:[%s18660_s1 + $0x90] sm:$0xff] }
 0x3f9   :  { %v11641_v60 = vpack.c.bf16 %v3455_v48, %v3455_v48  ;;  %v3456_v46 = vmul.f32 %v13617_v41, %v3420_v10  ;;  %v12438_v40 = vadd.f32 %v15095_v58, %v3155_v19  ;;  %v3157_v32 = vpop.f32.mrb[13].mxu1  ;;  %v4232_v28 = vsel %vm1327_vm8, %v4227_v3, %v4231_v29  ;;  %v13338_v41 = vld [vmem:[%s18666_s7 + $0xe0] sm:$0xff]  }
 0x3fa   :  { %5562 = vmatpush1.bf16.msra.mxu0 %v13332_v38  ;;  %v3730_v35 = vsel %vm13992_vm7, %v3721_v42, %v3729_v30  ;;  %v3731_v14 = vrot.slane %v3729_v30, 4  ;;  %v3739_v5 = vor.u32 %v3738_v31, %v3735_v49  ;;  %v3158_v24 = vpop.f32.mrb[14].mxu1  ;;  %5438 = vmatprep.mubr.bf16.mxu0 %v4232_v28  ;;  %v15377_v30 = vshrl.u32 %v15320_v63, 16 }
 0x3fb   :  { %5563 = vmatprep.subr.bf16.mxu0 %v18774_v56  ;;  %3995 = vst [vmem:[#allocation3 + $0x40] sm:$0xf] %v3730_v35  ;;  %v3743_v51 = vshrl.u32 %v11641_v60, 16  ;;  %v3746_v36 = vshll.u32 %v11641_v60, 16  ;;  %v11642_v4 = vpack.c.bf16 %v3456_v46, %v3456_v46  ;;  %v3333_v9 = vadd.f32 %v12438_v40, %v18870_v52  ;;  %v3160_v54 = vpop.f32.mrb[15].mxu1  ;;  %v15354_v25 = vld [vmem:[#allocation3 + $0x38] sm:$0xff]  }
 0x3fc   :  { %v3740_v55 = vsel %vm13992_vm7, %v3731_v14, %v3739_v5  ;;  %v12439_v12 = vadd.f32 %v15095_v58, %v3158_v24  ;;  %v3741_v2 = vrot.slane %v3739_v5, 4  ;;  %v4737_v39 = vrot.slane %v15354_v25, 3  ;;  %v18872_v14 = vld [vmem:[#allocation54_spill] sm:$0xff] }
 0x3fd   :  { %3996 = vst [vmem:[#allocation3 + $0x44] sm:$0xf] %v3740_v55  ;;  %v3745_v8 = vrot.slane %v3743_v51, 6  ;;  %v3748_v16 = vrot.slane %v3746_v36, 7  ;;  %v3753_v45 = vshrl.u32 %v11642_v4, 16  ;;  %v3756_v7 = vshll.u32 %v11642_v4, 16 }
 0x3fe   :  { %5564 = vmatpush1.bf16.msra.mxu0 %v13334_v18  ;;  %v3421_v42 = vmax.f32 %v3333_v9, 0.0  ;;  %v3336_v23 = vadd.f32 %v12439_v12, %v18871_v57  ;;  %v15368_v37 = vshll.u32 %v15354_v25, 16  ;;  %v4235_v1 = vor.u32 %v15377_v30, %v4231_v29  ;;  %v18873_v12 = vld [vmem:[#allocation56_spill] sm:$0xff] }
 0x3ff   :  { %5439 = vmatmul.mubr.bf16.gmra.mrb[116].mxu0 %v15278_v61  ;;  %5565 = vmatprep.subr.bf16.mxu0 %v18774_v56  ;;  %v3749_v38 = vor.u32 %v3748_v16, %v3745_v8  ;;  %v3755_v53 = vrot.slane %v3753_v45, 6  ;;  %v3758_v11 = vrot.slane %v3756_v7, 7  ;;  %v4738_v61 = vsel %vm1879_vm9, %v4735_v59, %v4737_v39  ;;  %v13619_v59 = vld [vmem:[%s18660_s1 + $0x98] sm:$0xff]  ;;  %v13340_v16 = vld [vmem:[%s18666_s7 + $0xe8] sm:$0xff]  }
 0x400   :  { %v3457_v34 = vmul.f32 %v13618_v22, %v3421_v42  ;;  %v3422_v48 = vmax.f32 %v3336_v23, 0.0  ;;  %v3163_v10 = vpop.f32.mrb[16].mxu1  ;;  %12244 = vmatprep.mubr.bf16.mxu1 %v4738_v61  ;;  %v4239_v18 = vrot.slane %v15368_v37, 1  ;;  %v15400_v8 = vshrl.u32 %v15354_v25, 16  ;;  %v13620_v42 = vld [vmem:[%s18660_s1 + $0xa0] sm:$0xff]  ;;  %v13621_v61 = vld [vmem:[%s18660_s1 + $0xa8] sm:$0xff] }
 0x401   :  { %v3750_v49 = vsel %vm13992_vm7, %v3741_v2, %v3749_v38  ;;  %v3751_v31 = vrot.slane %v3749_v38, 4  ;;  %v3759_v19 = vor.u32 %v3758_v11, %v3755_v53  ;;  %v12440_v3 = vadd.f32 %v15095_v58, %v3163_v10  ;;  %v3165_v60 = vpop.f32.mrb[17].mxu1 }
 0x402   :  { %5566 = vmatpush1.bf16.msra.mxu0 %v13336_v13  ;;  %3997 = vst [vmem:[#allocation3 + $0x48] sm:$0xf] %v3750_v49  ;;  %v11643_v46 = vpack.c.bf16 %v3457_v34, %v3457_v34  ;;  %v3458_v40 = vmul.f32 %v13619_v59, %v3422_v48  ;;  %v3166_v32 = vpop.f32.mrb[18].mxu1  ;;  %v4240_v9 = vsel %vm1327_vm8, %v4235_v1, %v4239_v18  ;;  %v13343_v60 = vld [vmem:[%s18666_s7 + $0xf0] sm:$0xff]  }
 0x403   :  { %5567 = vmatprep.subr.bf16.mxu0 %v18774_v56  ;;  %v3760_v35 = vsel %vm13992_vm7, %v3751_v31, %v3759_v19  ;;  %v3341_v5 = vadd.f32 %v12440_v3, %v18872_v14  ;;  %v12441_v24 = vadd.f32 %v15095_v58, %v3166_v32  ;;  %v3168_v51 = vpop.f32.mrb[19].mxu1  ;;  %v3761_v29 = vrot.slane %v3759_v19, 4  ;;  %5446 = vmatprep.mubr.bf16.mxu0 %v4240_v9 }
 0x404   :  { %3998 = vst [vmem:[#allocation3 + $0x4c] sm:$0xf] %v3760_v35  ;;  %v3763_v36 = vshrl.u32 %v11643_v46, 16  ;;  %v3766_v4 = vshll.u32 %v11643_v46, 16  ;;  %v11644_v52 = vpack.c.bf16 %v3458_v40, %v3458_v40  ;;  %v15396_v54 = vld [vmem:[#allocation3 + $0x40] sm:$0xff]   ;;  %v4243_v10 = vor.u32 %v15400_v8, %v4239_v18  ;;  %v18874_v35 = vld [vmem:[#allocation53_spill] sm:$0xff] }
 0x405   :  { %v3423_v55 = vmax.f32 %v3341_v5, 0.0  ;;  %v3344_v28 = vadd.f32 %v12441_v24, %v18873_v12  ;;  %v4739_v38 = vrot.slane %v15396_v54, 3  ;;  %v15412_v53 = vshll.u32 %v15396_v54, 16  ;;  %v13346_v12 = vld [vmem:[%s18666_s7 + $0xf8] sm:$0xff]  }
 0x406   :  { %5568 = vmatpush1.bf16.msra.mxu0 %v13338_v41  ;;  %v3765_v45 = vrot.slane %v3763_v36, 6  ;;  %v3768_v7 = vrot.slane %v3766_v4, 7  ;;  %v3773_v13 = vshrl.u32 %v11644_v52, 16  ;;  %v3776_v2 = vshll.u32 %v11644_v52, 16 }
 0x407   :  { %5447 = vmatmul.mubr.bf16.gmra.mrb[120].mxu0 %v15320_v63  ;;  %5569 = vmatprep.subr.bf16.mxu0 %v18774_v56  ;;  %v3459_v57 = vmul.f32 %v13620_v42, %v3423_v55  ;;  %v3424_v23 = vmax.f32 %v3344_v28, 0.0  ;;  %v4740_v3 = vsel %vm1879_vm9, %v4737_v39, %v4739_v38  ;;  %v4247_v32 = vrot.slane %v15412_v53, 1 }
 0x408   :  { %v3769_v11 = vor.u32 %v3768_v7, %v3765_v45  ;;  %v3775_v22 = vrot.slane %v3773_v13, 6  ;;  %v3778_v34 = vrot.slane %v3776_v2, 7  ;;  %v3171_v48 = vpop.f32.mrb[20].mxu1  ;;  %12245 = vmatmul.mubr.bf16.gmra.mrb[80].mxu1 %v4740_v3  ;;  %v18875_v45 = vld [vmem:[#allocation55_spill] sm:$0xff]  ;;  %v13624_v3 = vld [vmem:[%s18660_s1 + $0xb8] sm:$0xff] }
 0x409   :  { %v11645_v63 = vpack.c.bf16 %v3459_v57, %v3459_v57  ;;  %v3460_v49 = vmul.f32 %v13621_v61, %v3424_v23  ;;  %v12442_v31 = vadd.f32 %v15095_v58, %v3171_v48  ;;  %v3173_v19 = vpop.f32.mrb[21].mxu1  ;;  %v4248_v4 = vsel %vm1327_vm8, %v4243_v10, %v4247_v32  ;;  %v13622_v23 = vld [vmem:[%s18660_s1 + $0xb0] sm:$0xff] }
 0x40a   :  { %5570 = vmatpush1.bf16.msra.mxu0 %v13340_v16  ;;  %v3770_v41 = vsel %vm13992_vm7, %v3761_v29, %v3769_v11  ;;  %v3771_v46 = vrot.slane %v3769_v11, 4  ;;  %v3779_v59 = vor.u32 %v3778_v34, %v3775_v22  ;;  %v3174_v40 = vpop.f32.mrb[22].mxu1  ;;  %5454 = vmatprep.mubr.bf16.mxu0 %v4248_v4  ;;  %v15453_v48 = vshrl.u32 %v15396_v54, 16 }
 0x40b   :  { %5571 = vmatprep.subr.bf16.mxu0 %v18774_v56  ;;  %3999 = vst [vmem:[#allocation3 + $0x50] sm:$0xf] %v3770_v41  ;;  %v3783_v1 = vshrl.u32 %v11645_v63, 16  ;;  %v3786_v18 = vshll.u32 %v11645_v63, 16  ;;  %v11646_v39 = vpack.c.bf16 %v3460_v49, %v3460_v49  ;;  %v3349_v14 = vadd.f32 %v12442_v31, %v18874_v35  ;;  %v3176_v5 = vpop.f32.mrb[23].mxu1  ;;  %v15430_v24 = vld [vmem:[#allocation3 + $0x48] sm:$0xff]  }
 0x40c   :  { %v3780_v51 = vsel %vm13992_vm7, %v3771_v46, %v3779_v59  ;;  %v12443_v36 = vadd.f32 %v15095_v58, %v3174_v40  ;;  %v3781_v28 = vrot.slane %v3779_v59, 4  ;;  %v4741_v58 = vrot.slane %v15430_v24, 3  ;;  %v15460_v49 = vld [vmem:[%s18665_s6] ss:$0 sm:$0xff] }
 0x40d   :  { %4000 = vst [vmem:[#allocation3 + $0x54] sm:$0xf] %v3780_v51  ;;  %v3785_v52 = vrot.slane %v3783_v1, 6  ;;  %v3788_v9 = vrot.slane %v3786_v18, 7  ;;  %v3793_v29 = vshrl.u32 %v11646_v39, 16  ;;  %v3796_v55 = vshll.u32 %v11646_v39, 16 }
 0x40e   :  { %5572 = vmatpush1.bf16.msra.mxu0 %v13343_v60  ;;  %v3425_v16 = vmax.f32 %v3349_v14, 0.0  ;;  %v3352_v7 = vadd.f32 %v12443_v36, %v18875_v45  ;;  %v15444_v57 = vshll.u32 %v15430_v24, 16  ;;  %v4251_v46 = vor.u32 %v15453_v48, %v4247_v32  ;;  %v18876_v1 = vld [vmem:[#allocation58_spill] sm:$0xff] }
 0x40f   :  { %5455 = vmatmul.mubr.bf16.gmra.mrb[124].mxu0 %v15354_v25  ;;  %5573 = vmatprep.subr.bf16.mxu0 %v18774_v56  ;;  %v3789_v13 = vor.u32 %v3788_v9, %v3785_v52  ;;  %v3795_v2 = vrot.slane %v3793_v29, 6  ;;  %v3798_v42 = vrot.slane %v3796_v55, 7  ;;  %v4742_v25 = vsel %vm1879_vm9, %v4739_v38, %v4741_v58  ;;  %v18877_v9 = vld [vmem:[#allocation60_spill] sm:$0xff] }
 0x410   :  { %v3461_v11 = vmul.f32 %v13622_v23, %v3425_v16  ;;  %v3426_v22 = vmax.f32 %v3352_v7, 0.0  ;;  %v3179_v34 = vpop.f32.mrb[24].mxu1  ;;  %12248 = vmatprep.mubr.bf16.mxu1 %v4742_v25  ;;  %v4255_v59 = vrot.slane %v15444_v57, 1  ;;  %v15478_v55 = vshrl.u32 %v15430_v24, 16  ;;  %v13625_v7 = vld [vmem:[%s18660_s1 + $0xc0] sm:$0xff] }
 0x411   :  { %v3790_v10 = vsel %vm13992_vm7, %v3781_v28, %v3789_v13  ;;  %v3791_v63 = vrot.slane %v3789_v13, 4  ;;  %v3799_v61 = vor.u32 %v3798_v42, %v3795_v2  ;;  %v12444_v31 = vadd.f32 %v15460_v49, %v3179_v34  ;;  %v3181_v19 = vpop.f32.mrb[25].mxu1 }
 0x412   :  { %5574 = vmatpush1.bf16.msra.mxu0 %v13346_v12  ;;  %4001 = vst [vmem:[#allocation3 + $0x58] sm:$0xf] %v3790_v10  ;;  %v11647_v38 = vpack.c.bf16 %v3461_v11, %v3461_v11  ;;  %v3462_v60 = vmul.f32 %v13624_v3, %v3426_v22  ;;  %v3182_v41 = vpop.f32.mrb[26].mxu1  ;;  %v4256_v36 = vsel %vm1327_vm8, %v4251_v46, %v4255_v59 }
 0x413   :  { %5720 = vmatprep.subr.bf16.mxu0 %v18774_v56  ;;  %v3800_v40 = vsel %vm13992_vm7, %v3791_v63, %v3799_v61  ;;  %v3357_v18 = vadd.f32 %v12444_v31, %v18876_v1  ;;  %v12445_v39 = vadd.f32 %v15460_v49, %v3182_v41  ;;  %v3184_v35 = vpop.f32.mrb[27].mxu1  ;;  %v3801_v32 = vrot.slane %v3799_v61, 4  ;;  %5462 = vmatprep.mubr.bf16.mxu0 %v4256_v36 }
 0x414   :  { %4002 = vst [vmem:[#allocation3 + $0x5c] sm:$0xf] %v3800_v40  ;;  %v3803_v14 = vshrl.u32 %v11647_v38, 16  ;;  %v3806_v5 = vshll.u32 %v11647_v38, 16  ;;  %v11648_v51 = vpack.c.bf16 %v3462_v60, %v3462_v60  ;;  %v15474_v4 = vld [vmem:[#allocation3 + $0x50] sm:$0xff]   ;;  %v4259_v10 = vor.u32 %v15478_v55, %v4255_v59 }
 0x415   :  { %v3427_v52 = vmax.f32 %v3357_v18, 0.0  ;;  %v3360_v29 = vadd.f32 %v12445_v39, %v18877_v9  ;;  %v4743_v42 = vrot.slane %v15474_v4, 3  ;;  %v15486_v23 = vshll.u32 %v15474_v4, 16  ;;  %v18879_v39 = vld [vmem:[#allocation57_spill] sm:$0xff] }
 0x416   :  { %v3805_v12 = vrot.slane %v3803_v14, 6  ;;  %v3808_v28 = vrot.slane %v3806_v5, 7  ;;  %v3813_v16 = vshrl.u32 %v11648_v51, 16  ;;  %v3816_v45 = vshll.u32 %v11648_v51, 16 }
 0x417   :  { %5463 = vmatmul.mubr.bf16.gmra.mrb[128].mxu0 %v15396_v54  ;;  %v3463_v13 = vmul.f32 %v13625_v7, %v3427_v52  ;;  %v3428_v2 = vmax.f32 %v3360_v29, 0.0  ;;  %18878 = vst [vmem:[#allocation12_spill] sm:$0xff] %v15486_v23  ;;  %v13626_v54 = vld [vmem:[%s18660_s1 + $0xc8] sm:$0xff]  ;;  %v4744_v38 = vsel %vm1879_vm9, %v4741_v58, %v4743_v42  ;;  %v4263_v59 = vrot.slane %v15486_v23, 1 }
 0x418   :  { %v3809_v11 = vor.u32 %v3808_v28, %v3805_v12  ;;  %v3815_v22 = vrot.slane %v3813_v16, 6  ;;  %v3818_v34 = vrot.slane %v3816_v45, 7  ;;  %v3187_v25 = vpop.f32.mrb[28].mxu1  ;;  %12249 = vmatmul.mubr.bf16.gmra.mrb[84].mxu1 %v4744_v38  ;;  %v18880_v16 = vld [vmem:[#allocation59_spill] sm:$0xff] }
 0x419   :  { %v11649_v63 = vpack.c.bf16 %v3463_v13, %v3463_v13  ;;  %v3464_v61 = vmul.f32 %v13626_v54, %v3428_v2  ;;  %v12446_v31 = vadd.f32 %v15460_v49, %v3187_v25  ;;  %v3189_v19 = vpop.f32.mrb[29].mxu1  ;;  %v4264_v36 = vsel %vm1327_vm8, %v4259_v10, %v4263_v59 }
 0x41a   :  { %v3810_v3 = vsel %vm13992_vm7, %v3801_v32, %v3809_v11  ;;  %v3811_v60 = vrot.slane %v3809_v11, 4  ;;  %v3819_v41 = vor.u32 %v3818_v34, %v3815_v22  ;;  %v3190_v46 = vpop.f32.mrb[30].mxu1  ;;  %5470 = vmatprep.mubr.bf16.mxu0 %v4264_v36  ;;  %v13627_v34 = vld [vmem:[%s18660_s1 + $0xd0] sm:$0xff] }
 0x41b   :  { %4003 = vst [vmem:[#allocation3 + $0x60] sm:$0xf] %v3810_v3  ;;  %v3823_v40 = vshrl.u32 %v11649_v63, 16  ;;  %v3826_v1 = vshll.u32 %v11649_v63, 16  ;;  %v11650_v18 = vpack.c.bf16 %v3464_v61, %v3464_v61  ;;  %v3365_v35 = vadd.f32 %v12446_v31, %v18879_v39  ;;  %v3192_v14 = vpop.f32.mrb[31].mxu1  ;;  %v15500_v5 = vld [vmem:[#allocation3 + $0x58] sm:$0xff]  }
 0x41c   :  { %v3820_v58 = vsel %vm13992_vm7, %v3811_v60, %v3819_v41  ;;  %v12447_v51 = vadd.f32 %v15460_v49, %v3190_v46  ;;  %v3821_v12 = vrot.slane %v3819_v41, 4  ;;  %v4745_v7 = vrot.slane %v15500_v5, 3  ;;  %v13628_v41 = vld [vmem:[%s18660_s1 + $0xd8] sm:$0xff]  ;;  %v18883_v39 = vld [vmem:[#allocation62_spill] sm:$0xff] }
 0x41d   :  { %4004 = vst [vmem:[#allocation3 + $0x64] sm:$0xf] %v3820_v58  ;;  %v3825_v32 = vrot.slane %v3823_v40, 6  ;;  %v3828_v52 = vrot.slane %v3826_v1, 7  ;;  %v3833_v9 = vshrl.u32 %v11650_v18, 16  ;;  %v3836_v29 = vshll.u32 %v11650_v18, 16 }
 0x41e   :  { %v3429_v28 = vmax.f32 %v3365_v35, 0.0  ;;  %v3368_v45 = vadd.f32 %v12447_v51, %v18880_v16  ;;  %v15510_v22 = vshll.u32 %v15500_v5, 16  ;;  %v4746_v54 = vsel %vm1879_vm9, %v4743_v42, %v4745_v7 }
 0x41f   :  { %5471 = vmatmul.mubr.bf16.gmra.mrb[132].mxu0 %v15430_v24  ;;  %v3829_v13 = vor.u32 %v3828_v52, %v3825_v32  ;;  %v3835_v2 = vrot.slane %v3833_v9, 6  ;;  %v3838_v11 = vrot.slane %v3836_v29, 7  ;;  %v15517_v61 = vshrl.u32 %v15474_v4, 16  ;;  %12252 = vmatprep.mubr.bf16.mxu1 %v4746_v54 }
 0x420   :  { %18881 = vst [vmem:[#allocation14_spill] sm:$0xff] %v15510_v22  ;;  %v3465_v25 = vmul.f32 %v13627_v34, %v3429_v28  ;;  %v3430_v10 = vmax.f32 %v3368_v45, 0.0  ;;  %v3195_v63 = vpop.f32.mrb[32].mxu1  ;;  %v4271_v1 = vrot.slane %v15510_v22, 1  ;;  %v15536_v16 = vshrl.u32 %v15500_v5, 16  ;;  %v13629_v34 = vld [vmem:[%s18660_s1 + $0xe0] sm:$0xff] }
 0x421   :  { %18882 = vst [vmem:[#allocation13_spill] sm:$0xff] %v15517_v61  ;;  %v3830_v24 = vsel %vm13992_vm7, %v3821_v12, %v3829_v13  ;;  %v3831_v31 = vrot.slane %v3829_v13, 4  ;;  %v3839_v19 = vor.u32 %v3838_v11, %v3835_v2  ;;  %v12448_v38 = vadd.f32 %v15460_v49, %v3195_v63  ;;  %v3197_v3 = vpop.f32.mrb[33].mxu1  ;;  %v18884_v12 = vld [vmem:[#allocation64_spill] sm:$0xff] }
 0x422   :  { %4005 = vst [vmem:[#allocation3 + $0x68] sm:$0xf] %v3830_v24  ;;  %v11651_v60 = vpack.c.bf16 %v3465_v25, %v3465_v25  ;;  %v3466_v46 = vmul.f32 %v13628_v41, %v3430_v10  ;;  %v3198_v42 = vpop.f32.mrb[34].mxu1  ;;  %v4267_v40 = vor.u32 %v15517_v61, %v4263_v59  ;;  %18885 = vst [vmem:[#allocation15_spill] sm:$0xff] %v15536_v16  ;;  %v13630_v41 = vld [vmem:[%s18660_s1 + $0xe8] sm:$0xff] }
 0x423   :  { %v3840_v18 = vsel %vm13992_vm7, %v3831_v31, %v3839_v19  ;;  %v3373_v35 = vadd.f32 %v12448_v38, %v18883_v39  ;;  %v12449_v14 = vadd.f32 %v15460_v49, %v3198_v42  ;;  %v3200_v58 = vpop.f32.mrb[35].mxu1  ;;  %v3841_v29 = vrot.slane %v3839_v19, 4 }
 0x424   :  { %4006 = vst [vmem:[#allocation3 + $0x6c] sm:$0xf] %v3840_v18  ;;  %v3843_v51 = vshrl.u32 %v11651_v60, 16  ;;  %v3846_v36 = vshll.u32 %v11651_v60, 16  ;;  %v11652_v32 = vpack.c.bf16 %v3466_v46, %v3466_v46  ;;  %v4272_v52 = vsel %vm1327_vm8, %v4267_v40, %v4271_v1  ;;  %v15532_v9 = vld [vmem:[#allocation3 + $0x60] sm:$0xff]  }
 0x425   :  { %v3431_v59 = vmax.f32 %v3373_v35, 0.0  ;;  %v3376_v28 = vadd.f32 %v12449_v14, %v18884_v12  ;;  %5478 = vmatprep.mubr.bf16.mxu0 %v4272_v52  ;;  %v4747_v63 = vrot.slane %v15532_v9, 3  ;;  %v15544_v54 = vshll.u32 %v15532_v9, 16  ;;  %v18887_v52 = vld [vmem:[#allocation61_spill] sm:$0xff] }
 0x426   :  { %v3845_v45 = vrot.slane %v3843_v51, 6  ;;  %v3848_v13 = vrot.slane %v3846_v36, 7  ;;  %v3853_v2 = vshrl.u32 %v11652_v32, 16  ;;  %v3856_v11 = vshll.u32 %v11652_v32, 16 }
 0x427   :  { %5479 = vmatmul.mubr.bf16.gmra.mrb[136].mxu0 %v15474_v4  ;;  %v3467_v25 = vmul.f32 %v13629_v34, %v3431_v59  ;;  %v3432_v10 = vmax.f32 %v3376_v28, 0.0  ;;  %18886 = vst [vmem:[#allocation16_spill] sm:$0xff] %v15544_v54  ;;  %v4275_v3 = vor.u32 %v15536_v16, %v4271_v1  ;;  %v4748_v18 = vsel %vm1879_vm9, %v4745_v7, %v4747_v63 }
 0x428   :  { %v3849_v24 = vor.u32 %v3848_v13, %v3845_v45  ;;  %v3855_v31 = vrot.slane %v3853_v2, 6  ;;  %v3858_v19 = vrot.slane %v3856_v11, 7  ;;  %v3203_v38 = vpop.f32.mrb[36].mxu1  ;;  %12253 = vmatmul.mubr.bf16.gmra.mrb[88].mxu1 %v4748_v18  ;;  %v4279_v1 = vrot.slane %v15544_v54, 1 }
 0x429   :  { %v11653_v60 = vpack.c.bf16 %v3467_v25, %v3467_v25  ;;  %v3468_v46 = vmul.f32 %v13630_v41, %v3432_v10  ;;  %v12450_v42 = vadd.f32 %v15460_v49, %v3203_v38  ;;  %v3205_v40 = vpop.f32.mrb[37].mxu1 }
 0x42a   :  { %v3850_v39 = vsel %vm13992_vm7, %v3841_v29, %v3849_v24  ;;  %v3851_v35 = vrot.slane %v3849_v24, 4  ;;  %v3859_v14 = vor.u32 %v3858_v19, %v3855_v31  ;;  %v3206_v58 = vpop.f32.mrb[38].mxu1  ;;  %v4280_v45 = vsel %vm1327_vm8, %v4275_v3, %v4279_v1  ;;  %v18888_v24 = vld [vmem:[#allocation63_spill] sm:$0xff] }
 0x42b   :  { %4007 = vst [vmem:[#allocation3 + $0x70] sm:$0xf] %v3850_v39  ;;  %v3863_v51 = vshrl.u32 %v11653_v60, 16  ;;  %v3866_v36 = vshll.u32 %v11653_v60, 16  ;;  %v11654_v32 = vpack.c.bf16 %v3468_v46, %v3468_v46  ;;  %v3381_v59 = vadd.f32 %v12450_v42, %v18887_v52  ;;  %v3208_v12 = vpop.f32.mrb[39].mxu1  ;;  %v15556_v28 = vld [vmem:[#allocation3 + $0x68] sm:$0xff]   ;;  %5486 = vmatprep.mubr.bf16.mxu0 %v4280_v45 }
 0x42c   :  { %v3860_v7 = vsel %vm13992_vm7, %v3851_v35, %v3859_v14  ;;  %v12451_v29 = vadd.f32 %v15460_v49, %v3206_v58  ;;  %v3861_v25 = vrot.slane %v3859_v14, 4  ;;  %v4749_v19 = vrot.slane %v15556_v28, 3  ;;  %v13631_v3 = vld [vmem:[%s18660_s1 + $0xf0] sm:$0xff] }
 0x42d   :  { %4008 = vst [vmem:[#allocation3 + $0x74] sm:$0xf] %v3860_v7  ;;  %v3865_v13 = vrot.slane %v3863_v51, 6  ;;  %v3868_v2 = vrot.slane %v3866_v36, 7  ;;  %v3873_v11 = vshrl.u32 %v11654_v32, 16  ;;  %v3876_v34 = vshll.u32 %v11654_v32, 16 }
 0x42e   :  { %v3433_v10 = vmax.f32 %v3381_v59, 0.0  ;;  %v3384_v31 = vadd.f32 %v12451_v29, %v18888_v24  ;;  %v15566_v46 = vshll.u32 %v15556_v28, 16  ;;  %v4750_v39 = vsel %vm1879_vm9, %v4747_v63, %v4749_v19  ;;  %v13632_v59 = vld [vmem:[%s18660_s1 + $0xf8] sm:$0xff] }
 0x42f   :  { %5487 = vmatmul.mubr.bf16.gmra.mrb[140].mxu0 %v15500_v5  ;;  %v3869_v38 = vor.u32 %v3868_v2, %v3865_v13  ;;  %v3875_v60 = vrot.slane %v3873_v11, 6  ;;  %v3878_v41 = vrot.slane %v3876_v34, 7  ;;  %v15573_v35 = vshrl.u32 %v15532_v9, 16  ;;  %12256 = vmatprep.mubr.bf16.mxu1 %v4750_v39  ;;  %v18891_v13 = vld [vmem:[#allocation66_spill] sm:$0xff] }
 0x430   :  { %18889 = vst [vmem:[#allocation17_spill] sm:$0xff] %v15566_v46  ;;  %v3469_v42 = vmul.f32 %v13631_v3, %v3433_v10  ;;  %v3434_v40 = vmax.f32 %v3384_v31, 0.0  ;;  %v3211_v18 = vpop.f32.mrb[40].mxu1  ;;  %v4287_v29 = vrot.slane %v15566_v46, 1 }
 0x431   :  { %18890 = vst [vmem:[#allocation19_spill] sm:$0xff] %v15573_v35  ;;  %v3870_v14 = vsel %vm13992_vm7, %v3861_v25, %v3869_v38  ;;  %v3871_v58 = vrot.slane %v3869_v38, 4  ;;  %v3879_v51 = vor.u32 %v3878_v41, %v3875_v60  ;;  %v12452_v36 = vadd.f32 %v15460_v49, %v3211_v18  ;;  %v3213_v32 = vpop.f32.mrb[41].mxu1  ;;  %v18892_v41 = vld [vmem:[#allocation68_spill] sm:$0xff] }
 0x432   :  { %4009 = vst [vmem:[#allocation3 + $0x78] sm:$0xf] %v3870_v14  ;;  %v11655_v52 = vpack.c.bf16 %v3469_v42, %v3469_v42  ;;  %v3470_v12 = vmul.f32 %v13632_v59, %v3434_v40  ;;  %v3214_v63 = vpop.f32.mrb[42].mxu1  ;;  %v4283_v7 = vor.u32 %v15573_v35, %v4279_v1  ;;  %v15592_v42 = vshrl.u32 %v15556_v28, 16 }
 0x433   :  { %v3880_v45 = vsel %vm13992_vm7, %v3871_v58, %v3879_v51  ;;  %v3389_v2 = vadd.f32 %v12452_v36, %v18891_v13  ;;  %v12453_v11 = vadd.f32 %v15460_v49, %v3214_v63  ;;  %v3216_v34 = vpop.f32.mrb[43].mxu1  ;;  %v3881_v60 = vrot.slane %v3879_v51, 4  ;;  %v13633_v58 = vld [vmem:[%s18660_s1 + $0x100] sm:$0xff] }
 0x434   :  { %4010 = vst [vmem:[#allocation3 + $0x7c] sm:$0xf] %v3880_v45  ;;  %v3883_v25 = vshrl.u32 %v11655_v52, 16  ;;  %v3886_v10 = vshll.u32 %v11655_v52, 16  ;;  %v11656_v24 = vpack.c.bf16 %v3470_v12, %v3470_v12  ;;  %v4288_v31 = vsel %vm1327_vm8, %v4283_v7, %v4287_v29  ;;  %v15588_v38 = vld [vmem:[#allocation3 + $0x70] sm:$0xff]   ;;  %18893 = vst [vmem:[#allocation18_spill] sm:$0xff] %v15592_v42 }
 0x435   :  { %v3435_v1 = vmax.f32 %v3389_v2, 0.0  ;;  %v3392_v3 = vadd.f32 %v12453_v11, %v18892_v41  ;;  %5494 = vmatprep.mubr.bf16.mxu0 %v4288_v31  ;;  %v4751_v51 = vrot.slane %v15588_v38, 3  ;;  %v15600_v52 = vshll.u32 %v15588_v38, 16  ;;  %v13634_v2 = vld [vmem:[%s18660_s1 + $0x108] sm:$0xff] }
 0x436   :  { %v3885_v40 = vrot.slane %v3883_v25, 6  ;;  %v3888_v18 = vrot.slane %v3886_v10, 7  ;;  %v3893_v39 = vshrl.u32 %v11656_v24, 16  ;;  %v3896_v14 = vshll.u32 %v11656_v24, 16 }
 0x437   :  { %5495 = vmatmul.mubr.bf16.gmra.mrb[144].mxu0 %v15532_v9  ;;  %v3471_v36 = vmul.f32 %v13633_v58, %v3435_v1  ;;  %v3436_v32 = vmax.f32 %v3392_v3, 0.0  ;;  %v4291_v45 = vor.u32 %v15592_v42, %v4287_v29  ;;  %v4752_v10 = vsel %vm1879_vm9, %v4749_v19, %v4751_v51  ;;  %v4057_v42 = vld [vmem:[#allocation3] sm:$0xe] }
 0x438   :  { %v3889_v59 = vor.u32 %v3888_v18, %v3885_v40  ;;  %v3895_v12 = vrot.slane %v3893_v39, 6  ;;  %v3898_v63 = vrot.slane %v3896_v14, 7  ;;  %v3219_v7 = vpop.f32.mrb[44].mxu1  ;;  %12257 = vmatmul.mubr.bf16.gmra.mrb[92].mxu1 %v4752_v10  ;;  %v4295_v29 = vrot.slane %v15600_v52, 1  ;;  %v18894_v39 = vld [vmem:[#allocation65_spill] sm:$0xff] }
 0x439   :  { %v11657_v13 = vpack.c.bf16 %v3471_v36, %v3471_v36  ;;  %v3472_v11 = vmul.f32 %v13634_v2, %v3436_v32  ;;  %v12454_v34 = vadd.f32 %v15460_v49, %v3219_v7  ;;  %v3221_v25 = vpop.f32.mrb[45].mxu1 }
 0x43a   :  { %v3890_v24 = vsel %vm13992_vm7, %v3881_v60, %v3889_v59  ;;  %v3891_v31 = vrot.slane %v3889_v59, 4  ;;  %v3899_v1 = vor.u32 %v3898_v63, %v3895_v12  ;;  %v3222_v41 = vpop.f32.mrb[46].mxu1  ;;  %v4296_v32 = vsel %vm1327_vm8, %v4291_v45, %v4295_v29 }
 0x43b   :  { %4011 = vst [vmem:[#allocation3 + $0x80] sm:$0xf] %v3890_v24  ;;  %v3903_v3 = vshrl.u32 %v11657_v13, 16  ;;  %v3906_v40 = vshll.u32 %v11657_v13, 16  ;;  %v11658_v18 = vpack.c.bf16 %v3472_v11, %v3472_v11  ;;  %v3397_v14 = vadd.f32 %v12454_v34, %v18894_v39  ;;  %v3224_v58 = vpop.f32.mrb[47].mxu1  ;;  %v15612_v36 = vld [vmem:[#allocation3 + $0x78] sm:$0xff]   ;;  %5502 = vmatprep.mubr.bf16.mxu0 %v4296_v32 }
 0x43c   :  { %v3900_v19 = vsel %vm13992_vm7, %v3891_v31, %v3899_v1  ;;  %v12455_v60 = vadd.f32 %v15460_v49, %v3222_v41  ;;  %v15619_v59 = vshrl.u32 %v15588_v38, 16  ;;  %v3901_v2 = vrot.slane %v3899_v1, 4  ;;  %v18895_v34 = vld [vmem:[#allocation67_spill] sm:$0xff]  ;;  %v13636_v32 = vld [vmem:[%s18660_s1 + $0x118] sm:$0xff] }
 0x43d   :  { %4012 = vst [vmem:[#allocation3 + $0x84] sm:$0xf] %v3900_v19  ;;  %v3905_v12 = vrot.slane %v3903_v3, 6  ;;  %v3908_v63 = vrot.slane %v3906_v40, 7  ;;  %v3913_v7 = vshrl.u32 %v11658_v18, 16  ;;  %v3916_v13 = vshll.u32 %v11658_v18, 16 }
 0x43e   :  { %v3437_v11 = vmax.f32 %v3397_v14, 0.0  ;;  %v3400_v25 = vadd.f32 %v12455_v60, %v18895_v34  ;;  %v4753_v10 = vrot.slane %v15612_v36, 3  ;;  %v15625_v31 = vshll.u32 %v15612_v36, 16  ;;  %v13635_v41 = vld [vmem:[%s18660_s1 + $0x110] sm:$0xff] }
 0x43f   :  { %5503 = vmatmul.mubr.bf16.gmra.mrb[148].mxu0 %v15556_v28  ;;  %v3909_v49 = vor.u32 %v3908_v63, %v3905_v12  ;;  %v3915_v24 = vrot.slane %v3913_v7, 6  ;;  %v3918_v45 = vrot.slane %v3916_v13, 7  ;;  %v4299_v18 = vor.u32 %v15619_v59, %v4295_v29 }
 0x440   :  { %v3473_v3 = vmul.f32 %v13635_v41, %v3437_v11  ;;  %v3438_v40 = vmax.f32 %v3400_v25, 0.0  ;;  %v4754_v1 = vsel %vm1879_vm9, %v4751_v51, %v4753_v10  ;;  %v4303_v19 = vrot.slane %v15625_v31, 1 }
 0x441   :  { %v3910_v39 = vsel %vm13992_vm7, %v3901_v2, %v3909_v49  ;;  %v3911_v14 = vrot.slane %v3909_v49, 4  ;;  %v3919_v58 = vor.u32 %v3918_v45, %v3915_v24  ;;  %12260 = vmatprep.mubr.bf16.mxu1 %v4754_v1  ;;  %v15646_v45 = vshrl.u32 %v15612_v36, 16 }
 0x442   :  { %4013 = vst [vmem:[#allocation3 + $0x88] sm:$0xf] %v3910_v39  ;;  %v11659_v60 = vpack.c.bf16 %v3473_v3, %v3473_v3  ;;  %v3474_v12 = vmul.f32 %v13636_v32, %v3438_v40  ;;  %v4304_v29 = vsel %vm1327_vm8, %v4299_v18, %v4303_v19 }
 0x443   :  { %v3920_v51 = vsel %vm13992_vm7, %v3911_v14, %v3919_v58  ;;  %5510 = vmatprep.mubr.bf16.mxu0 %v4304_v29  ;;  %v3921_v3 = vrot.slane %v3919_v58, 4  ;;  %v4307_v14 = vor.u32 %v15646_v45, %v4303_v19  ;;  %v4017_v29 = vld [vmem:[#allocation3 + $0x98] sm:$0x3]  ;;  %v4375_v19 = vrot.slane %v15556_v28, 1 }
 0x444   :  { %4014 = vst [vmem:[#allocation3 + $0x8c] sm:$0xf] %v3920_v51  ;;  %v3923_v63 = vshrl.u32 %v11659_v60, 16  ;;  %v3926_v7 = vshll.u32 %v11659_v60, 16  ;;  %v11660_v13 = vpack.c.bf16 %v3474_v12, %v3474_v12  ;;  %v15641_v2 = vld [vmem:[#allocation3 + $0x80] sm:$0xff]  }
 0x445   :  { %v4755_v24 = vrot.slane %v15641_v2, 3  ;;  %v15649_v41 = vshll.u32 %v15641_v2, 16 }
 0x446   :  { %v3925_v11 = vrot.slane %v3923_v63, 6  ;;  %v3928_v34 = vrot.slane %v3926_v7, 7  ;;  %v3933_v25 = vshrl.u32 %v11660_v13, 16  ;;  %v3936_v49 = vshll.u32 %v11660_v13, 16 }
 0x447   :  { %5511 = vmatmul.mubr.bf16.gmra.mrb[152].mxu0 %v15588_v38  ;;  %v4756_v39 = vsel %vm1879_vm9, %v4753_v10, %v4755_v24  ;;  %v4311_v60 = vrot.slane %v15649_v41, 1  ;;  %v4437_v63 = vrot.slane %v4197_v33, 2  ;;  %v15662_v10 = vshrl.u32 %v15641_v2, 16 }
 0x448   :  { %v3929_v40 = vor.u32 %v3928_v34, %v3925_v11  ;;  %v3935_v1 = vrot.slane %v3933_v25, 6  ;;  %v3938_v18 = vrot.slane %v3936_v49, 7  ;;  %12261 = vmatmul.mubr.bf16.gmra.mrb[96].mxu1 %v4756_v39  ;;  %v18690_v34 = vrot.slane %v15532_v9, 1 }
 0x449   :  { %v4312_v58 = vsel %vm1327_vm8, %v4307_v14, %v4311_v60  ;;  %v4377_v25 = vrot.slane %v15588_v38, 1  ;;  %v4436_v33 = vrot.slane %v4201_v15, 1  ;;  %v4379_v39 = vrot.slane %v15612_v36, 1 }
 0x44a   :  { %v3930_v32 = vsel %vm13992_vm7, %v3921_v3, %v3929_v40  ;;  %v3931_v12 = vrot.slane %v3929_v40, 4  ;;  %v3939_v51 = vor.u32 %v3938_v18, %v3935_v1  ;;  %5518 = vmatprep.mubr.bf16.mxu0 %v4312_v58  ;;  %v4315_v3 = vor.u32 %v15662_v10, %v4311_v60 }
 0x44b   :  { %4015 = vst [vmem:[#allocation3 + $0x90] sm:$0xf] %v3930_v32  ;;  %v15659_v7 = vld [vmem:[#allocation3 + $0x88] sm:$0xff]   ;;  %v15682_v18 = vsel %vm1497_vm11, %v18690_v34, %v4375_v19  ;;  %v15685_v15 = vsel %vm1497_vm11, %v4375_v19, %v4377_v25  ;;  %v4381_v32 = vrot.slane %v15641_v2, 1 }
 0x44c   :  { %v3940_v13 = vsel %vm13992_vm7, %v3931_v12, %v3939_v51  ;;  %v3941_v11 = vrot.slane %v3939_v51, 4  ;;  %v4757_v49 = vrot.slane %v15659_v7, 3  ;;  %v15674_v40 = vshll.u32 %v15659_v7, 16 }
 0x44d   :  { %4016 = vst [vmem:[#allocation3 + $0x94] sm:$0xf] %v3940_v13  ;;  %v4383_v12 = vrot.slane %v15659_v7, 1  ;;  %v15693_v51 = vsel %vm1497_vm11, %v4377_v25, %v4379_v39  ;;  %v15697_v58 = vsel %vm1497_vm11, %v4379_v39, %v4381_v32  ;;  %v15702_v13 = vor.u32 %v4437_v63, %v4436_v33 }
 0x44e   :  { %v4018_v1 = vsel %vm13923_vm2, %v3941_v11, %v4017_v29  ;;  %v4758_v14 = vsel %vm1879_vm9, %v4755_v24, %v4757_v49  ;;  %v4319_v60 = vrot.slane %v15674_v40, 1  ;;  %v15705_v11 = vshrl.u32 %v15659_v7, 16 }
 0x44f   :  { %5519 = vmatmul.mubr.bf16.gmra.mrb[156].mxu0 %v15612_v36  ;;  %4019 = vst [vmem:[#allocation3 + $0x98] sm:$0x3] %v4018_v1  ;;  %12264 = vmatprep.mubr.bf16.mxu1 %v4758_v14  ;;  %v15700_v19 = vsel %vm1497_vm11, %v4381_v32, %v4383_v12  ;;  %v4570_v16 = vrot.slane %v15659_v7, 2  ;;  %v4497_v23 = vrot.slane %v15674_v40, 2 }
 0x450   :  { %v4320_v29 = vsel %vm1327_vm8, %v4315_v3, %v4319_v60  ;;  %v4323_v34 = vor.u32 %v15705_v11, %v4319_v60  ;;  %v4058_v3 = vld [vmem:[#allocation3 + $0x8] sm:$0xe] }
 0x451   :  { %5526 = vmatprep.mubr.bf16.mxu0 %v4320_v29  ;;  %v15718_v29 = vld [vmem:[#allocation3 + $0xc] sm:$0xf] }
 0x452   :  { %v13344_v24 = vld [vmem:[#allocation3 + $0x90] ss:$0 sps:$4 sm:$0x11]   ;;  %v15721_v27 = vcombine.low %v4058_v3, %v15718_v29  ;;  %v4353_v3 = vrot.slane %v15181_v17, 1 }
 0x453   :  { %v4325_v1 = vshll.u32 %v13344_v24, 16  ;;  %v4385_v25 = vrot.slane %v13344_v24, 1 }
 0x454   :  { %v15707_v14 = vld [vmem:[#allocation3 + $0x90] sm:$0xff]  }
 0x455   :  { %v4327_v39 = vrot.slane %v4325_v1, 1  ;;  %v4759_v32 = vrot.slane %v15707_v14, 3  ;;  %v18702_v63 = vrot.slane %v15707_v14, 1  ;;  %v15716_v33 = vsel %vm1497_vm11, %v4383_v12, %v4385_v25 }
 0x456   :  { %v15712_v62 = vld [vmem:[#allocation3 + $0x98] sm:$0xff]   ;;  %v15795_v61 = vrot.slane %v15707_v14, 2 }
 0x457   :  { %5527 = vmatmul.mubr.bf16.gmra.mrb[160].mxu0 %v15641_v2  ;;  %18896 = vst [vmem:[#allocation20_spill] sm:$0xff] %v15712_v62  ;;  %v4328_v60 = vsel %vm1327_vm8, %v4323_v34, %v4327_v39  ;;  %v4760_v24 = vsel %vm1879_vm9, %v4757_v49, %v4759_v32  ;;  %v4761_v1 = vrot.slane %v15712_v62, 3  ;;  %v15731_v46 = vsel %vm1497_vm11, %v4383_v12, %v18702_v63  ;;  %v13638_v39 = vld [vmem:[#allocation3 + $0x4] sm:$0xf]  ;;  %v13351_v63 = vld [vmem:[%s18666_s7 + $0x100] sm:$0xff]  }
 0x458   :  { %5534 = vmatprep.mubr.bf16.mxu0 %v4328_v60  ;;  %12265 = vmatmul.mubr.bf16.gmra.mrb[100].mxu1 %v4760_v24  ;;  %v4416_v34 = vrot.slane %v15721_v27, 1  ;;  %v4763_v49 = vrot.slane %v15726_v50, 3  ;;  %v11254_v54 = vcombine.low %v4057_v42, %v13638_v39  ;;  %v15741_v24 = vld [vmem:[#allocation3 + $0x18] sm:$0xff]   ;;  %v18703_v39 = vrot.slane %v15532_v9, 2 }
 0x459   :  { %v4762_v25 = vsel %vm1879_vm9, %v4759_v32, %v4761_v1  ;;  %v4351_v32 = vrot.slane %v15152_v20, 1  ;;  %v13352_v20 = vld [vmem:[%s18666_s7 + $0x108] sm:$0xff]  }
 0x45a   :  { %12268 = vmatprep.mubr.bf16.mxu1 %v4762_v25  ;;  %v4417_v35 = vsel %vm1497_vm11, %v4416_v34, %v4353_v3  ;;  %v4764_v12 = vsel %vm1879_vm9, %v4761_v1, %v4763_v49  ;;  %v4350_v60 = vrot.slane %v11254_v54, 1  ;;  %v4355_v25 = vrot.slane %v15741_v24, 1 }
 0x45b   :  { %v4564_v34 = vrot.slane %v15588_v38, 2  ;;  %v4485_v49 = vrot.slane %v15600_v52, 2  ;;  %v4489_v38 = vrot.slane %v15625_v31, 2  ;;  %v4354_v22 = vsel %vm1497_vm11, %v4351_v32, %v4353_v3 }
 0x45c   :  { %v4352_v42 = vsel %vm1497_vm11, %v4350_v60, %v4351_v32  ;;  %v4356_v1 = vsel %vm1497_vm11, %v4353_v3, %v4355_v25  ;;  %v4488_v60 = vrot.slane %v15646_v45, 1  ;;  %v4496_v3 = vrot.slane %v15705_v11, 1 }
 0x45f   :  { %5535 = vmatmul.mubr.bf16.gmra.mrb[164].mxu0 %v15659_v7 }
 0x460   :  { %5575 = vmatprep.mubr.bf16.mxu0 %v4417_v35  ;;  %12269 = vmatmul.mubr.bf16.gmra.mrb[104].mxu1 %v4764_v12  ;;  %v4562_v35 = vrot.slane %v15556_v28, 2  ;;  %v4484_v28 = vrot.slane %v15619_v59, 1 }
 0x462   :  { %v15757_v54 = vsel %vm1688_vm13, %v18703_v39, %v4562_v35  ;;  %v15765_v12 = vsel %vm1688_vm13, %v4562_v35, %v4564_v34  ;;  %v4492_v35 = vrot.slane %v15662_v10, 1 }
 0x463   :  { %18898 = vst [vmem:[#allocation22_spill] sm:$0xff] %v15757_v54  ;;  %18899 = vst [vmem:[#allocation34_spill] sm:$0xff] %v15765_v12  ;;  %v4568_v54 = vrot.slane %v15641_v2, 2  ;;  %v4493_v12 = vrot.slane %v15649_v41, 2 }
 0x465   :  { %v4494_v32 = vor.u32 %v4493_v12, %v4492_v35 }
 0x467   :  { %5576 = vmatmul.mubr.bf16.vlgmr.msra.gmra.mrb[96].mxu0 %v4352_v42  ;;  %v15768_v42 = vld [vmem:[#allocation3 + $0x20] sm:$0xff]  }
 0x468   :  { %5721 = vmatpush1.bf16.msra.mxu0 %v13351_v63  ;;  %5583 = vmatprep.mubr.bf16.mxu0 %v4356_v1  ;;  %v4566_v63 = vrot.slane %v15612_v36, 2  ;;  %v4357_v39 = vrot.slane %v15768_v42, 1  ;;  %v13353_v36 = vld [vmem:[%s18666_s7 + $0x110] sm:$0xff]  }
 0x469   :  { %5722 = vmatprep.subr.bf16.mxu0 %v18774_v56 }
 0x46a   :  { %v15772_v50 = vsel %vm1688_vm13, %v4564_v34, %v4566_v63  ;;  %v15784_v34 = vor.u32 %v4485_v49, %v4484_v28  ;;  %v15787_v2 = vsel %vm1688_vm13, %v4566_v63, %v4568_v54  ;;  %v4358_v7 = vsel %vm1497_vm11, %v4355_v25, %v4357_v39 }
 0x46b   :  { %18900 = vst [vmem:[#allocation36_spill] sm:$0xff] %v15772_v50  ;;  %v4490_v50 = vor.u32 %v4489_v38, %v4488_v60  ;;  %18901 = vst [vmem:[#allocation23_spill] sm:$0xff] %v15787_v2  ;;  %v4501_v49 = vshrl.u32 %v15707_v14, 16  ;;  %v4504_v63 = vshll.u32 %v15707_v14, 16  ;;  %v15812_v25 = vsel %vm1688_vm13, %v4570_v16, %v15795_v61 }
 0x46c   :  { %5723 = vmatpush1.bf16.msra.mxu0 %v13352_v20  ;;  %v15791_v20 = vsel %vm1688_vm13, %v4568_v54, %v4570_v16  ;;  %v13354_v54 = vld [vmem:[%s18666_s7 + $0x118] sm:$0xff]   ;;  %18903 = vst [vmem:[#allocation33_spill] sm:$0xff] %v15812_v25 }
 0x46d   :  { %5724 = vmatprep.subr.bf16.mxu0 %v18774_v56  ;;  %18902 = vst [vmem:[#allocation24_spill] sm:$0xff] %v15791_v20  ;;  %v15800_v28 = vsel %vm1576_vm10, %v15784_v34, %v4490_v50  ;;  %v15808_v12 = vsel %vm1576_vm10, %v4490_v50, %v4494_v32  ;;  %v4503_v60 = vrot.slane %v4501_v49, 1  ;;  %v4506_v38 = vrot.slane %v4504_v63, 2  ;;  %v13355_v50 = vld [vmem:[%s18666_s7 + $0x120] sm:$0xff]  }
 0x46f   :  { %5584 = vmatmul.mubr.bf16.gmra.mrb[100].mxu0 %v4354_v22  ;;  %v4498_v22 = vor.u32 %v4497_v23, %v4496_v3  ;;  %v15821_v2 = vor.u32 %v4506_v38, %v4503_v60  ;;  %v13356_v3 = vld [vmem:[%s18666_s7 + $0x128] sm:$0xff]   ;;  %v4670_v60 = vrot.slane %v15600_v52, 3  ;;  %v13358_v38 = vld [vmem:[%s18666_s7 + $0x138] sm:$0xff]   ;;  %v4681_v52 = vrot.slane %v15705_v11, 2 }
 0x470   :  { %5591 = vmatprep.mubr.bf16.mxu0 %v4358_v7  ;;  %5725 = vmatpush1.bf16.msra.mxu0 %v13353_v36  ;;  %v15818_v36 = vld [vmem:[#allocation3 + $0x28] sm:$0xff]   ;;  %v4690_v11 = vshrl.u32 %v15712_v62, 16 }
 0x471   :  { %5726 = vmatprep.subr.bf16.mxu0 %v18774_v56  ;;  %v15816_v35 = vsel %vm1576_vm10, %v4494_v32, %v4498_v22  ;;  %v4359_v20 = vrot.slane %v15818_v36, 1  ;;  %18905 = vst [vmem:[#allocation25_spill] sm:$0xff] %v15821_v2  ;;  %v15829_v23 = vsel %vm1576_vm10, %v4498_v22, %v15821_v2  ;;  %v15836_v32 = vld [vmem:[#allocation3 + $0x30] sm:$0xff]   ;;  %v13357_v22 = vld [vmem:[%s18666_s7 + $0x130] sm:$0xff]  }
 0x472   :  { %18904 = vst [vmem:[#allocation35_spill] sm:$0xff] %v15816_v35  ;;  %18906 = vst [vmem:[#allocation26_spill] sm:$0xff] %v15829_v23  ;;  %v15858_v23 = vld [vmem:[#allocation3 + $0x38] sm:$0xff]   ;;  %v4685_v35 = vrot.slane %v4501_v49, 2 }
 0x473   :  { %v4360_v16 = vsel %vm1497_vm11, %v4357_v39, %v4359_v20  ;;  %v4363_v25 = vrot.slane %v15858_v23, 1 }
 0x474   :  { %5727 = vmatpush1.bf16.msra.mxu0 %v13354_v54  ;;  %v4361_v54 = vrot.slane %v15836_v32, 1 }
 0x475   :  { %5728 = vmatprep.subr.bf16.mxu0 %v18774_v56 }
 0x476   :  { %v4362_v39 = vsel %vm1497_vm11, %v4359_v20, %v4361_v54  ;;  %v4678_v20 = vrot.slane %v15649_v41, 3 }
 0x477   :  { %5592 = vmatmul.mubr.bf16.gmra.mrb[104].mxu0 %v4356_v1  ;;  %v4669_v1 = vrot.slane %v15619_v59, 2 }
 0x478   :  { %5599 = vmatprep.mubr.bf16.mxu0 %v4360_v16  ;;  %5729 = vmatpush1.bf16.msra.mxu0 %v13355_v50  ;;  %v4673_v50 = vrot.slane %v15646_v45, 2 }
 0x479   :  { %5730 = vmatprep.subr.bf16.mxu0 %v18774_v56  ;;  %v15854_v2 = vor.u32 %v4670_v60, %v4669_v1 }
 0x47c   :  { %5731 = vmatpush1.bf16.msra.mxu0 %v13356_v3  ;;  %v4674_v3 = vrot.slane %v15625_v31, 3  ;;  %v4686_v31 = vrot.slane %v4504_v63, 3  ;;  %v18721_v63 = vrot.slane %v15712_v62, 2 }
 0x47d   :  { %5732 = vmatprep.subr.bf16.mxu0 %v18774_v56 }
 0x47e   :  { %v4675_v59 = vor.u32 %v4674_v3, %v4673_v50  ;;  %v4687_v49 = vor.u32 %v4686_v31, %v4685_v35  ;;  %v4692_v50 = vrot.slane %v4690_v11, 2  ;;  %v13360_v35 = vld [vmem:[%s18666_s7 + $0x148] sm:$0xff]  }
 0x47f   :  { %5600 = vmatmul.mubr.bf16.gmra.mrb[108].mxu0 %v4358_v7  ;;  %v4677_v7 = vrot.slane %v15662_v10, 2  ;;  %v13359_v10 = vld [vmem:[%s18666_s7 + $0x140] sm:$0xff]  }
 0x480   :  { %5607 = vmatprep.mubr.bf16.mxu0 %v4362_v39  ;;  %5733 = vmatpush1.bf16.msra.mxu0 %v13357_v22  ;;  %v4682_v22 = vrot.slane %v15674_v40, 3  ;;  %v15866_v41 = vsel %vm1767_vm12, %v15854_v2, %v4675_v59  ;;  %v4693_v40 = vshll.u32 %v15712_v62, 16 }
 0x481   :  { %5734 = vmatprep.subr.bf16.mxu0 %v18774_v56  ;;  %v4679_v45 = vor.u32 %v4678_v20, %v4677_v7  ;;  %v4364_v7 = vsel %vm1497_vm11, %v4361_v54, %v4363_v25  ;;  %v15898_v54 = vld [vmem:[#allocation3 + $0x40] sm:$0xff]  }
 0x482   :  { %v4683_v1 = vor.u32 %v4682_v22, %v4681_v52  ;;  %v4695_v3 = vrot.slane %v4693_v40, 3  ;;  %v4365_v22 = vrot.slane %v15898_v54, 1  ;;  %v13363_v40 = vld [vmem:[%s18666_s7 + $0x160] sm:$0xff]  }
 0x483   :  { %v15872_v60 = vsel %vm1767_vm12, %v4675_v59, %v4679_v45  ;;  %v15886_v59 = vsel %vm1688_vm13, %v15795_v61, %v18721_v63  ;;  %v4429_v63 = vshrl.u32 %v15721_v27, 16 }
 0x484   :  { %5735 = vmatpush1.bf16.msra.mxu0 %v13358_v38  ;;  %v15876_v38 = vsel %vm1767_vm12, %v4679_v45, %v4683_v1  ;;  %v15880_v20 = vsel %vm1767_vm12, %v4683_v1, %v4687_v49  ;;  %18907 = vst [vmem:[#allocation38_spill] sm:$0xff] %v15886_v59  ;;  %v15891_v52 = vor.u32 %v4695_v3, %v4692_v50  ;;  %v13361_v45 = vld [vmem:[%s18666_s7 + $0x150] sm:$0xff]  }
 0x485   :  { %5736 = vmatprep.subr.bf16.mxu0 %v18774_v56  ;;  %v4366_v31 = vsel %vm1497_vm11, %v4363_v25, %v4365_v22  ;;  %v15910_v1 = vld [vmem:[#allocation3 + $0x48] sm:$0xff]  }
 0x486   :  { %18908 = vst [vmem:[#allocation40_spill] sm:$0xff] %v15891_v52  ;;  %v4367_v11 = vrot.slane %v15910_v1, 1  ;;  %v13365_v50 = vld [vmem:[%s18666_s7 + $0x170] sm:$0xff]  }
 0x487   :  { %5608 = vmatmul.mubr.bf16.gmra.mrb[112].mxu0 %v4360_v16  ;;  %v15896_v16 = vsel %vm1767_vm12, %v4687_v49, %v15891_v52  ;;  %v4369_v49 = vrot.slane %v15474_v4, 1  ;;  %v4371_v4 = vrot.slane %v15500_v5, 1 }
 0x488   :  { %5615 = vmatprep.mubr.bf16.mxu0 %v4364_v7  ;;  %5737 = vmatpush1.bf16.msra.mxu0 %v13359_v10  ;;  %18909 = vst [vmem:[#allocation27_spill] sm:$0xff] %v15896_v16  ;;  %v13362_v10 = vld [vmem:[%s18666_s7 + $0x158] sm:$0xff]   ;;  %v4368_v25 = vsel %vm1497_vm11, %v4365_v22, %v4367_v11  ;;  %v18910_v22 = vrot.slane %v15532_v9, 1 }
 0x489   :  { %5738 = vmatprep.subr.bf16.mxu0 %v18774_v56  ;;  %v4370_v3 = vsel %vm1497_vm11, %v4367_v11, %v4369_v49 }
 0x48c   :  { %5739 = vmatpush1.bf16.msra.mxu0 %v13360_v35  ;;  %v4372_v35 = vsel %vm1497_vm11, %v4369_v49, %v4371_v4 }
 0x48d   :  { %5740 = vmatprep.subr.bf16.mxu0 %v18774_v56 }
 0x48f   :  { %5616 = vmatmul.mubr.bf16.gmra.mrb[116].mxu0 %v4362_v39  ;;  %v13364_v39 = vld [vmem:[%s18666_s7 + $0x168] sm:$0xff]  }
 0x490   :  { %5623 = vmatprep.mubr.bf16.mxu0 %v4366_v31  ;;  %5741 = vmatpush1.bf16.msra.mxu0 %v13361_v45  ;;  %v4374_v45 = vsel %vm1497_vm11, %v4371_v4, %v18910_v22  ;;  %v4063_v22 = vld [vmem:[#allocation3 + $0x8] sm:$0xc] }
 0x491   :  { %5742 = vmatprep.subr.bf16.mxu0 %v18774_v56 }
 0x494   :  { %5743 = vmatpush1.bf16.msra.mxu0 %v13362_v10 }
 0x495   :  { %5744 = vmatprep.subr.bf16.mxu0 %v18774_v56 }
 0x497   :  { %5624 = vmatmul.mubr.bf16.gmra.mrb[120].mxu0 %v4364_v7  ;;  %v13367_v7 = vld [vmem:[%s18666_s7 + $0x178] sm:$0xff]  }
 0x498   :  { %5631 = vmatprep.mubr.bf16.mxu0 %v4368_v25  ;;  %5745 = vmatpush1.bf16.msra.mxu0 %v13363_v40 }
 0x499   :  { %5746 = vmatprep.subr.bf16.mxu0 %v18774_v56 }
 0x49c   :  { %5747 = vmatpush1.bf16.msra.mxu0 %v13364_v39 }
 0x49d   :  { %5748 = vmatprep.subr.bf16.mxu0 %v18774_v56 }
 0x49f   :  { %5632 = vmatmul.mubr.bf16.gmra.mrb[124].mxu0 %v4366_v31 }
 0x4a0   :  { %5639 = vmatprep.mubr.bf16.mxu0 %v4370_v3  ;;  %5749 = vmatpush1.bf16.msra.mxu0 %v13365_v50 }
 0x4a1   :  { %5750 = vmatprep.subr.bf16.mxu0 %v18774_v56 }
 0x4a4   :  { %5751 = vmatpush1.bf16.msra.mxu0 %v13367_v7 }
 0x4a5   :  { %5897 = vmatprep.subr.bf16.mxu0 %v18774_v56 }
 0x4a7   :  { %5640 = vmatmul.mubr.bf16.gmra.mrb[128].mxu0 %v4368_v25 }
 0x4a8   :  { %5647 = vmatprep.mubr.bf16.mxu0 %v4372_v35 }
 0x4af   :  { %5648 = vmatmul.mubr.bf16.gmra.mrb[132].mxu0 %v4370_v3  ;;  %v13366_v3 = vld [vmem:[#allocation3 + $0x98] ss:$0 sps:$4 sm:$0x11]  }
 0x4b0   :  { %5655 = vmatprep.mubr.bf16.mxu0 %v4374_v45  ;;  %v4420_v4 = vrot.slane %v13366_v3, 1 }
 0x4b7   :  { %5656 = vmatmul.mubr.bf16.gmra.mrb[136].mxu0 %v4372_v35 }
 0x4b8   :  { %5663 = vmatprep.mubr.bf16.mxu0 %v15682_v18 }
 0x4bb   :  { %v15939_v31 = vpop.f32.mrb[72].mxu1 }
 0x4bc   :  { %18911 = vst [vmem:[#allocation28_spill] sm:$0xff] %v15939_v31  ;;  %v15941_v5 = vpop.f32.mrb[73].mxu1 }
 0x4bd   :  { %18912 = vst [vmem:[#allocation29_spill] sm:$0xff] %v15941_v5  ;;  %v15944_v10 = vpop.f32.mrb[74].mxu1  ;;  %v4625_v5 = vrot.slane %v15248_v47, 2 }
 0x4be   :  { %18913 = vst [vmem:[#allocation37_spill] sm:$0xff] %v15944_v10  ;;  %v15946_v11 = vpop.f32.mrb[75].mxu1 }
 0x4bf   :  { %5664 = vmatmul.mubr.bf16.gmra.mrb[140].mxu0 %v4374_v45  ;;  %18914 = vst [vmem:[#allocation39_spill] sm:$0xff] %v15946_v11  ;;  %v4540_v45 = vrot.slane %v15181_v17, 2  ;;  %v15991_v17 = vrot.slane %v15741_v24, 2  ;;  %v13370_v24 = vld [vmem:[%s18666_s7 + $0x188] sm:$0xff]  }
 0x4c0   :  { %5671 = vmatprep.mubr.bf16.mxu0 %v15685_v15  ;;  %v18964_v11 = vld [vmem:[#allocation26_spill] sm:$0xff] }
 0x4c7   :  { %5672 = vmatmul.mubr.bf16.gmra.mrb[144].mxu0 %v15682_v18 }
 0x4c8   :  { %5679 = vmatprep.mubr.bf16.mxu0 %v15693_v51 }
 0x4cb   :  { %v15950_v40 = vpop.f32.mrb[76].mxu1 }
 0x4cc   :  { %18915 = vst [vmem:[#allocation30_spill] sm:$0xff] %v15950_v40  ;;  %v15953_v25 = vpop.f32.mrb[77].mxu1  ;;  %v18955_v40 = vld [vmem:[#allocation18_spill] sm:$0xff] }
 0x4cd   :  { %18916 = vst [vmem:[#allocation42_spill] sm:$0xff] %v15953_v25  ;;  %v15956_v39 = vpop.f32.mrb[78].mxu1 }
 0x4ce   :  { %18917 = vst [vmem:[#allocation31_spill] sm:$0xff] %v15956_v39  ;;  %v15958_v49 = vpop.f32.mrb[79].mxu1  ;;  %v18954_v39 = vrot.slane %v15532_v9, 2  ;;  %v18958_v9 = vld [vmem:[#allocation34_spill] sm:$0xff] }
 0x4cf   :  { %5680 = vmatmul.mubr.bf16.gmra.mrb[148].mxu0 %v15685_v15  ;;  %18918 = vst [vmem:[#allocation32_spill] sm:$0xff] %v15958_v49 }
 0x4d0   :  { %5687 = vmatprep.mubr.bf16.mxu0 %v15697_v58 }
 0x4d7   :  { %5688 = vmatmul.mubr.bf16.gmra.mrb[152].mxu0 %v15693_v51  ;;  %v18923_v51 = vrot.slane %v15707_v14, 1 }
 0x4d8   :  { %5695 = vmatprep.mubr.bf16.mxu0 %v15700_v19 }
 0x4d9   :  { %v4421_v35 = vsel %vm1497_vm11, %v18923_v51, %v4420_v4  ;;  %v4431_v4 = vrot.slane %v4429_v63, 1  ;;  %v4543_v63 = vsel %vm1688_vm13, %v4540_v45, %v15991_v17 }
 0x4db   :  { %v15962_v50 = vpop.f32.mrb[80].mxu1 }
 0x4dc   :  { %18919 = vst [vmem:[#allocation44_spill] sm:$0xff] %v15962_v50  ;;  %v15965_v18 = vpop.f32.mrb[81].mxu1 }
 0x4dd   :  { %18920 = vst [vmem:[#allocation41_spill] sm:$0xff] %v15965_v18  ;;  %v15968_v15 = vpop.f32.mrb[82].mxu1 }
 0x4de   :  { %18921 = vst [vmem:[#allocation43_spill] sm:$0xff] %v15968_v15  ;;  %v15970_v7 = vpop.f32.mrb[83].mxu1 }
 0x4df   :  { %5696 = vmatmul.mubr.bf16.gmra.mrb[156].mxu0 %v15697_v58  ;;  %18922 = vst [vmem:[#allocation46_spill] sm:$0xff] %v15970_v7  ;;  %v11259_v58 = vcombine.low %v4063_v22, %v15718_v29  ;;  %v4441_v22 = vrot.slane %v15217_v21, 2 }
 0x4e0   :  { %5703 = vmatprep.mubr.bf16.mxu0 %v15731_v46  ;;  %v4432_v46 = vshll.u32 %v15721_v27, 16 }
 0x4e1   :  { %v4539_v15 = vrot.slane %v11259_v58, 2 }
 0x4e2   :  { %v4434_v29 = vrot.slane %v4432_v46, 2  ;;  %v4544_v46 = vrot.slane %v15768_v42, 2 }
 0x4e4   :  { %v4435_v27 = vor.u32 %v4434_v29, %v4431_v4  ;;  %v4444_v29 = vrot.slane %v15301_v0, 1  ;;  %v16019_v42 = vsel %vm1688_vm13, %v15991_v17, %v4544_v46 }
 0x4e7   :  { %5704 = vmatmul.mubr.bf16.gmra.mrb[160].mxu0 %v15700_v19  ;;  %v4541_v19 = vsel %vm1688_vm13, %v4539_v15, %v4540_v45  ;;  %v4440_v15 = vrot.slane %v15248_v47, 1 }
 0x4e8   :  { %5711 = vmatprep.mubr.bf16.mxu0 %v4421_v35  ;;  %v13369_v35 = vld [vmem:[%s18666_s7 + $0x180] sm:$0xff]  }
 0x4e9   :  { %v4442_v58 = vor.u32 %v4441_v22, %v4440_v15 }
 0x4eb   :  { %v15980_v50 = vpop.f32.mrb[84].mxu1  ;;  %v4443_v45 = vsel %vm1576_vm10, %v15702_v13, %v4442_v58 }
 0x4ec   :  { %18924 = vst [vmem:[#allocation48_spill] sm:$0xff] %v15980_v50  ;;  %v15984_v14 = vpop.f32.mrb[85].mxu1 }
 0x4ed   :  { %18925 = vst [vmem:[#allocation45_spill] sm:$0xff] %v15984_v14  ;;  %v15986_v3 = vpop.f32.mrb[86].mxu1 }
 0x4ee   :  { %18926 = vst [vmem:[#allocation47_spill] sm:$0xff] %v15986_v3  ;;  %v15988_v51 = vpop.f32.mrb[87].mxu1  ;;  %v18943_v3 = vld [vmem:[#allocation12_spill] sm:$0xff] }
 0x4ef   :  { %5712 = vmatmul.mubr.bf16.gmra.mrb[164].mxu0 %v15716_v33  ;;  %18927 = vst [vmem:[#allocation50_spill] sm:$0xff] %v15988_v51  ;;  %v4439_v33 = vsel %vm1576_vm10, %v4435_v27, %v15702_v13  ;;  %v4445_v27 = vrot.slane %v15260_v44, 2  ;;  %v13372_v13 = vld [vmem:[%s18666_s7 + $0x198] sm:$0xff]   ;;  %v4469_v50 = vrot.slane %v18943_v3, 2  ;;  %v18948_v51 = vld [vmem:[#allocation15_spill] sm:$0xff] }
 0x4f0   :  { %5752 = vmatprep.mubr.bf16.mxu0 %v4541_v19  ;;  %v13371_v19 = vld [vmem:[%s18666_s7 + $0x190] sm:$0xff]   ;;  %v4472_v14 = vrot.slane %v18948_v51, 1 }
 0x4f1   :  { %v4446_v22 = vor.u32 %v4445_v27, %v4444_v29  ;;  %v13375_v27 = vld [vmem:[%s18666_s7 + $0x1b0] sm:$0xff]  }
 0x4f7   :  { %5753 = vmatmul.mubr.bf16.vlgmr.msra.gmra.mrb[96].mxu0 %v4439_v33 }
 0x4f8   :  { %5898 = vmatpush1.bf16.msra.mxu0 %v13369_v35  ;;  %5760 = vmatprep.mubr.bf16.mxu0 %v4543_v63  ;;  %v4546_v63 = vrot.slane %v15818_v36, 2  ;;  %v13374_v36 = vld [vmem:[%s18666_s7 + $0x1a8] sm:$0xff]  }
 0x4f9   :  { %5899 = vmatprep.subr.bf16.mxu0 %v18774_v56 }
 0x4fb   :  { %v16013_v4 = vpop.f32.mrb[88].mxu1 }
 0x4fc   :  { %5900 = vmatpush1.bf16.msra.mxu0 %v13370_v24  ;;  %18928 = vst [vmem:[#allocation52_spill] sm:$0xff] %v16013_v4  ;;  %v16021_v35 = vpop.f32.mrb[89].mxu1  ;;  %v13373_v24 = vld [vmem:[%s18666_s7 + $0x1a0] sm:$0xff]   ;;  %v16041_v4 = vsel %vm1688_vm13, %v4544_v46, %v4546_v63 }
 0x4fd   :  { %5901 = vmatprep.subr.bf16.mxu0 %v18774_v56  ;;  %18929 = vst [vmem:[#allocation49_spill] sm:$0xff] %v16021_v35  ;;  %v16024_v33 = vpop.f32.mrb[90].mxu1 }
 0x4fe   :  { %18930 = vst [vmem:[#allocation51_spill] sm:$0xff] %v16024_v33  ;;  %v16029_v15 = vpop.f32.mrb[91].mxu1  ;;  %v4449_v33 = vrot.slane %v15292_v43, 2 }
 0x4ff   :  { %5761 = vmatmul.mubr.bf16.gmra.mrb[100].mxu0 %v4443_v45  ;;  %18931 = vst [vmem:[#allocation54_spill] sm:$0xff] %v16029_v15  ;;  %v4448_v45 = vrot.slane %v15324_v6, 1  ;;  %v18942_v15 = vld [vmem:[#allocation13_spill] sm:$0xff] }
 0x500   :  { %5768 = vmatprep.mubr.bf16.mxu0 %v16019_v42  ;;  %5902 = vmatpush1.bf16.msra.mxu0 %v13371_v19  ;;  %v4447_v19 = vsel %vm1576_vm10, %v4442_v58, %v4446_v22  ;;  %v4548_v58 = vrot.slane %v15836_v32, 2  ;;  %v4468_v35 = vrot.slane %v18942_v15, 1 }
 0x501   :  { %5903 = vmatprep.subr.bf16.mxu0 %v18774_v56  ;;  %v4450_v29 = vor.u32 %v4449_v33, %v4448_v45 }
 0x502   :  { %v16059_v33 = vsel %vm1688_vm13, %v4546_v63, %v4548_v58  ;;  %v13377_v63 = vld [vmem:[%s18666_s7 + $0x1c0] sm:$0xff]  }
 0x503   :  { %v4451_v46 = vsel %vm1576_vm10, %v4446_v22, %v4450_v29  ;;  %v13376_v22 = vld [vmem:[%s18666_s7 + $0x1b8] sm:$0xff]  }
 0x504   :  { %5904 = vmatpush1.bf16.msra.mxu0 %v13372_v13 }
 0x505   :  { %5905 = vmatprep.subr.bf16.mxu0 %v18774_v56 }
 0x507   :  { %5769 = vmatmul.mubr.bf16.gmra.mrb[104].mxu0 %v4447_v19  ;;  %v4453_v19 = vrot.slane %v15336_v26, 2 }
 0x508   :  { %5776 = vmatprep.mubr.bf16.mxu0 %v16041_v4  ;;  %5906 = vmatpush1.bf16.msra.mxu0 %v13373_v24  ;;  %v4452_v24 = vrot.slane %v15377_v30, 1 }
 0x509   :  { %5907 = vmatprep.subr.bf16.mxu0 %v18774_v56 }
 0x50b   :  { %v16054_v13 = vpop.f32.mrb[92].mxu1 }
 0x50c   :  { %5908 = vmatpush1.bf16.msra.mxu0 %v13374_v36  ;;  %18932 = vst [vmem:[#allocation56_spill] sm:$0xff] %v16054_v13  ;;  %v16061_v32 = vpop.f32.mrb[93].mxu1  ;;  %v4454_v13 = vor.u32 %v4453_v19, %v4452_v24  ;;  %v13379_v19 = vld [vmem:[%s18666_s7 + $0x1d0] sm:$0xff]  }
 0x50d   :  { %5909 = vmatprep.subr.bf16.mxu0 %v18774_v56  ;;  %18933 = vst [vmem:[#allocation53_spill] sm:$0xff] %v16061_v32  ;;  %v16064_v45 = vpop.f32.mrb[94].mxu1  ;;  %v4457_v32 = vrot.slane %v15368_v37, 2 }
 0x50e   :  { %18934 = vst [vmem:[#allocation55_spill] sm:$0xff] %v16064_v45  ;;  %v16069_v36 = vpop.f32.mrb[95].mxu1  ;;  %v4456_v45 = vrot.slane %v15400_v8, 1 }
 0x50f   :  { %5777 = vmatmul.mubr.bf16.gmra.mrb[108].mxu0 %v4451_v46  ;;  %18935 = vst [vmem:[#allocation58_spill] sm:$0xff] %v16069_v36  ;;  %v4550_v46 = vrot.slane %v15858_v23, 2  ;;  %v13378_v23 = vld [vmem:[%s18666_s7 + $0x1c8] sm:$0xff]  }
 0x510   :  { %5784 = vmatprep.mubr.bf16.mxu0 %v16059_v33  ;;  %5910 = vmatpush1.bf16.msra.mxu0 %v13375_v27  ;;  %v4455_v27 = vsel %vm1576_vm10, %v4450_v29, %v4454_v13  ;;  %v4458_v24 = vor.u32 %v4457_v32, %v4456_v45  ;;  %v4552_v29 = vrot.slane %v15898_v54, 2 }
 0x511   :  { %5911 = vmatprep.subr.bf16.mxu0 %v18774_v56  ;;  %v16081_v36 = vsel %vm1688_vm13, %v4548_v58, %v4550_v46 }
 0x512   :  { %v4459_v58 = vsel %vm1576_vm10, %v4454_v13, %v4458_v24  ;;  %v16099_v32 = vsel %vm1688_vm13, %v4550_v46, %v4552_v29  ;;  %v13380_v13 = vld [vmem:[%s18666_s7 + $0x1d8] sm:$0xff]   ;;  %v13381_v46 = vld [vmem:[%s18666_s7 + $0x1e0] sm:$0xff]  }
 0x514   :  { %5912 = vmatpush1.bf16.msra.mxu0 %v13376_v22 }
 0x515   :  { %5913 = vmatprep.subr.bf16.mxu0 %v18774_v56 }
 0x517   :  { %5785 = vmatmul.mubr.bf16.gmra.mrb[112].mxu0 %v4455_v27  ;;  %v4461_v27 = vrot.slane %v15412_v53, 2 }
 0x518   :  { %5792 = vmatprep.mubr.bf16.mxu0 %v16081_v36  ;;  %5914 = vmatpush1.bf16.msra.mxu0 %v13377_v63  ;;  %v4460_v63 = vrot.slane %v15453_v48, 1 }
 0x519   :  { %5915 = vmatprep.subr.bf16.mxu0 %v18774_v56 }
 0x51b   :  { %v16094_v22 = vpop.f32.mrb[96].mxu1 }
 0x51c   :  { %5916 = vmatpush1.bf16.msra.mxu0 %v13378_v23  ;;  %18936 = vst [vmem:[#allocation60_spill] sm:$0xff] %v16094_v22  ;;  %v16101_v54 = vpop.f32.mrb[97].mxu1  ;;  %v4462_v22 = vor.u32 %v4461_v27, %v4460_v63  ;;  %v13646_v27 = vld [vmem:[#allocation3 + $0x50] sm:$0xff]  }
 0x51d   :  { %5917 = vmatprep.subr.bf16.mxu0 %v18774_v56  ;;  %18937 = vst [vmem:[#allocation57_spill] sm:$0xff] %v16101_v54  ;;  %v16104_v45 = vpop.f32.mrb[98].mxu1  ;;  %v4465_v54 = vrot.slane %v15444_v57, 2 }
 0x51e   :  { %18938 = vst [vmem:[#allocation59_spill] sm:$0xff] %v16104_v45  ;;  %v16109_v23 = vpop.f32.mrb[99].mxu1  ;;  %v4464_v45 = vrot.slane %v15478_v55, 1 }
 0x51f   :  { %5793 = vmatmul.mubr.bf16.gmra.mrb[116].mxu0 %v4459_v58  ;;  %18939 = vst [vmem:[#allocation62_spill] sm:$0xff] %v16109_v23  ;;  %v4554_v58 = vrot.slane %v15910_v1, 2  ;;  %v13382_v1 = vld [vmem:[%s18666_s7 + $0x1e8] sm:$0xff]  }
 0x520   :  { %5800 = vmatprep.mubr.bf16.mxu0 %v16099_v32  ;;  %5918 = vmatpush1.bf16.msra.mxu0 %v13379_v19  ;;  %v4463_v19 = vsel %vm1576_vm10, %v4458_v24, %v4462_v22  ;;  %v4466_v63 = vor.u32 %v4465_v54, %v4464_v45  ;;  %v4556_v24 = vrot.slane %v13646_v27, 2  ;;  %v4470_v27 = vor.u32 %v4469_v50, %v4468_v35 }
 0x521   :  { %5919 = vmatprep.subr.bf16.mxu0 %v18774_v56  ;;  %v16121_v23 = vsel %vm1688_vm13, %v4552_v29, %v4554_v58 }
 0x522   :  { %v4467_v29 = vsel %vm1576_vm10, %v4462_v22, %v4466_v63  ;;  %v16140_v54 = vsel %vm1688_vm13, %v4554_v58, %v4556_v24  ;;  %v13385_v22 = vld [vmem:[%s18666_s7 + $0x1f8] sm:$0xff]   ;;  %v4471_v58 = vsel %vm1576_vm10, %v4466_v63, %v4470_v27  ;;  %v18952_v63 = vld [vmem:[#allocation19_spill] sm:$0xff] }
 0x524   :  { %5920 = vmatpush1.bf16.msra.mxu0 %v13380_v13  ;;  %v13383_v13 = vld [vmem:[%s18666_s7 + $0x1f0] sm:$0xff]  }
 0x525   :  { %5921 = vmatprep.subr.bf16.mxu0 %v18774_v56 }
 0x527   :  { %5801 = vmatmul.mubr.bf16.gmra.mrb[120].mxu0 %v4463_v19 }
 0x528   :  { %5808 = vmatprep.mubr.bf16.mxu0 %v16121_v23  ;;  %5922 = vmatpush1.bf16.msra.mxu0 %v13381_v46 }
 0x529   :  { %5923 = vmatprep.subr.bf16.mxu0 %v18774_v56 }
 0x52b   :  { %v16131_v19 = vpop.f32.mrb[100].mxu1 }
 0x52c   :  { %5924 = vmatpush1.bf16.msra.mxu0 %v13382_v1  ;;  %18940 = vst [vmem:[#allocation64_spill] sm:$0xff] %v16131_v19  ;;  %v16135_v46 = vpop.f32.mrb[101].mxu1  ;;  %v13647_v19 = vld [vmem:[#allocation3 + $0x58] sm:$0xff]  }
 0x52d   :  { %5925 = vmatprep.subr.bf16.mxu0 %v18774_v56  ;;  %18941 = vst [vmem:[#allocation61_spill] sm:$0xff] %v16135_v46  ;;  %v16142_v45 = vpop.f32.mrb[102].mxu1  ;;  %v4558_v46 = vrot.slane %v13647_v19, 2 }
 0x52e   :  { %18944 = vst [vmem:[#allocation63_spill] sm:$0xff] %v16142_v45  ;;  %v16145_v1 = vpop.f32.mrb[103].mxu1 }
 0x52f   :  { %5809 = vmatmul.mubr.bf16.gmra.mrb[124].mxu0 %v4467_v29  ;;  %18945 = vst [vmem:[#allocation66_spill] sm:$0xff] %v16145_v1  ;;  %v18949_v1 = vld [vmem:[#allocation14_spill] sm:$0xff]  ;;  %v16159_v7 = vsel %vm1688_vm13, %v4556_v24, %v4558_v46 }
 0x530   :  { %5816 = vmatprep.mubr.bf16.mxu0 %v16140_v54  ;;  %5926 = vmatpush1.bf16.msra.mxu0 %v13383_v13  ;;  %v4473_v13 = vrot.slane %v18949_v1, 2 }
 0x531   :  { %5927 = vmatprep.subr.bf16.mxu0 %v18774_v56 }
 0x532   :  { %v4474_v35 = vor.u32 %v4473_v13, %v4472_v14  ;;  %v18956_v14 = vld [vmem:[#allocation17_spill] sm:$0xff] }
 0x533   :  { %v16151_v29 = vpop.f32.mrb[104].mxu1  ;;  %v4481_v13 = vrot.slane %v18956_v14, 2 }
 0x534   :  { %5928 = vmatpush1.bf16.msra.mxu0 %v13385_v22  ;;  %18946 = vst [vmem:[#allocation68_spill] sm:$0xff] %v16151_v29  ;;  %v16154_v45 = vpop.f32.mrb[105].mxu1  ;;  %v4475_v19 = vsel %vm1576_vm10, %v4470_v27, %v4474_v35  ;;  %v4476_v22 = vrot.slane %v18952_v63, 1  ;;  %v18953_v29 = vld [vmem:[#allocation16_spill] sm:$0xff]  ;;  %v18957_v27 = vld [vmem:[#allocation22_spill] sm:$0xff] }
 0x535   :  { %18947 = vst [vmem:[#allocation65_spill] sm:$0xff] %v16154_v45  ;;  %v16161_v18 = vpop.f32.mrb[106].mxu1  ;;  %v4477_v45 = vrot.slane %v18953_v29, 2 }
 0x536   :  { %18950 = vst [vmem:[#allocation67_spill] sm:$0xff] %v16161_v18  ;;  %v16164_v50 = vpop.f32.mrb[107].mxu1 }
 0x537   :  { %5817 = vmatmul.mubr.bf16.gmra.mrb[128].mxu0 %v4471_v58  ;;  %18951 = vst [vmem:[#allocation13_spill] sm:$0xff] %v16164_v50  ;;  %v16172_v58 = vsel %vm1688_vm13, %v4558_v46, %v18954_v39  ;;  %v4478_v24 = vor.u32 %v4477_v45, %v4476_v22  ;;  %v4480_v50 = vrot.slane %v18955_v40, 1  ;;  %v18959_v46 = vld [vmem:[#allocation36_spill] sm:$0xff]  ;;  %v18960_v45 = vld [vmem:[#allocation23_spill] sm:$0xff]  ;;  %v18963_v22 = vld [vmem:[#allocation33_spill] sm:$0xff] }
 0x538   :  { %5824 = vmatprep.mubr.bf16.mxu0 %v16159_v7 }
 0x539   :  { %v4479_v18 = vsel %vm1576_vm10, %v4474_v35, %v4478_v24  ;;  %v4482_v49 = vor.u32 %v4481_v13, %v4480_v50  ;;  %v13384_v50 = vld [vmem:[#allocation3 + $0x98] ss:$0 sps:$4 sm:$0x33]   ;;  %v18962_v35 = vld [vmem:[#allocation35_spill] sm:$0xff]  ;;  %v13648_v13 = vld [vmem:[#allocation3 + $0x14] sm:$0xf] }
 0x53b   :  { %v4487_v39 = vsel %vm1576_vm10, %v4482_v49, %v15784_v34  ;;  %v4510_v34 = vshrl.u32 %v13384_v50, 16 }
 0x53f   :  { %5825 = vmatmul.mubr.bf16.gmra.mrb[132].mxu0 %v4475_v19  ;;  %v4483_v19 = vsel %vm1576_vm10, %v4478_v24, %v4482_v49  ;;  %v4064_v24 = vld [vmem:[#allocation3 + $0x10] sm:$0xc]  ;;  %v4513_v49 = vshll.u32 %v13384_v50, 16 }
 0x540   :  { %5832 = vmatprep.mubr.bf16.mxu0 %v16172_v58 }
 0x541   :  { %v4515_v31 = vrot.slane %v4513_v49, 2 }
 0x547   :  { %5833 = vmatmul.mubr.bf16.gmra.mrb[136].mxu0 %v4479_v18  ;;  %v18961_v18 = vld [vmem:[#allocation24_spill] sm:$0xff] }
 0x548   :  { %5840 = vmatprep.mubr.bf16.mxu0 %v18957_v27 }
 0x54f   :  { %5841 = vmatmul.mubr.bf16.gmra.mrb[140].mxu0 %v4483_v19  ;;  %v11260_v19 = vcombine.low %v4064_v24, %v13648_v13 }
 0x550   :  { %5848 = vmatprep.mubr.bf16.mxu0 %v18958_v9 }
 0x551   :  { %v4618_v25 = vshrl.u32 %v11260_v19, 16  ;;  %v4621_v10 = vshll.u32 %v11260_v19, 16  ;;  %v4605_v49 = vrot.slane %v11260_v19, 2  ;;  %v4646_v19 = vrot.slane %v15412_v53, 3 }
 0x553   :  { %v4620_v62 = vrot.slane %v4618_v25, 2  ;;  %v4623_v52 = vrot.slane %v4621_v10, 3  ;;  %v4641_v10 = vrot.slane %v15400_v8, 2  ;;  %v4642_v25 = vrot.slane %v15368_v37, 3 }
 0x554   :  { %v4645_v8 = vrot.slane %v15453_v48, 2  ;;  %v4649_v48 = vrot.slane %v15478_v55, 2  ;;  %v4653_v55 = vrot.slane %v18942_v15, 2  ;;  %v4661_v15 = vrot.slane %v18952_v63, 2 }
 0x555   :  { %v4624_v59 = vor.u32 %v4623_v52, %v4620_v62  ;;  %v4633_v62 = vrot.slane %v15324_v6, 2  ;;  %v4634_v52 = vrot.slane %v15292_v43, 3  ;;  %v13389_v43 = vld [vmem:[%s18668_s9 + $0x8] sm:$0xff]  }
 0x557   :  { %5849 = vmatmul.mubr.bf16.gmra.mrb[144].mxu0 %v4487_v39  ;;  %v4574_v39 = vrot.slane %v13384_v50, 2  ;;  %v18965_v50 = vld [vmem:[#allocation25_spill] sm:$0xff] }
 0x558   :  { %5856 = vmatprep.mubr.bf16.mxu0 %v18959_v46 }
 0x55f   :  { %5857 = vmatmul.mubr.bf16.gmra.mrb[148].mxu0 %v15800_v28  ;;  %v4512_v28 = vrot.slane %v4510_v34, 1 }
 0x560   :  { %5864 = vmatprep.mubr.bf16.mxu0 %v18960_v45 }
 0x561   :  { %v4516_v24 = vor.u32 %v4515_v31, %v4512_v28  ;;  %v4647_v28 = vor.u32 %v4646_v19, %v4645_v8  ;;  %v18972_v19 = vld [vmem:[#allocation29_spill] sm:$0xff] }
 0x563   :  { %v4517_v16 = vsel %vm1576_vm10, %v18965_v50, %v4516_v24 }
 0x567   :  { %5865 = vmatmul.mubr.bf16.gmra.mrb[152].mxu0 %v15808_v12  ;;  %v4575_v12 = vsel %vm1688_vm13, %v15795_v61, %v4574_v39  ;;  %v4630_v61 = vrot.slane %v15260_v44, 3  ;;  %v4637_v44 = vrot.slane %v15377_v30, 2  ;;  %v13390_v30 = vld [vmem:[%s18668_s9 + $0x10] sm:$0xff]   ;;  %v13393_v39 = vld [vmem:[%s18668_s9 + $0x28] sm:$0xff]  }
 0x568   :  { %5872 = vmatprep.mubr.bf16.mxu0 %v18961_v18 }
 0x56f   :  { %5873 = vmatmul.mubr.bf16.gmra.mrb[156].mxu0 %v18962_v35  ;;  %v4626_v35 = vrot.slane %v15217_v21, 3  ;;  %v4606_v21 = vsel %vm1688_vm13, %v4605_v49, %v15991_v17  ;;  %v13391_v17 = vld [vmem:[%s18668_s9 + $0x18] sm:$0xff]  }
 0x570   :  { %5880 = vmatprep.mubr.bf16.mxu0 %v18963_v22 }
 0x571   :  { %v4627_v13 = vor.u32 %v4626_v35, %v4625_v5  ;;  %v13388_v5 = vld [vmem:[%s18668_s9] sm:$0xff]   ;;  %v13395_v35 = vld [vmem:[%s18668_s9 + $0x38] sm:$0xff]  }
 0x572   :  { %8215 = vmatpush1.bf16.msra.mxu1 %v13388_v5 }
 0x573   :  { %v4628_v34 = vsel %vm1767_vm12, %v4624_v59, %v4627_v13  ;;  %v4638_v59 = vrot.slane %v15336_v26, 3  ;;  %8216 = vmatprep.subr.bf16.mxu1 %v18774_v56 }
 0x575   :  { %v4639_v6 = vor.u32 %v4638_v59, %v4637_v44  ;;  %v13406_v44 = vld [vmem:[%s18668_s9 + $0x210] sm:$0xff]  }
 0x576   :  { %8217 = vmatpush1.bf16.msra.mxu1 %v13389_v43  ;;  %v18970_v59 = vld [vmem:[#allocation20_spill] sm:$0xff] }
 0x577   :  { %5881 = vmatmul.mubr.bf16.gmra.mrb[160].mxu0 %v18964_v11  ;;  %v4629_v11 = vrot.slane %v15301_v0, 2  ;;  %8218 = vmatprep.subr.bf16.mxu1 %v18774_v56  ;;  %v18971_v5 = vrot.slane %v18970_v59, 2 }
 0x578   :  { %5888 = vmatprep.mubr.bf16.mxu0 %v4575_v12  ;;  %v4650_v12 = vrot.slane %v15444_v57, 3  ;;  %v4654_v57 = vrot.slane %v18943_v3, 3  ;;  %v4662_v3 = vrot.slane %v18953_v29, 3 }
 0x579   :  { %v4631_v47 = vor.u32 %v4630_v61, %v4629_v11  ;;  %v4658_v11 = vrot.slane %v18949_v1, 3  ;;  %v4666_v1 = vrot.slane %v18956_v14, 3 }
 0x57a   :  { %8219 = vmatpush1.bf16.msra.mxu1 %v13390_v30  ;;  %v4651_v24 = vor.u32 %v4650_v12, %v4649_v48  ;;  %v13411_v30 = vld [vmem:[%s18668_s9 + $0x220] sm:$0xff]   ;;  %v18973_v48 = vld [vmem:[#allocation39_spill] sm:$0xff] }
 0x57b   :  { %v4632_v31 = vsel %vm1767_vm12, %v4627_v13, %v4631_v47  ;;  %8220 = vmatprep.subr.bf16.mxu1 %v18774_v56  ;;  %v4655_v13 = vor.u32 %v4654_v57, %v4653_v55 }
 0x57d   :  { %v4656_v50 = vsel %vm1767_vm12, %v4651_v24, %v4655_v13 }
 0x57e   :  { %8221 = vmatpush1.bf16.msra.mxu1 %v13391_v17  ;;  %v16351_v17 = vld [vmem:[%s18667_s8] ss:$0 sm:$0xff] }
 0x57f   :  { %5889 = vmatmul.mubr.bf16.gmra.mrb[164].mxu0 %v4517_v16  ;;  %v4635_v16 = vor.u32 %v4634_v52, %v4633_v62  ;;  %8222 = vmatprep.subr.bf16.mxu1 %v18774_v56  ;;  %v13403_v62 = vld [vmem:[%s18668_s9 + $0x70] sm:$0xff]   ;;  %v13404_v52 = vld [vmem:[%s18668_s9 + $0x208] sm:$0xff]  }
 0x580   :  { %5929 = vmatprep.mubr.bf16.mxu0 %v4628_v34  ;;  %v4657_v34 = vrot.slane %v18948_v51, 2  ;;  %v4665_v51 = vrot.slane %v18955_v40, 2  ;;  %v13396_v40 = vld [vmem:[%s18668_s9 + $0x40] sm:$0xff]  }
 0x581   :  { %v4636_v0 = vsel %vm1767_vm12, %v4631_v47, %v4635_v16  ;;  %v4640_v26 = vsel %vm1767_vm12, %v4635_v16, %v4639_v6  ;;  %v4663_v47 = vor.u32 %v4662_v3, %v4661_v15 }
 0x582   :  { %v4659_v61 = vor.u32 %v4658_v11, %v4657_v34  ;;  %v4667_v49 = vor.u32 %v4666_v1, %v4665_v51 }
 0x584   :  { %v4672_v29 = vsel %vm1767_vm12, %v4667_v49, %v15854_v2  ;;  %v13398_v2 = vld [vmem:[%s18668_s9 + $0x50] sm:$0xff]  }
 0x587   :  { %5930 = vmatmul.mubr.bf16.vlgmr.msra.gmra.mrb[96].mxu0 %v4606_v21  ;;  %v18969_v21 = vld [vmem:[#allocation40_spill] sm:$0xff] }
 0x588   :  { %5937 = vmatprep.mubr.bf16.mxu0 %v4632_v31 }
 0x58f   :  { %5938 = vmatmul.mubr.bf16.gmra.mrb[100].mxu0 %v16019_v42  ;;  %v4643_v42 = vor.u32 %v4642_v25, %v4641_v10  ;;  %v13415_v10 = vld [vmem:[%s18668_s9 + $0x230] sm:$0xff]   ;;  %v13418_v25 = vld [vmem:[%s18668_s9 + $0x238] sm:$0xff]  }
 0x590   :  { %5945 = vmatprep.mubr.bf16.mxu0 %v4636_v0  ;;  %v13405_v0 = vld [vmem:[%s18668_s9 + $0x78] sm:$0xff]  }
 0x591   :  { %v4644_v37 = vsel %vm1767_vm12, %v4639_v6, %v4643_v42  ;;  %v4648_v53 = vsel %vm1767_vm12, %v4643_v42, %v4647_v28  ;;  %v13410_v6 = vld [vmem:[%s18668_s9 + $0x218] sm:$0xff]  }
 0x597   :  { %5946 = vmatmul.mubr.bf16.gmra.mrb[104].mxu0 %v16041_v4  ;;  %v13392_v4 = vld [vmem:[%s18668_s9 + $0x20] sm:$0xff]  }
 0x598   :  { %5953 = vmatprep.mubr.bf16.mxu0 %v4640_v26  ;;  %8223 = vmatpush1.bf16.msra.mxu1 %v13392_v4  ;;  %v13414_v26 = vld [vmem:[%s18668_s9 + $0x228] sm:$0xff]  }
 0x599   :  { %8224 = vmatprep.subr.bf16.mxu1 %v18774_v56 }
 0x59c   :  { %8225 = vmatpush1.bf16.msra.mxu1 %v13393_v39 }
 0x59d   :  { %8226 = vmatprep.subr.bf16.mxu1 %v18774_v56 }
 0x59f   :  { %5954 = vmatmul.mubr.bf16.gmra.mrb[108].mxu0 %v16059_v33  ;;  %v13394_v33 = vld [vmem:[%s18668_s9 + $0x30] sm:$0xff]  }
 0x5a0   :  { %5961 = vmatprep.mubr.bf16.mxu0 %v4644_v37  ;;  %8227 = vmatpush1.bf16.msra.mxu1 %v13394_v33 }
 0x5a1   :  { %8228 = vmatprep.subr.bf16.mxu1 %v18774_v56 }
 0x5a4   :  { %8229 = vmatpush1.bf16.msra.mxu1 %v13395_v35  ;;  %v13649_v35 = vld [vmem:[%s18660_s1] sm:$0xff] }
 0x5a5   :  { %8230 = vmatprep.subr.bf16.mxu1 %v18774_v56 }
 0x5a7   :  { %5962 = vmatmul.mubr.bf16.gmra.mrb[112].mxu0 %v16081_v36  ;;  %v4652_v36 = vsel %vm1767_vm12, %v4647_v28, %v4651_v24 }
 0x5a8   :  { %5969 = vmatprep.mubr.bf16.mxu0 %v4648_v53  ;;  %8231 = vmatpush1.bf16.msra.mxu1 %v13396_v40 }
 0x5a9   :  { %8232 = vmatprep.subr.bf16.mxu1 %v18774_v56 }
 0x5af   :  { %5970 = vmatmul.mubr.bf16.gmra.mrb[116].mxu0 %v16099_v32  ;;  %v4660_v32 = vsel %vm1767_vm12, %v4655_v13, %v4659_v61  ;;  %v13650_v13 = vld [vmem:[%s18660_s1 + $0x8] sm:$0xff] }
 0x5b0   :  { %5977 = vmatprep.mubr.bf16.mxu0 %v4652_v36 }
 0x5b7   :  { %5978 = vmatmul.mubr.bf16.gmra.mrb[120].mxu0 %v16121_v23  ;;  %v4664_v23 = vsel %vm1767_vm12, %v4659_v61, %v4663_v47 }
 0x5b8   :  { %5985 = vmatprep.mubr.bf16.mxu0 %v4656_v50 }
 0x5bf   :  { %5986 = vmatmul.mubr.bf16.gmra.mrb[124].mxu0 %v16140_v54  ;;  %v4668_v54 = vsel %vm1767_vm12, %v4663_v47, %v4667_v49  ;;  %v18974_v47 = vld [vmem:[#allocation28_spill] sm:$0xff]  ;;  %v6868_v49 = vld [vmem:[#allocation2] sm:$0xf] }
 0x5c0   :  { %5993 = vmatprep.mubr.bf16.mxu0 %v4660_v32 }
 0x5c7   :  { %5994 = vmatmul.mubr.bf16.gmra.mrb[128].mxu0 %v16159_v7  ;;  %v13397_v7 = vld [vmem:[%s18668_s9 + $0x48] sm:$0xff]  }
 0x5c8   :  { %6001 = vmatprep.mubr.bf16.mxu0 %v4664_v23  ;;  %8233 = vmatpush1.bf16.msra.mxu1 %v13397_v7 }
 0x5c9   :  { %8234 = vmatprep.subr.bf16.mxu1 %v18774_v56 }
 0x5cc   :  { %8235 = vmatpush1.bf16.msra.mxu1 %v13398_v2  ;;  %v6869_v2 = vld [vmem:[#allocation2 + $0x4] sm:$0xf] }
 0x5cd   :  { %8236 = vmatprep.subr.bf16.mxu1 %v18774_v56 }
 0x5cf   :  { %6002 = vmatmul.mubr.bf16.gmra.mrb[132].mxu0 %v16172_v58  ;;  %v13400_v58 = vld [vmem:[%s18668_s9 + $0x60] sm:$0xff]  }
 0x5d0   :  { %6009 = vmatprep.mubr.bf16.mxu0 %v4668_v54 }
 0x5d7   :  { %6010 = vmatmul.mubr.bf16.gmra.mrb[136].mxu0 %v18957_v27 }
 0x5d8   :  { %6017 = vmatprep.mubr.bf16.mxu0 %v4672_v29 }
 0x5df   :  { %6018 = vmatmul.mubr.bf16.gmra.mrb[140].mxu0 %v18958_v9  ;;  %v18967_v9 = vld [vmem:[#allocation27_spill] sm:$0xff] }
 0x5e0   :  { %6025 = vmatprep.mubr.bf16.mxu0 %v15866_v41  ;;  %v13399_v41 = vld [vmem:[%s18668_s9 + $0x58] sm:$0xff]  }
 0x5e1   :  { %8237 = vmatpush1.bf16.msra.mxu1 %v13399_v41 }
 0x5e2   :  { %8238 = vmatprep.subr.bf16.mxu1 %v18774_v56 }
 0x5e5   :  { %8239 = vmatpush1.bf16.msra.mxu1 %v13400_v58 }
 0x5e6   :  { %8240 = vmatprep.subr.bf16.mxu1 %v18774_v56 }
 0x5e7   :  { %6026 = vmatmul.mubr.bf16.gmra.mrb[144].mxu0 %v18959_v46 }
 0x5e8   :  { %6033 = vmatprep.mubr.bf16.mxu0 %v15872_v60  ;;  %v18966_v60 = vld [vmem:[#allocation21_spill] sm:$0xff] }
 0x5e9   :  { %v4702_v63 = vshll.u32 %v18966_v60, 16 }
 0x5eb   :  { %v4704_v27 = vrot.slane %v4702_v63, 3 }
 0x5ef   :  { %6034 = vmatmul.mubr.bf16.gmra.mrb[148].mxu0 %v18960_v45  ;;  %v13402_v45 = vld [vmem:[%s18668_s9 + $0x200] sm:$0xff]  }
 0x5f0   :  { %6041 = vmatprep.mubr.bf16.mxu0 %v15876_v38  ;;  %v4699_v38 = vshrl.u32 %v18966_v60, 16  ;;  %12272 = vmatprep.subr.bf16.mxu0 %v13402_v45  ;;  %v18975_v60 = vld [vmem:[#allocation37_spill] sm:$0xff] }
 0x5f1   :  { %12273 = vmatpush3.bf16.msra.mxu0 %v13402_v45 }
 0x5f2   :  { %v4701_v14 = vrot.slane %v4699_v38, 2  ;;  %12274 = vmatprep.subr.bf16.mxu0 %v13404_v52 }
 0x5f4   :  { %v4705_v46 = vor.u32 %v4704_v27, %v4701_v14  ;;  %v6827_v27 = vld [vmem:[#allocation2 + $0x8] sm:$0xe] }
 0x5f5   :  { %12275 = vmatpush3.bf16.msra.mxu0 %v13404_v52 }
 0x5f6   :  { %v4706_v31 = vsel %vm1767_vm12, %v18969_v21, %v4705_v46  ;;  %12276 = vmatprep.subr.bf16.mxu0 %v13406_v44  ;;  %v16961_v21 = vld [vmem:[#allocation2 + $0xa0] ss:$0 sps:$4 sm:$0x77]  }
 0x5f7   :  { %6042 = vmatmul.mubr.bf16.gmra.mrb[152].mxu0 %v18961_v18  ;;  %v13387_v18 = vld [vmem:[#allocation3 + $0xa0] ss:$0 sps:$4 sm:$0x33]   ;;  %19020 = vst [vmem:[#allocation36_spill] sm:$0xff] %v16961_v21 }
 0x5f8   :  { %6049 = vmatprep.mubr.bf16.mxu0 %v15880_v20  ;;  %v13401_v20 = vld [vmem:[%s18668_s9 + $0x68] sm:$0xff]   ;;  %v4609_v16 = vrot.slane %v13387_v18, 2  ;;  %v16370_v18 = vcombine.low %v6868_v49, %v6869_v2 }
 0x5f9   :  { %8241 = vmatpush1.bf16.msra.mxu1 %v13401_v20  ;;  %12277 = vmatpush3.bf16.msra.mxu0 %v13406_v44  ;;  %v13652_v44 = vld [vmem:[%s18660_s1 + $0x18] sm:$0xff] }
 0x5fa   :  { %8242 = vmatprep.subr.bf16.mxu1 %v18774_v56  ;;  %v4610_v43 = vsel %vm1688_vm13, %v18971_v5, %v4609_v16  ;;  %12278 = vmatprep.subr.bf16.mxu0 %v13410_v6 }
 0x5fd   :  { %8243 = vmatpush1.bf16.msra.mxu1 %v13403_v62  ;;  %12279 = vmatpush3.bf16.msra.mxu0 %v13410_v6 }
 0x5fe   :  { %8244 = vmatprep.subr.bf16.mxu1 %v18774_v56  ;;  %12280 = vmatprep.subr.bf16.mxu0 %v13411_v30 }
 0x5ff   :  { %6050 = vmatmul.mubr.bf16.gmra.mrb[156].mxu0 %v18963_v22  ;;  %v18968_v22 = vld [vmem:[#allocation38_spill] sm:$0xff] }
 0x600   :  { %6057 = vmatprep.mubr.bf16.mxu0 %v18967_v9  ;;  %v13651_v9 = vld [vmem:[%s18660_s1 + $0x10] sm:$0xff] }
 0x601   :  { %8245 = vmatpush1.bf16.msra.mxu1 %v13405_v0  ;;  %12281 = vmatpush3.bf16.msra.mxu0 %v13411_v30  ;;  %v18978_v30 = vld [vmem:[#allocation42_spill] sm:$0xff] }
 0x602   :  { %8391 = vmatprep.subr.bf16.mxu1 %v18774_v56  ;;  %12282 = vmatprep.subr.bf16.mxu0 %v13414_v26 }
 0x605   :  { %12283 = vmatpush3.bf16.msra.mxu0 %v13414_v26 }
 0x606   :  { %12284 = vmatprep.subr.bf16.mxu0 %v13415_v10 }
 0x607   :  { %6058 = vmatmul.mubr.bf16.gmra.mrb[160].mxu0 %v18968_v22 }
 0x608   :  { %6065 = vmatprep.mubr.bf16.mxu0 %v4706_v31 }
 0x609   :  { %12285 = vmatpush3.bf16.msra.mxu0 %v13415_v10 }
 0x60a   :  { %12286 = vmatprep.subr.bf16.mxu0 %v13418_v25 }
 0x60d   :  { %12287 = vmatpush3.bf16.msra.mxu0 %v13418_v25 }
 0x60f   :  { %6066 = vmatmul.mubr.bf16.gmra.mrb[164].mxu0 %v4610_v43 }
 0x65a   :  { %v5931_v42 = vpop.f32.mrb[96].mxu0 }
 0x65b   :  { %v12456_v4 = vadd.f32 %v16351_v17, %v5931_v42  ;;  %v5933_v37 = vpop.f32.mrb[97].mxu0 }
 0x65c   :  { %v5934_v8 = vpop.f32.mrb[98].mxu0 }
 0x65d   :  { %v6109_v39 = vadd.f32 %v12456_v4, %v18972_v19  ;;  %v12457_v28 = vadd.f32 %v16351_v17, %v5934_v8  ;;  %v5936_v33 = vpop.f32.mrb[99].mxu0  ;;  %v18979_v19 = vld [vmem:[#allocation32_spill] sm:$0xff] }
 0x65f   :  { %v6251_v53 = vmax.f32 %v6109_v39, 0.0  ;;  %v6112_v12 = vadd.f32 %v12457_v28, %v18973_v48  ;;  %v7032_v28 = vshll.u32 %v16370_v18, 16 }
 0x661   :  { %v6287_v24 = vmul.f32 %v13649_v35, %v6251_v53  ;;  %v6252_v36 = vmax.f32 %v6112_v12, 0.0  ;;  %v13653_v35 = vld [vmem:[%s18660_s1 + $0x20] sm:$0xff] }
 0x662   :  { %v5939_v55 = vpop.f32.mrb[100].mxu0 }
 0x663   :  { %v11661_v57 = vpack.c.bf16 %v6287_v24, %v6287_v24  ;;  %v6288_v50 = vmul.f32 %v13650_v13, %v6252_v36  ;;  %v12458_v34 = vadd.f32 %v16351_v17, %v5939_v55  ;;  %v5941_v11 = vpop.f32.mrb[101].mxu0 }
 0x664   :  { %v5942_v61 = vpop.f32.mrb[102].mxu0 }
 0x665   :  { %v6432_v32 = vshrl.u32 %v11661_v57, 16  ;;  %v6435_v15 = vshll.u32 %v11661_v57, 16  ;;  %v11662_v3 = vpack.c.bf16 %v6288_v50, %v6288_v50  ;;  %v6117_v23 = vadd.f32 %v12458_v34, %v18974_v47  ;;  %v5944_v51 = vpop.f32.mrb[103].mxu0 }
 0x666   :  { %v12459_v1 = vadd.f32 %v16351_v17, %v5942_v61  ;;  %v13654_v61 = vld [vmem:[%s18660_s1 + $0x28] sm:$0xff]  ;;  %v7030_v47 = vshrl.u32 %v16370_v18, 16 }
 0x667   :  { %v6434_v54 = vrot.slane %v6432_v32, 6  ;;  %v6437_v29 = vrot.slane %v6435_v15, 7  ;;  %v6441_v40 = vshrl.u32 %v11662_v3, 16  ;;  %v6444_v7 = vshll.u32 %v11662_v3, 16 }
 0x668   :  { %v6253_v41 = vmax.f32 %v6117_v23, 0.0  ;;  %v6120_v38 = vadd.f32 %v12459_v1, %v18975_v60 }
 0x669   :  { %v6438_v63 = vor.u32 %v6437_v29, %v6434_v54  ;;  %v6443_v58 = vrot.slane %v6441_v40, 6  ;;  %v6446_v14 = vrot.slane %v6444_v7, 7  ;;  %v7034_v29 = vrot.slane %v7032_v28, 1 }
 0x66a   :  { %v6289_v20 = vmul.f32 %v13651_v9, %v6253_v41  ;;  %v6254_v46 = vmax.f32 %v6120_v38, 0.0  ;;  %v5947_v45 = vpop.f32.mrb[104].mxu0  ;;  %v18980_v41 = vld [vmem:[#allocation30_spill] sm:$0xff] }
 0x66b   :  { %v6439_v22 = vrot.slane %v6438_v63, 4  ;;  %v6828_v31 = vsel %vm13931_vm5, %v6438_v63, %v6827_v27  ;;  %v6447_v62 = vor.u32 %v6446_v14, %v6443_v58  ;;  %v12460_v52 = vadd.f32 %v16351_v17, %v5947_v45  ;;  %v5949_v16 = vpop.f32.mrb[105].mxu0 }
 0x66c   :  { %6829 = vst [vmem:[#allocation2 + $0x8] sm:$0xe] %v6828_v31  ;;  %v11663_v0 = vpack.c.bf16 %v6289_v20, %v6289_v20  ;;  %v6290_v59 = vmul.f32 %v13652_v44, %v6254_v46  ;;  %v5950_v5 = vpop.f32.mrb[106].mxu0  ;;  %v18981_v31 = vld [vmem:[#allocation31_spill] sm:$0xff] }
 0x66d   :  { %v6448_v6 = vsel %vm13992_vm7, %v6439_v22, %v6447_v62  ;;  %v6125_v26 = vadd.f32 %v12460_v52, %v18978_v30  ;;  %v12461_v10 = vadd.f32 %v16351_v17, %v5950_v5  ;;  %v5952_v25 = vpop.f32.mrb[107].mxu0  ;;  %v6449_v55 = vrot.slane %v6447_v62, 4 }
 0x66e   :  { %6830 = vst [vmem:[#allocation2 + $0xc] sm:$0xf] %v6448_v6  ;;  %v6451_v42 = vshrl.u32 %v11663_v0, 16  ;;  %v6454_v4 = vshll.u32 %v11663_v0, 16  ;;  %v11664_v37 = vpack.c.bf16 %v6290_v59, %v6290_v59  ;;  %v7035_v52 = vor.u32 %v7034_v29, %v7030_v47  ;;  %v13655_v6 = vld [vmem:[%s18660_s1 + $0x30] sm:$0xff] }
 0x66f   :  { %v6255_v8 = vmax.f32 %v6125_v26, 0.0  ;;  %v6128_v39 = vadd.f32 %v12461_v10, %v18979_v19 }
 0x670   :  { %v6453_v33 = vrot.slane %v6451_v42, 6  ;;  %v6456_v53 = vrot.slane %v6454_v4, 7  ;;  %v6461_v48 = vshrl.u32 %v11664_v37, 16  ;;  %v6464_v12 = vshll.u32 %v11664_v37, 16 }
 0x671   :  { %v6291_v24 = vmul.f32 %v13653_v35, %v6255_v8  ;;  %v6256_v36 = vmax.f32 %v6128_v39, 0.0  ;;  %v13409_v39 = vld [vmem:[%s18668_s9 + $0x80] sm:$0xff]  }
 0x672   :  { %v6457_v57 = vor.u32 %v6456_v53, %v6453_v33  ;;  %v6463_v13 = vrot.slane %v6461_v48, 6  ;;  %v6466_v50 = vrot.slane %v6464_v12, 7  ;;  %v5955_v34 = vpop.f32.mrb[108].mxu0  ;;  %v13656_v33 = vld [vmem:[%s18660_s1 + $0x38] sm:$0xff] }
 0x673   :  { %v11665_v11 = vpack.c.bf16 %v6291_v24, %v6291_v24  ;;  %v6292_v32 = vmul.f32 %v13654_v61, %v6256_v36  ;;  %v12462_v15 = vadd.f32 %v16351_v17, %v5955_v34  ;;  %v5957_v3 = vpop.f32.mrb[109].mxu0  ;;  %v6870_v54 = vld [vmem:[#allocation2 + $0x8] sm:$0xf]  ;;  %v18982_v24 = vld [vmem:[#allocation41_spill] sm:$0xff] }
 0x674   :  { %v6458_v23 = vsel %vm13992_vm7, %v6449_v55, %v6457_v57  ;;  %v6459_v51 = vrot.slane %v6457_v57, 4  ;;  %v6467_v1 = vor.u32 %v6466_v50, %v6463_v13  ;;  %v5958_v49 = vpop.f32.mrb[110].mxu0 }
 0x675   :  { %6831 = vst [vmem:[#allocation2 + $0x10] sm:$0xf] %v6458_v23  ;;  %v6471_v40 = vshrl.u32 %v11665_v11, 16  ;;  %v6474_v7 = vshll.u32 %v11665_v11, 16  ;;  %v11666_v2 = vpack.c.bf16 %v6292_v32, %v6292_v32  ;;  %v6133_v60 = vadd.f32 %v12462_v15, %v18980_v41  ;;  %v5960_v38 = vpop.f32.mrb[111].mxu0  ;;  %v18983_v15 = vld [vmem:[#allocation46_spill] sm:$0xff] }
 0x676   :  { %v6871_v63 = vld [vmem:[#allocation2 + $0xc] sm:$0xf]  ;;  %v6468_v58 = vsel %vm13992_vm7, %v6459_v51, %v6467_v1  ;;  %v12463_v14 = vadd.f32 %v16351_v17, %v5958_v49  ;;  %v6469_v0 = vrot.slane %v6467_v1, 4 }
 0x677   :  { %v16398_v27 = vcombine.low %v6870_v54, %v6871_v63  ;;  %6832 = vst [vmem:[#allocation2 + $0x14] sm:$0xf] %v6468_v58  ;;  %v6473_v9 = vrot.slane %v6471_v40, 6  ;;  %v6476_v20 = vrot.slane %v6474_v7, 7  ;;  %v6481_v46 = vshrl.u32 %v11666_v2, 16  ;;  %v13413_v51 = vld [vmem:[%s18668_s9 + $0x88] sm:$0xff]  }
 0x678   :  { %v6484_v45 = vshll.u32 %v11666_v2, 16  ;;  %v6257_v22 = vmax.f32 %v6133_v60, 0.0  ;;  %v6136_v62 = vadd.f32 %v12463_v14, %v18981_v31  ;;  %v13657_v40 = vld [vmem:[%s18660_s1 + $0x40] sm:$0xff] }
 0x679   :  { %v7037_v16 = vshll.u32 %v16398_v27, 16  ;;  %v6477_v44 = vor.u32 %v6476_v20, %v6473_v9  ;;  %v6483_v59 = vrot.slane %v6481_v46, 6  ;;  %v7041_v23 = vshrl.u32 %v16398_v27, 16  ;;  %v13658_v46 = vld [vmem:[%s18660_s1 + $0x48] sm:$0xff] }
 0x67a   :  { %v6486_v5 = vrot.slane %v6484_v45, 7  ;;  %v6293_v30 = vmul.f32 %v13655_v6, %v6257_v22  ;;  %v6258_v26 = vmax.f32 %v6136_v62, 0.0  ;;  %v5963_v10 = vpop.f32.mrb[112].mxu0 }
 0x67b   :  { %v7039_v25 = vrot.slane %v7037_v16, 1  ;;  %v6478_v42 = vsel %vm13992_vm7, %v6469_v0, %v6477_v44  ;;  %v6479_v4 = vrot.slane %v6477_v44, 4  ;;  %v12464_v8 = vadd.f32 %v16351_v17, %v5963_v10  ;;  %v5965_v19 = vpop.f32.mrb[113].mxu0  ;;  %v18984_v10 = vld [vmem:[#allocation44_spill] sm:$0xff] }
 0x67c   :  { %v6487_v37 = vor.u32 %v6486_v5, %v6483_v59  ;;  %6833 = vst [vmem:[#allocation2 + $0x18] sm:$0xf] %v6478_v42  ;;  %v11667_v28 = vpack.c.bf16 %v6293_v30, %v6293_v30  ;;  %v6294_v53 = vmul.f32 %v13656_v33, %v6258_v26  ;;  %v5966_v48 = vpop.f32.mrb[114].mxu0  ;;  %v6872_v11 = vld [vmem:[#allocation2 + $0x10] sm:$0xf] }
 0x67d   :  { %v7040_v12 = vsel %vm1327_vm8, %v7035_v52, %v7039_v25  ;;  %v6141_v36 = vadd.f32 %v12464_v8, %v18982_v24  ;;  %v12465_v55 = vadd.f32 %v16351_v17, %v5966_v48  ;;  %v5968_v57 = vpop.f32.mrb[115].mxu0  ;;  %v6917_v60 = vld [vmem:[#allocation2 + $0x10] sm:$0x8]  ;;  %v7043_v5 = vor.u32 %v7041_v23, %v7039_v25 }
 0x67e   :  { %v6488_v35 = vsel %vm13992_vm7, %v6479_v4, %v6487_v37  ;;  %8246 = vmatprep.mubr.bf16.mxu1 %v7040_v12  ;;  %v6491_v13 = vshrl.u32 %v11667_v28, 16  ;;  %v6494_v50 = vshll.u32 %v11667_v28, 16  ;;  %v11668_v34 = vpack.c.bf16 %v6294_v53, %v6294_v53  ;;  %v6873_v61 = vld [vmem:[#allocation2 + $0x14] sm:$0xf]  ;;  %v13421_v12 = vld [vmem:[%s18668_s9 + $0x98] sm:$0xff]  }
 0x67f   :  { %6834 = vst [vmem:[#allocation2 + $0x1c] sm:$0xf] %v6488_v35  ;;  %8247 = vmatmul.mubr.bf16.vlgmr.msra.gmra.mrb[108].mxu1 %v16370_v18  ;;  %v6259_v32 = vmax.f32 %v6141_v36, 0.0  ;;  %v6144_v3 = vadd.f32 %v12465_v55, %v18983_v15  ;;  %v16421_v47 = vcombine.low %v6872_v11, %v6873_v61  ;;  %v6489_v18 = vrot.slane %v6487_v37, 4  ;;  %v13419_v52 = vld [vmem:[%s18668_s9 + $0x90] sm:$0xff]  }
 0x680   :  { %8392 = vmatpush1.bf16.msra.mxu1 %v13409_v39  ;;  %v6493_v1 = vrot.slane %v6491_v13, 6  ;;  %v6496_v49 = vrot.slane %v6494_v50, 7  ;;  %v6501_v54 = vshrl.u32 %v11668_v34, 16  ;;  %v6504_v29 = vshll.u32 %v11668_v34, 16  ;;  %v18985_v36 = vld [vmem:[#allocation43_spill] sm:$0xff] }
 0x681   :  { %8393 = vmatprep.subr.bf16.mxu1 %v18774_v56  ;;  %v6295_v7 = vmul.f32 %v13657_v40, %v6259_v32  ;;  %v6260_v2 = vmax.f32 %v6144_v3, 0.0  ;;  %v7045_v41 = vshll.u32 %v16421_v47, 16  ;;  %v11403_v9 = vcombine.low %v6917_v60, %v6873_v61  ;;  %v13659_v61 = vld [vmem:[%s18660_s1 + $0x50] sm:$0xff]  ;;  %v13423_v40 = vld [vmem:[%s18668_s9 + $0xa0] sm:$0xff]  }
 0x682   :  { %v6497_v38 = vor.u32 %v6496_v49, %v6493_v1  ;;  %v6503_v63 = vrot.slane %v6501_v54, 6  ;;  %v6506_v58 = vrot.slane %v6504_v29, 7  ;;  %v5971_v14 = vpop.f32.mrb[116].mxu0 }
 0x683   :  { %v11669_v20 = vpack.c.bf16 %v6295_v7, %v6295_v7  ;;  %v6296_v45 = vmul.f32 %v13658_v46, %v6260_v2  ;;  %v12466_v22 = vadd.f32 %v16351_v17, %v5971_v14  ;;  %v5973_v31 = vpop.f32.mrb[117].mxu0  ;;  %v7047_v62 = vrot.slane %v7045_v41, 1  ;;  %v13660_v2 = vld [vmem:[%s18660_s1 + $0x58] sm:$0xff] }
 0x684   :  { %8394 = vmatpush1.bf16.msra.mxu1 %v13413_v51  ;;  %v6498_v16 = vsel %vm13992_vm7, %v6489_v18, %v6497_v38  ;;  %v6499_v0 = vrot.slane %v6497_v38, 4  ;;  %v6507_v44 = vor.u32 %v6506_v58, %v6503_v63  ;;  %v5974_v59 = vpop.f32.mrb[118].mxu0  ;;  %v7576_v28 = vrot.slane %v11403_v9, 3  ;;  %v18986_v9 = vld [vmem:[#allocation45_spill] sm:$0xff] }
 0x685   :  { %8395 = vmatprep.subr.bf16.mxu1 %v18774_v56  ;;  %6835 = vst [vmem:[#allocation2 + $0x20] sm:$0xf] %v6498_v16  ;;  %v6511_v6 = vshrl.u32 %v11669_v20, 16  ;;  %v6514_v30 = vshll.u32 %v11669_v20, 16  ;;  %v11670_v26 = vpack.c.bf16 %v6296_v45, %v6296_v45  ;;  %v6149_v42 = vadd.f32 %v12466_v22, %v18984_v10  ;;  %v5976_v4 = vpop.f32.mrb[119].mxu0 }
 0x686   :  { %v16445_v37 = vld [vmem:[#allocation2 + $0x18] sm:$0xff]   ;;  %v6508_v8 = vsel %vm13992_vm7, %v6499_v0, %v6507_v44  ;;  %v12467_v19 = vadd.f32 %v16351_v17, %v5974_v59  ;;  %v7048_v39 = vsel %vm1327_vm8, %v7043_v5, %v7047_v62  ;;  %v6509_v35 = vrot.slane %v6507_v44, 4  ;;  %v18987_v59 = vld [vmem:[#allocation50_spill] sm:$0xff] }
 0x687   :  { %6836 = vst [vmem:[#allocation2 + $0x24] sm:$0xf] %v6508_v8  ;;  %v6513_v25 = vrot.slane %v6511_v6, 6  ;;  %v6516_v33 = vrot.slane %v6514_v30, 7  ;;  %v6521_v53 = vshrl.u32 %v11670_v26, 16  ;;  %v6524_v48 = vshll.u32 %v11670_v26, 16  ;;  %8254 = vmatprep.mubr.bf16.mxu1 %v7048_v39 }
 0x688   :  { %8396 = vmatpush1.bf16.msra.mxu1 %v13419_v52  ;;  %v6261_v24 = vmax.f32 %v6149_v42, 0.0  ;;  %v6152_v55 = vadd.f32 %v12467_v19, %v18985_v36  ;;  %v7577_v57 = vrot.slane %v16445_v37, 3  ;;  %v16459_v11 = vshll.u32 %v16445_v37, 16  ;;  %v13425_v30 = vld [vmem:[%s18668_s9 + $0xa8] sm:$0xff]   ;;  %v13661_v8 = vld [vmem:[%s18660_s1 + $0x60] sm:$0xff] }
 0x689   :  { %8255 = vmatmul.mubr.bf16.gmra.mrb[112].mxu1 %v16398_v27  ;;  %8397 = vmatprep.subr.bf16.mxu1 %v18774_v56  ;;  %v6517_v13 = vor.u32 %v6516_v33, %v6513_v25  ;;  %v6523_v50 = vrot.slane %v6521_v53, 6  ;;  %v6526_v34 = vrot.slane %v6524_v48, 7  ;;  %v7049_v51 = vshrl.u32 %v16421_v47, 16  ;;  %v13662_v36 = vld [vmem:[%s18660_s1 + $0x68] sm:$0xff] }
 0x68a   :  { %v6297_v32 = vmul.f32 %v13659_v61, %v6261_v24  ;;  %v6262_v15 = vmax.f32 %v6152_v55, 0.0  ;;  %v5979_v3 = vpop.f32.mrb[120].mxu0  ;;  %v7578_v23 = vsel %vm1879_vm9, %v7576_v28, %v7577_v57  ;;  %v7055_v58 = vrot.slane %v16459_v11, 1  ;;  %v13428_v61 = vld [vmem:[%s18668_s9 + $0xb0] sm:$0xff]  }
 0x68b   :  { %v6518_v1 = vsel %vm13992_vm7, %v6509_v35, %v6517_v13  ;;  %v6519_v49 = vrot.slane %v6517_v13, 4  ;;  %v6527_v54 = vor.u32 %v6526_v34, %v6523_v50  ;;  %v12468_v29 = vadd.f32 %v16351_v17, %v5979_v3  ;;  %v5981_v18 = vpop.f32.mrb[121].mxu0  ;;  %12288 = vmatprep.mubr.bf16.mxu0 %v7578_v23 }
 0x68c   :  { %8398 = vmatpush1.bf16.msra.mxu1 %v13421_v12  ;;  %6837 = vst [vmem:[#allocation2 + $0x28] sm:$0xf] %v6518_v1  ;;  %v11671_v7 = vpack.c.bf16 %v6297_v32, %v6297_v32  ;;  %v6298_v60 = vmul.f32 %v13660_v2, %v6262_v15  ;;  %v5982_v38 = vpop.f32.mrb[122].mxu0  ;;  %v7051_v63 = vor.u32 %v7049_v51, %v7047_v62  ;;  %v16490_v6 = vshrl.u32 %v16445_v37, 16 }
 0x68d   :  { %8399 = vmatprep.subr.bf16.mxu1 %v18774_v56  ;;  %v6528_v14 = vsel %vm13992_vm7, %v6519_v49, %v6527_v54  ;;  %v6157_v20 = vadd.f32 %v12468_v29, %v18986_v9  ;;  %v12469_v46 = vadd.f32 %v16351_v17, %v5982_v38  ;;  %v5984_v45 = vpop.f32.mrb[123].mxu0  ;;  %v6529_v62 = vrot.slane %v6527_v54, 4  ;;  %v18988_v29 = vld [vmem:[#allocation48_spill] sm:$0xff] }
 0x68e   :  { %6838 = vst [vmem:[#allocation2 + $0x2c] sm:$0xf] %v6528_v14  ;;  %v6531_v22 = vshrl.u32 %v11671_v7, 16  ;;  %v6534_v31 = vshll.u32 %v11671_v7, 16  ;;  %v11672_v52 = vpack.c.bf16 %v6298_v60, %v6298_v60  ;;  %v7056_v16 = vsel %vm1327_vm8, %v7051_v63, %v7055_v58  ;;  %v16486_v0 = vld [vmem:[#allocation2 + $0x20] sm:$0xff]  }
 0x68f   :  { %v6263_v44 = vmax.f32 %v6157_v20, 0.0  ;;  %v6160_v5 = vadd.f32 %v12469_v46, %v18987_v59  ;;  %8262 = vmatprep.mubr.bf16.mxu1 %v7056_v16  ;;  %v7579_v28 = vrot.slane %v16486_v0, 3  ;;  %v16502_v25 = vshll.u32 %v16486_v0, 16  ;;  %v13430_v20 = vld [vmem:[%s18668_s9 + $0xb8] sm:$0xff]  }
 0x690   :  { %8400 = vmatpush1.bf16.msra.mxu1 %v13423_v40  ;;  %v6533_v26 = vrot.slane %v6531_v22, 6  ;;  %v6536_v10 = vrot.slane %v6534_v31, 7  ;;  %v6541_v42 = vshrl.u32 %v11672_v52, 16  ;;  %v6544_v4 = vshll.u32 %v11672_v52, 16  ;;  %v18989_v22 = vld [vmem:[#allocation47_spill] sm:$0xff] }
 0x691   :  { %8263 = vmatmul.mubr.bf16.gmra.mrb[116].mxu1 %v16421_v47  ;;  %8401 = vmatprep.subr.bf16.mxu1 %v18774_v56  ;;  %v6299_v19 = vmul.f32 %v13661_v8, %v6263_v44  ;;  %v6264_v39 = vmax.f32 %v6160_v5, 0.0  ;;  %v7059_v35 = vor.u32 %v16490_v6, %v7055_v58  ;;  %v7580_v34 = vsel %vm1879_vm9, %v7577_v57, %v7579_v28  ;;  %v13663_v5 = vld [vmem:[%s18660_s1 + $0x70] sm:$0xff] }
 0x692   :  { %v6537_v33 = vor.u32 %v6536_v10, %v6533_v26  ;;  %v6543_v53 = vrot.slane %v6541_v42, 6  ;;  %v6546_v48 = vrot.slane %v6544_v4, 7  ;;  %v5987_v12 = vpop.f32.mrb[124].mxu0  ;;  %12289 = vmatmul.mubr.bf16.vlgmr.msra.gmra.mrb[168].mxu0 %v7580_v34  ;;  %v7063_v1 = vrot.slane %v16502_v25, 1 }
 0x693   :  { %v11673_v24 = vpack.c.bf16 %v6299_v19, %v6299_v19  ;;  %v6300_v55 = vmul.f32 %v13662_v36, %v6264_v39  ;;  %v12470_v13 = vadd.f32 %v16351_v17, %v5987_v12  ;;  %v5989_v50 = vpop.f32.mrb[125].mxu0  ;;  %v16543_v42 = vshrl.u32 %v16486_v0, 16 }
 0x694   :  { %8402 = vmatpush1.bf16.msra.mxu1 %v13425_v30  ;;  %v6538_v32 = vsel %vm13992_vm7, %v6529_v62, %v6537_v33  ;;  %v6539_v15 = vrot.slane %v6537_v33, 4  ;;  %v6547_v3 = vor.u32 %v6546_v48, %v6543_v53  ;;  %v5990_v23 = vpop.f32.mrb[126].mxu0  ;;  %v7064_v38 = vsel %vm1327_vm8, %v7059_v35, %v7063_v1  ;;  %v13432_v53 = vld [vmem:[%s18668_s9 + $0xc0] sm:$0xff]  }
 0x695   :  { %8403 = vmatprep.subr.bf16.mxu1 %v18774_v56  ;;  %6839 = vst [vmem:[#allocation2 + $0x30] sm:$0xf] %v6538_v32  ;;  %v6551_v49 = vshrl.u32 %v11673_v24, 16  ;;  %v6554_v54 = vshll.u32 %v11673_v24, 16  ;;  %v11674_v57 = vpack.c.bf16 %v6300_v55, %v6300_v55  ;;  %v6165_v18 = vadd.f32 %v12470_v13, %v18988_v29  ;;  %v5992_v40 = vpop.f32.mrb[127].mxu0  ;;  %v16520_v7 = vld [vmem:[#allocation2 + $0x28] sm:$0xff]   ;;  %8270 = vmatprep.mubr.bf16.mxu1 %v7064_v38 }
 0x696   :  { %v6548_v2 = vsel %vm13992_vm7, %v6539_v15, %v6547_v3  ;;  %v12471_v60 = vadd.f32 %v16351_v17, %v5990_v23  ;;  %v6549_v46 = vrot.slane %v6547_v3, 4  ;;  %v7581_v52 = vrot.slane %v16520_v7, 3  ;;  %v18990_v13 = vld [vmem:[#allocation49_spill] sm:$0xff]  ;;  %v13434_v40 = vld [vmem:[%s18668_s9 + $0xc8] sm:$0xff]  }
 0x697   :  { %6840 = vst [vmem:[#allocation2 + $0x34] sm:$0xf] %v6548_v2  ;;  %v6553_v63 = vrot.slane %v6551_v49, 6  ;;  %v6556_v58 = vrot.slane %v6554_v54, 7  ;;  %v6561_v14 = vshrl.u32 %v11674_v57, 16  ;;  %v6564_v9 = vshll.u32 %v11674_v57, 16 }
 0x698   :  { %8404 = vmatpush1.bf16.msra.mxu1 %v13428_v61  ;;  %v6265_v45 = vmax.f32 %v6165_v18, 0.0  ;;  %v6168_v31 = vadd.f32 %v12471_v60, %v18989_v22  ;;  %v16534_v59 = vshll.u32 %v16520_v7, 16  ;;  %v7067_v24 = vor.u32 %v16543_v42, %v7063_v1  ;;  %v18991_v57 = vld [vmem:[#allocation54_spill] sm:$0xff] }
 0x699   :  { %8271 = vmatmul.mubr.bf16.gmra.mrb[120].mxu1 %v16445_v37  ;;  %8405 = vmatprep.subr.bf16.mxu1 %v18774_v56  ;;  %v6557_v16 = vor.u32 %v6556_v58, %v6553_v63  ;;  %v6563_v62 = vrot.slane %v6561_v14, 6  ;;  %v6566_v44 = vrot.slane %v6564_v9, 7  ;;  %v7582_v37 = vsel %vm1879_vm9, %v7579_v28, %v7581_v52  ;;  %v13664_v28 = vld [vmem:[%s18660_s1 + $0x78] sm:$0xff]  ;;  %v13665_v58 = vld [vmem:[%s18660_s1 + $0x80] sm:$0xff] }
 0x69a   :  { %v6301_v30 = vmul.f32 %v13663_v5, %v6265_v45  ;;  %v6266_v26 = vmax.f32 %v6168_v31, 0.0  ;;  %v5995_v10 = vpop.f32.mrb[128].mxu0  ;;  %12292 = vmatprep.mubr.bf16.mxu0 %v7582_v37  ;;  %v7071_v36 = vrot.slane %v16534_v59, 1  ;;  %v16566_v18 = vshrl.u32 %v16520_v7, 16  ;;  %v13436_v37 = vld [vmem:[%s18668_s9 + $0xd0] sm:$0xff]  }
 0x69b   :  { %v6558_v4 = vsel %vm13992_vm7, %v6549_v46, %v6557_v16  ;;  %v6559_v8 = vrot.slane %v6557_v16, 4  ;;  %v6567_v19 = vor.u32 %v6566_v44, %v6563_v62  ;;  %v12472_v39 = vadd.f32 %v16351_v17, %v5995_v10  ;;  %v5997_v33 = vpop.f32.mrb[129].mxu0  ;;  %v13666_v44 = vld [vmem:[%s18660_s1 + $0x88] sm:$0xff] }
 0x69c   :  { %8406 = vmatpush1.bf16.msra.mxu1 %v13430_v20  ;;  %6841 = vst [vmem:[#allocation2 + $0x38] sm:$0xf] %v6558_v4  ;;  %v11675_v48 = vpack.c.bf16 %v6301_v30, %v6301_v30  ;;  %v6302_v12 = vmul.f32 %v13664_v28, %v6266_v26  ;;  %v5998_v35 = vpop.f32.mrb[130].mxu0  ;;  %v7072_v23 = vsel %vm1327_vm8, %v7067_v24, %v7071_v36  ;;  %v18992_v28 = vld [vmem:[#allocation52_spill] sm:$0xff] }
 0x69d   :  { %8407 = vmatprep.subr.bf16.mxu1 %v18774_v56  ;;  %v6568_v55 = vsel %vm13992_vm7, %v6559_v8, %v6567_v19  ;;  %v6173_v50 = vadd.f32 %v12472_v39, %v18990_v13  ;;  %v12473_v34 = vadd.f32 %v16351_v17, %v5998_v35  ;;  %v6000_v61 = vpop.f32.mrb[131].mxu0  ;;  %v6569_v1 = vrot.slane %v6567_v19, 4  ;;  %8278 = vmatprep.mubr.bf16.mxu1 %v7072_v23 }
 0x69e   :  { %6842 = vst [vmem:[#allocation2 + $0x3c] sm:$0xf] %v6568_v55  ;;  %v6571_v32 = vshrl.u32 %v11675_v48, 16  ;;  %v6574_v15 = vshll.u32 %v11675_v48, 16  ;;  %v11676_v3 = vpack.c.bf16 %v6302_v12, %v6302_v12  ;;  %v16562_v49 = vld [vmem:[#allocation2 + $0x30] sm:$0xff]   ;;  %v7075_v62 = vor.u32 %v16566_v18, %v7071_v36 }
 0x69f   :  { %v6267_v54 = vmax.f32 %v6173_v50, 0.0  ;;  %v6176_v29 = vadd.f32 %v12473_v34, %v18991_v57  ;;  %v7583_v20 = vrot.slane %v16562_v49, 3  ;;  %v16578_v46 = vshll.u32 %v16562_v49, 16 }
 0x6a0   :  { %8408 = vmatpush1.bf16.msra.mxu1 %v13432_v53  ;;  %v6573_v2 = vrot.slane %v6571_v32, 6  ;;  %v6576_v60 = vrot.slane %v6574_v15, 7  ;;  %v6581_v38 = vshrl.u32 %v11676_v3, 16  ;;  %v6584_v63 = vshll.u32 %v11676_v3, 16  ;;  %v13438_v15 = vld [vmem:[%s18668_s9 + $0xd8] sm:$0xff]  }
 0x6a1   :  { %8279 = vmatmul.mubr.bf16.gmra.mrb[124].mxu1 %v16486_v0  ;;  %8409 = vmatprep.subr.bf16.mxu1 %v18774_v56  ;;  %v6303_v14 = vmul.f32 %v13665_v58, %v6267_v54  ;;  %v6268_v9 = vmax.f32 %v6176_v29, 0.0  ;;  %v7584_v10 = vsel %vm1879_vm9, %v7581_v52, %v7583_v20  ;;  %v7079_v33 = vrot.slane %v16578_v46, 1 }
 0x6a2   :  { %v6577_v45 = vor.u32 %v6576_v60, %v6573_v2  ;;  %v6583_v22 = vrot.slane %v6581_v38, 6  ;;  %v6586_v31 = vrot.slane %v6584_v63, 7  ;;  %v6003_v16 = vpop.f32.mrb[132].mxu0  ;;  %12293 = vmatmul.mubr.bf16.gmra.mrb[172].mxu0 %v7584_v10  ;;  %v13667_v38 = vld [vmem:[%s18660_s1 + $0x90] sm:$0xff] }
 0x6a3   :  { %v11677_v0 = vpack.c.bf16 %v6303_v14, %v6303_v14  ;;  %v6304_v5 = vmul.f32 %v13666_v44, %v6268_v9  ;;  %v12474_v30 = vadd.f32 %v16351_v17, %v6003_v16  ;;  %v6005_v26 = vpop.f32.mrb[133].mxu0  ;;  %v7080_v13 = vsel %vm1327_vm8, %v7075_v62, %v7079_v33 }
 0x6a4   :  { %8410 = vmatpush1.bf16.msra.mxu1 %v13434_v40  ;;  %v6578_v4 = vsel %vm13992_vm7, %v6569_v1, %v6577_v45  ;;  %v6579_v8 = vrot.slane %v6577_v45, 4  ;;  %v6587_v19 = vor.u32 %v6586_v31, %v6583_v22  ;;  %v6006_v39 = vpop.f32.mrb[134].mxu0  ;;  %8286 = vmatprep.mubr.bf16.mxu1 %v7080_v13  ;;  %v18993_v1 = vld [vmem:[#allocation51_spill] sm:$0xff]  ;;  %v16619_v9 = vshrl.u32 %v16562_v49, 16 }
 0x6a5   :  { %8411 = vmatprep.subr.bf16.mxu1 %v18774_v56  ;;  %6843 = vst [vmem:[#allocation2 + $0x40] sm:$0xf] %v6578_v4  ;;  %v6591_v53 = vshrl.u32 %v11677_v0, 16  ;;  %v6594_v48 = vshll.u32 %v11677_v0, 16  ;;  %v11678_v52 = vpack.c.bf16 %v6304_v5, %v6304_v5  ;;  %v6181_v12 = vadd.f32 %v12474_v30, %v18992_v28  ;;  %v6008_v35 = vpop.f32.mrb[135].mxu0  ;;  %v16596_v24 = vld [vmem:[#allocation2 + $0x38] sm:$0xff]  }
 0x6a6   :  { %v6588_v36 = vsel %vm13992_vm7, %v6579_v8, %v6587_v19  ;;  %v12475_v55 = vadd.f32 %v16351_v17, %v6006_v39  ;;  %v6589_v3 = vrot.slane %v6587_v19, 4  ;;  %v7585_v57 = vrot.slane %v16596_v24, 3  ;;  %v13440_v0 = vld [vmem:[%s18668_s9 + $0xe0] sm:$0xff]  }
 0x6a7   :  { %6844 = vst [vmem:[#allocation2 + $0x44] sm:$0xf] %v6588_v36  ;;  %v6593_v50 = vrot.slane %v6591_v53, 6  ;;  %v6596_v34 = vrot.slane %v6594_v48, 7  ;;  %v6601_v61 = vshrl.u32 %v11678_v52, 16  ;;  %v6604_v32 = vshll.u32 %v11678_v52, 16 }
 0x6a8   :  { %8412 = vmatpush1.bf16.msra.mxu1 %v13436_v37  ;;  %v6269_v23 = vmax.f32 %v6181_v12, 0.0  ;;  %v6184_v54 = vadd.f32 %v12475_v55, %v18993_v1  ;;  %v16610_v60 = vshll.u32 %v16596_v24, 16  ;;  %v7083_v26 = vor.u32 %v16619_v9, %v7079_v33  ;;  %v18994_v4 = vld [vmem:[#allocation53_spill] sm:$0xff]  ;;  %v18995_v36 = vld [vmem:[#allocation58_spill] sm:$0xff] }
 0x6a9   :  { %8287 = vmatmul.mubr.bf16.gmra.mrb[128].mxu1 %v16520_v7  ;;  %8413 = vmatprep.subr.bf16.mxu1 %v18774_v56  ;;  %v6597_v29 = vor.u32 %v6596_v34, %v6593_v50  ;;  %v6603_v40 = vrot.slane %v6601_v61, 6  ;;  %v6606_v2 = vrot.slane %v6604_v32, 7  ;;  %v7586_v7 = vsel %vm1879_vm9, %v7583_v20, %v7585_v57  ;;  %v13668_v20 = vld [vmem:[%s18660_s1 + $0x98] sm:$0xff]  ;;  %v13442_v50 = vld [vmem:[%s18668_s9 + $0xe8] sm:$0xff]  }
 0x6aa   :  { %v6305_v63 = vmul.f32 %v13667_v38, %v6269_v23  ;;  %v6270_v58 = vmax.f32 %v6184_v54, 0.0  ;;  %v6011_v14 = vpop.f32.mrb[136].mxu0  ;;  %12296 = vmatprep.mubr.bf16.mxu0 %v7586_v7  ;;  %v7087_v10 = vrot.slane %v16610_v60, 1  ;;  %v16642_v13 = vshrl.u32 %v16596_v24, 16 }
 0x6ab   :  { %v6598_v45 = vsel %vm13992_vm7, %v6589_v3, %v6597_v29  ;;  %v6599_v22 = vrot.slane %v6597_v29, 4  ;;  %v6607_v31 = vor.u32 %v6606_v2, %v6603_v40  ;;  %v12476_v16 = vadd.f32 %v16351_v17, %v6011_v14  ;;  %v6013_v62 = vpop.f32.mrb[137].mxu0  ;;  %v13669_v3 = vld [vmem:[%s18660_s1 + $0xa0] sm:$0xff]  ;;  %v13670_v14 = vld [vmem:[%s18660_s1 + $0xa8] sm:$0xff] }
 0x6ac   :  { %8414 = vmatpush1.bf16.msra.mxu1 %v13438_v15  ;;  %6845 = vst [vmem:[#allocation2 + $0x48] sm:$0xf] %v6598_v45  ;;  %v11679_v44 = vpack.c.bf16 %v6305_v63, %v6305_v63  ;;  %v6306_v5 = vmul.f32 %v13668_v20, %v6270_v58  ;;  %v6014_v30 = vpop.f32.mrb[138].mxu0  ;;  %v7088_v28 = vsel %vm1327_vm8, %v7083_v26, %v7087_v10 }
 0x6ad   :  { %8415 = vmatprep.subr.bf16.mxu1 %v18774_v56  ;;  %v6608_v37 = vsel %vm13992_vm7, %v6599_v22, %v6607_v31  ;;  %v6189_v8 = vadd.f32 %v12476_v16, %v18994_v4  ;;  %v12477_v19 = vadd.f32 %v16351_v17, %v6014_v30  ;;  %v6016_v39 = vpop.f32.mrb[139].mxu0  ;;  %v6609_v33 = vrot.slane %v6607_v31, 4  ;;  %8294 = vmatprep.mubr.bf16.mxu1 %v7088_v28  ;;  %v13445_v16 = vld [vmem:[%s18668_s9 + $0xf0] sm:$0xff]  }
 0x6ae   :  { %6846 = vst [vmem:[#allocation2 + $0x4c] sm:$0xf] %v6608_v37  ;;  %v6611_v53 = vshrl.u32 %v11679_v44, 16  ;;  %v6614_v48 = vshll.u32 %v11679_v44, 16  ;;  %v11680_v52 = vpack.c.bf16 %v6306_v5, %v6306_v5  ;;  %v16638_v12 = vld [vmem:[#allocation2 + $0x40] sm:$0xff]   ;;  %v7091_v58 = vor.u32 %v16642_v13, %v7087_v10  ;;  %v18996_v10 = vld [vmem:[#allocation56_spill] sm:$0xff] }
 0x6af   :  { %v6271_v35 = vmax.f32 %v6189_v8, 0.0  ;;  %v6192_v55 = vadd.f32 %v12477_v19, %v18995_v36  ;;  %v7587_v54 = vrot.slane %v16638_v12, 3  ;;  %v16654_v29 = vshll.u32 %v16638_v12, 16 }
 0x6b0   :  { %8416 = vmatpush1.bf16.msra.mxu1 %v13440_v0  ;;  %v6613_v34 = vrot.slane %v6611_v53, 6  ;;  %v6616_v61 = vrot.slane %v6614_v48, 7  ;;  %v6621_v32 = vshrl.u32 %v11680_v52, 16  ;;  %v6624_v15 = vshll.u32 %v11680_v52, 16 }
 0x6b1   :  { %8295 = vmatmul.mubr.bf16.gmra.mrb[132].mxu1 %v16562_v49  ;;  %8417 = vmatprep.subr.bf16.mxu1 %v18774_v56  ;;  %v6307_v23 = vmul.f32 %v13669_v3, %v6271_v35  ;;  %v6272_v1 = vmax.f32 %v6192_v55, 0.0  ;;  %v7588_v31 = vsel %vm1879_vm9, %v7585_v57, %v7587_v54  ;;  %v7095_v5 = vrot.slane %v16654_v29, 1  ;;  %v13448_v35 = vld [vmem:[%s18668_s9 + $0xf8] sm:$0xff]  }
 0x6b2   :  { %v6617_v40 = vor.u32 %v6616_v61, %v6613_v34  ;;  %v6623_v2 = vrot.slane %v6621_v32, 6  ;;  %v6626_v38 = vrot.slane %v6624_v15, 7  ;;  %v6019_v63 = vpop.f32.mrb[140].mxu0  ;;  %12297 = vmatmul.mubr.bf16.gmra.mrb[176].mxu0 %v7588_v31  ;;  %v13672_v31 = vld [vmem:[%s18660_s1 + $0xb8] sm:$0xff] }
 0x6b3   :  { %v11681_v49 = vpack.c.bf16 %v6307_v23, %v6307_v23  ;;  %v6308_v7 = vmul.f32 %v13670_v14, %v6272_v1  ;;  %v12478_v45 = vadd.f32 %v16351_v17, %v6019_v63  ;;  %v6021_v22 = vpop.f32.mrb[141].mxu0  ;;  %v7096_v53 = vsel %vm1327_vm8, %v7091_v58, %v7095_v5  ;;  %v13671_v1 = vld [vmem:[%s18660_s1 + $0xb0] sm:$0xff] }
 0x6b4   :  { %8418 = vmatpush1.bf16.msra.mxu1 %v13442_v50  ;;  %v6618_v62 = vsel %vm13992_vm7, %v6609_v33, %v6617_v40  ;;  %v6619_v0 = vrot.slane %v6617_v40, 4  ;;  %v6627_v44 = vor.u32 %v6626_v38, %v6623_v2  ;;  %v6022_v20 = vpop.f32.mrb[142].mxu0  ;;  %8302 = vmatprep.mubr.bf16.mxu1 %v7096_v53  ;;  %v18997_v50 = vld [vmem:[#allocation55_spill] sm:$0xff]  ;;  %v16695_v63 = vshrl.u32 %v16638_v12, 16 }
 0x6b5   :  { %8419 = vmatprep.subr.bf16.mxu1 %v18774_v56  ;;  %6847 = vst [vmem:[#allocation2 + $0x50] sm:$0xf] %v6618_v62  ;;  %v6631_v30 = vshrl.u32 %v11681_v49, 16  ;;  %v6634_v26 = vshll.u32 %v11681_v49, 16  ;;  %v11682_v57 = vpack.c.bf16 %v6308_v7, %v6308_v7  ;;  %v6197_v37 = vadd.f32 %v12478_v45, %v18996_v10  ;;  %v6024_v4 = vpop.f32.mrb[143].mxu0  ;;  %v16672_v8 = vld [vmem:[#allocation2 + $0x48] sm:$0xff]  }
 0x6b6   :  { %v6628_v19 = vsel %vm13992_vm7, %v6619_v0, %v6627_v44  ;;  %v12479_v39 = vadd.f32 %v16351_v17, %v6022_v20  ;;  %v6629_v36 = vrot.slane %v6627_v44, 4  ;;  %v7589_v61 = vrot.slane %v16672_v8, 3  ;;  %v18998_v44 = vld [vmem:[#allocation57_spill] sm:$0xff] }
 0x6b7   :  { %6848 = vst [vmem:[#allocation2 + $0x54] sm:$0xf] %v6628_v19  ;;  %v6633_v48 = vrot.slane %v6631_v30, 6  ;;  %v6636_v52 = vrot.slane %v6634_v26, 7  ;;  %v6641_v28 = vshrl.u32 %v11682_v57, 16  ;;  %v6644_v33 = vshll.u32 %v11682_v57, 16 }
 0x6b8   :  { %8420 = vmatpush1.bf16.msra.mxu1 %v13445_v16  ;;  %v6273_v55 = vmax.f32 %v6197_v37, 0.0  ;;  %v6200_v34 = vadd.f32 %v12479_v39, %v18997_v50  ;;  %v16686_v23 = vshll.u32 %v16672_v8, 16  ;;  %v7099_v62 = vor.u32 %v16695_v63, %v7095_v5  ;;  %v16712_v30 = vld [vmem:[%s18667_s8] ss:$0 sm:$0xff] }
 0x6b9   :  { %8303 = vmatmul.mubr.bf16.gmra.mrb[136].mxu1 %v16596_v24  ;;  %8421 = vmatprep.subr.bf16.mxu1 %v18774_v56  ;;  %v6637_v32 = vor.u32 %v6636_v52, %v6633_v48  ;;  %v6643_v15 = vrot.slane %v6641_v28, 6  ;;  %v6646_v3 = vrot.slane %v6644_v33, 7  ;;  %v7590_v24 = vsel %vm1879_vm9, %v7587_v54, %v7589_v61  ;;  %v18999_v48 = vld [vmem:[#allocation62_spill] sm:$0xff] }
 0x6ba   :  { %v6309_v40 = vmul.f32 %v13671_v1, %v6273_v55  ;;  %v6274_v2 = vmax.f32 %v6200_v34, 0.0  ;;  %v6027_v38 = vpop.f32.mrb[144].mxu0  ;;  %12300 = vmatprep.mubr.bf16.mxu0 %v7590_v24  ;;  %v7103_v0 = vrot.slane %v16686_v23, 1  ;;  %v16720_v28 = vshrl.u32 %v16672_v8, 16  ;;  %v13674_v50 = vld [vmem:[%s18660_s1 + $0xc0] sm:$0xff] }
 0x6bb   :  { %v6638_v58 = vsel %vm13992_vm7, %v6629_v36, %v6637_v32  ;;  %v6639_v49 = vrot.slane %v6637_v32, 4  ;;  %v6647_v14 = vor.u32 %v6646_v3, %v6643_v15  ;;  %v12480_v7 = vadd.f32 %v16351_v17, %v6027_v38  ;;  %v6029_v45 = vpop.f32.mrb[145].mxu0 }
 0x6bc   :  { %8422 = vmatpush1.bf16.msra.mxu1 %v13448_v35  ;;  %6849 = vst [vmem:[#allocation2 + $0x58] sm:$0xf] %v6638_v58  ;;  %v11683_v22 = vpack.c.bf16 %v6309_v40, %v6309_v40  ;;  %v6310_v54 = vmul.f32 %v13672_v31, %v6274_v2  ;;  %v6030_v16 = vpop.f32.mrb[146].mxu0  ;;  %v7104_v4 = vsel %vm1327_vm8, %v7099_v62, %v7103_v0 }
 0x6bd   :  { %8568 = vmatprep.subr.bf16.mxu1 %v18774_v56  ;;  %v6648_v17 = vsel %vm13992_vm7, %v6639_v49, %v6647_v14  ;;  %v6205_v20 = vadd.f32 %v12480_v7, %v18998_v44  ;;  %v12481_v26 = vadd.f32 %v16712_v30, %v6030_v16  ;;  %v6032_v57 = vpop.f32.mrb[147].mxu0  ;;  %v6649_v39 = vrot.slane %v6647_v14, 4  ;;  %8310 = vmatprep.mubr.bf16.mxu1 %v7104_v4 }
 0x6be   :  { %6850 = vst [vmem:[#allocation2 + $0x5c] sm:$0xf] %v6648_v17  ;;  %v6651_v10 = vshrl.u32 %v11683_v22, 16  ;;  %v6654_v5 = vshll.u32 %v11683_v22, 16  ;;  %v11684_v37 = vpack.c.bf16 %v6310_v54, %v6310_v54  ;;  %v16716_v19 = vld [vmem:[#allocation2 + $0x50] sm:$0xff]   ;;  %v7107_v24 = vor.u32 %v16720_v28, %v7103_v0 }
 0x6bf   :  { %v6275_v53 = vmax.f32 %v6205_v20, 0.0  ;;  %v6208_v52 = vadd.f32 %v12481_v26, %v18999_v48  ;;  %v7591_v15 = vrot.slane %v16716_v19, 3  ;;  %v16728_v3 = vshll.u32 %v16716_v19, 16  ;;  %v19001_v20 = vld [vmem:[#allocation60_spill] sm:$0xff] }
 0x6c0   :  { %v6653_v33 = vrot.slane %v6651_v10, 6  ;;  %v6656_v35 = vrot.slane %v6654_v5, 7  ;;  %v6661_v36 = vshrl.u32 %v11684_v37, 16  ;;  %v6664_v55 = vshll.u32 %v11684_v37, 16 }
 0x6c1   :  { %8311 = vmatmul.mubr.bf16.gmra.mrb[140].mxu1 %v16638_v12  ;;  %v6311_v34 = vmul.f32 %v13674_v50, %v6275_v53  ;;  %v6276_v32 = vmax.f32 %v6208_v52, 0.0  ;;  %19000 = vst [vmem:[#allocation12_spill] sm:$0xff] %v16728_v3  ;;  %v13675_v12 = vld [vmem:[%s18660_s1 + $0xc8] sm:$0xff]  ;;  %v7592_v45 = vsel %vm1879_vm9, %v7589_v61, %v7591_v15  ;;  %v7111_v62 = vrot.slane %v16728_v3, 1 }
 0x6c2   :  { %v6657_v1 = vor.u32 %v6656_v35, %v6653_v33  ;;  %v6663_v40 = vrot.slane %v6661_v36, 6  ;;  %v6666_v2 = vrot.slane %v6664_v55, 7  ;;  %v6035_v38 = vpop.f32.mrb[148].mxu0  ;;  %12301 = vmatmul.mubr.bf16.gmra.mrb[180].mxu0 %v7592_v45  ;;  %v19002_v35 = vld [vmem:[#allocation59_spill] sm:$0xff] }
 0x6c3   :  { %v11685_v58 = vpack.c.bf16 %v6311_v34, %v6311_v34  ;;  %v6312_v49 = vmul.f32 %v13675_v12, %v6276_v32  ;;  %v12482_v14 = vadd.f32 %v16712_v30, %v6035_v38  ;;  %v6037_v7 = vpop.f32.mrb[149].mxu0  ;;  %v7112_v37 = vsel %vm1327_vm8, %v7107_v24, %v7111_v62 }
 0x6c4   :  { %v6658_v22 = vsel %vm13992_vm7, %v6649_v39, %v6657_v1  ;;  %v6659_v31 = vrot.slane %v6657_v1, 4  ;;  %v6667_v54 = vor.u32 %v6666_v2, %v6663_v40  ;;  %v6038_v16 = vpop.f32.mrb[150].mxu0  ;;  %8318 = vmatprep.mubr.bf16.mxu1 %v7112_v37  ;;  %v13676_v40 = vld [vmem:[%s18660_s1 + $0xd0] sm:$0xff]  ;;  %v16759_v12 = vshrl.u32 %v16716_v19, 16 }
 0x6c5   :  { %6851 = vst [vmem:[#allocation2 + $0x60] sm:$0xf] %v6658_v22  ;;  %v6671_v0 = vshrl.u32 %v11685_v58, 16  ;;  %v6674_v17 = vshll.u32 %v11685_v58, 16  ;;  %v11686_v44 = vpack.c.bf16 %v6312_v49, %v6312_v49  ;;  %v6213_v26 = vadd.f32 %v12482_v14, %v19001_v20  ;;  %v6040_v57 = vpop.f32.mrb[151].mxu0  ;;  %v16742_v10 = vld [vmem:[#allocation2 + $0x58] sm:$0xff]  }
 0x6c6   :  { %v6668_v61 = vsel %vm13992_vm7, %v6659_v31, %v6667_v54  ;;  %v12483_v5 = vadd.f32 %v16712_v30, %v6038_v16  ;;  %v6669_v52 = vrot.slane %v6667_v54, 4  ;;  %v7593_v55 = vrot.slane %v16742_v10, 3  ;;  %19004 = vst [vmem:[#allocation14_spill] sm:$0xff] %v16759_v12  ;;  %v13677_v31 = vld [vmem:[%s18660_s1 + $0xd8] sm:$0xff] }
 0x6c7   :  { %6852 = vst [vmem:[#allocation2 + $0x64] sm:$0xf] %v6668_v61  ;;  %v6673_v4 = vrot.slane %v6671_v0, 6  ;;  %v6676_v39 = vrot.slane %v6674_v17, 7  ;;  %v6681_v53 = vshrl.u32 %v11686_v44, 16  ;;  %v6684_v48 = vshll.u32 %v11686_v44, 16 }
 0x6c8   :  { %v6277_v33 = vmax.f32 %v6213_v26, 0.0  ;;  %v6216_v36 = vadd.f32 %v12483_v5, %v19002_v35  ;;  %v16752_v1 = vshll.u32 %v16742_v10, 16  ;;  %v7594_v58 = vsel %vm1879_vm9, %v7591_v15, %v7593_v55  ;;  %v19005_v44 = vld [vmem:[#allocation61_spill] sm:$0xff] }
 0x6c9   :  { %8319 = vmatmul.mubr.bf16.gmra.mrb[144].mxu1 %v16672_v8  ;;  %v6677_v50 = vor.u32 %v6676_v39, %v6673_v4  ;;  %v6683_v34 = vrot.slane %v6681_v53, 6  ;;  %v6686_v32 = vrot.slane %v6684_v48, 7  ;;  %12304 = vmatprep.mubr.bf16.mxu0 %v7594_v58  ;;  %v7115_v16 = vor.u32 %v16759_v12, %v7111_v62  ;;  %v19006_v48 = vld [vmem:[#allocation66_spill] sm:$0xff] }
 0x6ca   :  { %19003 = vst [vmem:[#allocation15_spill] sm:$0xff] %v16752_v1  ;;  %v6313_v2 = vmul.f32 %v13676_v40, %v6277_v33  ;;  %v6278_v38 = vmax.f32 %v6216_v36, 0.0  ;;  %v6043_v24 = vpop.f32.mrb[152].mxu0  ;;  %v7119_v0 = vrot.slane %v16752_v1, 1  ;;  %v16778_v33 = vshrl.u32 %v16742_v10, 16 }
 0x6cb   :  { %v6678_v8 = vsel %vm13992_vm7, %v6669_v52, %v6677_v50  ;;  %v6679_v49 = vrot.slane %v6677_v50, 4  ;;  %v6687_v14 = vor.u32 %v6686_v32, %v6683_v34  ;;  %v12484_v7 = vadd.f32 %v16712_v30, %v6043_v24  ;;  %v6045_v45 = vpop.f32.mrb[153].mxu0  ;;  %v13678_v32 = vld [vmem:[%s18660_s1 + $0xe0] sm:$0xff] }
 0x6cc   :  { %6853 = vst [vmem:[#allocation2 + $0x68] sm:$0xf] %v6678_v8  ;;  %v11687_v22 = vpack.c.bf16 %v6313_v2, %v6313_v2  ;;  %v6314_v54 = vmul.f32 %v13677_v31, %v6278_v38  ;;  %v6046_v15 = vpop.f32.mrb[154].mxu0  ;;  %v7120_v4 = vsel %vm1327_vm8, %v7115_v16, %v7119_v0  ;;  %19007 = vst [vmem:[#allocation19_spill] sm:$0xff] %v16778_v33 }
 0x6cd   :  { %v6688_v17 = vsel %vm13992_vm7, %v6679_v49, %v6687_v14  ;;  %v6221_v20 = vadd.f32 %v12484_v7, %v19005_v44  ;;  %v12485_v26 = vadd.f32 %v16712_v30, %v6046_v15  ;;  %v6048_v57 = vpop.f32.mrb[155].mxu0  ;;  %v6689_v53 = vrot.slane %v6687_v14, 4  ;;  %8326 = vmatprep.mubr.bf16.mxu1 %v7120_v4 }
 0x6ce   :  { %6854 = vst [vmem:[#allocation2 + $0x6c] sm:$0xf] %v6688_v17  ;;  %v6691_v61 = vshrl.u32 %v11687_v22, 16  ;;  %v6694_v5 = vshll.u32 %v11687_v22, 16  ;;  %v11688_v37 = vpack.c.bf16 %v6314_v54, %v6314_v54  ;;  %v16774_v39 = vld [vmem:[#allocation2 + $0x60] sm:$0xff]   ;;  %v7123_v7 = vor.u32 %v16778_v33, %v7119_v0  ;;  %v13679_v22 = vld [vmem:[%s18660_s1 + $0xe8] sm:$0xff] }
 0x6cf   :  { %v6279_v62 = vmax.f32 %v6221_v20, 0.0  ;;  %v6224_v52 = vadd.f32 %v12485_v26, %v19006_v48  ;;  %v7595_v38 = vrot.slane %v16774_v39, 3  ;;  %v16786_v24 = vshll.u32 %v16774_v39, 16 }
 0x6d0   :  { %v6693_v35 = vrot.slane %v6691_v61, 6  ;;  %v6696_v36 = vrot.slane %v6694_v5, 7  ;;  %v6701_v50 = vshrl.u32 %v11688_v37, 16  ;;  %v6704_v34 = vshll.u32 %v11688_v37, 16  ;;  %v19009_v37 = vld [vmem:[#allocation64_spill] sm:$0xff] }
 0x6d1   :  { %8327 = vmatmul.mubr.bf16.gmra.mrb[148].mxu1 %v16716_v19  ;;  %v6315_v40 = vmul.f32 %v13678_v32, %v6279_v62  ;;  %v6280_v2 = vmax.f32 %v6224_v52, 0.0  ;;  %19008 = vst [vmem:[#allocation16_spill] sm:$0xff] %v16786_v24  ;;  %v7596_v16 = vsel %vm1879_vm9, %v7593_v55, %v7595_v38  ;;  %v7127_v0 = vrot.slane %v16786_v24, 1 }
 0x6d2   :  { %v6697_v58 = vor.u32 %v6696_v36, %v6693_v35  ;;  %v6703_v8 = vrot.slane %v6701_v50, 6  ;;  %v6706_v49 = vrot.slane %v6704_v34, 7  ;;  %v6051_v14 = vpop.f32.mrb[156].mxu0  ;;  %12305 = vmatmul.mubr.bf16.gmra.mrb[184].mxu0 %v7596_v16 }
 0x6d3   :  { %v11689_v45 = vpack.c.bf16 %v6315_v40, %v6315_v40  ;;  %v6316_v31 = vmul.f32 %v13679_v22, %v6280_v2  ;;  %v12486_v54 = vadd.f32 %v16712_v30, %v6051_v14  ;;  %v6053_v15 = vpop.f32.mrb[157].mxu0  ;;  %v7128_v52 = vsel %vm1327_vm8, %v7123_v7, %v7127_v0  ;;  %v19010_v2 = vld [vmem:[#allocation63_spill] sm:$0xff] }
 0x6d4   :  { %v6698_v17 = vsel %vm13992_vm7, %v6689_v53, %v6697_v58  ;;  %v6699_v44 = vrot.slane %v6697_v58, 4  ;;  %v6707_v20 = vor.u32 %v6706_v49, %v6703_v8  ;;  %v6054_v26 = vpop.f32.mrb[158].mxu0  ;;  %8334 = vmatprep.mubr.bf16.mxu1 %v7128_v52  ;;  %v13680_v7 = vld [vmem:[%s18660_s1 + $0xf0] sm:$0xff]  ;;  %v19013_v52 = vld [vmem:[#allocation65_spill] sm:$0xff] }
 0x6d5   :  { %6855 = vst [vmem:[#allocation2 + $0x70] sm:$0xf] %v6698_v17  ;;  %v6711_v57 = vshrl.u32 %v11689_v45, 16  ;;  %v6714_v61 = vshll.u32 %v11689_v45, 16  ;;  %v11690_v5 = vpack.c.bf16 %v6316_v31, %v6316_v31  ;;  %v6229_v4 = vadd.f32 %v12486_v54, %v19009_v37  ;;  %v6056_v62 = vpop.f32.mrb[159].mxu0  ;;  %v16798_v48 = vld [vmem:[#allocation2 + $0x68] sm:$0xff]  }
 0x6d6   :  { %v6708_v55 = vsel %vm13992_vm7, %v6699_v44, %v6707_v20  ;;  %v12487_v53 = vadd.f32 %v16712_v30, %v6054_v26  ;;  %v6709_v32 = vrot.slane %v6707_v20, 4  ;;  %v7597_v8 = vrot.slane %v16798_v48, 3  ;;  %v13681_v37 = vld [vmem:[%s18660_s1 + $0xf8] sm:$0xff] }
 0x6d7   :  { %6856 = vst [vmem:[#allocation2 + $0x74] sm:$0xf] %v6708_v55  ;;  %v6713_v35 = vrot.slane %v6711_v57, 6  ;;  %v6716_v36 = vrot.slane %v6714_v61, 7  ;;  %v6721_v50 = vshrl.u32 %v11690_v5, 16  ;;  %v6724_v34 = vshll.u32 %v11690_v5, 16 }
 0x6d8   :  { %v6281_v40 = vmax.f32 %v6229_v4, 0.0  ;;  %v6232_v58 = vadd.f32 %v12487_v53, %v19010_v2  ;;  %v16808_v22 = vshll.u32 %v16798_v48, 16  ;;  %v7598_v16 = vsel %vm1879_vm9, %v7595_v38, %v7597_v8 }
 0x6d9   :  { %8335 = vmatmul.mubr.bf16.gmra.mrb[152].mxu1 %v16742_v10  ;;  %v6717_v49 = vor.u32 %v6716_v36, %v6713_v35  ;;  %v6723_v14 = vrot.slane %v6721_v50, 6  ;;  %v6726_v45 = vrot.slane %v6724_v34, 7  ;;  %v16815_v17 = vshrl.u32 %v16774_v39, 16  ;;  %12308 = vmatprep.mubr.bf16.mxu0 %v7598_v16 }
 0x6da   :  { %19011 = vst [vmem:[#allocation18_spill] sm:$0xff] %v16808_v22  ;;  %v6317_v31 = vmul.f32 %v13680_v7, %v6281_v40  ;;  %v6282_v54 = vmax.f32 %v6232_v58, 0.0  ;;  %v6059_v15 = vpop.f32.mrb[160].mxu0  ;;  %v7135_v55 = vrot.slane %v16808_v22, 1  ;;  %v16834_v7 = vshrl.u32 %v16798_v48, 16 }
 0x6db   :  { %19012 = vst [vmem:[#allocation17_spill] sm:$0xff] %v16815_v17  ;;  %v6718_v44 = vsel %vm13992_vm7, %v6709_v32, %v6717_v49  ;;  %v6719_v20 = vrot.slane %v6717_v49, 4  ;;  %v6727_v26 = vor.u32 %v6726_v45, %v6723_v14  ;;  %v12488_v57 = vadd.f32 %v16712_v30, %v6059_v15  ;;  %v6061_v61 = vpop.f32.mrb[161].mxu0  ;;  %v19014_v14 = vld [vmem:[#allocation13_spill] sm:$0xff] }
 0x6dc   :  { %6857 = vst [vmem:[#allocation2 + $0x78] sm:$0xf] %v6718_v44  ;;  %v11691_v5 = vpack.c.bf16 %v6317_v31, %v6317_v31  ;;  %v6318_v4 = vmul.f32 %v13681_v37, %v6282_v54  ;;  %v6062_v38 = vpop.f32.mrb[162].mxu0  ;;  %v7131_v62 = vor.u32 %v16815_v17, %v7127_v0  ;;  %19015 = vst [vmem:[#allocation22_spill] sm:$0xff] %v16834_v7  ;;  %v13682_v44 = vld [vmem:[%s18660_s1 + $0x100] sm:$0xff]  ;;  %v7201_v22 = vrot.slane %v16421_v47, 1 }
 0x6dd   :  { %v6728_v53 = vsel %vm13992_vm7, %v6719_v20, %v6727_v26  ;;  %v6237_v35 = vadd.f32 %v12488_v57, %v19013_v52  ;;  %v12489_v36 = vadd.f32 %v16712_v30, %v6062_v38  ;;  %v6064_v50 = vpop.f32.mrb[163].mxu0  ;;  %v6729_v49 = vrot.slane %v6727_v26, 4  ;;  %v13683_v52 = vld [vmem:[%s18660_s1 + $0x108] sm:$0xff] }
 0x6de   :  { %6858 = vst [vmem:[#allocation2 + $0x7c] sm:$0xf] %v6728_v53  ;;  %v6731_v34 = vshrl.u32 %v11691_v5, 16  ;;  %v6734_v32 = vshll.u32 %v11691_v5, 16  ;;  %v11692_v40 = vpack.c.bf16 %v6318_v4, %v6318_v4  ;;  %v7136_v2 = vsel %vm1327_vm8, %v7131_v62, %v7135_v55  ;;  %v16830_v58 = vld [vmem:[#allocation2 + $0x70] sm:$0xff]  }
 0x6df   :  { %v6283_v0 = vmax.f32 %v6237_v35, 0.0  ;;  %v6240_v45 = vadd.f32 %v12489_v36, %v19014_v14  ;;  %8342 = vmatprep.mubr.bf16.mxu1 %v7136_v2  ;;  %v7599_v26 = vrot.slane %v16830_v58, 3  ;;  %v16842_v61 = vshll.u32 %v16830_v58, 16 }
 0x6e0   :  { %v6733_v31 = vrot.slane %v6731_v34, 6  ;;  %v6736_v54 = vrot.slane %v6734_v32, 7  ;;  %v6741_v15 = vshrl.u32 %v11692_v40, 16  ;;  %v6744_v16 = vshll.u32 %v11692_v40, 16 }
 0x6e1   :  { %8343 = vmatmul.mubr.bf16.gmra.mrb[156].mxu1 %v16774_v39  ;;  %v6319_v20 = vmul.f32 %v13682_v44, %v6283_v0  ;;  %v6284_v57 = vmax.f32 %v6240_v45, 0.0  ;;  %v7139_v62 = vor.u32 %v16834_v7, %v7135_v55  ;;  %v7600_v34 = vsel %vm1879_vm9, %v7597_v8, %v7599_v26  ;;  %v6905_v7 = vld [vmem:[#allocation2] sm:$0xe] }
 0x6e2   :  { %v6737_v5 = vor.u32 %v6736_v54, %v6733_v31  ;;  %v6743_v37 = vrot.slane %v6741_v15, 6  ;;  %v6746_v4 = vrot.slane %v6744_v16, 7  ;;  %v6067_v38 = vpop.f32.mrb[164].mxu0  ;;  %12309 = vmatmul.mubr.bf16.gmra.mrb[188].mxu0 %v7600_v34  ;;  %v7143_v55 = vrot.slane %v16842_v61, 1  ;;  %v19016_v54 = vld [vmem:[#allocation68_spill] sm:$0xff] }
 0x6e3   :  { %v11693_v53 = vpack.c.bf16 %v6319_v20, %v6319_v20  ;;  %v6320_v35 = vmul.f32 %v13683_v52, %v6284_v57  ;;  %v12490_v36 = vadd.f32 %v16712_v30, %v6067_v38  ;;  %v6069_v50 = vpop.f32.mrb[165].mxu0  ;;  %v16861_v57 = vshrl.u32 %v16830_v58, 16 }
 0x6e4   :  { %v6738_v32 = vsel %vm13992_vm7, %v6729_v49, %v6737_v5  ;;  %v6739_v40 = vrot.slane %v6737_v5, 4  ;;  %v6747_v2 = vor.u32 %v6746_v4, %v6743_v37  ;;  %v6070_v0 = vpop.f32.mrb[166].mxu0  ;;  %v7144_v20 = vsel %vm1327_vm8, %v7139_v62, %v7143_v55 }
 0x6e5   :  { %6859 = vst [vmem:[#allocation2 + $0x80] sm:$0xf] %v6738_v32  ;;  %v6751_v14 = vshrl.u32 %v11693_v53, 16  ;;  %v6754_v45 = vshll.u32 %v11693_v53, 16  ;;  %v11694_v31 = vpack.c.bf16 %v6320_v35, %v6320_v35  ;;  %v6245_v15 = vadd.f32 %v12490_v36, %v19016_v54  ;;  %v6072_v16 = vpop.f32.mrb[167].mxu0  ;;  %v16854_v44 = vld [vmem:[#allocation2 + $0x78] sm:$0xff]   ;;  %8350 = vmatprep.mubr.bf16.mxu1 %v7144_v20 }
 0x6e6   :  { %v6748_v8 = vsel %vm13992_vm7, %v6739_v40, %v6747_v2  ;;  %v12491_v49 = vadd.f32 %v16712_v30, %v6070_v0  ;;  %v6749_v53 = vrot.slane %v6747_v2, 4  ;;  %v19017_v35 = vld [vmem:[#allocation67_spill] sm:$0xff]  ;;  %v7601_v50 = vrot.slane %v16854_v44, 3 }
 0x6e7   :  { %6860 = vst [vmem:[#allocation2 + $0x84] sm:$0xf] %v6748_v8  ;;  %v6753_v5 = vrot.slane %v6751_v14, 6  ;;  %v6756_v37 = vrot.slane %v6754_v45, 7  ;;  %v6761_v4 = vshrl.u32 %v11694_v31, 16  ;;  %v6764_v38 = vshll.u32 %v11694_v31, 16 }
 0x6e8   :  { %v6285_v52 = vmax.f32 %v6245_v15, 0.0  ;;  %v6248_v36 = vadd.f32 %v12491_v49, %v19017_v35  ;;  %v16867_v32 = vshll.u32 %v16854_v44, 16  ;;  %v13684_v40 = vld [vmem:[%s18660_s1 + $0x110] sm:$0xff]  ;;  %v7602_v2 = vsel %vm1879_vm9, %v7599_v26, %v7601_v50  ;;  %v13685_v49 = vld [vmem:[%s18660_s1 + $0x118] sm:$0xff] }
 0x6e9   :  { %8351 = vmatmul.mubr.bf16.gmra.mrb[160].mxu1 %v16798_v48  ;;  %v6757_v30 = vor.u32 %v6756_v37, %v6753_v5  ;;  %v6763_v34 = vrot.slane %v6761_v4, 6  ;;  %v6766_v62 = vrot.slane %v6764_v38, 7  ;;  %v7147_v45 = vor.u32 %v16861_v57, %v7143_v55  ;;  %12312 = vmatprep.mubr.bf16.mxu0 %v7602_v2 }
 0x6ea   :  { %v6321_v0 = vmul.f32 %v13684_v40, %v6285_v52  ;;  %v6286_v14 = vmax.f32 %v6248_v36, 0.0  ;;  %v7151_v16 = vrot.slane %v16867_v32, 1 }
 0x6eb   :  { %v6758_v31 = vsel %vm13992_vm7, %v6749_v53, %v6757_v30  ;;  %v6759_v54 = vrot.slane %v6757_v30, 4  ;;  %v6767_v15 = vor.u32 %v6766_v62, %v6763_v34  ;;  %v16888_v34 = vshrl.u32 %v16854_v44, 16 }
 0x6ec   :  { %6861 = vst [vmem:[#allocation2 + $0x88] sm:$0xf] %v6758_v31  ;;  %v11695_v8 = vpack.c.bf16 %v6321_v0, %v6321_v0  ;;  %v6322_v20 = vmul.f32 %v13685_v49, %v6286_v14  ;;  %v7152_v55 = vsel %vm1327_vm8, %v7147_v45, %v7151_v16 }
 0x6ed   :  { %v6768_v26 = vsel %vm13992_vm7, %v6759_v54, %v6767_v15  ;;  %8358 = vmatprep.mubr.bf16.mxu1 %v7152_v55  ;;  %v6769_v40 = vrot.slane %v6767_v15, 4  ;;  %v7155_v31 = vor.u32 %v16888_v34, %v7151_v16  ;;  %v7285_v16 = vrot.slane %v7045_v41, 2 }
 0x6ee   :  { %6862 = vst [vmem:[#allocation2 + $0x8c] sm:$0xf] %v6768_v26  ;;  %v6771_v5 = vshrl.u32 %v11695_v8, 16  ;;  %v6774_v37 = vshll.u32 %v11695_v8, 16  ;;  %v11696_v4 = vpack.c.bf16 %v6322_v20, %v6322_v20  ;;  %v16883_v38 = vld [vmem:[#allocation2 + $0x80] sm:$0xff]   ;;  %v7223_v41 = vrot.slane %v16798_v48, 1 }
 0x6ef   :  { %v7603_v30 = vrot.slane %v16883_v38, 3  ;;  %v16891_v62 = vshll.u32 %v16883_v38, 16 }
 0x6f0   :  { %v6773_v53 = vrot.slane %v6771_v5, 6  ;;  %v6776_v52 = vrot.slane %v6774_v37, 7  ;;  %v6781_v35 = vshrl.u32 %v11696_v4, 16  ;;  %v6784_v36 = vshll.u32 %v11696_v4, 16  ;;  %v6865_v4 = vld [vmem:[#allocation2 + $0x98] sm:$0x3] }
 0x6f1   :  { %8359 = vmatmul.mubr.bf16.gmra.mrb[164].mxu1 %v16830_v58  ;;  %v7604_v45 = vsel %vm1879_vm9, %v7601_v50, %v7603_v30  ;;  %v7159_v54 = vrot.slane %v16891_v62, 1  ;;  %v16904_v50 = vshrl.u32 %v16883_v38, 16  ;;  %v7284_v37 = vrot.slane %v7049_v51, 1 }
 0x6f2   :  { %v6777_v0 = vor.u32 %v6776_v52, %v6773_v53  ;;  %v6783_v14 = vrot.slane %v6781_v35, 6  ;;  %v6786_v2 = vrot.slane %v6784_v36, 7  ;;  %12313 = vmatmul.mubr.bf16.gmra.mrb[192].mxu0 %v7604_v45  ;;  %v7227_v45 = vrot.slane %v16854_v44, 1 }
 0x6f3   :  { %v7160_v26 = vsel %vm1327_vm8, %v7155_v31, %v7159_v54  ;;  %v7341_v33 = vrot.slane %v16891_v62, 2 }
 0x6f4   :  { %v6778_v8 = vsel %vm13992_vm7, %v6769_v40, %v6777_v0  ;;  %v6779_v49 = vrot.slane %v6777_v0, 4  ;;  %v6787_v20 = vor.u32 %v6786_v2, %v6783_v14  ;;  %8366 = vmatprep.mubr.bf16.mxu1 %v7160_v26  ;;  %v7163_v40 = vor.u32 %v16904_v50, %v7159_v54 }
 0x6f5   :  { %6863 = vst [vmem:[#allocation2 + $0x90] sm:$0xf] %v6778_v8  ;;  %v16899_v55 = vld [vmem:[#allocation2 + $0x88] sm:$0xff]   ;;  %v18724_v0 = vrot.slane %v16774_v39, 1  ;;  %v7225_v2 = vrot.slane %v16830_v58, 1  ;;  %v7229_v54 = vrot.slane %v16883_v38, 1 }
 0x6f6   :  { %v6788_v15 = vsel %vm13992_vm7, %v6779_v49, %v6787_v20  ;;  %v6789_v5 = vrot.slane %v6787_v20, 4  ;;  %v7605_v53 = vrot.slane %v16899_v55, 3  ;;  %v16912_v52 = vshll.u32 %v16899_v55, 16 }
 0x6f7   :  { %6864 = vst [vmem:[#allocation2 + $0x94] sm:$0xf] %v6788_v15  ;;  %v16927_v31 = vsel %vm1497_vm11, %v18724_v0, %v7223_v41  ;;  %v16932_v49 = vsel %vm1497_vm11, %v7223_v41, %v7225_v2  ;;  %v16938_v26 = vsel %vm1497_vm11, %v7227_v45, %v7229_v54  ;;  %v16940_v15 = vor.u32 %v7285_v16, %v7284_v37  ;;  %v16953_v16 = vld [vmem:[#allocation2 + $0xc] sm:$0xf] }
 0x6f8   :  { %v6866_v36 = vsel %vm13923_vm2, %v6789_v5, %v6865_v4  ;;  %v7606_v51 = vsel %vm1879_vm9, %v7603_v30, %v7605_v53  ;;  %v7167_v14 = vrot.slane %v16912_v52, 1  ;;  %v16935_v30 = vsel %vm1497_vm11, %v7225_v2, %v7227_v45 }
 0x6f9   :  { %8367 = vmatmul.mubr.bf16.gmra.mrb[168].mxu1 %v16854_v44  ;;  %6867 = vst [vmem:[#allocation2 + $0x98] sm:$0x3] %v6866_v36  ;;  %12316 = vmatprep.mubr.bf16.mxu0 %v7606_v51  ;;  %v16943_v5 = vshrl.u32 %v16899_v55, 16  ;;  %v7231_v45 = vrot.slane %v16899_v55, 1 }
 0x6fa   :  { %v7168_v8 = vsel %vm1327_vm8, %v7163_v40, %v7167_v14  ;;  %v6906_v40 = vld [vmem:[#allocation2 + $0x8] sm:$0xe] }
 0x6fb   :  { %8374 = vmatprep.mubr.bf16.mxu1 %v7168_v8  ;;  %v7171_v41 = vor.u32 %v16943_v5, %v7167_v14  ;;  %v16956_v37 = vcombine.low %v6906_v40, %v16953_v16  ;;  %v16964_v14 = vsel %vm1497_vm11, %v7229_v54, %v7231_v45  ;;  %v7344_v3 = vrot.slane %v16943_v5, 1 }
 0x6fc   :  { %v13446_v20 = vld [vmem:[#allocation2 + $0x90] ss:$0 sps:$4 sm:$0x11]  }
 0x6fd   :  { %v7173_v4 = vshll.u32 %v13446_v20, 16  ;;  %v7264_v40 = vrot.slane %v16956_v37, 1 }
 0x6fe   :  { %v16945_v36 = vld [vmem:[#allocation2 + $0x90] sm:$0xff]  }
 0x6ff   :  { %v7175_v51 = vrot.slane %v7173_v4, 1  ;;  %v7607_v2 = vrot.slane %v16945_v36, 3  ;;  %v7265_v24 = vsel %vm1497_vm11, %v7264_v40, %v7201_v22  ;;  %v18734_v54 = vrot.slane %v16945_v36, 1  ;;  %v13453_v40 = vld [vmem:[%s18668_s9 + $0x100] sm:$0xff]  }
 0x700   :  { %v16950_v8 = vld [vmem:[#allocation2 + $0x98] sm:$0xff]  }
 0x701   :  { %8375 = vmatmul.mubr.bf16.gmra.mrb[172].mxu1 %v16883_v38  ;;  %19019 = vst [vmem:[#allocation34_spill] sm:$0xff] %v16950_v8  ;;  %v7176_v0 = vsel %vm1327_vm8, %v7171_v41, %v7175_v51  ;;  %v7608_v35 = vsel %vm1879_vm9, %v7605_v53, %v7607_v2  ;;  %v7609_v43 = vrot.slane %v16950_v8, 3  ;;  %v7611_v41 = vrot.slane %v16961_v21, 3  ;;  %v13687_v53 = vld [vmem:[#allocation2 + $0x4] sm:$0xf]  ;;  %v16980_v21 = vld [vmem:[#allocation2 + $0x18] sm:$0xff]  }
 0x702   :  { %8382 = vmatprep.mubr.bf16.mxu1 %v7176_v0  ;;  %12317 = vmatmul.mubr.bf16.gmra.mrb[196].mxu0 %v7608_v35  ;;  %v11393_v51 = vcombine.low %v6905_v7, %v13687_v53  ;;  %v16977_v0 = vsel %vm1497_vm11, %v7231_v45, %v18734_v54  ;;  %v7203_v7 = vrot.slane %v16980_v21, 1  ;;  %v7414_v54 = vrot.slane %v16854_v44, 2 }
 0x703   :  { %v7610_v4 = vsel %vm1879_vm9, %v7607_v2, %v7609_v43  ;;  %v7612_v35 = vsel %vm1879_vm9, %v7609_v43, %v7611_v41  ;;  %v18737_v43 = vrot.slane %v16774_v39, 2  ;;  %v7410_v41 = vrot.slane %v16798_v48, 2 }
 0x704   :  { %12320 = vmatprep.mubr.bf16.mxu0 %v7610_v4  ;;  %v7198_v2 = vrot.slane %v11393_v51, 1  ;;  %v7199_v4 = vrot.slane %v16398_v27, 1  ;;  %v7204_v53 = vsel %vm1497_vm11, %v7201_v22, %v7203_v7  ;;  %v7412_v51 = vrot.slane %v16830_v58, 2  ;;  %v13454_v27 = vld [vmem:[%s18668_s9 + $0x108] sm:$0xff]  }
 0x705   :  { %v7416_v44 = vrot.slane %v16883_v38, 2 }
 0x706   :  { %v17001_v48 = vsel %vm1688_vm13, %v7410_v41, %v7412_v51  ;;  %v7202_v12 = vsel %vm1497_vm11, %v7199_v4, %v7201_v22  ;;  %v13456_v22 = vld [vmem:[%s18668_s9 + $0x118] sm:$0xff]  }
 0x707   :  { %19022 = vst [vmem:[#allocation24_spill] sm:$0xff] %v17001_v48 }
 0x709   :  { %8383 = vmatmul.mubr.bf16.gmra.mrb[176].mxu1 %v16899_v55 }
 0x70a   :  { %8423 = vmatprep.mubr.bf16.mxu1 %v7265_v24  ;;  %12321 = vmatmul.mubr.bf16.gmra.mrb[200].mxu0 %v7612_v35  ;;  %v7200_v24 = vsel %vm1497_vm11, %v7198_v2, %v7199_v4  ;;  %v7233_v35 = vrot.slane %v13446_v20, 1  ;;  %v16997_v2 = vsel %vm1688_vm13, %v18737_v43, %v7410_v41  ;;  %v17009_v20 = vld [vmem:[#allocation2 + $0x20] sm:$0xff]   ;;  %v7336_v43 = vrot.slane %v16888_v34, 1  ;;  %v13455_v41 = vld [vmem:[%s18668_s9 + $0x110] sm:$0xff]  }
 0x70b   :  { %19021 = vst [vmem:[#allocation23_spill] sm:$0xff] %v16997_v2  ;;  %v7205_v17 = vrot.slane %v17009_v20, 1  ;;  %v7337_v2 = vrot.slane %v16867_v32, 2  ;;  %v7352_v4 = vshll.u32 %v16945_v36, 16 }
 0x70c   :  { %v17005_v58 = vsel %vm1497_vm11, %v7231_v45, %v7233_v35  ;;  %v17020_v45 = vsel %vm1688_vm13, %v7412_v51, %v7414_v54  ;;  %v7340_v35 = vrot.slane %v16904_v50, 1  ;;  %v7345_v51 = vrot.slane %v16912_v52, 2 }
 0x70d   :  { %19023 = vst [vmem:[#allocation35_spill] sm:$0xff] %v17020_v45  ;;  %v7338_v1 = vor.u32 %v7337_v2, %v7336_v43  ;;  %v7206_v38 = vsel %vm1497_vm11, %v7203_v7, %v7205_v17  ;;  %v7541_v45 = vshll.u32 %v16950_v8, 16 }
 0x70e   :  { %v7342_v43 = vor.u32 %v7341_v33, %v7340_v35  ;;  %v7349_v33 = vshrl.u32 %v16945_v36, 16  ;;  %v7354_v35 = vrot.slane %v7352_v4, 2 }
 0x711   :  { %8424 = vmatmul.mubr.bf16.vlgmr.msra.gmra.mrb[108].mxu1 %v7200_v24  ;;  %v7332_v24 = vrot.slane %v16861_v57, 1 }
 0x712   :  { %8569 = vmatpush1.bf16.msra.mxu1 %v13453_v40  ;;  %8431 = vmatprep.mubr.bf16.mxu1 %v7204_v53  ;;  %v7333_v40 = vrot.slane %v16842_v61, 2 }
 0x713   :  { %8570 = vmatprep.subr.bf16.mxu1 %v18774_v56 }
 0x714   :  { %v17017_v48 = vor.u32 %v7333_v40, %v7332_v24  ;;  %v17030_v24 = vsel %vm1688_vm13, %v7414_v54, %v7416_v44  ;;  %v17049_v54 = vrot.slane %v16945_v36, 2 }
 0x715   :  { %19024 = vst [vmem:[#allocation33_spill] sm:$0xff] %v17030_v24  ;;  %v7534_v24 = vrot.slane %v7352_v4, 3 }
 0x716   :  { %8571 = vmatpush1.bf16.msra.mxu1 %v13454_v27  ;;  %v7418_v27 = vrot.slane %v16899_v55, 2  ;;  %v17036_v40 = vsel %vm1576_vm10, %v17017_v48, %v7338_v1  ;;  %v7346_v55 = vor.u32 %v7345_v51, %v7344_v3  ;;  %v13457_v51 = vld [vmem:[%s18668_s9 + $0x120] sm:$0xff]  }
 0x717   :  { %8572 = vmatprep.subr.bf16.mxu1 %v18774_v56  ;;  %19025 = vst [vmem:[#allocation26_spill] sm:$0xff] %v17036_v40  ;;  %v7538_v40 = vshrl.u32 %v16950_v8, 16 }
 0x718   :  { %v17039_v2 = vsel %vm1688_vm13, %v7416_v44, %v7418_v27  ;;  %v17054_v7 = vsel %vm1576_vm10, %v7342_v43, %v7346_v55  ;;  %v17061_v3 = vsel %vm1688_vm13, %v7418_v27, %v17049_v54  ;;  %v13458_v27 = vld [vmem:[%s18668_s9 + $0x128] sm:$0xff]  }
 0x719   :  { %8432 = vmatmul.mubr.bf16.gmra.mrb[112].mxu1 %v7202_v12  ;;  %19026 = vst [vmem:[#allocation25_spill] sm:$0xff] %v17039_v2  ;;  %v17046_v12 = vsel %vm1576_vm10, %v7338_v1, %v7342_v43  ;;  %19028 = vst [vmem:[#allocation27_spill] sm:$0xff] %v17054_v7  ;;  %v7351_v1 = vrot.slane %v7349_v33, 1 }
 0x71a   :  { %8439 = vmatprep.mubr.bf16.mxu1 %v7206_v38  ;;  %8573 = vmatpush1.bf16.msra.mxu1 %v13455_v41  ;;  %19027 = vst [vmem:[#allocation21_spill] sm:$0xff] %v17046_v12  ;;  %v17056_v41 = vld [vmem:[#allocation2 + $0x28] sm:$0xff]   ;;  %19029 = vst [vmem:[#allocation38_spill] sm:$0xff] %v17061_v3  ;;  %v7530_v12 = vrot.slane %v16912_v52, 3  ;;  %v18753_v52 = vrot.slane %v16950_v8, 2 }
 0x71b   :  { %8574 = vmatprep.subr.bf16.mxu1 %v18774_v56  ;;  %v7207_v44 = vrot.slane %v17056_v41, 1  ;;  %v17067_v2 = vor.u32 %v7354_v35, %v7351_v1  ;;  %v7518_v35 = vrot.slane %v16842_v61, 3  ;;  %v7526_v61 = vrot.slane %v16891_v62, 3 }
 0x71d   :  { %19030 = vst [vmem:[#allocation40_spill] sm:$0xff] %v17067_v2  ;;  %v7208_v43 = vsel %vm1497_vm11, %v7205_v17, %v7207_v44  ;;  %v17072_v7 = vsel %vm1576_vm10, %v7346_v55, %v17067_v2  ;;  %v13459_v17 = vld [vmem:[%s18668_s9 + $0x130] sm:$0xff]   ;;  %v7517_v55 = vrot.slane %v16861_v57, 2  ;;  %v7522_v2 = vrot.slane %v16867_v32, 3  ;;  %v13461_v32 = vld [vmem:[%s18668_s9 + $0x140] sm:$0xff]  }
 0x71e   :  { %8575 = vmatpush1.bf16.msra.mxu1 %v13456_v22  ;;  %19031 = vst [vmem:[#allocation20_spill] sm:$0xff] %v17072_v7  ;;  %v17078_v22 = vld [vmem:[#allocation2 + $0x30] sm:$0xff]   ;;  %v17095_v7 = vld [vmem:[#allocation2 + $0x38] sm:$0xff]  }
 0x71f   :  { %8576 = vmatprep.subr.bf16.mxu1 %v18774_v56  ;;  %v7209_v1 = vrot.slane %v17078_v22, 1  ;;  %v7211_v57 = vrot.slane %v17095_v7, 1 }
 0x721   :  { %8440 = vmatmul.mubr.bf16.gmra.mrb[116].mxu1 %v7204_v53  ;;  %v7210_v53 = vsel %vm1497_vm11, %v7207_v44, %v7209_v1  ;;  %v7529_v44 = vrot.slane %v16943_v5, 2  ;;  %v7212_v4 = vsel %vm1497_vm11, %v7209_v1, %v7211_v57  ;;  %v13463_v1 = vld [vmem:[%s18668_s9 + $0x150] sm:$0xff]  }
 0x722   :  { %8447 = vmatprep.mubr.bf16.mxu1 %v7208_v43  ;;  %8577 = vmatpush1.bf16.msra.mxu1 %v13457_v51  ;;  %v13460_v51 = vld [vmem:[%s18668_s9 + $0x138] sm:$0xff]  }
 0x723   :  { %8578 = vmatprep.subr.bf16.mxu1 %v18774_v56  ;;  %v7531_v5 = vor.u32 %v7530_v12, %v7529_v44  ;;  %v17152_v44 = vld [vmem:[#allocation2 + $0x48] sm:$0xff]  }
 0x726   :  { %8579 = vmatpush1.bf16.msra.mxu1 %v13458_v27  ;;  %v7521_v27 = vrot.slane %v16888_v34, 2  ;;  %v7533_v34 = vrot.slane %v7349_v33, 2 }
 0x727   :  { %8580 = vmatprep.subr.bf16.mxu1 %v18774_v56 }
 0x728   :  { %v7523_v3 = vor.u32 %v7522_v2, %v7521_v27  ;;  %v7535_v33 = vor.u32 %v7534_v24, %v7533_v34  ;;  %v17125_v27 = vsel %vm1688_vm13, %v17049_v54, %v18753_v52  ;;  %v13462_v24 = vld [vmem:[%s18668_s9 + $0x148] sm:$0xff]   ;;  %v7215_v34 = vrot.slane %v17152_v44, 1 }
 0x729   :  { %8448 = vmatmul.mubr.bf16.gmra.mrb[120].mxu1 %v7206_v38  ;;  %v7525_v38 = vrot.slane %v16904_v50, 2  ;;  %19032 = vst [vmem:[#allocation29_spill] sm:$0xff] %v17125_v27 }
 0x72a   :  { %8455 = vmatprep.mubr.bf16.mxu1 %v7210_v53  ;;  %8581 = vmatpush1.bf16.msra.mxu1 %v13459_v17  ;;  %v17100_v17 = vor.u32 %v7518_v35, %v7517_v55  ;;  %v7540_v55 = vrot.slane %v7538_v40, 2  ;;  %v7543_v35 = vrot.slane %v7541_v45, 3  ;;  %v17131_v45 = vsel %vm1767_vm12, %v7531_v5, %v7535_v33 }
 0x72b   :  { %8582 = vmatprep.subr.bf16.mxu1 %v18774_v56  ;;  %v7527_v50 = vor.u32 %v7526_v61, %v7525_v38  ;;  %v13464_v61 = vld [vmem:[%s18668_s9 + $0x158] sm:$0xff]  }
 0x72c   :  { %v17111_v62 = vsel %vm1767_vm12, %v17100_v17, %v7523_v3  ;;  %v17133_v40 = vor.u32 %v7543_v35, %v7540_v55  ;;  %v13469_v55 = vld [vmem:[%s18668_s9 + $0x178] sm:$0xff]  }
 0x72d   :  { %v17115_v2 = vsel %vm1767_vm12, %v7523_v3, %v7527_v50  ;;  %v17140_v3 = vld [vmem:[#allocation2 + $0x40] sm:$0xff]  }
 0x72e   :  { %8583 = vmatpush1.bf16.msra.mxu1 %v13460_v51  ;;  %v17119_v51 = vsel %vm1767_vm12, %v7527_v50, %v7531_v5  ;;  %19033 = vst [vmem:[#allocation39_spill] sm:$0xff] %v17133_v40  ;;  %v17138_v12 = vsel %vm1767_vm12, %v7535_v33, %v17133_v40  ;;  %v7217_v50 = vrot.slane %v16716_v19, 1  ;;  %v13467_v5 = vld [vmem:[%s18668_s9 + $0x170] sm:$0xff]   ;;  %v7219_v19 = vrot.slane %v16742_v10, 1 }
 0x72f   :  { %8584 = vmatprep.subr.bf16.mxu1 %v18774_v56 }
 0x730   :  { %v7218_v33 = vsel %vm1497_vm11, %v7215_v34, %v7217_v50  ;;  %v7220_v35 = vsel %vm1497_vm11, %v7217_v50, %v7219_v19  ;;  %v13468_v50 = vld [vmem:[#allocation2 + $0x98] ss:$0 sps:$4 sm:$0x11]  }
 0x731   :  { %8456 = vmatmul.mubr.bf16.gmra.mrb[124].mxu1 %v7208_v43  ;;  %v7213_v43 = vrot.slane %v17140_v3, 1 }
 0x732   :  { %8463 = vmatprep.mubr.bf16.mxu1 %v7212_v4  ;;  %8585 = vmatpush1.bf16.msra.mxu1 %v13461_v32  ;;  %v13465_v32 = vld [vmem:[%s18668_s9 + $0x160] sm:$0xff]  }
 0x733   :  { %8586 = vmatprep.subr.bf16.mxu1 %v18774_v56  ;;  %v7214_v38 = vsel %vm1497_vm11, %v7211_v57, %v7213_v43  ;;  %v13466_v57 = vld [vmem:[%s18668_s9 + $0x168] sm:$0xff]  }
 0x736   :  { %8587 = vmatpush1.bf16.msra.mxu1 %v13462_v24 }
 0x737   :  { %8588 = vmatprep.subr.bf16.mxu1 %v18774_v56 }
 0x739   :  { %8464 = vmatmul.mubr.bf16.gmra.mrb[128].mxu1 %v7210_v53  ;;  %v7216_v53 = vsel %vm1497_vm11, %v7213_v43, %v7215_v34 }
 0x73a   :  { %8471 = vmatprep.mubr.bf16.mxu1 %v7214_v38  ;;  %8589 = vmatpush1.bf16.msra.mxu1 %v13463_v1 }
 0x73b   :  { %8590 = vmatprep.subr.bf16.mxu1 %v18774_v56 }
 0x73e   :  { %8591 = vmatpush1.bf16.msra.mxu1 %v13464_v61 }
 0x73f   :  { %8592 = vmatprep.subr.bf16.mxu1 %v18774_v56 }
 0x741   :  { %8472 = vmatmul.mubr.bf16.gmra.mrb[132].mxu1 %v7212_v4  ;;  %v19034_v4 = vrot.slane %v16774_v39, 1 }
 0x742   :  { %8479 = vmatprep.mubr.bf16.mxu1 %v7216_v53  ;;  %8593 = vmatpush1.bf16.msra.mxu1 %v13465_v32 }
 0x743   :  { %8594 = vmatprep.subr.bf16.mxu1 %v18774_v56  ;;  %v7222_v24 = vsel %vm1497_vm11, %v7219_v19, %v19034_v4  ;;  %v6911_v19 = vld [vmem:[#allocation2 + $0x8] sm:$0xc]  ;;  %v7277_v4 = vshrl.u32 %v16956_v37, 16 }
 0x746   :  { %8595 = vmatpush1.bf16.msra.mxu1 %v13466_v57 }
 0x747   :  { %8596 = vmatprep.subr.bf16.mxu1 %v18774_v56 }
 0x749   :  { %8480 = vmatmul.mubr.bf16.gmra.mrb[136].mxu1 %v7214_v38 }
 0x74a   :  { %8487 = vmatprep.mubr.bf16.mxu1 %v7218_v33  ;;  %8597 = vmatpush1.bf16.msra.mxu1 %v13467_v5 }
 0x74b   :  { %8598 = vmatprep.subr.bf16.mxu1 %v18774_v56 }
 0x74e   :  { %8599 = vmatpush1.bf16.msra.mxu1 %v13469_v55 }
 0x74f   :  { %8745 = vmatprep.subr.bf16.mxu1 %v18774_v56 }
 0x751   :  { %8488 = vmatmul.mubr.bf16.gmra.mrb[140].mxu1 %v7216_v53 }
 0x752   :  { %8495 = vmatprep.mubr.bf16.mxu1 %v7220_v35 }
 0x759   :  { %8496 = vmatmul.mubr.bf16.gmra.mrb[144].mxu1 %v7218_v33  ;;  %v7268_v33 = vrot.slane %v13468_v50, 1 }
 0x75a   :  { %8503 = vmatprep.mubr.bf16.mxu1 %v7222_v24 }
 0x761   :  { %8504 = vmatmul.mubr.bf16.gmra.mrb[148].mxu1 %v7220_v35  ;;  %v7388_v35 = vrot.slane %v16421_v47, 2  ;;  %v17233_v47 = vrot.slane %v16980_v21, 2  ;;  %v13472_v21 = vld [vmem:[%s18668_s9 + $0x188] sm:$0xff]  }
 0x762   :  { %8511 = vmatprep.mubr.bf16.mxu1 %v16927_v31 }
 0x765   :  { %v17181_v43 = vpop.f32.mrb[168].mxu0 }
 0x766   :  { %19035 = vst [vmem:[#allocation28_spill] sm:$0xff] %v17181_v43  ;;  %v17183_v10 = vpop.f32.mrb[169].mxu0  ;;  %v19090_v43 = vld [vmem:[#allocation20_spill] sm:$0xff] }
 0x767   :  { %19036 = vst [vmem:[#allocation37_spill] sm:$0xff] %v17183_v10  ;;  %v17186_v1 = vpop.f32.mrb[170].mxu0 }
 0x768   :  { %19037 = vst [vmem:[#allocation42_spill] sm:$0xff] %v17186_v1  ;;  %v17188_v38 = vpop.f32.mrb[171].mxu0 }
 0x769   :  { %8512 = vmatmul.mubr.bf16.gmra.mrb[152].mxu1 %v7222_v24  ;;  %19038 = vst [vmem:[#allocation32_spill] sm:$0xff] %v17188_v38  ;;  %v7473_v38 = vrot.slane %v16490_v6, 2 }
 0x76a   :  { %8519 = vmatprep.mubr.bf16.mxu1 %v16932_v49 }
 0x771   :  { %8520 = vmatmul.mubr.bf16.gmra.mrb[156].mxu1 %v16927_v31 }
 0x772   :  { %8527 = vmatprep.mubr.bf16.mxu1 %v16935_v30 }
 0x775   :  { %v17192_v61 = vpop.f32.mrb[172].mxu0 }
 0x776   :  { %19039 = vst [vmem:[#allocation30_spill] sm:$0xff] %v17192_v61  ;;  %v17195_v34 = vpop.f32.mrb[173].mxu0 }
 0x777   :  { %19040 = vst [vmem:[#allocation31_spill] sm:$0xff] %v17195_v34  ;;  %v17198_v32 = vpop.f32.mrb[174].mxu0 }
 0x778   :  { %19041 = vst [vmem:[#allocation41_spill] sm:$0xff] %v17198_v32  ;;  %v17200_v53 = vpop.f32.mrb[175].mxu0  ;;  %v13697_v32 = vld [vmem:[#allocation2 + $0x14] sm:$0xf] }
 0x779   :  { %8528 = vmatmul.mubr.bf16.gmra.mrb[160].mxu1 %v16932_v49  ;;  %19042 = vst [vmem:[#allocation46_spill] sm:$0xff] %v17200_v53 }
 0x77a   :  { %8535 = vmatprep.mubr.bf16.mxu1 %v16938_v26 }
 0x781   :  { %8536 = vmatmul.mubr.bf16.gmra.mrb[164].mxu1 %v16935_v30  ;;  %v19047_v30 = vrot.slane %v16945_v36, 1 }
 0x782   :  { %8543 = vmatprep.mubr.bf16.mxu1 %v16964_v14 }
 0x783   :  { %v7269_v55 = vsel %vm1497_vm11, %v19047_v30, %v7268_v33  ;;  %v7279_v33 = vrot.slane %v7277_v4, 1  ;;  %v7391_v4 = vsel %vm1688_vm13, %v7388_v35, %v17233_v47 }
 0x785   :  { %v17204_v57 = vpop.f32.mrb[176].mxu0 }
 0x786   :  { %19043 = vst [vmem:[#allocation44_spill] sm:$0xff] %v17204_v57  ;;  %v17207_v31 = vpop.f32.mrb[177].mxu0 }
 0x787   :  { %19044 = vst [vmem:[#allocation43_spill] sm:$0xff] %v17207_v31  ;;  %v17210_v49 = vpop.f32.mrb[178].mxu0 }
 0x788   :  { %19045 = vst [vmem:[#allocation45_spill] sm:$0xff] %v17210_v49  ;;  %v17212_v5 = vpop.f32.mrb[179].mxu0 }
 0x789   :  { %8544 = vmatmul.mubr.bf16.gmra.mrb[168].mxu1 %v16938_v26  ;;  %19046 = vst [vmem:[#allocation50_spill] sm:$0xff] %v17212_v5  ;;  %v11398_v26 = vcombine.low %v6911_v19, %v16953_v16  ;;  %v7288_v19 = vrot.slane %v16490_v6, 1  ;;  %v19079_v5 = vld [vmem:[#allocation22_spill] sm:$0xff] }
 0x78a   :  { %8551 = vmatprep.mubr.bf16.mxu1 %v16977_v0  ;;  %v7280_v0 = vshll.u32 %v16956_v37, 16 }
 0x78b   :  { %v7387_v24 = vrot.slane %v11398_v26, 2  ;;  %v7289_v26 = vrot.slane %v16459_v11, 2 }
 0x78c   :  { %v7282_v16 = vrot.slane %v7280_v0, 2 }
 0x78d   :  { %v7290_v0 = vor.u32 %v7289_v26, %v7288_v19 }
 0x78e   :  { %v7283_v37 = vor.u32 %v7282_v16, %v7279_v33  ;;  %v7292_v16 = vrot.slane %v16543_v42, 1 }
 0x791   :  { %8552 = vmatmul.mubr.bf16.gmra.mrb[172].mxu1 %v16964_v14  ;;  %v7389_v14 = vsel %vm1688_vm13, %v7387_v24, %v7388_v35  ;;  %v7392_v24 = vrot.slane %v17009_v20, 2  ;;  %v7291_v35 = vsel %vm1576_vm10, %v16940_v15, %v7290_v0 }
 0x792   :  { %8559 = vmatprep.mubr.bf16.mxu1 %v7269_v55  ;;  %v13471_v55 = vld [vmem:[%s18668_s9 + $0x180] sm:$0xff]  }
 0x793   :  { %v17261_v20 = vsel %vm1688_vm13, %v17233_v47, %v7392_v24 }
 0x795   :  { %v17222_v52 = vpop.f32.mrb[180].mxu0 }
 0x796   :  { %19048 = vst [vmem:[#allocation48_spill] sm:$0xff] %v17222_v52  ;;  %v17226_v36 = vpop.f32.mrb[181].mxu0 }
 0x797   :  { %19049 = vst [vmem:[#allocation47_spill] sm:$0xff] %v17226_v36  ;;  %v17228_v50 = vpop.f32.mrb[182].mxu0 }
 0x798   :  { %19050 = vst [vmem:[#allocation49_spill] sm:$0xff] %v17228_v50  ;;  %v17230_v30 = vpop.f32.mrb[183].mxu0  ;;  %v19067_v50 = vld [vmem:[#allocation12_spill] sm:$0xff] }
 0x799   :  { %8560 = vmatmul.mubr.bf16.gmra.mrb[176].mxu1 %v17005_v58  ;;  %19051 = vst [vmem:[#allocation54_spill] sm:$0xff] %v17230_v30  ;;  %v7287_v58 = vsel %vm1576_vm10, %v7283_v37, %v16940_v15  ;;  %v7293_v37 = vrot.slane %v16502_v25, 2  ;;  %v13474_v15 = vld [vmem:[%s18668_s9 + $0x198] sm:$0xff]   ;;  %v7317_v52 = vrot.slane %v19067_v50, 2  ;;  %v19072_v30 = vld [vmem:[#allocation19_spill] sm:$0xff] }
 0x79a   :  { %8600 = vmatprep.mubr.bf16.mxu1 %v7389_v14  ;;  %v13473_v14 = vld [vmem:[%s18668_s9 + $0x190] sm:$0xff]   ;;  %v7320_v36 = vrot.slane %v19072_v30, 1 }
 0x79b   :  { %v7294_v26 = vor.u32 %v7293_v37, %v7292_v16  ;;  %v13477_v37 = vld [vmem:[%s18668_s9 + $0x1b0] sm:$0xff]  }
 0x7a1   :  { %8601 = vmatmul.mubr.bf16.vlgmr.msra.gmra.mrb[108].mxu1 %v7287_v58 }
 0x7a2   :  { %8746 = vmatpush1.bf16.msra.mxu1 %v13471_v55  ;;  %8608 = vmatprep.mubr.bf16.mxu1 %v7391_v4  ;;  %v7394_v4 = vrot.slane %v17056_v41, 2  ;;  %v13476_v41 = vld [vmem:[%s18668_s9 + $0x1a8] sm:$0xff]  }
 0x7a3   :  { %8747 = vmatprep.subr.bf16.mxu1 %v18774_v56 }
 0x7a5   :  { %v17255_v33 = vpop.f32.mrb[184].mxu0 }
 0x7a6   :  { %8748 = vmatpush1.bf16.msra.mxu1 %v13472_v21  ;;  %19052 = vst [vmem:[#allocation52_spill] sm:$0xff] %v17255_v33  ;;  %v17263_v55 = vpop.f32.mrb[185].mxu0  ;;  %v13475_v21 = vld [vmem:[%s18668_s9 + $0x1a0] sm:$0xff]   ;;  %v17283_v33 = vsel %vm1688_vm13, %v7392_v24, %v7394_v4 }
 0x7a7   :  { %8749 = vmatprep.subr.bf16.mxu1 %v18774_v56  ;;  %19053 = vst [vmem:[#allocation51_spill] sm:$0xff] %v17263_v55  ;;  %v17266_v58 = vpop.f32.mrb[186].mxu0 }
 0x7a8   :  { %19054 = vst [vmem:[#allocation53_spill] sm:$0xff] %v17266_v58  ;;  %v17271_v19 = vpop.f32.mrb[187].mxu0  ;;  %v7297_v58 = vrot.slane %v16534_v59, 2 }
 0x7a9   :  { %8609 = vmatmul.mubr.bf16.gmra.mrb[112].mxu1 %v7291_v35  ;;  %19055 = vst [vmem:[#allocation58_spill] sm:$0xff] %v17271_v19  ;;  %v7296_v35 = vrot.slane %v16566_v18, 1  ;;  %v19066_v19 = vld [vmem:[#allocation14_spill] sm:$0xff] }
 0x7aa   :  { %8616 = vmatprep.mubr.bf16.mxu1 %v17261_v20  ;;  %8750 = vmatpush1.bf16.msra.mxu1 %v13473_v14  ;;  %v7295_v14 = vsel %vm1576_vm10, %v7290_v0, %v7294_v26  ;;  %v7396_v0 = vrot.slane %v17078_v22, 2  ;;  %v7316_v55 = vrot.slane %v19066_v19, 1 }
 0x7ab   :  { %8751 = vmatprep.subr.bf16.mxu1 %v18774_v56  ;;  %v7298_v16 = vor.u32 %v7297_v58, %v7296_v35 }
 0x7ac   :  { %v17301_v58 = vsel %vm1688_vm13, %v7394_v4, %v7396_v0  ;;  %v13479_v4 = vld [vmem:[%s18668_s9 + $0x1c0] sm:$0xff]  }
 0x7ad   :  { %v7299_v24 = vsel %vm1576_vm10, %v7294_v26, %v7298_v16  ;;  %v13478_v26 = vld [vmem:[%s18668_s9 + $0x1b8] sm:$0xff]  }
 0x7ae   :  { %8752 = vmatpush1.bf16.msra.mxu1 %v13474_v15 }
 0x7af   :  { %8753 = vmatprep.subr.bf16.mxu1 %v18774_v56 }
 0x7b1   :  { %8617 = vmatmul.mubr.bf16.gmra.mrb[116].mxu1 %v7295_v14  ;;  %v7301_v14 = vrot.slane %v16578_v46, 2 }
 0x7b2   :  { %8624 = vmatprep.mubr.bf16.mxu1 %v17283_v33  ;;  %8754 = vmatpush1.bf16.msra.mxu1 %v13475_v21  ;;  %v7300_v21 = vrot.slane %v16619_v9, 1 }
 0x7b3   :  { %8755 = vmatprep.subr.bf16.mxu1 %v18774_v56 }
 0x7b5   :  { %v17296_v15 = vpop.f32.mrb[188].mxu0 }
 0x7b6   :  { %8756 = vmatpush1.bf16.msra.mxu1 %v13476_v41  ;;  %19056 = vst [vmem:[#allocation56_spill] sm:$0xff] %v17296_v15  ;;  %v17303_v22 = vpop.f32.mrb[189].mxu0  ;;  %v7302_v15 = vor.u32 %v7301_v14, %v7300_v21  ;;  %v13481_v14 = vld [vmem:[%s18668_s9 + $0x1d0] sm:$0xff]  }
 0x7b7   :  { %8757 = vmatprep.subr.bf16.mxu1 %v18774_v56  ;;  %19057 = vst [vmem:[#allocation55_spill] sm:$0xff] %v17303_v22  ;;  %v17306_v35 = vpop.f32.mrb[190].mxu0  ;;  %v7305_v22 = vrot.slane %v16610_v60, 2 }
 0x7b8   :  { %19058 = vst [vmem:[#allocation57_spill] sm:$0xff] %v17306_v35  ;;  %v17311_v41 = vpop.f32.mrb[191].mxu0  ;;  %v7304_v35 = vrot.slane %v16642_v13, 1 }
 0x7b9   :  { %8625 = vmatmul.mubr.bf16.gmra.mrb[120].mxu1 %v7299_v24  ;;  %19059 = vst [vmem:[#allocation62_spill] sm:$0xff] %v17311_v41  ;;  %v7398_v24 = vrot.slane %v17095_v7, 2  ;;  %v13480_v7 = vld [vmem:[%s18668_s9 + $0x1c8] sm:$0xff]  }
 0x7ba   :  { %8632 = vmatprep.mubr.bf16.mxu1 %v17301_v58  ;;  %8758 = vmatpush1.bf16.msra.mxu1 %v13477_v37  ;;  %v7303_v37 = vsel %vm1576_vm10, %v7298_v16, %v7302_v15  ;;  %v7306_v21 = vor.u32 %v7305_v22, %v7304_v35  ;;  %v7400_v16 = vrot.slane %v17140_v3, 2 }
 0x7bb   :  { %8759 = vmatprep.subr.bf16.mxu1 %v18774_v56  ;;  %v17323_v41 = vsel %vm1688_vm13, %v7396_v0, %v7398_v24 }
 0x7bc   :  { %v7307_v0 = vsel %vm1576_vm10, %v7302_v15, %v7306_v21  ;;  %v17341_v22 = vsel %vm1688_vm13, %v7398_v24, %v7400_v16  ;;  %v13482_v15 = vld [vmem:[%s18668_s9 + $0x1d8] sm:$0xff]   ;;  %v13483_v24 = vld [vmem:[%s18668_s9 + $0x1e0] sm:$0xff]  }
 0x7be   :  { %8760 = vmatpush1.bf16.msra.mxu1 %v13478_v26 }
 0x7bf   :  { %8761 = vmatprep.subr.bf16.mxu1 %v18774_v56 }
 0x7c1   :  { %8633 = vmatmul.mubr.bf16.gmra.mrb[124].mxu1 %v7303_v37  ;;  %v7309_v37 = vrot.slane %v16654_v29, 2 }
 0x7c2   :  { %8640 = vmatprep.mubr.bf16.mxu1 %v17323_v41  ;;  %8762 = vmatpush1.bf16.msra.mxu1 %v13479_v4  ;;  %v7308_v4 = vrot.slane %v16695_v63, 1 }
 0x7c3   :  { %8763 = vmatprep.subr.bf16.mxu1 %v18774_v56 }
 0x7c5   :  { %v17336_v26 = vpop.f32.mrb[192].mxu0 }
 0x7c6   :  { %8764 = vmatpush1.bf16.msra.mxu1 %v13480_v7  ;;  %19060 = vst [vmem:[#allocation60_spill] sm:$0xff] %v17336_v26  ;;  %v17343_v3 = vpop.f32.mrb[193].mxu0  ;;  %v7310_v26 = vor.u32 %v7309_v37, %v7308_v4  ;;  %v13695_v37 = vld [vmem:[#allocation2 + $0x50] sm:$0xff]  }
 0x7c7   :  { %8765 = vmatprep.subr.bf16.mxu1 %v18774_v56  ;;  %19061 = vst [vmem:[#allocation59_spill] sm:$0xff] %v17343_v3  ;;  %v17346_v35 = vpop.f32.mrb[194].mxu0  ;;  %v7313_v3 = vrot.slane %v16686_v23, 2 }
 0x7c8   :  { %19062 = vst [vmem:[#allocation61_spill] sm:$0xff] %v17346_v35  ;;  %v17351_v7 = vpop.f32.mrb[195].mxu0  ;;  %v7312_v35 = vrot.slane %v16720_v28, 1 }
 0x7c9   :  { %8641 = vmatmul.mubr.bf16.gmra.mrb[128].mxu1 %v7307_v0  ;;  %19063 = vst [vmem:[#allocation66_spill] sm:$0xff] %v17351_v7  ;;  %v7402_v0 = vrot.slane %v17152_v44, 2  ;;  %v13484_v44 = vld [vmem:[%s18668_s9 + $0x1e8] sm:$0xff]  }
 0x7ca   :  { %8648 = vmatprep.mubr.bf16.mxu1 %v17341_v22  ;;  %8766 = vmatpush1.bf16.msra.mxu1 %v13481_v14  ;;  %v7311_v14 = vsel %vm1576_vm10, %v7306_v21, %v7310_v26  ;;  %v7314_v4 = vor.u32 %v7313_v3, %v7312_v35  ;;  %v7404_v21 = vrot.slane %v13695_v37, 2  ;;  %v7318_v37 = vor.u32 %v7317_v52, %v7316_v55 }
 0x7cb   :  { %8767 = vmatprep.subr.bf16.mxu1 %v18774_v56  ;;  %v17363_v7 = vsel %vm1688_vm13, %v7400_v16, %v7402_v0 }
 0x7cc   :  { %v7315_v16 = vsel %vm1576_vm10, %v7310_v26, %v7314_v4  ;;  %v17382_v3 = vsel %vm1688_vm13, %v7402_v0, %v7404_v21  ;;  %v13487_v26 = vld [vmem:[%s18668_s9 + $0x1f8] sm:$0xff]   ;;  %v7319_v0 = vsel %vm1576_vm10, %v7314_v4, %v7318_v37 }
 0x7cd   :  { %v19076_v4 = vld [vmem:[#allocation17_spill] sm:$0xff] }
 0x7ce   :  { %8768 = vmatpush1.bf16.msra.mxu1 %v13482_v15  ;;  %v13485_v15 = vld [vmem:[%s18668_s9 + $0x1f0] sm:$0xff]  }
 0x7cf   :  { %8769 = vmatprep.subr.bf16.mxu1 %v18774_v56 }
 0x7d1   :  { %8649 = vmatmul.mubr.bf16.gmra.mrb[132].mxu1 %v7311_v14 }
 0x7d2   :  { %8656 = vmatprep.mubr.bf16.mxu1 %v17363_v7  ;;  %8770 = vmatpush1.bf16.msra.mxu1 %v13483_v24 }
 0x7d3   :  { %8771 = vmatprep.subr.bf16.mxu1 %v18774_v56 }
 0x7d5   :  { %v17373_v14 = vpop.f32.mrb[196].mxu0 }
 0x7d6   :  { %8772 = vmatpush1.bf16.msra.mxu1 %v13484_v44  ;;  %19064 = vst [vmem:[#allocation64_spill] sm:$0xff] %v17373_v14  ;;  %v17377_v24 = vpop.f32.mrb[197].mxu0  ;;  %v13696_v14 = vld [vmem:[#allocation2 + $0x58] sm:$0xff]  }
 0x7d7   :  { %8773 = vmatprep.subr.bf16.mxu1 %v18774_v56  ;;  %19065 = vst [vmem:[#allocation63_spill] sm:$0xff] %v17377_v24  ;;  %v17384_v35 = vpop.f32.mrb[198].mxu0  ;;  %v7406_v24 = vrot.slane %v13696_v14, 2  ;;  %v7324_v14 = vrot.slane %v19076_v4, 1 }
 0x7d8   :  { %19068 = vst [vmem:[#allocation65_spill] sm:$0xff] %v17384_v35  ;;  %v17387_v44 = vpop.f32.mrb[199].mxu0 }
 0x7d9   :  { %8657 = vmatmul.mubr.bf16.gmra.mrb[136].mxu1 %v7315_v16  ;;  %19069 = vst [vmem:[#allocation13_spill] sm:$0xff] %v17387_v44  ;;  %v19073_v44 = vld [vmem:[#allocation15_spill] sm:$0xff]  ;;  %v17401_v49 = vsel %vm1688_vm13, %v7404_v21, %v7406_v24 }
 0x7da   :  { %8664 = vmatprep.mubr.bf16.mxu1 %v17382_v3  ;;  %8774 = vmatpush1.bf16.msra.mxu1 %v13485_v15  ;;  %v7321_v15 = vrot.slane %v19073_v44, 2 }
 0x7db   :  { %8775 = vmatprep.subr.bf16.mxu1 %v18774_v56 }
 0x7dc   :  { %v7322_v52 = vor.u32 %v7321_v15, %v7320_v36  ;;  %v19080_v36 = vld [vmem:[#allocation18_spill] sm:$0xff] }
 0x7dd   :  { %v17393_v16 = vpop.f32.mrb[200].mxu0  ;;  %v7329_v15 = vrot.slane %v19080_v36, 2 }
 0x7de   :  { %8776 = vmatpush1.bf16.msra.mxu1 %v13487_v26  ;;  %19070 = vst [vmem:[#allocation68_spill] sm:$0xff] %v17393_v16  ;;  %v17396_v35 = vpop.f32.mrb[201].mxu0  ;;  %v7323_v55 = vsel %vm1576_vm10, %v7318_v37, %v7322_v52  ;;  %v19077_v26 = vld [vmem:[#allocation16_spill] sm:$0xff]  ;;  %v19081_v37 = vld [vmem:[#allocation23_spill] sm:$0xff] }
 0x7df   :  { %19071 = vst [vmem:[#allocation67_spill] sm:$0xff] %v17396_v35  ;;  %v17403_v57 = vpop.f32.mrb[202].mxu0  ;;  %v7325_v16 = vrot.slane %v19077_v26, 2  ;;  %v19078_v35 = vrot.slane %v16774_v39, 2  ;;  %v19082_v39 = vld [vmem:[#allocation24_spill] sm:$0xff] }
 0x7e0   :  { %19074 = vst [vmem:[#allocation14_spill] sm:$0xff] %v17403_v57  ;;  %v17406_v56 = vpop.f32.mrb[203].mxu0 }
 0x7e1   :  { %8665 = vmatmul.mubr.bf16.gmra.mrb[140].mxu1 %v7319_v0  ;;  %19075 = vst [vmem:[#allocation12_spill] sm:$0xff] %v17406_v56  ;;  %v17414_v0 = vsel %vm1688_vm13, %v7406_v24, %v19078_v35  ;;  %v7326_v21 = vor.u32 %v7325_v16, %v7324_v14  ;;  %v7328_v56 = vrot.slane %v19079_v5, 1  ;;  %v19083_v35 = vld [vmem:[#allocation35_spill] sm:$0xff]  ;;  %v19084_v16 = vld [vmem:[#allocation26_spill] sm:$0xff]  ;;  %v19086_v14 = vld [vmem:[#allocation21_spill] sm:$0xff] }
 0x7e2   :  { %8672 = vmatprep.mubr.bf16.mxu1 %v17401_v49 }
 0x7e3   :  { %v7327_v57 = vsel %vm1576_vm10, %v7322_v52, %v7326_v21  ;;  %v7330_v31 = vor.u32 %v7329_v15, %v7328_v56  ;;  %v19085_v52 = vld [vmem:[#allocation33_spill] sm:$0xff]  ;;  %v13486_v56 = vld [vmem:[#allocation2 + $0x98] ss:$0 sps:$4 sm:$0x33]   ;;  %v19088_v15 = vld [vmem:[#allocation27_spill] sm:$0xff] }
 0x7e5   :  { %v7335_v24 = vsel %vm1576_vm10, %v7330_v31, %v17017_v48  ;;  %v7358_v48 = vshrl.u32 %v13486_v56, 16 }
 0x7e9   :  { %8673 = vmatmul.mubr.bf16.gmra.mrb[144].mxu1 %v7323_v55  ;;  %v7331_v55 = vsel %vm1576_vm10, %v7326_v21, %v7330_v31  ;;  %v19089_v21 = vld [vmem:[#allocation38_spill] sm:$0xff]  ;;  %v7361_v31 = vshll.u32 %v13486_v56, 16 }
 0x7ea   :  { %8680 = vmatprep.mubr.bf16.mxu1 %v17414_v0 }
 0x7eb   :  { %v7363_v1 = vrot.slane %v7361_v31, 2 }
 0x7f1   :  { %8681 = vmatmul.mubr.bf16.gmra.mrb[148].mxu1 %v7327_v57  ;;  %v19087_v57 = vld [vmem:[#allocation25_spill] sm:$0xff] }
 0x7f2   :  { %8688 = vmatprep.mubr.bf16.mxu1 %v19081_v37 }
 0x7f9   :  { %8689 = vmatmul.mubr.bf16.gmra.mrb[152].mxu1 %v7331_v55  ;;  %v6912_v55 = vld [vmem:[#allocation2 + $0x10] sm:$0xc] }
 0x7fa   :  { %8696 = vmatprep.mubr.bf16.mxu1 %v19082_v39  ;;  %v11399_v61 = vcombine.low %v6912_v55, %v13697_v32 }
 0x7fc   :  { %v7466_v53 = vshrl.u32 %v11399_v61, 16  ;;  %v7469_v34 = vshll.u32 %v11399_v61, 16  ;;  %v7453_v31 = vrot.slane %v11399_v61, 2 }
 0x7fe   :  { %v7468_v10 = vrot.slane %v7466_v53, 2  ;;  %v7471_v8 = vrot.slane %v7469_v34, 3 }
 0x800   :  { %v7472_v40 = vor.u32 %v7471_v8, %v7468_v10  ;;  %v7481_v8 = vrot.slane %v16566_v18, 2  ;;  %v7482_v10 = vrot.slane %v16534_v59, 3  ;;  %v7489_v18 = vrot.slane %v16642_v13, 2 }
 0x801   :  { %8697 = vmatmul.mubr.bf16.gmra.mrb[156].mxu1 %v7335_v24  ;;  %v7422_v24 = vrot.slane %v13486_v56, 2  ;;  %v19091_v56 = vld [vmem:[#allocation40_spill] sm:$0xff]  ;;  %v7490_v59 = vrot.slane %v16610_v60, 3  ;;  %v7497_v13 = vrot.slane %v16720_v28, 2  ;;  %v7498_v60 = vrot.slane %v16686_v23, 3 }
 0x802   :  { %8704 = vmatprep.mubr.bf16.mxu1 %v19083_v35  ;;  %v7505_v28 = vrot.slane %v19072_v30, 2  ;;  %v7506_v23 = vrot.slane %v19073_v44, 3  ;;  %v7513_v30 = vrot.slane %v19079_v5, 2  ;;  %v7514_v44 = vrot.slane %v19080_v36, 3  ;;  %v19093_v36 = vld [vmem:[#allocation29_spill] sm:$0xff] }
 0x803   :  { %v7491_v34 = vor.u32 %v7490_v59, %v7489_v18  ;;  %v19097_v59 = vld [vmem:[#allocation37_spill] sm:$0xff] }
 0x809   :  { %8705 = vmatmul.mubr.bf16.gmra.mrb[160].mxu1 %v19084_v16  ;;  %v7360_v16 = vrot.slane %v7358_v48, 1 }
 0x80a   :  { %8712 = vmatprep.mubr.bf16.mxu1 %v19085_v52 }
 0x80b   :  { %v7364_v32 = vor.u32 %v7363_v1, %v7360_v16  ;;  %v7507_v16 = vor.u32 %v7506_v23, %v7505_v28  ;;  %v19100_v28 = vld [vmem:[#allocation42_spill] sm:$0xff] }
 0x80d   :  { %v7365_v27 = vsel %vm1576_vm10, %v19091_v56, %v7364_v32  ;;  %v13493_v32 = vld [vmem:[%s18670_s11 + $0x8] sm:$0xff]   ;;  %v13495_v56 = vld [vmem:[%s18670_s11 + $0x10] sm:$0xff]  }
 0x811   :  { %8713 = vmatmul.mubr.bf16.gmra.mrb[164].mxu1 %v19086_v14  ;;  %v7423_v14 = vsel %vm1688_vm13, %v17049_v54, %v7422_v24  ;;  %v7478_v54 = vrot.slane %v16502_v25, 3  ;;  %v7485_v25 = vrot.slane %v16619_v9, 2  ;;  %v7493_v9 = vrot.slane %v16695_v63, 2 }
 0x812   :  { %8720 = vmatprep.mubr.bf16.mxu1 %v19087_v57  ;;  %v7501_v63 = vrot.slane %v19066_v19, 2  ;;  %v7509_v19 = vrot.slane %v19076_v4, 2 }
 0x819   :  { %8721 = vmatmul.mubr.bf16.gmra.mrb[168].mxu1 %v19088_v15  ;;  %v7474_v15 = vrot.slane %v16459_v11, 3  ;;  %v7454_v11 = vsel %vm1688_vm13, %v7453_v31, %v17233_v47  ;;  %v13500_v31 = vld [vmem:[%s18670_s11 + $0x68] sm:$0xff]  }
 0x81a   :  { %8728 = vmatprep.mubr.bf16.mxu1 %v19089_v21 }
 0x81b   :  { %v7475_v55 = vor.u32 %v7474_v15, %v7473_v38  ;;  %v7515_v15 = vor.u32 %v7514_v44, %v7513_v30 }
 0x81d   :  { %v7476_v48 = vsel %vm1767_vm12, %v7472_v40, %v7475_v55  ;;  %v7486_v40 = vrot.slane %v16578_v46, 3  ;;  %v7494_v46 = vrot.slane %v16654_v29, 3  ;;  %v7502_v29 = vrot.slane %v19067_v50, 3 }
 0x81e   :  { %v7510_v50 = vrot.slane %v19077_v26, 3  ;;  %v7520_v4 = vsel %vm1767_vm12, %v7515_v15, %v17100_v17 }
 0x81f   :  { %v7487_v38 = vor.u32 %v7486_v40, %v7485_v25  ;;  %v7495_v47 = vor.u32 %v7494_v46, %v7493_v9  ;;  %v7503_v24 = vor.u32 %v7502_v29, %v7501_v63  ;;  %v17556_v25 = vld [vmem:[%s18669_s10] ss:$0 sm:$0xff]  ;;  %v19098_v46 = vld [vmem:[#allocation32_spill] sm:$0xff] }
 0x821   :  { %8729 = vmatmul.mubr.bf16.gmra.mrb[172].mxu1 %v19090_v43  ;;  %v7477_v43 = vrot.slane %v16543_v42, 2  ;;  %v7492_v53 = vsel %vm1767_vm12, %v7487_v38, %v7491_v34 }
 0x822   :  { %8736 = vmatprep.mubr.bf16.mxu1 %v7423_v14  ;;  %v7511_v14 = vor.u32 %v7510_v50, %v7509_v19 }
 0x823   :  { %v7479_v6 = vor.u32 %v7478_v54, %v7477_v43  ;;  %v13497_v43 = vld [vmem:[%s18670_s11 + $0x18] sm:$0xff]   ;;  %v13498_v54 = vld [vmem:[%s18670_s11 + $0x60] sm:$0xff]  }
 0x825   :  { %v7480_v1 = vsel %vm1767_vm12, %v7475_v55, %v7479_v6  ;;  %v13494_v55 = vld [vmem:[%s18670_s11 + $0x50] sm:$0xff]  }
 0x829   :  { %8737 = vmatmul.mubr.bf16.gmra.mrb[176].mxu1 %v7365_v27  ;;  %v7483_v27 = vor.u32 %v7482_v10, %v7481_v8  ;;  %v13505_v8 = vld [vmem:[%s18670_s11 + $0x30] sm:$0xff]   ;;  %v13506_v10 = vld [vmem:[%s18670_s11 + $0x78] sm:$0xff]  }
 0x82a   :  { %8777 = vmatprep.mubr.bf16.mxu1 %v7476_v48  ;;  %v13496_v48 = vld [vmem:[%s18670_s11 + $0x58] sm:$0xff]  }
 0x82b   :  { %v7484_v42 = vsel %vm1767_vm12, %v7479_v6, %v7483_v27  ;;  %v7488_v61 = vsel %vm1767_vm12, %v7483_v27, %v7487_v38  ;;  %v13499_v6 = vld [vmem:[%s18670_s11 + $0x20] sm:$0xff]   ;;  %v13507_v27 = vld [vmem:[%s18670_s11 + $0x38] sm:$0xff]  }
 0x831   :  { %8778 = vmatmul.mubr.bf16.vlgmr.msra.gmra.mrb[108].mxu1 %v7454_v11  ;;  %v13501_v11 = vld [vmem:[%s18670_s11 + $0x28] sm:$0xff]  }
 0x832   :  { %8785 = vmatprep.mubr.bf16.mxu1 %v7480_v1  ;;  %v13504_v1 = vld [vmem:[%s18670_s11 + $0x70] sm:$0xff]  }
 0x839   :  { %8786 = vmatmul.mubr.bf16.gmra.mrb[112].mxu1 %v17261_v20  ;;  %v7499_v20 = vor.u32 %v7498_v60, %v7497_v13 }
 0x83a   :  { %8793 = vmatprep.mubr.bf16.mxu1 %v7484_v42  ;;  %v13511_v42 = vld [vmem:[%s18670_s11 + $0xc0] sm:$0xff]  }
 0x841   :  { %8794 = vmatmul.mubr.bf16.gmra.mrb[116].mxu1 %v17283_v33  ;;  %v7496_v33 = vsel %vm1767_vm12, %v7491_v34, %v7495_v47 }
 0x842   :  { %8801 = vmatprep.mubr.bf16.mxu1 %v7488_v61 }
 0x849   :  { %8802 = vmatmul.mubr.bf16.gmra.mrb[120].mxu1 %v17301_v58  ;;  %v7500_v58 = vsel %vm1767_vm12, %v7495_v47, %v7499_v20 }
 0x84a   :  { %8809 = vmatprep.mubr.bf16.mxu1 %v7492_v53 }
 0x851   :  { %8810 = vmatmul.mubr.bf16.gmra.mrb[124].mxu1 %v17323_v41  ;;  %v7504_v41 = vsel %vm1767_vm12, %v7499_v20, %v7503_v24 }
 0x852   :  { %8817 = vmatprep.mubr.bf16.mxu1 %v7496_v33 }
 0x859   :  { %8818 = vmatmul.mubr.bf16.gmra.mrb[128].mxu1 %v17341_v22  ;;  %v7508_v22 = vsel %vm1767_vm12, %v7503_v24, %v7507_v16 }
 0x85a   :  { %8825 = vmatprep.mubr.bf16.mxu1 %v7500_v58  ;;  %v19099_v58 = vld [vmem:[#allocation28_spill] sm:$0xff] }
 0x861   :  { %8826 = vmatmul.mubr.bf16.gmra.mrb[132].mxu1 %v17363_v7  ;;  %v7512_v7 = vsel %vm1767_vm12, %v7507_v16, %v7511_v14 }
 0x862   :  { %8833 = vmatprep.mubr.bf16.mxu1 %v7504_v41  ;;  %v137_v41 = vld [vmem:[%s18661_s2] sm:$0xff] }
 0x869   :  { %8834 = vmatmul.mubr.bf16.gmra.mrb[136].mxu1 %v17382_v3  ;;  %v7516_v3 = vsel %vm1767_vm12, %v7511_v14, %v7515_v15 }
 0x86a   :  { %8841 = vmatprep.mubr.bf16.mxu1 %v7508_v22 }
 0x871   :  { %8842 = vmatmul.mubr.bf16.gmra.mrb[140].mxu1 %v17401_v49  ;;  %v19092_v49 = vld [vmem:[#allocation36_spill] sm:$0xff] }
 0x872   :  { %8849 = vmatprep.mubr.bf16.mxu1 %v7512_v7  ;;  %v7547_v5 = vshrl.u32 %v19092_v49, 16  ;;  %v7550_v17 = vshll.u32 %v19092_v49, 16 }
 0x874   :  { %v7549_v26 = vrot.slane %v7547_v5, 2 }
 0x879   :  { %8850 = vmatmul.mubr.bf16.gmra.mrb[144].mxu1 %v17414_v0 }
 0x87a   :  { %8857 = vmatprep.mubr.bf16.mxu1 %v7516_v3  ;;  %v19101_v3 = vld [vmem:[#allocation31_spill] sm:$0xff] }
 0x881   :  { %8858 = vmatmul.mubr.bf16.gmra.mrb[148].mxu1 %v19081_v37  ;;  %v19094_v37 = vld [vmem:[#allocation39_spill] sm:$0xff] }
 0x882   :  { %8865 = vmatprep.mubr.bf16.mxu1 %v7520_v4 }
 0x889   :  { %8866 = vmatmul.mubr.bf16.gmra.mrb[152].mxu1 %v19082_v39 }
 0x88a   :  { %8873 = vmatprep.mubr.bf16.mxu1 %v17111_v62  ;;  %v7552_v62 = vrot.slane %v7550_v17, 3  ;;  %v138_v17 = vld [vmem:[%s18661_s2 + $0x8] sm:$0xff] }
 0x88c   :  { %v7553_v0 = vor.u32 %v7552_v62, %v7549_v26 }
 0x891   :  { %8874 = vmatmul.mubr.bf16.gmra.mrb[156].mxu1 %v19083_v35  ;;  %v13491_v35 = vld [vmem:[%s18670_s11] sm:$0xff]  }
 0x892   :  { %8881 = vmatprep.mubr.bf16.mxu1 %v17115_v2  ;;  %v13489_v2 = vld [vmem:[#allocation2 + $0xa0] ss:$0 sps:$4 sm:$0x33]  }
 0x893   :  { %v7457_v39 = vrot.slane %v13489_v2, 2 }
 0x899   :  { %8882 = vmatmul.mubr.bf16.gmra.mrb[160].mxu1 %v19085_v52  ;;  %v19095_v52 = vld [vmem:[#allocation34_spill] sm:$0xff] }
 0x89a   :  { %8889 = vmatprep.mubr.bf16.mxu1 %v17119_v51  ;;  %v7554_v51 = vsel %vm1767_vm12, %v19094_v37, %v7553_v0  ;;  %v19102_v0 = vld [vmem:[#allocation46_spill] sm:$0xff] }
 0x8a1   :  { %8890 = vmatmul.mubr.bf16.gmra.mrb[164].mxu1 %v19087_v57  ;;  %v19096_v57 = vrot.slane %v19095_v52, 2 }
 0x8a2   :  { %8897 = vmatprep.mubr.bf16.mxu1 %v17131_v45  ;;  %v13490_v45 = vld [vmem:[%s18670_s11 + $0x40] sm:$0xff]  }
 0x8a3   :  { %11819 = vmatprep.subr.bf16.mxu0 %v13490_v45 }
 0x8a4   :  { %11820 = vmatpush3.bf16.msra.mxu0 %v13491_v35 }
 0x8a9   :  { %8898 = vmatmul.mubr.bf16.gmra.mrb[168].mxu1 %v19089_v21  ;;  %v7458_v21 = vsel %vm1688_vm13, %v19096_v57, %v7457_v39 }
 0x8aa   :  { %8905 = vmatprep.mubr.bf16.mxu1 %v17138_v12  ;;  %v13492_v12 = vld [vmem:[%s18670_s11 + $0x48] sm:$0xff]  }
 0x8ab   :  { %11821 = vmatprep.subr.bf16.mxu0 %v13492_v12 }
 0x8ac   :  { %11822 = vmatpush3.bf16.msra.mxu0 %v13493_v32 }
 0x8ad   :  { %11823 = vmatprep.subr.bf16.mxu0 %v13494_v55 }
 0x8b0   :  { %11824 = vmatpush3.bf16.msra.mxu0 %v13495_v56 }
 0x8b1   :  { %8906 = vmatmul.mubr.bf16.gmra.mrb[172].mxu1 %v19093_v36  ;;  %11825 = vmatprep.subr.bf16.mxu0 %v13496_v48  ;;  %v9440_v36 = vld [vmem:[#allocation4 + $0x8] sm:$0xe]  ;;  %v19104_v48 = vld [vmem:[#allocation30_spill] sm:$0xff] }
 0x8b2   :  { %8913 = vmatprep.mubr.bf16.mxu1 %v7554_v51 }
 0x8b4   :  { %11826 = vmatpush3.bf16.msra.mxu0 %v13497_v43 }
 0x8b5   :  { %11827 = vmatprep.subr.bf16.mxu0 %v13498_v54 }
 0x8b8   :  { %11828 = vmatpush3.bf16.msra.mxu0 %v13499_v6 }
 0x8b9   :  { %8914 = vmatmul.mubr.bf16.gmra.mrb[176].mxu1 %v7458_v21  ;;  %11829 = vmatprep.subr.bf16.mxu0 %v13500_v31  ;;  %v139_v31 = vld [vmem:[%s18661_s2 + $0x10] sm:$0xff] }
 0x8bc   :  { %11830 = vmatpush3.bf16.msra.mxu0 %v13501_v11 }
 0x8bd   :  { %11831 = vmatprep.subr.bf16.mxu0 %v13504_v1 }
 0x8c0   :  { %11832 = vmatpush3.bf16.msra.mxu0 %v13505_v8  ;;  %v19105_v8 = vld [vmem:[#allocation41_spill] sm:$0xff] }
 0x8c1   :  { %11833 = vmatprep.subr.bf16.mxu0 %v13506_v10 }
 0x8c4   :  { %11834 = vmatpush3.bf16.msra.mxu0 %v13507_v27  ;;  %v9463_v27 = vld [vmem:[#allocation4] sm:$0xf] }
 0x8c5   :  { %11889 = vmatprep.subr.bf16.mxu0 %v13511_v42  ;;  %v9464_v42 = vld [vmem:[#allocation4 + $0x4] sm:$0xf] }
 0x904   :  { %v8779_v40 = vpop.f32.mrb[108].mxu1 }
 0x905   :  { %v12492_v38 = vadd.f32 %v17556_v25, %v8779_v40  ;;  %v8781_v61 = vpop.f32.mrb[109].mxu1 }
 0x906   :  { %v8782_v18 = vpop.f32.mrb[110].mxu1 }
 0x907   :  { %v8957_v34 = vadd.f32 %v12492_v38, %v19097_v59  ;;  %v12493_v53 = vadd.f32 %v17556_v25, %v8782_v18  ;;  %v8784_v9 = vpop.f32.mrb[111].mxu1 }
 0x909   :  { %9099 = vst [vmem:[#allocation5] sm:$0xff] %v8957_v34  ;;  %v8960_v47 = vadd.f32 %v12493_v53, %v19098_v46  ;;  %v17585_v34 = vcombine.low %v9463_v27, %v9464_v42 }
 0x90b   :  { %9100 = vst [vmem:[#allocation5 + $0x8] sm:$0xff] %v8960_v47 }
 0x90c   :  { %v8787_v33 = vpop.f32.mrb[112].mxu1 }
 0x90d   :  { %v12494_v13 = vadd.f32 %v17556_v25, %v8787_v33  ;;  %v8789_v60 = vpop.f32.mrb[113].mxu1 }
 0x90e   :  { %v8790_v20 = vpop.f32.mrb[114].mxu1 }
 0x90f   :  { %v8965_v63 = vadd.f32 %v12494_v13, %v19099_v58  ;;  %v12495_v29 = vadd.f32 %v17556_v25, %v8790_v20  ;;  %v8792_v24 = vpop.f32.mrb[115].mxu1  ;;  %v19107_v58 = vld [vmem:[#allocation43_spill] sm:$0xff] }
 0x911   :  { %9101 = vst [vmem:[#allocation5 + $0x10] sm:$0xff] %v8965_v63  ;;  %v8968_v23 = vadd.f32 %v12495_v29, %v19100_v28  ;;  %v9555_v28 = vshll.u32 %v17585_v34, 16 }
 0x912   :  { %v9135_v16 = vld [vmem:[#allocation5] ss:$2 sm:$0xff] }
 0x913   :  { %v9170_v22 = vmul.f32 %v9135_v16, %v137_v41  ;;  %9102 = vst [vmem:[#allocation5 + $0x18] sm:$0xff] %v8968_v23  ;;  %v140_v41 = vld [vmem:[%s18661_s2 + $0x18] sm:$0xff] }
 0x914   :  { %v8795_v19 = vpop.f32.mrb[116].mxu1 }
 0x915   :  { %v11697_v50 = vpack.c.bf16 %v9170_v22, %v9170_v22  ;;  %v12496_v14 = vadd.f32 %v17556_v25, %v8795_v19  ;;  %v8797_v7 = vpop.f32.mrb[117].mxu1  ;;  %v19108_v22 = vld [vmem:[#allocation50_spill] sm:$0xff] }
 0x916   :  { %v8798_v30 = vpop.f32.mrb[118].mxu1 }
 0x917   :  { %v9243_v44 = vshrl.u32 %v11697_v50, 16  ;;  %v9246_v15 = vshll.u32 %v11697_v50, 16  ;;  %v8973_v4 = vadd.f32 %v12496_v14, %v19101_v3  ;;  %v12497_v49 = vadd.f32 %v17556_v25, %v8798_v30  ;;  %v8800_v5 = vpop.f32.mrb[119].mxu1 }
 0x918   :  { %v9557_v3 = vrot.slane %v9555_v28, 1 }
 0x919   :  { %v9245_v26 = vrot.slane %v9243_v44, 6  ;;  %v9248_v62 = vrot.slane %v9246_v15, 7  ;;  %9103 = vst [vmem:[#allocation5 + $0x20] sm:$0xff] %v8973_v4  ;;  %v8976_v2 = vadd.f32 %v12497_v49, %v19102_v0  ;;  %v9553_v15 = vshrl.u32 %v17585_v34, 16 }
 0x91a   :  { %v9137_v37 = vld [vmem:[#allocation5 + $0x10] ss:$2 sm:$0xff] }
 0x91b   :  { %v9249_v51 = vor.u32 %v9248_v62, %v9245_v26  ;;  %v9171_v39 = vmul.f32 %v9137_v37, %v138_v17  ;;  %9104 = vst [vmem:[#allocation5 + $0x28] sm:$0xff] %v8976_v2 }
 0x91c   :  { %v8803_v45 = vpop.f32.mrb[120].mxu1 }
 0x91d   :  { %v9441_v12 = vsel %vm13931_vm5, %v9249_v51, %v9440_v36  ;;  %v11698_v52 = vpack.c.bf16 %v9171_v39, %v9171_v39  ;;  %v12498_v57 = vadd.f32 %v17556_v25, %v8803_v45  ;;  %v8805_v21 = vpop.f32.mrb[121].mxu1  ;;  %v9250_v38 = vrot.slane %v9249_v51, 4  ;;  %v19109_v51 = vld [vmem:[#allocation44_spill] sm:$0xff] }
 0x91e   :  { %9442 = vst [vmem:[#allocation4 + $0x8] sm:$0xe] %v9441_v12  ;;  %v8806_v32 = vpop.f32.mrb[122].mxu1  ;;  %v141_v12 = vld [vmem:[%s18661_s2 + $0x20] sm:$0xff] }
 0x91f   :  { %v9252_v55 = vshrl.u32 %v11698_v52, 16  ;;  %v9255_v56 = vshll.u32 %v11698_v52, 16  ;;  %v8981_v43 = vadd.f32 %v12498_v57, %v19104_v48  ;;  %v12499_v54 = vadd.f32 %v17556_v25, %v8806_v32  ;;  %v8808_v6 = vpop.f32.mrb[123].mxu1 }
 0x920   :  { %v9558_v52 = vor.u32 %v9557_v3, %v9553_v15 }
 0x921   :  { %v9254_v11 = vrot.slane %v9252_v55, 6  ;;  %v9257_v1 = vrot.slane %v9255_v56, 7  ;;  %9105 = vst [vmem:[#allocation5 + $0x30] sm:$0xff] %v8981_v43  ;;  %v8984_v10 = vadd.f32 %v12499_v54, %v19105_v8  ;;  %v19110_v55 = vld [vmem:[#allocation45_spill] sm:$0xff] }
 0x922   :  { %v9139_v40 = vld [vmem:[#allocation5 + $0x20] ss:$2 sm:$0xff] }
 0x923   :  { %v9258_v61 = vor.u32 %v9257_v1, %v9254_v11  ;;  %v9172_v18 = vmul.f32 %v9139_v40, %v139_v31  ;;  %9106 = vst [vmem:[#allocation5 + $0x38] sm:$0xff] %v8984_v10  ;;  %v13512_v11 = vld [vmem:[%s18670_s11 + $0x80] sm:$0xff]   ;;  %v13514_v10 = vld [vmem:[%s18670_s11 + $0xc8] sm:$0xff]  }
 0x924   :  { %v8811_v59 = vpop.f32.mrb[124].mxu1 }
 0x925   :  { %v9259_v9 = vsel %vm13992_vm7, %v9250_v38, %v9258_v61  ;;  %v11699_v46 = vpack.c.bf16 %v9172_v18, %v9172_v18  ;;  %v12500_v47 = vadd.f32 %v17556_v25, %v8811_v59  ;;  %v8813_v33 = vpop.f32.mrb[125].mxu1  ;;  %v9260_v14 = vrot.slane %v9258_v61, 4  ;;  %v9465_v26 = vld [vmem:[#allocation4 + $0x8] sm:$0xf] }
 0x926   :  { %9443 = vst [vmem:[#allocation4 + $0xc] sm:$0xf] %v9259_v9  ;;  %v8814_v13 = vpop.f32.mrb[126].mxu1  ;;  %v19111_v9 = vld [vmem:[#allocation47_spill] sm:$0xff] }
 0x927   :  { %v9262_v60 = vshrl.u32 %v11699_v46, 16  ;;  %v9265_v20 = vshll.u32 %v11699_v46, 16  ;;  %v8989_v63 = vadd.f32 %v12500_v47, %v19107_v58  ;;  %v12501_v29 = vadd.f32 %v17556_v25, %v8814_v13  ;;  %v8816_v24 = vpop.f32.mrb[127].mxu1  ;;  %v13515_v13 = vld [vmem:[%s18670_s11 + $0x88] sm:$0xff]  }
 0x928   :  { %v9483_v24 = vld [vmem:[#allocation4 + $0x8] sm:$0xe] }
 0x929   :  { %v9264_v23 = vrot.slane %v9262_v60, 6  ;;  %v9267_v16 = vrot.slane %v9265_v20, 7  ;;  %9107 = vst [vmem:[#allocation5 + $0x40] sm:$0xff] %v8989_v63  ;;  %v8992_v19 = vadd.f32 %v12501_v29, %v19108_v22  ;;  %v142_v60 = vld [vmem:[%s18661_s2 + $0x28] sm:$0xff] }
 0x92a   :  { %v9141_v50 = vld [vmem:[#allocation5 + $0x30] ss:$2 sm:$0xff]  ;;  %v19112_v63 = vld [vmem:[#allocation54_spill] sm:$0xff] }
 0x92b   :  { %v9268_v7 = vor.u32 %v9267_v16, %v9264_v23  ;;  %v9173_v30 = vmul.f32 %v9141_v50, %v140_v41  ;;  %9108 = vst [vmem:[#allocation5 + $0x48] sm:$0xff] %v8992_v19  ;;  %v13517_v19 = vld [vmem:[%s18670_s11 + $0x90] sm:$0xff]  }
 0x92c   :  { %v8819_v44 = vpop.f32.mrb[128].mxu1 }
 0x92d   :  { %v9269_v4 = vsel %vm13992_vm7, %v9260_v14, %v9268_v7  ;;  %v11700_v49 = vpack.c.bf16 %v9173_v30, %v9173_v30  ;;  %v12502_v5 = vadd.f32 %v17556_v25, %v8819_v44  ;;  %v8821_v17 = vpop.f32.mrb[129].mxu1  ;;  %v17601_v62 = vld [vmem:[#allocation4 + $0xc] sm:$0xf]  ;;  %v9270_v54 = vrot.slane %v9268_v7, 4  ;;  %v13519_v14 = vld [vmem:[%s18670_s11 + $0xd8] sm:$0xff]  }
 0x92e   :  { %9444 = vst [vmem:[#allocation4 + $0x10] sm:$0xf] %v9269_v4  ;;  %v8822_v0 = vpop.f32.mrb[130].mxu1  ;;  %v17604_v2 = vcombine.low %v9465_v26, %v17601_v62  ;;  %v17640_v28 = vcombine.low %v9483_v24, %v17601_v62 }
 0x92f   :  { %v9272_v36 = vshrl.u32 %v11700_v49, 16  ;;  %v9275_v37 = vshll.u32 %v11700_v49, 16  ;;  %v8997_v39 = vadd.f32 %v12502_v5, %v19109_v51  ;;  %v12503_v45 = vadd.f32 %v17556_v25, %v8822_v0  ;;  %v8824_v35 = vpop.f32.mrb[131].mxu1 }
 0x930   :  { %v9560_v57 = vshll.u32 %v17604_v2, 16  ;;  %v9564_v17 = vshrl.u32 %v17604_v2, 16  ;;  %v9679_v26 = vrot.slane %v17640_v28, 1  ;;  %v13520_v35 = vld [vmem:[%s18670_s11 + $0x98] sm:$0xff]  }
 0x931   :  { %v9274_v21 = vrot.slane %v9272_v36, 6  ;;  %v9277_v32 = vrot.slane %v9275_v37, 7  ;;  %9109 = vst [vmem:[#allocation5 + $0x50] sm:$0xff] %v8997_v39  ;;  %v9000_v56 = vadd.f32 %v12503_v45, %v19110_v55  ;;  %v19113_v37 = vld [vmem:[#allocation48_spill] sm:$0xff]  ;;  %v9641_v55 = vrot.slane %v17604_v2, 1 }
 0x932   :  { %v9143_v48 = vld [vmem:[#allocation5 + $0x40] ss:$2 sm:$0xff]  ;;  %v17613_v43 = vrot.slane %v9560_v57, 1 }
 0x933   :  { %v9278_v6 = vor.u32 %v9277_v32, %v9274_v21  ;;  %v9174_v31 = vmul.f32 %v9143_v48, %v141_v12  ;;  %9110 = vst [vmem:[#allocation5 + $0x58] sm:$0xff] %v9000_v56  ;;  %v143_v12 = vld [vmem:[%s18661_s2 + $0x30] sm:$0xff]  ;;  %v13521_v21 = vld [vmem:[%s18670_s11 + $0xe0] sm:$0xff]  }
 0x934   :  { %v8827_v1 = vpop.f32.mrb[132].mxu1  ;;  %v9563_v8 = vsel %vm1327_vm8, %v9558_v52, %v17613_v43 }
 0x935   :  { %v9279_v27 = vsel %vm13992_vm7, %v9270_v54, %v9278_v6  ;;  %v11701_v42 = vpack.c.bf16 %v9174_v31, %v9174_v31  ;;  %v12504_v40 = vadd.f32 %v17556_v25, %v8827_v1  ;;  %v8829_v38 = vpop.f32.mrb[133].mxu1  ;;  %10517 = vmatprep.mubr.bf16.mxu0 %v9563_v8  ;;  %v9280_v23 = vrot.slane %v9278_v6, 4  ;;  %v9467_v3 = vld [vmem:[#allocation4 + $0x10] sm:$0xf]  ;;  %v19114_v54 = vld [vmem:[#allocation49_spill] sm:$0xff] }
 0x936   :  { %9445 = vst [vmem:[#allocation4 + $0x14] sm:$0xf] %v9279_v27  ;;  %v8830_v61 = vpop.f32.mrb[134].mxu1  ;;  %10518 = vmatmul.mubr.bf16.vlgmr.msra.gmra.mrb[204].mxu0 %v17585_v34  ;;  %v13516_v34 = vld [vmem:[%s18670_s11 + $0xd0] sm:$0xff]   ;;  %v9566_v31 = vor.u32 %v9564_v17, %v17613_v43  ;;  %v13522_v43 = vld [vmem:[%s18670_s11 + $0xa0] sm:$0xff]  }
 0x937   :  { %v9282_v18 = vshrl.u32 %v11701_v42, 16  ;;  %v9285_v59 = vshll.u32 %v11701_v42, 16  ;;  %v9005_v46 = vadd.f32 %v12504_v40, %v19111_v9  ;;  %v12505_v47 = vadd.f32 %v17556_v25, %v8830_v61  ;;  %v8832_v33 = vpop.f32.mrb[135].mxu1  ;;  %11890 = vmatpush3.bf16.msra.mxu0 %v13512_v11 }
 0x938   :  { %11891 = vmatprep.subr.bf16.mxu0 %v13514_v10 }
 0x939   :  { %v9284_v20 = vrot.slane %v9282_v18, 6  ;;  %v9287_v58 = vrot.slane %v9285_v59, 7  ;;  %9111 = vst [vmem:[#allocation5 + $0x60] sm:$0xff] %v9005_v46  ;;  %v9008_v29 = vadd.f32 %v12505_v47, %v19112_v63  ;;  %v13524_v46 = vld [vmem:[%s18670_s11 + $0xe8] sm:$0xff]  }
 0x93a   :  { %v9145_v41 = vld [vmem:[#allocation5 + $0x50] ss:$2 sm:$0xff] }
 0x93b   :  { %v9288_v16 = vor.u32 %v9287_v58, %v9284_v20  ;;  %v9175_v22 = vmul.f32 %v9145_v41, %v142_v60  ;;  %9112 = vst [vmem:[#allocation5 + $0x68] sm:$0xff] %v9008_v29  ;;  %11892 = vmatpush3.bf16.msra.mxu0 %v13515_v13  ;;  %v19115_v63 = vld [vmem:[#allocation51_spill] sm:$0xff] }
 0x93c   :  { %v8835_v50 = vpop.f32.mrb[136].mxu1  ;;  %11893 = vmatprep.subr.bf16.mxu0 %v13516_v34 }
 0x93d   :  { %v9289_v7 = vsel %vm13992_vm7, %v9280_v23, %v9288_v16  ;;  %v11702_v30 = vpack.c.bf16 %v9175_v22, %v9175_v22  ;;  %v12506_v44 = vadd.f32 %v17556_v25, %v8835_v50  ;;  %v8837_v15 = vpop.f32.mrb[137].mxu1  ;;  %v17651_v4 = vld [vmem:[#allocation4 + $0x14] sm:$0xf]  ;;  %v9290_v42 = vrot.slane %v9288_v16, 4  ;;  %v144_v16 = vld [vmem:[%s18661_s2 + $0x38] sm:$0xff]  ;;  %v13526_v22 = vld [vmem:[%s18670_s11 + $0xf0] sm:$0xff]  }
 0x93e   :  { %9446 = vst [vmem:[#allocation4 + $0x18] sm:$0xf] %v9289_v7  ;;  %v8838_v49 = vpop.f32.mrb[138].mxu1  ;;  %v17654_v5 = vcombine.low %v9467_v3, %v17651_v4  ;;  %v13525_v23 = vld [vmem:[%s18670_s11 + $0xa8] sm:$0xff]  }
 0x93f   :  { %v9292_v0 = vshrl.u32 %v11702_v30, 16  ;;  %v9295_v36 = vshll.u32 %v11702_v30, 16  ;;  %v9013_v51 = vadd.f32 %v12506_v44, %v19113_v37  ;;  %v12507_v39 = vadd.f32 %v17556_v25, %v8838_v49  ;;  %v8840_v45 = vpop.f32.mrb[139].mxu1  ;;  %11894 = vmatpush3.bf16.msra.mxu0 %v13517_v19  ;;  %v13527_v49 = vld [vmem:[%s18670_s11 + $0xb0] sm:$0xff]  }
 0x940   :  { %v9568_v52 = vshll.u32 %v17654_v5, 16  ;;  %v9572_v57 = vshrl.u32 %v17654_v5, 16  ;;  %11895 = vmatprep.subr.bf16.mxu0 %v13519_v14  ;;  %v17672_v32 = vrot.slane %v17654_v5, 1  ;;  %v19116_v14 = vld [vmem:[#allocation58_spill] sm:$0xff] }
 0x941   :  { %v9294_v56 = vrot.slane %v9292_v0, 6  ;;  %v9297_v48 = vrot.slane %v9295_v36, 7  ;;  %9113 = vst [vmem:[#allocation5 + $0x70] sm:$0xff] %v9013_v51  ;;  %v9016_v6 = vadd.f32 %v12507_v39, %v19114_v54  ;;  %v13531_v54 = vld [vmem:[%s18670_s11 + $0xb8] sm:$0xff]  }
 0x942   :  { %v9147_v11 = vld [vmem:[#allocation5 + $0x60] ss:$2 sm:$0xff]  ;;  %v17677_v1 = vrot.slane %v9568_v52, 1  ;;  %v9700_v8 = vrot.slane %v9568_v52, 2  ;;  %v9699_v10 = vrot.slane %v9572_v57, 1  ;;  %v17683_v27 = vsel %vm1497_vm11, %v9679_v26, %v17672_v32  ;;  %v19117_v52 = vld [vmem:[#allocation52_spill] sm:$0xff] }
 0x943   :  { %v9298_v40 = vor.u32 %v9297_v48, %v9294_v56  ;;  %v9176_v38 = vmul.f32 %v9147_v11, %v143_v12  ;;  %9114 = vst [vmem:[#allocation5 + $0x78] sm:$0xff] %v9016_v6  ;;  %11896 = vmatpush3.bf16.msra.mxu0 %v13520_v35  ;;  %v17692_v61 = vsel %vm1497_vm11, %v9641_v55, %v17672_v32  ;;  %v13529_v26 = vld [vmem:[%s18670_s11 + $0xf8] sm:$0xff]   ;;  %v145_v6 = vld [vmem:[%s18661_s2 + $0x40] sm:$0xff] }
 0x944   :  { %v8843_v18 = vpop.f32.mrb[140].mxu1  ;;  %v9571_v59 = vsel %vm1327_vm8, %v9566_v31, %v17677_v1  ;;  %v17696_v9 = vor.u32 %v9700_v8, %v9699_v10  ;;  %11897 = vmatprep.subr.bf16.mxu0 %v13521_v21  ;;  %v13533_v11 = vld [vmem:[%s18670_s11 + $0x140] sm:$0xff]  }
 0x945   :  { %v9299_v47 = vsel %vm13992_vm7, %v9290_v42, %v9298_v40  ;;  %v11703_v33 = vpack.c.bf16 %v9176_v38, %v9176_v38  ;;  %v12508_v13 = vadd.f32 %v17556_v25, %v8843_v18  ;;  %v8845_v60 = vpop.f32.mrb[141].mxu1  ;;  %10525 = vmatprep.mubr.bf16.mxu0 %v9571_v59  ;;  %v9300_v44 = vrot.slane %v9298_v40, 4  ;;  %v19118_v40 = vld [vmem:[#allocation53_spill] sm:$0xff] }
 0x946   :  { %9447 = vst [vmem:[#allocation4 + $0x1c] sm:$0xf] %v9299_v47  ;;  %v8846_v34 = vpop.f32.mrb[142].mxu1  ;;  %10526 = vmatmul.mubr.bf16.gmra.mrb[208].mxu0 %v17604_v2  ;;  %v9574_v18 = vor.u32 %v9572_v57, %v17677_v1  ;;  %v9488_v60 = vld [vmem:[#allocation4 + $0x8] sm:$0xc] }
 0x947   :  { %v9302_v20 = vshrl.u32 %v11703_v33, 16  ;;  %v9305_v58 = vshll.u32 %v11703_v33, 16  ;;  %v9021_v29 = vadd.f32 %v12508_v13, %v19115_v63  ;;  %v12509_v24 = vadd.f32 %v17556_v25, %v8846_v34  ;;  %v8848_v41 = vpop.f32.mrb[143].mxu1  ;;  %11898 = vmatpush3.bf16.msra.mxu0 %v13522_v43 }
 0x948   :  { %11899 = vmatprep.subr.bf16.mxu0 %v13524_v46  ;;  %v11510_v57 = vcombine.low %v9488_v60, %v17601_v62  ;;  %v9695_v41 = vshll.u32 %v17640_v28, 16 }
 0x949   :  { %v9304_v19 = vrot.slane %v9302_v20, 6  ;;  %v9307_v50 = vrot.slane %v9305_v58, 7  ;;  %9115 = vst [vmem:[#allocation5 + $0x80] sm:$0xff] %v9021_v29  ;;  %v9024_v7 = vadd.f32 %v12509_v24, %v19116_v14  ;;  %v9692_v24 = vshrl.u32 %v17640_v28, 16  ;;  %v146_v14 = vld [vmem:[%s18661_s2 + $0x48] sm:$0xff] }
 0x94a   :  { %v9149_v30 = vld [vmem:[#allocation5 + $0x70] ss:$2 sm:$0xff] }
 0x94b   :  { %v9308_v15 = vor.u32 %v9307_v50, %v9304_v19  ;;  %v9177_v3 = vmul.f32 %v9149_v30, %v144_v16  ;;  %9116 = vst [vmem:[#allocation5 + $0x88] sm:$0xff] %v9024_v7  ;;  %11900 = vmatpush3.bf16.msra.mxu0 %v13525_v23  ;;  %v9757_v7 = vrot.slane %v11510_v57, 2 }
 0x94c   :  { %v8851_v17 = vpop.f32.mrb[144].mxu1  ;;  %11901 = vmatprep.subr.bf16.mxu0 %v13526_v22  ;;  %v19119_v22 = vld [vmem:[#allocation55_spill] sm:$0xff] }
 0x94d   :  { %v9309_v0 = vsel %vm13992_vm7, %v9300_v44, %v9308_v15  ;;  %v11704_v36 = vpack.c.bf16 %v9177_v3, %v9177_v3  ;;  %v12510_v37 = vadd.f32 %v17556_v25, %v8851_v17  ;;  %v8853_v51 = vpop.f32.mrb[145].mxu1  ;;  %v17726_v39 = vld [vmem:[#allocation4 + $0x18] sm:$0xff]   ;;  %v9310_v47 = vrot.slane %v9308_v15, 4  ;;  %v19120_v15 = vld [vmem:[#allocation62_spill] sm:$0xff] }
 0x94e   :  { %9448 = vst [vmem:[#allocation4 + $0x20] sm:$0xf] %v9309_v0  ;;  %v8854_v45 = vpop.f32.mrb[146].mxu1  ;;  %v17737_v31 = vshll.u32 %v17726_v39, 16  ;;  %v9645_v8 = vrot.slane %v17726_v39, 1  ;;  %v9694_v17 = vrot.slane %v9692_v24, 1 }
 0x94f   :  { %v9312_v35 = vshrl.u32 %v11704_v36, 16  ;;  %v9315_v12 = vshll.u32 %v11704_v36, 16  ;;  %v9029_v21 = vadd.f32 %v12510_v37, %v19117_v52  ;;  %v12511_v56 = vadd.f32 %v17556_v25, %v8854_v45  ;;  %v8856_v48 = vpop.f32.mrb[147].mxu1  ;;  %11902 = vmatpush3.bf16.msra.mxu0 %v13527_v49 }
 0x950   :  { %11903 = vmatprep.subr.bf16.mxu0 %v13529_v26  ;;  %v9578_v59 = vrot.slane %v17737_v31, 1  ;;  %v17752_v46 = vsel %vm1497_vm11, %v17672_v32, %v9645_v8  ;;  %v9758_v49 = vrot.slane %v17654_v5, 2  ;;  %v9697_v26 = vrot.slane %v9695_v41, 2 }
 0x951   :  { %v9314_v10 = vrot.slane %v9312_v35, 6  ;;  %v9317_v42 = vrot.slane %v9315_v12, 7  ;;  %9117 = vst [vmem:[#allocation5 + $0x90] sm:$0xff] %v9029_v21  ;;  %v9032_v38 = vadd.f32 %v12511_v56, %v19118_v40 }
 0x952   :  { %v9151_v43 = vld [vmem:[#allocation5 + $0x80] ss:$2 sm:$0xff]  ;;  %v9579_v20 = vsel %vm1327_vm8, %v9574_v18, %v9578_v59  ;;  %v17774_v51 = vsel %vm1688_vm13, %v9757_v7, %v9758_v49 }
 0x953   :  { %v9318_v33 = vor.u32 %v9317_v42, %v9314_v10  ;;  %v9178_v13 = vmul.f32 %v9151_v43, %v145_v6  ;;  %9118 = vst [vmem:[#allocation5 + $0x98] sm:$0xff] %v9032_v38  ;;  %11904 = vmatpush3.bf16.msra.mxu0 %v13531_v54  ;;  %10533 = vmatprep.mubr.bf16.mxu0 %v9579_v20  ;;  %v17782_v54 = vshrl.u32 %v17726_v39, 16  ;;  %v19121_v42 = vld [vmem:[#allocation56_spill] sm:$0xff]  ;;  %v9489_v18 = vld [vmem:[#allocation4 + $0x10] sm:$0xc] }
 0x954   :  { %v8859_v34 = vpop.f32.mrb[148].mxu1  ;;  %11959 = vmatprep.subr.bf16.mxu0 %v13533_v11  ;;  %10534 = vmatmul.mubr.bf16.gmra.mrb[212].mxu0 %v17654_v5  ;;  %v9698_v6 = vor.u32 %v9697_v26, %v9694_v17 }
 0x955   :  { %v9319_v1 = vsel %vm13992_vm7, %v9310_v47, %v9318_v33  ;;  %v11705_v58 = vpack.c.bf16 %v9178_v13, %v9178_v13  ;;  %v12512_v32 = vadd.f32 %v17556_v25, %v8859_v34  ;;  %v8861_v63 = vpop.f32.mrb[149].mxu1  ;;  %v9320_v0 = vrot.slane %v9318_v33, 4  ;;  %v147_v47 = vld [vmem:[%s18661_s2 + $0x50] sm:$0xff] }
 0x956   :  { %9449 = vst [vmem:[#allocation4 + $0x24] sm:$0xf] %v9319_v1  ;;  %v8862_v29 = vpop.f32.mrb[150].mxu1  ;;  %v17795_v60 = vsel %vm1576_vm10, %v9698_v6, %v17696_v9  ;;  %v11511_v34 = vcombine.low %v9489_v18, %v17651_v4  ;;  %v19122_v1 = vld [vmem:[#allocation57_spill] sm:$0xff]  ;;  %v9582_v63 = vor.u32 %v17782_v54, %v9578_v59 }
 0x957   :  { %v9322_v23 = vshrl.u32 %v11705_v58, 16  ;;  %v9325_v16 = vshll.u32 %v11705_v58, 16  ;;  %v9037_v62 = vadd.f32 %v12512_v32, %v19119_v22  ;;  %v12513_v19 = vadd.f32 %v17556_v25, %v8862_v29  ;;  %v8864_v50 = vpop.f32.mrb[151].mxu1 }
 0x958   :  { %v9812_v59 = vshll.u32 %v11511_v34, 16  ;;  %v9494_v50 = vld [vmem:[#allocation4 + $0x10] sm:$0x8]  ;;  %v9796_v17 = vrot.slane %v11511_v34, 2 }
 0x959   :  { %v9324_v30 = vrot.slane %v9322_v23, 6  ;;  %v9327_v44 = vrot.slane %v9325_v16, 7  ;;  %9119 = vst [vmem:[#allocation5 + $0xa0] sm:$0xff] %v9037_v62  ;;  %v9040_v3 = vadd.f32 %v12513_v19, %v19120_v15  ;;  %v9809_v19 = vshrl.u32 %v11511_v34, 16 }
 0x95a   :  { %v9153_v28 = vld [vmem:[#allocation5 + $0x90] ss:$2 sm:$0xff]  ;;  %v9704_v15 = vrot.slane %v17737_v31, 2  ;;  %v9817_v34 = vrot.slane %v17737_v31, 3 }
 0x95b   :  { %v9328_v36 = vor.u32 %v9327_v44, %v9324_v30  ;;  %v9179_v37 = vmul.f32 %v9153_v28, %v146_v14  ;;  %9120 = vst [vmem:[#allocation5 + $0xa8] sm:$0xff] %v9040_v3  ;;  %v11515_v44 = vcombine.low %v9494_v50, %v17651_v4  ;;  %v9703_v3 = vrot.slane %v17782_v54, 1  ;;  %v148_v4 = vld [vmem:[%s18661_s2 + $0x58] sm:$0xff] }
 0x95c   :  { %v8867_v45 = vpop.f32.mrb[152].mxu1 }
 0x95d   :  { %v9329_v35 = vsel %vm13992_vm7, %v9320_v0, %v9328_v36  ;;  %v11706_v12 = vpack.c.bf16 %v9179_v37, %v9179_v37  ;;  %v12514_v52 = vadd.f32 %v17556_v25, %v8867_v45  ;;  %v8869_v21 = vpop.f32.mrb[153].mxu1  ;;  %v17779_v56 = vld [vmem:[#allocation4 + $0x20] sm:$0xff]   ;;  %v9330_v41 = vrot.slane %v9328_v36, 4  ;;  %v19123_v36 = vld [vmem:[#allocation59_spill] sm:$0xff] }
 0x95e   :  { %9450 = vst [vmem:[#allocation4 + $0x28] sm:$0xf] %v9329_v35  ;;  %v8870_v48 = vpop.f32.mrb[154].mxu1  ;;  %v17790_v33 = vshll.u32 %v17779_v56, 16  ;;  %v9647_v13 = vrot.slane %v17779_v56, 1  ;;  %v9814_v21 = vrot.slane %v9812_v59, 3 }
 0x95f   :  { %v9332_v11 = vshrl.u32 %v11706_v12, 16  ;;  %v9335_v10 = vshll.u32 %v11706_v12, 16  ;;  %v9045_v40 = vadd.f32 %v12514_v52, %v19121_v42  ;;  %v12515_v38 = vadd.f32 %v17556_v25, %v8870_v48  ;;  %v8872_v43 = vpop.f32.mrb[155].mxu1 }
 0x960   :  { %v9586_v29 = vrot.slane %v17790_v33, 1  ;;  %v17808_v24 = vsel %vm1497_vm11, %v9645_v8, %v9647_v13  ;;  %v17826_v12 = vrot.slane %v17726_v39, 2  ;;  %v9811_v52 = vrot.slane %v9809_v19, 2 }
 0x961   :  { %v9334_v20 = vrot.slane %v9332_v11, 6  ;;  %v9337_v57 = vrot.slane %v9335_v10, 7  ;;  %9121 = vst [vmem:[#allocation5 + $0xb0] sm:$0xff] %v9045_v40  ;;  %v9048_v58 = vadd.f32 %v12515_v38, %v19122_v1  ;;  %v9875_v48 = vrot.slane %v17726_v39, 3  ;;  %v19124_v10 = vld [vmem:[#allocation66_spill] sm:$0xff] }
 0x962   :  { %v9155_v32 = vld [vmem:[#allocation5 + $0xa0] ss:$2 sm:$0xff]  ;;  %v9587_v62 = vsel %vm1327_vm8, %v9582_v63, %v9586_v29  ;;  %v9874_v40 = vrot.slane %v11515_v44, 3  ;;  %v17834_v43 = vsel %vm1688_vm13, %v9758_v49, %v17826_v12  ;;  %v17838_v18 = vsel %vm1688_vm13, %v9796_v17, %v17826_v12 }
 0x963   :  { %v9338_v23 = vor.u32 %v9337_v57, %v9334_v20  ;;  %v9180_v16 = vmul.f32 %v9155_v32, %v147_v47  ;;  %9122 = vst [vmem:[#allocation5 + $0xb8] sm:$0xff] %v9048_v58  ;;  %10541 = vmatprep.mubr.bf16.mxu0 %v9587_v62  ;;  %v9816_v47 = vrot.slane %v17782_v54, 2  ;;  %v17847_v49 = vor.u32 %v9704_v15, %v9703_v3  ;;  %v149_v44 = vld [vmem:[%s18661_s2 + $0x60] sm:$0xff] }
 0x964   :  { %v8875_v22 = vpop.f32.mrb[156].mxu1  ;;  %10542 = vmatmul.mubr.bf16.gmra.mrb[216].mxu0 %v17726_v39  ;;  %v17845_v58 = vsel %vm1879_vm9, %v9874_v40, %v9875_v48  ;;  %v9815_v32 = vor.u32 %v9814_v21, %v9811_v52  ;;  %v9588_v15 = vshrl.u32 %v17779_v56, 16 }
 0x965   :  { %v9339_v14 = vsel %vm13992_vm7, %v9330_v41, %v9338_v23  ;;  %v11707_v7 = vpack.c.bf16 %v9180_v16, %v9180_v16  ;;  %v12516_v30 = vadd.f32 %v17556_v25, %v8875_v22  ;;  %v8877_v8 = vpop.f32.mrb[157].mxu1  ;;  %v9340_v20 = vrot.slane %v9338_v23, 4 }
 0x966   :  { %9451 = vst [vmem:[#allocation4 + $0x2c] sm:$0xf] %v9339_v14  ;;  %v8878_v28 = vpop.f32.mrb[158].mxu1  ;;  %v17849_v63 = vor.u32 %v9817_v34, %v9816_v47  ;;  %v17859_v62 = vsel %vm1576_vm10, %v17696_v9, %v17847_v49  ;;  %v19125_v14 = vld [vmem:[#allocation60_spill] sm:$0xff]  ;;  %v19127_v34 = vld [vmem:[#allocation63_spill] sm:$0xff] }
 0x967   :  { %v9342_v26 = vshrl.u32 %v11707_v7, 16  ;;  %v9345_v0 = vshll.u32 %v11707_v7, 16  ;;  %v9053_v37 = vadd.f32 %v12516_v30, %v19123_v36  ;;  %v12517_v45 = vadd.f32 %v17556_v25, %v8878_v28  ;;  %v8880_v35 = vpop.f32.mrb[159].mxu1 }
 0x968   :  { %v17863_v19 = vsel %vm1767_vm12, %v9815_v32, %v17849_v63  ;;  %v150_v32 = vld [vmem:[%s18661_s2 + $0x68] sm:$0xff] }
 0x969   :  { %v9344_v6 = vrot.slane %v9342_v26, 6  ;;  %v9347_v11 = vrot.slane %v9345_v0, 7  ;;  %9123 = vst [vmem:[#allocation5 + $0xc0] sm:$0xff] %v9053_v37  ;;  %v9056_v42 = vadd.f32 %v12517_v45, %v19124_v10  ;;  %v19126_v26 = vld [vmem:[#allocation61_spill] sm:$0xff]  ;;  %v9590_v37 = vor.u32 %v9588_v15, %v9586_v29 }
 0x96a   :  { %v9157_v38 = vld [vmem:[#allocation5 + $0xb0] ss:$2 sm:$0xff] }
 0x96b   :  { %v9348_v57 = vor.u32 %v9347_v11, %v9344_v6  ;;  %v9181_v1 = vmul.f32 %v9157_v38, %v148_v4  ;;  %9124 = vst [vmem:[#allocation5 + $0xc8] sm:$0xff] %v9056_v42 }
 0x96c   :  { %v8883_v5 = vpop.f32.mrb[160].mxu1 }
 0x96d   :  { %v9349_v54 = vsel %vm13992_vm7, %v9340_v20, %v9348_v57  ;;  %v11708_v41 = vpack.c.bf16 %v9181_v1, %v9181_v1  ;;  %v12518_v31 = vadd.f32 %v17556_v25, %v8883_v5  ;;  %v8885_v23 = vpop.f32.mrb[161].mxu1  ;;  %v17854_v16 = vld [vmem:[#allocation4 + $0x28] sm:$0xff]   ;;  %v9350_v4 = vrot.slane %v9348_v57, 4 }
 0x96e   :  { %9452 = vst [vmem:[#allocation4 + $0x30] sm:$0xf] %v9349_v54  ;;  %v8886_v22 = vpop.f32.mrb[162].mxu1  ;;  %v17872_v9 = vshll.u32 %v17854_v16, 16  ;;  %v9649_v3 = vrot.slane %v17854_v16, 1  ;;  %v9708_v5 = vrot.slane %v17790_v33, 2 }
 0x96f   :  { %v9352_v59 = vshrl.u32 %v11708_v41, 16  ;;  %v9355_v50 = vshll.u32 %v11708_v41, 16  ;;  %v9061_v7 = vadd.f32 %v12518_v31, %v19125_v14  ;;  %v12519_v30 = vadd.f32 %v17556_v25, %v8886_v22  ;;  %v8888_v8 = vpop.f32.mrb[163].mxu1 }
 0x970   :  { %v9594_v45 = vrot.slane %v17872_v9, 1  ;;  %v17884_v35 = vsel %vm1497_vm11, %v9647_v13, %v9649_v3  ;;  %v9707_v54 = vrot.slane %v9588_v15, 1  ;;  %v9762_v41 = vrot.slane %v17779_v56, 2 }
 0x971   :  { %v9354_v28 = vrot.slane %v9352_v59, 6  ;;  %v9357_v17 = vrot.slane %v9355_v50, 7  ;;  %9125 = vst [vmem:[#allocation5 + $0xd0] sm:$0xff] %v9061_v7  ;;  %v9064_v0 = vadd.f32 %v12519_v30, %v19126_v26  ;;  %v9877_v31 = vrot.slane %v17779_v56, 3  ;;  %v19128_v59 = vld [vmem:[#allocation13_spill] sm:$0xff] }
 0x972   :  { %v9159_v36 = vld [vmem:[#allocation5 + $0xc0] ss:$2 sm:$0xff]  ;;  %v9595_v11 = vsel %vm1327_vm8, %v9590_v37, %v9594_v45  ;;  %v17906_v7 = vsel %vm1688_vm13, %v17826_v12, %v9762_v41  ;;  %v9820_v30 = vrot.slane %v9588_v15, 2  ;;  %v9821_v8 = vrot.slane %v17790_v33, 3 }
 0x973   :  { %v9358_v52 = vor.u32 %v9357_v17, %v9354_v28  ;;  %v9182_v21 = vmul.f32 %v9159_v36, %v149_v44  ;;  %9126 = vst [vmem:[#allocation5 + $0xd8] sm:$0xff] %v9064_v0  ;;  %10549 = vmatprep.mubr.bf16.mxu0 %v9595_v11  ;;  %v17914_v44 = vsel %vm1879_vm9, %v9875_v48, %v9877_v31 }
 0x974   :  { %v8891_v6 = vpop.f32.mrb[164].mxu1  ;;  %10550 = vmatmul.mubr.bf16.gmra.mrb[220].mxu0 %v17779_v56  ;;  %v17916_v36 = vor.u32 %v9708_v5, %v9707_v54  ;;  %v17918_v37 = vor.u32 %v9821_v8, %v9820_v30  ;;  %v13698_v56 = vld [vmem:[%s18669_s10] ss:$0 sm:$0xff] }
 0x975   :  { %v9359_v29 = vsel %vm13992_vm7, %v9350_v4, %v9358_v52  ;;  %v11709_v10 = vpack.c.bf16 %v9182_v21, %v9182_v21  ;;  %v12520_v42 = vadd.f32 %v17556_v25, %v8891_v6  ;;  %v8893_v40 = vpop.f32.mrb[165].mxu1  ;;  %v9360_v28 = vrot.slane %v9358_v52, 4 }
 0x976   :  { %9453 = vst [vmem:[#allocation4 + $0x34] sm:$0xf] %v9359_v29  ;;  %v8894_v13 = vpop.f32.mrb[166].mxu1  ;;  %v17928_v52 = vsel %vm1576_vm10, %v17847_v49, %v17916_v36  ;;  %v17933_v21 = vsel %vm1767_vm12, %v17849_v63, %v17918_v37  ;;  %v19129_v29 = vld [vmem:[#allocation64_spill] sm:$0xff] }
 0x977   :  { %v9362_v38 = vshrl.u32 %v11709_v10, 16  ;;  %v9365_v47 = vshll.u32 %v11709_v10, 16  ;;  %v9069_v20 = vadd.f32 %v12520_v42, %v19127_v34  ;;  %v12521_v57 = vadd.f32 %v17556_v25, %v8894_v13  ;;  %v8896_v1 = vpop.f32.mrb[167].mxu1  ;;  %v151_v13 = vld [vmem:[%s18661_s2 + $0x70] sm:$0xff] }
 0x979   :  { %v9364_v23 = vrot.slane %v9362_v38, 6  ;;  %v9367_v22 = vrot.slane %v9365_v47, 7  ;;  %9127 = vst [vmem:[#allocation5 + $0xe0] sm:$0xff] %v9069_v20  ;;  %v9072_v50 = vadd.f32 %v12521_v57, %v19128_v59  ;;  %v9596_v38 = vshrl.u32 %v17854_v16, 16  ;;  %v19130_v20 = vld [vmem:[#allocation65_spill] sm:$0xff] }
 0x97a   :  { %v9161_v14 = vld [vmem:[#allocation5 + $0xd0] ss:$2 sm:$0xff] }
 0x97b   :  { %v9368_v17 = vor.u32 %v9367_v22, %v9364_v23  ;;  %v9183_v26 = vmul.f32 %v9161_v14, %v150_v32  ;;  %9128 = vst [vmem:[#allocation5 + $0xe8] sm:$0xff] %v9072_v50  ;;  %v9598_v5 = vor.u32 %v9596_v38, %v9594_v45 }
 0x97c   :  { %v8899_v0 = vpop.f32.mrb[168].mxu1 }
 0x97d   :  { %v9369_v12 = vsel %vm13992_vm7, %v9360_v28, %v9368_v17  ;;  %v11710_v33 = vpack.c.bf16 %v9183_v26, %v9183_v26  ;;  %v12522_v15 = vadd.f32 %v17556_v25, %v8899_v0  ;;  %v8901_v4 = vpop.f32.mrb[169].mxu1  ;;  %v17923_v39 = vld [vmem:[#allocation4 + $0x30] sm:$0xff]   ;;  %v9370_v23 = vrot.slane %v9368_v17, 4 }
 0x97e   :  { %9454 = vst [vmem:[#allocation4 + $0x38] sm:$0xf] %v9369_v12  ;;  %v8902_v48 = vpop.f32.mrb[170].mxu1  ;;  %v17942_v49 = vshll.u32 %v17923_v39, 16  ;;  %v9651_v47 = vrot.slane %v17923_v39, 1  ;;  %v19131_v0 = vld [vmem:[#allocation67_spill] sm:$0xff] }
 0x97f   :  { %v9372_v6 = vshrl.u32 %v11710_v33, 16  ;;  %v9375_v11 = vshll.u32 %v11710_v33, 16  ;;  %v9077_v10 = vadd.f32 %v12522_v15, %v19129_v29  ;;  %v12523_v42 = vadd.f32 %v17556_v25, %v8902_v48  ;;  %v8904_v40 = vpop.f32.mrb[171].mxu1  ;;  %v152_v48 = vld [vmem:[%s18661_s2 + $0x78] sm:$0xff] }
 0x980   :  { %v9602_v32 = vrot.slane %v17942_v49, 1  ;;  %v17954_v54 = vsel %vm1497_vm11, %v9649_v3, %v9651_v47  ;;  %v9712_v4 = vrot.slane %v17872_v9, 2  ;;  %v9879_v29 = vrot.slane %v17854_v16, 3  ;;  %v19132_v40 = vld [vmem:[#allocation12_spill] sm:$0xff] }
 0x981   :  { %v9374_v63 = vrot.slane %v9372_v6, 6  ;;  %v9377_v34 = vrot.slane %v9375_v11, 7  ;;  %9129 = vst [vmem:[#allocation5 + $0xf0] sm:$0xff] %v9077_v10  ;;  %v9080_v57 = vadd.f32 %v12523_v42, %v19130_v20  ;;  %v9711_v6 = vrot.slane %v9596_v38, 1 }
 0x982   :  { %v9163_v1 = vld [vmem:[#allocation5 + $0xe0] ss:$2 sm:$0xff]  ;;  %v9603_v14 = vsel %vm1327_vm8, %v9598_v5, %v9602_v32  ;;  %v9764_v11 = vrot.slane %v17854_v16, 2  ;;  %v9825_v20 = vrot.slane %v17872_v9, 3 }
 0x983   :  { %v9378_v22 = vor.u32 %v9377_v34, %v9374_v63  ;;  %v9184_v59 = vmul.f32 %v9163_v1, %v151_v13  ;;  %9130 = vst [vmem:[#allocation5 + $0xf8] sm:$0xff] %v9080_v57  ;;  %10557 = vmatprep.mubr.bf16.mxu0 %v9603_v14  ;;  %v9824_v34 = vrot.slane %v9596_v38, 2  ;;  %v17983_v57 = vsel %vm1879_vm9, %v9877_v31, %v9879_v29 }
 0x984   :  { %v8907_v50 = vpop.f32.mrb[172].mxu1  ;;  %10558 = vmatmul.mubr.bf16.gmra.mrb[224].mxu0 %v17854_v16 }
 0x985   :  { %v9379_v45 = vsel %vm13992_vm7, %v9370_v23, %v9378_v22  ;;  %v11711_v30 = vpack.c.bf16 %v9184_v59, %v9184_v59  ;;  %v12524_v8 = vadd.f32 %v17556_v25, %v8907_v50  ;;  %v8909_v28 = vpop.f32.mrb[173].mxu1  ;;  %v9380_v1 = vrot.slane %v9378_v22, 4 }
 0x986   :  { %9455 = vst [vmem:[#allocation4 + $0x3c] sm:$0xf] %v9379_v45  ;;  %v8910_v3 = vpop.f32.mrb[174].mxu1  ;;  %v17985_v50 = vor.u32 %v9712_v4, %v9711_v6  ;;  %v17987_v14 = vor.u32 %v9825_v20, %v9824_v34  ;;  %v19134_v6 = vld [vmem:[#allocation14_spill] sm:$0xff] }
 0x987   :  { %v9382_v17 = vshrl.u32 %v11711_v30, 16  ;;  %v9385_v26 = vshll.u32 %v11711_v30, 16  ;;  %v9085_v12 = vadd.f32 %v12524_v8, %v19131_v0  ;;  %v12525_v33 = vadd.f32 %v17556_v25, %v8910_v3  ;;  %v8912_v15 = vpop.f32.mrb[175].mxu1 }
 0x988   :  { %v17975_v25 = vsel %vm1688_vm13, %v9762_v41, %v9764_v11  ;;  %v17999_v30 = vsel %vm1576_vm10, %v17916_v36, %v17985_v50  ;;  %v18004_v8 = vsel %vm1767_vm12, %v17918_v37, %v17987_v14  ;;  %v9604_v15 = vshrl.u32 %v17923_v39, 16 }
 0x989   :  { %v9384_v10 = vrot.slane %v9382_v17, 6  ;;  %v9387_v42 = vrot.slane %v9385_v26, 7  ;;  %9131 = vst [vmem:[#allocation5 + $0x100] sm:$0xff] %v9085_v12  ;;  %v9088_v13 = vadd.f32 %v12525_v33, %v19132_v40  ;;  %v19133_v17 = vld [vmem:[#allocation68_spill] sm:$0xff]  ;;  %v153_v33 = vld [vmem:[%s18661_s2 + $0x80] sm:$0xff] }
 0x98a   :  { %v9165_v63 = vld [vmem:[#allocation5 + $0xf0] ss:$2 sm:$0xff]  ;;  %v9606_v40 = vor.u32 %v9604_v15, %v9602_v32  ;;  %v9766_v32 = vrot.slane %v17923_v39, 2 }
 0x98b   :  { %v9388_v5 = vor.u32 %v9387_v42, %v9384_v10  ;;  %v9185_v23 = vmul.f32 %v9165_v63, %v152_v48  ;;  %9132 = vst [vmem:[#allocation5 + $0x108] sm:$0xff] %v9088_v13 }
 0x98c   :  { %v8915_v59 = vpop.f32.mrb[176].mxu1 }
 0x98d   :  { %v9389_v41 = vsel %vm13992_vm7, %v9380_v1, %v9388_v5  ;;  %v11712_v9 = vpack.c.bf16 %v9185_v23, %v9185_v23  ;;  %v12526_v38 = vadd.f32 %v13698_v56, %v8915_v59  ;;  %v8917_v31 = vpop.f32.mrb[177].mxu1  ;;  %v17994_v45 = vld [vmem:[#allocation4 + $0x38] sm:$0xff]   ;;  %v9390_v34 = vrot.slane %v9388_v5, 4 }
 0x98e   :  { %9456 = vst [vmem:[#allocation4 + $0x40] sm:$0xf] %v9389_v41  ;;  %v8918_v22 = vpop.f32.mrb[178].mxu1  ;;  %v18012_v36 = vshll.u32 %v17994_v45, 16  ;;  %v9653_v4 = vrot.slane %v17994_v45, 1  ;;  %v9716_v5 = vrot.slane %v17942_v49, 2 }
 0x98f   :  { %v9392_v28 = vshrl.u32 %v11712_v9, 16  ;;  %v9395_v3 = vshll.u32 %v11712_v9, 16  ;;  %v9093_v26 = vadd.f32 %v12526_v38, %v19133_v17  ;;  %v12527_v0 = vadd.f32 %v13698_v56, %v8918_v22  ;;  %v8920_v12 = vpop.f32.mrb[179].mxu1  ;;  %v154_v38 = vld [vmem:[%s18661_s2 + $0x88] sm:$0xff] }
 0x990   :  { %v9610_v13 = vrot.slane %v18012_v36, 1  ;;  %v18024_v63 = vsel %vm1497_vm11, %v9651_v47, %v9653_v4  ;;  %v18032_v47 = vsel %vm1688_vm13, %v9764_v11, %v9766_v32  ;;  %v9715_v31 = vrot.slane %v9604_v15, 1 }
 0x991   :  { %v9394_v48 = vrot.slane %v9392_v28, 6  ;;  %v9397_v37 = vrot.slane %v9395_v3, 7  ;;  %9133 = vst [vmem:[#allocation5 + $0x110] sm:$0xff] %v9093_v26  ;;  %v9096_v10 = vadd.f32 %v12527_v0, %v19134_v6  ;;  %v9612_v22 = vshrl.u32 %v17994_v45, 16 }
 0x992   :  { %v9167_v42 = vld [vmem:[#allocation5 + $0x100] ss:$2 sm:$0xff]  ;;  %v9611_v23 = vsel %vm1327_vm8, %v9606_v40, %v9610_v13  ;;  %v9881_v28 = vrot.slane %v17923_v39, 3  ;;  %v9828_v0 = vrot.slane %v9604_v15, 2  ;;  %v9829_v12 = vrot.slane %v17942_v49, 3 }
 0x993   :  { %v9398_v20 = vor.u32 %v9397_v37, %v9394_v48  ;;  %v9186_v1 = vmul.f32 %v9167_v42, %v153_v33  ;;  %9134 = vst [vmem:[#allocation5 + $0x118] sm:$0xff] %v9096_v10  ;;  %10565 = vmatprep.mubr.bf16.mxu0 %v9611_v23  ;;  %v9720_v6 = vrot.slane %v18012_v36, 2  ;;  %v9719_v10 = vrot.slane %v9612_v22, 1 }
 0x994   :  { %10566 = vmatmul.mubr.bf16.gmra.mrb[228].mxu0 %v17923_v39  ;;  %v18044_v11 = vsel %vm1879_vm9, %v9879_v29, %v9881_v28  ;;  %v9717_v42 = vor.u32 %v9716_v5, %v9715_v31  ;;  %v9830_v40 = vor.u32 %v9829_v12, %v9828_v0  ;;  %v9768_v23 = vrot.slane %v17994_v45, 2 }
 0x995   :  { %v9399_v59 = vsel %vm13992_vm7, %v9390_v34, %v9398_v20  ;;  %v11713_v41 = vpack.c.bf16 %v9186_v1, %v9186_v1  ;;  %v9400_v33 = vrot.slane %v9398_v20, 4  ;;  %v9883_v53 = vrot.slane %v17994_v45, 3 }
 0x996   :  { %9457 = vst [vmem:[#allocation4 + $0x44] sm:$0xf] %v9399_v59  ;;  %v18053_v16 = vsel %vm1576_vm10, %v17985_v50, %v9717_v42  ;;  %v18057_v49 = vsel %vm1767_vm12, %v17987_v14, %v9830_v40  ;;  %v9721_v59 = vor.u32 %v9720_v6, %v9719_v10  ;;  %v18065_v50 = vsel %vm1688_vm13, %v9766_v32, %v9768_v23 }
 0x997   :  { %v9402_v9 = vshrl.u32 %v11713_v41, 16  ;;  %v9405_v56 = vshll.u32 %v11713_v41, 16 }
 0x999   :  { %v9404_v3 = vrot.slane %v9402_v9, 6  ;;  %v9407_v17 = vrot.slane %v9405_v56, 7  ;;  %v9614_v56 = vor.u32 %v9612_v22, %v9610_v13 }
 0x99a   :  { %v9169_v26 = vld [vmem:[#allocation5 + $0x110] ss:$2 sm:$0xff] }
 0x99b   :  { %v9408_v48 = vor.u32 %v9407_v17, %v9404_v3  ;;  %v9187_v37 = vmul.f32 %v9169_v26, %v154_v38  ;;  %v18068_v38 = vsel %vm1576_vm10, %v9717_v42, %v9721_v59  ;;  %v9460_v17 = vld [vmem:[#allocation4 + $0x50] sm:$0x3] }
 0x99d   :  { %v11714_v39 = vpack.c.bf16 %v9187_v37, %v9187_v37  ;;  %v18047_v34 = vld [vmem:[#allocation4 + $0x40] sm:$0xff]   ;;  %v9409_v15 = vsel %vm13992_vm7, %v9400_v33, %v9408_v48  ;;  %v9410_v14 = vrot.slane %v9408_v48, 4  ;;  %v13536_v48 = vld [vmem:[%s18670_s11 + $0x148] sm:$0xff]  }
 0x99e   :  { %9458 = vst [vmem:[#allocation4 + $0x48] sm:$0xf] %v9409_v15  ;;  %v18060_v1 = vshll.u32 %v18047_v34, 16  ;;  %v9770_v32 = vrot.slane %v18047_v34, 2  ;;  %v9620_v12 = vshrl.u32 %v18047_v34, 16  ;;  %v9832_v15 = vrot.slane %v9612_v22, 2 }
 0x99f   :  { %v9412_v29 = vshrl.u32 %v11714_v39, 16  ;;  %v9415_v20 = vshll.u32 %v11714_v39, 16  ;;  %v9482_v39 = vld [vmem:[#allocation4] sm:$0xe] }
 0x9a0   :  { %v9618_v5 = vrot.slane %v18060_v1, 1  ;;  %v18082_v6 = vsel %vm1688_vm13, %v9768_v23, %v9770_v32 }
 0x9a1   :  { %v9414_v41 = vrot.slane %v9412_v29, 6  ;;  %v9417_v9 = vrot.slane %v9415_v20, 7  ;;  %v9833_v29 = vrot.slane %v18012_v36, 3  ;;  %v18087_v20 = vsel %vm1879_vm9, %v9881_v28, %v9883_v53 }
 0x9a2   :  { %v9619_v3 = vsel %vm1327_vm8, %v9614_v56, %v9618_v5  ;;  %v9622_v10 = vor.u32 %v9620_v12, %v9618_v5  ;;  %v9723_v56 = vrot.slane %v9620_v12, 1 }
 0x9a3   :  { %v9418_v31 = vor.u32 %v9417_v9, %v9414_v41  ;;  %10573 = vmatprep.mubr.bf16.mxu0 %v9619_v3  ;;  %v9724_v41 = vrot.slane %v18060_v1, 2 }
 0x9a4   :  { %10574 = vmatmul.mubr.bf16.gmra.mrb[232].mxu0 %v17994_v45 }
 0x9a5   :  { %v9419_v26 = vsel %vm13992_vm7, %v9410_v14, %v9418_v31  ;;  %v9420_v0 = vrot.slane %v9418_v31, 4  ;;  %v18074_v13 = vld [vmem:[#allocation4 + $0x48] ss:$0 sps:$4 sm:$0x11]   ;;  %v13699_v14 = vld [vmem:[#allocation4 + $0x4] sm:$0xf]  ;;  %v9834_v31 = vor.u32 %v9833_v29, %v9832_v15  ;;  %v9725_v22 = vor.u32 %v9724_v41, %v9723_v56 }
 0x9a6   :  { %9459 = vst [vmem:[#allocation4 + $0x4c] sm:$0xf] %v9419_v26  ;;  %v9624_v33 = vshll.u32 %v18074_v13, 16  ;;  %v11505_v23 = vcombine.low %v9482_v39, %v13699_v14  ;;  %v13539_v39 = vld [vmem:[%s18670_s11 + $0x110] sm:$0xff]   ;;  %v9836_v15 = vrot.slane %v9620_v12, 2  ;;  %v9837_v29 = vrot.slane %v18060_v1, 3 }
 0x9a7   :  { %v9461_v37 = vsel %vm13923_vm2, %v9420_v0, %v9460_v17  ;;  %v18096_v36 = vsel %vm1767_vm12, %v9830_v40, %v9834_v31  ;;  %v18103_v26 = vsel %vm1576_vm10, %v9721_v59, %v9725_v22  ;;  %v13541_v12 = vld [vmem:[%s18670_s11 + $0x118] sm:$0xff]   ;;  %v13544_v14 = vld [vmem:[%s18670_s11 + $0x168] sm:$0xff]  }
 0x9a8   :  { %9462 = vst [vmem:[#allocation4 + $0x50] sm:$0x3] %v9461_v37  ;;  %v9626_v42 = vrot.slane %v9624_v33, 1  ;;  %v9640_v28 = vrot.slane %v11505_v23, 1  ;;  %v13535_v33 = vld [vmem:[%s18670_s11 + $0x100] sm:$0xff]   ;;  %v9838_v56 = vor.u32 %v9837_v29, %v9836_v15  ;;  %v13545_v23 = vld [vmem:[%s18670_s11 + $0x128] sm:$0xff]  }
 0x9a9   :  { %v9655_v29 = vrot.slane %v18047_v34, 1 }
 0x9aa   :  { %v9627_v9 = vsel %vm1327_vm8, %v9622_v10, %v9626_v42  ;;  %v9642_v59 = vsel %vm1497_vm11, %v9640_v28, %v9641_v55  ;;  %v13538_v42 = vld [vmem:[%s18670_s11 + $0x150] sm:$0xff]   ;;  %v9885_v55 = vrot.slane %v18047_v34, 3  ;;  %v18149_v1 = vsel %vm1767_vm12, %v9834_v31, %v9838_v56 }
 0x9ab   :  { %10581 = vmatprep.mubr.bf16.mxu0 %v9627_v9  ;;  %v13540_v9 = vld [vmem:[%s18670_s11 + $0x158] sm:$0xff]   ;;  %v13547_v31 = vld [vmem:[%s18670_s11 + $0x170] sm:$0xff]  }
 0x9ac   :  { %10582 = vmatmul.mubr.bf16.gmra.mrb[236].mxu0 %v18047_v34  ;;  %v18138_v41 = vsel %vm1879_vm9, %v9883_v53, %v9885_v55  ;;  %v13542_v53 = vld [vmem:[%s18670_s11 + $0x160] sm:$0xff]   ;;  %v18170_v28 = vld [vmem:[#allocation4 + $0x58] ss:$0 sps:$4 sm:$0x77]   ;;  %v13557_v34 = vld [vmem:[%s18670_s11 + $0x188] sm:$0xff]  }
 0x9ad   :  { %v18092_v5 = vld [vmem:[#allocation4 + $0x48] sm:$0xff]   ;;  %10622 = vmatprep.mubr.bf16.mxu0 %v17683_v27 }
 0x9ae   :  { %v18099_v3 = vrot.slane %v18092_v5, 2  ;;  %v9728_v17 = vshrl.u32 %v18092_v5, 16  ;;  %v9731_v0 = vshll.u32 %v18092_v5, 16 }
 0x9b0   :  { %v18111_v27 = vsel %vm1688_vm13, %v9770_v32, %v18099_v3  ;;  %v9730_v40 = vrot.slane %v9728_v17, 1  ;;  %v9733_v37 = vrot.slane %v9731_v0, 2  ;;  %v13537_v32 = vld [vmem:[%s18670_s11 + $0x108] sm:$0xff]  }
 0x9b2   :  { %v18119_v10 = vor.u32 %v9733_v37, %v9730_v40  ;;  %v9840_v40 = vrot.slane %v9728_v17, 2  ;;  %v13550_v37 = vld [vmem:[%s18670_s11 + $0x178] sm:$0xff]  }
 0x9b3   :  { %v13551_v17 = vld [vmem:[%s18670_s11 + $0x138] sm:$0xff]  }
 0x9b4   :  { %10623 = vmatmul.mubr.bf16.vlgmr.msra.gmra.mrb[240].mxu0 %v9642_v59  ;;  %v18130_v2 = vsel %vm1576_vm10, %v9725_v22, %v18119_v10  ;;  %v18168_v22 = vld [vmem:[#allocation4 + $0x50] sm:$0xff]  }
 0x9b5   :  { %11960 = vmatpush3.bf16.msra.mxu0 %v13535_v33  ;;  %10630 = vmatprep.mubr.bf16.mxu0 %v17752_v46  ;;  %v9887_v33 = vrot.slane %v18092_v5, 3 }
 0x9b6   :  { %11961 = vmatprep.subr.bf16.mxu0 %v13536_v48  ;;  %v9841_v48 = vrot.slane %v9731_v0, 3 }
 0x9b7   :  { %v18180_v59 = vsel %vm1879_vm9, %v9885_v55, %v9887_v33 }
 0x9b9   :  { %11962 = vmatpush3.bf16.msra.mxu0 %v13537_v32  ;;  %v18182_v32 = vor.u32 %v9841_v48, %v9840_v40 }
 0x9ba   :  { %11963 = vmatprep.subr.bf16.mxu0 %v13538_v42  ;;  %v9889_v42 = vrot.slane %v18168_v22, 3 }
 0x9bb   :  { %v18193_v0 = vsel %vm1767_vm12, %v9838_v56, %v18182_v32  ;;  %v9681_v56 = vrot.slane %v18092_v5, 1  ;;  %v13562_v5 = vld [vmem:[%s18670_s11 + $0x1e0] sm:$0xff]  }
 0x9bc   :  { %10631 = vmatmul.mubr.bf16.gmra.mrb[244].mxu0 %v17692_v61  ;;  %v13543_v61 = vld [vmem:[%s18670_s11 + $0x120] sm:$0xff]   ;;  %v18196_v55 = vsel %vm1879_vm9, %v9887_v33, %v9889_v42 }
 0x9bd   :  { %10638 = vmatprep.mubr.bf16.mxu0 %v17808_v24  ;;  %11964 = vmatpush3.bf16.msra.mxu0 %v13539_v39  ;;  %v9891_v39 = vrot.slane %v18170_v28, 3 }
 0x9be   :  { %11965 = vmatprep.subr.bf16.mxu0 %v13540_v9  ;;  %v9656_v9 = vsel %vm1497_vm11, %v9653_v4, %v9655_v29  ;;  %v13554_v4 = vld [vmem:[%s18670_s11 + $0x180] sm:$0xff]  }
 0x9bf   :  { %v18202_v15 = vsel %vm1879_vm9, %v9889_v42, %v9891_v39  ;;  %v13567_v42 = vld [vmem:[%s18670_s11 + $0x1f0] sm:$0xff]  }
 0x9c0   :  { %v13568_v39 = vld [vmem:[%s18670_s11 + $0x1b0] sm:$0xff]  }
 0x9c1   :  { %11966 = vmatpush3.bf16.msra.mxu0 %v13541_v12  ;;  %v9682_v12 = vsel %vm1497_vm11, %v9655_v29, %v9681_v56 }
 0x9c2   :  { %11967 = vmatprep.subr.bf16.mxu0 %v13542_v53  ;;  %v13549_v53 = vld [vmem:[#allocation4 + $0x50] ss:$0 sps:$4 sm:$0x11]  }
 0x9c4   :  { %10639 = vmatmul.mubr.bf16.gmra.mrb[248].mxu0 %v17752_v46  ;;  %v13548_v46 = vld [vmem:[%s18670_s11 + $0x130] sm:$0xff]  }
 0x9c5   :  { %10646 = vmatprep.mubr.bf16.mxu0 %v17884_v35  ;;  %11968 = vmatpush3.bf16.msra.mxu0 %v13543_v61 }
 0x9c6   :  { %11969 = vmatprep.subr.bf16.mxu0 %v13544_v14 }
 0x9c9   :  { %11970 = vmatpush3.bf16.msra.mxu0 %v13545_v23 }
 0x9ca   :  { %11971 = vmatprep.subr.bf16.mxu0 %v13547_v31  ;;  %v13563_v31 = vld [vmem:[%s18670_s11 + $0x1a0] sm:$0xff]  }
 0x9cc   :  { %10647 = vmatmul.mubr.bf16.gmra.mrb[252].mxu0 %v17808_v24  ;;  %v13553_v24 = vld [vmem:[%s18670_s11 + $0x1c0] sm:$0xff]  }
 0x9cd   :  { %10654 = vmatprep.mubr.bf16.mxu0 %v17954_v54  ;;  %11972 = vmatpush3.bf16.msra.mxu0 %v13548_v46  ;;  %v13564_v46 = vld [vmem:[%s18670_s11 + $0x1e8] sm:$0xff]  }
 0x9ce   :  { %11973 = vmatprep.subr.bf16.mxu0 %v13550_v37  ;;  %v13565_v37 = vld [vmem:[%s18670_s11 + $0x1a8] sm:$0xff]  }
 0x9d1   :  { %11974 = vmatpush3.bf16.msra.mxu0 %v13551_v17  ;;  %v13571_v17 = vld [vmem:[%s18670_s11 + $0x1b8] sm:$0xff]  }
 0x9d2   :  { %12029 = vmatprep.subr.bf16.mxu0 %v13553_v24 }
 0x9d4   :  { %10655 = vmatmul.mubr.bf16.gmra.mrb[0].mxu0 %v17884_v35  ;;  %v9683_v35 = vrot.slane %v13549_v53, 1 }
 0x9d5   :  { %10662 = vmatprep.mubr.bf16.mxu0 %v18024_v63 }
 0x9d6   :  { %v9684_v61 = vsel %vm1497_vm11, %v9681_v56, %v9683_v35 }
 0x9dc   :  { %10663 = vmatmul.mubr.bf16.gmra.mrb[4].mxu0 %v17954_v54  ;;  %v9657_v54 = vrot.slane %v18074_v13, 1  ;;  %v13559_v13 = vld [vmem:[%s18670_s11 + $0x190] sm:$0xff]  }
 0x9dd   :  { %10670 = vmatprep.mubr.bf16.mxu0 %v9656_v9 }
 0x9de   :  { %v9658_v45 = vsel %vm1497_vm11, %v9655_v29, %v9657_v54 }
 0x9e4   :  { %10671 = vmatmul.mubr.bf16.gmra.mrb[8].mxu0 %v18024_v63  ;;  %v13556_v63 = vld [vmem:[%s18670_s11 + $0x1c8] sm:$0xff]  }
 0x9e5   :  { %10678 = vmatprep.mubr.bf16.mxu0 %v9682_v12  ;;  %v13728_v12 = vmov 0.0  }
 0x9ec   :  { %10679 = vmatmul.mubr.bf16.gmra.mrb[12].mxu0 %v9656_v9 }
 0x9ed   :  { %10686 = vmatprep.mubr.bf16.mxu0 %v9684_v61 }
 0x9f4   :  { %10687 = vmatmul.mubr.bf16.gmra.mrb[16].mxu0 %v9658_v45 }
 0x9f5   :  { %10727 = vmatprep.mubr.bf16.mxu0 %v17774_v51  ;;  %v13558_v51 = vld [vmem:[%s18670_s11 + $0x1d0] sm:$0xff]  }
 0x9fc   :  { %10728 = vmatmul.mubr.bf16.vlgmr.msra.gmra.mrb[20].mxu0 %v17795_v60  ;;  %v13560_v60 = vld [vmem:[%s18670_s11 + $0x1d8] sm:$0xff]  }
 0x9fd   :  { %12030 = vmatpush3.bf16.msra.mxu0 %v13554_v4  ;;  %10735 = vmatprep.mubr.bf16.mxu0 %v17834_v43  ;;  %v13561_v43 = vld [vmem:[%s18670_s11 + $0x198] sm:$0xff]  }
 0x9fe   :  { %12031 = vmatprep.subr.bf16.mxu0 %v13556_v63  ;;  %v13569_v63 = vld [vmem:[#allocation4 + $0x50] ss:$0 sps:$4 sm:$0x33]  }
 0xa01   :  { %12032 = vmatpush3.bf16.msra.mxu0 %v13557_v34 }
 0xa02   :  { %12033 = vmatprep.subr.bf16.mxu0 %v13558_v51  ;;  %v9740_v51 = vshll.u32 %v13569_v63, 16 }
 0xa04   :  { %10736 = vmatmul.mubr.bf16.gmra.mrb[24].mxu0 %v17859_v62 }
 0xa05   :  { %10743 = vmatprep.mubr.bf16.mxu0 %v17906_v7  ;;  %12034 = vmatpush3.bf16.msra.mxu0 %v13559_v13  ;;  %v9774_v13 = vrot.slane %v13569_v63, 2 }
 0xa06   :  { %12035 = vmatprep.subr.bf16.mxu0 %v13560_v60 }
 0xa09   :  { %v11835_v14 = vpop.f32.mrb[204].mxu0  ;;  %12036 = vmatpush3.bf16.msra.mxu0 %v13561_v43  ;;  %v9775_v43 = vsel %vm1688_vm13, %v18099_v3, %v9774_v13 }
 0xa0a   :  { %v11836_v23 = vpop.f32.mrb[205].mxu0  ;;  %12037 = vmatprep.subr.bf16.mxu0 %v13562_v5 }
 0xa0b   :  { %v18249_v62 = vadd.f32 %v11836_v23, %v11835_v14  ;;  %v11838_v33 = vpop.f32.mrb[206].mxu0 }
 0xa0c   :  { %v11839_v40 = vpop.f32.mrb[207].mxu0  ;;  %10744 = vmatmul.mubr.bf16.gmra.mrb[28].mxu0 %v17928_v52  ;;  %v13570_v52 = vld [vmem:[%s18670_s11 + $0x1f8] sm:$0xff]  }
 0xa0d   :  { %v18255_v48 = vadd.f32 %v11839_v40, %v11838_v33  ;;  %10751 = vmatprep.mubr.bf16.mxu0 %v17975_v25  ;;  %12038 = vmatpush3.bf16.msra.mxu0 %v13563_v31 }
 0xa0e   :  { %12039 = vmatprep.subr.bf16.mxu0 %v13564_v46 }
 0xa11   :  { %12040 = vmatpush3.bf16.msra.mxu0 %v13565_v37  ;;  %v13573_v37 = vld [vmem:[%s18670_s11 + $0x208] sm:$0xff]  }
 0xa12   :  { %12041 = vmatprep.subr.bf16.mxu0 %v13567_v42 }
 0xa14   :  { %10752 = vmatmul.mubr.bf16.gmra.mrb[32].mxu0 %v17999_v30 }
 0xa15   :  { %10759 = vmatprep.mubr.bf16.mxu0 %v18032_v47  ;;  %12042 = vmatpush3.bf16.msra.mxu0 %v13568_v39 }
 0xa16   :  { %12043 = vmatprep.subr.bf16.mxu0 %v13570_v52 }
 0xa19   :  { %v11841_v24 = vpop.f32.mrb[208].mxu0  ;;  %12044 = vmatpush3.bf16.msra.mxu0 %v13571_v17  ;;  %v13575_v17 = vld [vmem:[%s18670_s11 + $0x218] sm:$0xff]  }
 0xa1a   :  { %v11842_v29 = vpop.f32.mrb[209].mxu0  ;;  %12324 = vmatprep.subr.bf16.mxu0 %v13728_v12 }
 0xa1b   :  { %v18275_v9 = vadd.f32 %v11842_v29, %v11841_v24  ;;  %v11844_v56 = vpop.f32.mrb[210].mxu0  ;;  %v13576_v24 = vld [vmem:[%s18670_s11 + $0x220] sm:$0xff]  }
 0xa1c   :  { %v11845_v53 = vpop.f32.mrb[211].mxu0  ;;  %10760 = vmatmul.mubr.bf16.gmra.mrb[36].mxu0 %v18053_v16  ;;  %v9737_v16 = vshrl.u32 %v13569_v63, 16  ;;  %v9848_v63 = vshll.u32 %v18168_v22, 16 }
 0xa1d   :  { %v18278_v35 = vadd.f32 %v11845_v53, %v11844_v56  ;;  %10767 = vmatprep.mubr.bf16.mxu0 %v18065_v50  ;;  %v13578_v56 = vld [vmem:[%s18670_s11 + $0x230] sm:$0xff]  }
 0xa1e   :  { %v9739_v60 = vrot.slane %v9737_v16, 1 }
 0xa24   :  { %10768 = vmatmul.mubr.bf16.gmra.mrb[40].mxu0 %v18068_v38  ;;  %v9742_v38 = vrot.slane %v9740_v51, 2 }
 0xa25   :  { %10775 = vmatprep.mubr.bf16.mxu0 %v18082_v6 }
 0xa26   :  { %v9743_v5 = vor.u32 %v9742_v38, %v9739_v60  ;;  %v9850_v38 = vrot.slane %v9848_v63, 3 }
 0xa27   :  { %v11847_v30 = vpop.f32.mrb[212].mxu0 }
 0xa28   :  { %v11848_v61 = vpop.f32.mrb[213].mxu0  ;;  %v9744_v46 = vsel %vm1576_vm10, %v18119_v10, %v9743_v5 }
 0xa29   :  { %v18284_v54 = vadd.f32 %v11848_v61, %v11847_v30  ;;  %v11850_v45 = vpop.f32.mrb[214].mxu0  ;;  %v13580_v61 = vld [vmem:[%s18670_s11 + $0x238] sm:$0xff]  }
 0xa2a   :  { %v11851_v4 = vpop.f32.mrb[215].mxu0 }
 0xa2b   :  { %v18286_v34 = vadd.f32 %v11851_v4, %v11850_v45  ;;  %v9845_v4 = vshrl.u32 %v18168_v22, 16 }
 0xa2c   :  { %10776 = vmatmul.mubr.bf16.gmra.mrb[44].mxu0 %v18103_v26 }
 0xa2d   :  { %10783 = vmatprep.mubr.bf16.mxu0 %v18111_v27  ;;  %v9847_v60 = vrot.slane %v9845_v4, 2 }
 0xa34   :  { %10784 = vmatmul.mubr.bf16.gmra.mrb[48].mxu0 %v18130_v2  ;;  %v13572_v2 = vld [vmem:[%s18670_s11 + $0x200] sm:$0xff]  }
 0xa35   :  { %10791 = vmatprep.mubr.bf16.mxu0 %v9775_v43  ;;  %v9857_v43 = vshll.u32 %v18170_v28, 16 }
 0xa37   :  { %v11853_v14 = vpop.f32.mrb[216].mxu0 }
 0xa38   :  { %v11854_v23 = vpop.f32.mrb[217].mxu0 }
 0xa39   :  { %v18293_v31 = vadd.f32 %v11854_v23, %v11853_v14  ;;  %v11856_v33 = vpop.f32.mrb[218].mxu0  ;;  %v9859_v23 = vrot.slane %v9857_v43, 3 }
 0xa3a   :  { %v11857_v26 = vpop.f32.mrb[219].mxu0 }
 0xa3b   :  { %v18297_v40 = vadd.f32 %v11857_v26, %v11856_v33  ;;  %v9798_v33 = vrot.slane %v18168_v22, 2 }
 0xa3c   :  { %10792 = vmatmul.mubr.bf16.gmra.mrb[52].mxu0 %v9744_v46 }
 0xa3d   :  { %10832 = vmatprep.mubr.bf16.mxu0 %v17863_v19  ;;  %v13574_v19 = vld [vmem:[%s18670_s11 + $0x210] sm:$0xff]  }
 0xa44   :  { %10833 = vmatmul.mubr.bf16.vlgmr.msra.gmra.mrb[56].mxu0 %v17838_v18 }
 0xa45   :  { %12325 = vmatpush3.bf16.msra.mxu0 %v13572_v2  ;;  %10840 = vmatprep.mubr.bf16.mxu0 %v17933_v21 }
 0xa46   :  { %12326 = vmatprep.subr.bf16.mxu0 %v13728_v12 }
 0xa47   :  { %v11859_v10 = vpop.f32.mrb[220].mxu0 }
 0xa48   :  { %v11860_v42 = vpop.f32.mrb[221].mxu0 }
 0xa49   :  { %12327 = vmatpush3.bf16.msra.mxu0 %v13573_v37  ;;  %v18312_v39 = vadd.f32 %v11860_v42, %v11859_v10  ;;  %v11862_v52 = vpop.f32.mrb[222].mxu0 }
 0xa4a   :  { %12328 = vmatprep.subr.bf16.mxu0 %v13728_v12  ;;  %v11863_v18 = vpop.f32.mrb[223].mxu0 }
 0xa4b   :  { %v18315_v21 = vadd.f32 %v11863_v18, %v11862_v52 }
 0xa4c   :  { %10841 = vmatmul.mubr.bf16.gmra.mrb[60].mxu0 %v17906_v7  ;;  %v13577_v7 = vld [vmem:[%s18670_s11 + $0x228] sm:$0xff]  }
 0xa4d   :  { %10848 = vmatprep.mubr.bf16.mxu0 %v18004_v8  ;;  %12329 = vmatpush3.bf16.msra.mxu0 %v13574_v19 }
 0xa4e   :  { %12330 = vmatprep.subr.bf16.mxu0 %v13728_v12 }
 0xa51   :  { %12331 = vmatpush3.bf16.msra.mxu0 %v13575_v17 }
 0xa52   :  { %12332 = vmatprep.subr.bf16.mxu0 %v13728_v12 }
 0xa54   :  { %10849 = vmatmul.mubr.bf16.gmra.mrb[64].mxu0 %v17975_v25 }
 0xa55   :  { %10856 = vmatprep.mubr.bf16.mxu0 %v18057_v49  ;;  %12333 = vmatpush3.bf16.msra.mxu0 %v13576_v24 }
 0xa56   :  { %12334 = vmatprep.subr.bf16.mxu0 %v13728_v12 }
 0xa57   :  { %v11865_v8 = vpop.f32.mrb[224].mxu0 }
 0xa58   :  { %v11866_v29 = vpop.f32.mrb[225].mxu0 }
 0xa59   :  { %12335 = vmatpush3.bf16.msra.mxu0 %v13577_v7  ;;  %v18336_v53 = vadd.f32 %v11866_v29, %v11865_v8  ;;  %v11868_v30 = vpop.f32.mrb[226].mxu0  ;;  %v18380_v8 = vld [vmem:[%s18671_s12] ss:$0 sm:$0xff] }
 0xa5a   :  { %12336 = vmatprep.subr.bf16.mxu0 %v13728_v12  ;;  %v11869_v25 = vpop.f32.mrb[227].mxu0 }
 0xa5b   :  { %v18339_v49 = vadd.f32 %v11869_v25, %v11868_v30 }
 0xa5c   :  { %10857 = vmatmul.mubr.bf16.gmra.mrb[68].mxu0 %v18032_v47 }
 0xa5d   :  { %10864 = vmatprep.mubr.bf16.mxu0 %v18096_v36  ;;  %12337 = vmatpush3.bf16.msra.mxu0 %v13578_v56  ;;  %v10520_v56 = vadd.f32 %v18249_v62, %v18380_v8  ;;  %v10528_v62 = vadd.f32 %v18275_v9, %v18380_v8  ;;  %v10536_v9 = vadd.f32 %v18284_v54, %v18380_v8 }
 0xa5e   :  { %12338 = vmatprep.subr.bf16.mxu0 %v13728_v12  ;;  %v10544_v54 = vadd.f32 %v18293_v31, %v18380_v8  ;;  %v10552_v31 = vadd.f32 %v18312_v39, %v18380_v8  ;;  %v10560_v39 = vadd.f32 %v18336_v53, %v18380_v8 }
 0xa61   :  { %12339 = vmatpush3.bf16.msra.mxu0 %v13580_v61 }
 0xa64   :  { %10865 = vmatmul.mubr.bf16.gmra.mrb[72].mxu0 %v18065_v50  ;;  %v9851_v50 = vor.u32 %v9850_v38, %v9847_v60 }
 0xa65   :  { %10872 = vmatprep.mubr.bf16.mxu0 %v18149_v1  ;;  %v9854_v1 = vshrl.u32 %v18170_v28, 16  ;;  %v9799_v28 = vsel %vm1688_vm13, %v18099_v3, %v9798_v33 }
 0xa66   :  { %v9852_v5 = vsel %vm1767_vm12, %v18182_v32, %v9851_v50 }
 0xa67   :  { %v11871_v45 = vpop.f32.mrb[228].mxu0  ;;  %v9856_v14 = vrot.slane %v9854_v1, 2 }
 0xa68   :  { %v11872_v47 = vpop.f32.mrb[229].mxu0 }
 0xa69   :  { %v18351_v16 = vadd.f32 %v11872_v47, %v11871_v45  ;;  %v11874_v36 = vpop.f32.mrb[230].mxu0  ;;  %v9860_v46 = vor.u32 %v9859_v23, %v9856_v14  ;;  %v10523_v45 = vadd.f32 %v18255_v48, %v18380_v8  ;;  %v10531_v48 = vadd.f32 %v18278_v35, %v18380_v8 }
 0xa6a   :  { %v11875_v51 = vpop.f32.mrb[231].mxu0  ;;  %v10539_v35 = vadd.f32 %v18286_v34, %v18380_v8  ;;  %v10547_v34 = vadd.f32 %v18297_v40, %v18380_v8  ;;  %v10555_v40 = vadd.f32 %v18315_v21, %v18380_v8  ;;  %v10563_v21 = vadd.f32 %v18339_v49, %v18380_v8 }
 0xa6b   :  { %v18353_v13 = vadd.f32 %v11875_v51, %v11874_v36  ;;  %v9861_v32 = vsel %vm1767_vm12, %v9851_v50, %v9860_v46  ;;  %v10568_v53 = vadd.f32 %v18351_v16, %v18380_v8 }
 0xa6c   :  { %10873 = vmatmul.mubr.bf16.gmra.mrb[76].mxu0 %v18082_v6 }
 0xa6d   :  { %10880 = vmatprep.mubr.bf16.mxu0 %v18193_v0  ;;  %v10571_v49 = vadd.f32 %v18353_v13, %v18380_v8 }
 0xa74   :  { %10881 = vmatmul.mubr.bf16.gmra.mrb[80].mxu0 %v18111_v27  ;;  %v13581_v27 = vld [vmem:[#allocation4 + $0x58] ss:$0 sps:$4 sm:$0x33]  }
 0xa75   :  { %10888 = vmatprep.mubr.bf16.mxu0 %v9852_v5  ;;  %v9800_v19 = vrot.slane %v13581_v27, 2 }
 0xa77   :  { %v11877_v6 = vpop.f32.mrb[232].mxu0  ;;  %v9801_v7 = vsel %vm1688_vm13, %v9798_v33, %v9800_v19 }
 0xa78   :  { %v11878_v26 = vpop.f32.mrb[233].mxu0 }
 0xa79   :  { %v18363_v2 = vadd.f32 %v11878_v26, %v11877_v6  ;;  %v11880_v0 = vpop.f32.mrb[234].mxu0 }
 0xa7a   :  { %v11881_v37 = vpop.f32.mrb[235].mxu0 }
 0xa7b   :  { %v18367_v10 = vadd.f32 %v11881_v37, %v11880_v0  ;;  %v10576_v16 = vadd.f32 %v18363_v2, %v18380_v8 }
 0xa7c   :  { %10889 = vmatmul.mubr.bf16.gmra.mrb[84].mxu0 %v9799_v28 }
 0xa7d   :  { %10896 = vmatprep.mubr.bf16.mxu0 %v9861_v32  ;;  %v10579_v13 = vadd.f32 %v18367_v10, %v18380_v8 }
 0xa7f   :  { %v11883_v42 = vpop.f32.mrb[236].mxu0 }
 0xa80   :  { %v11884_v22 = vpop.f32.mrb[237].mxu0 }
 0xa81   :  { %v18370_v52 = vadd.f32 %v11884_v22, %v11883_v42  ;;  %v11886_v18 = vpop.f32.mrb[238].mxu0 }
 0xa82   :  { %v11887_v17 = vpop.f32.mrb[239].mxu0 }
 0xa83   :  { %v18372_v24 = vadd.f32 %v11887_v17, %v11886_v18  ;;  %v10584_v2 = vadd.f32 %v18370_v52, %v18380_v8 }
 0xa84   :  { %10897 = vmatmul.mubr.bf16.gmra.mrb[88].mxu0 %v9801_v7 }
 0xa85   :  { %12340 = vmatprep.mubr.msk.bf16.mxu0 %vm13729_vm14, %v13728_v12  ;;  %v10587_v10 = vadd.f32 %v18372_v24, %v18380_v8 }
 0xa87   :  { %v11905_v3 = vpop.f32.mrb[240].mxu0 }
 0xa88   :  { %v11906_v29 = vpop.f32.mrb[241].mxu0 }
 0xa89   :  { %v11907_v30 = vadd.f32 %v11906_v29, %v11905_v3  ;;  %v11908_v25 = vpop.f32.mrb[242].mxu0 }
 0xa8a   :  { %v11909_v61 = vpop.f32.mrb[243].mxu0 }
 0xa8b   :  { %v18386_v4 = vadd.f32 %v11907_v30, %v10520_v56  ;;  %v11910_v63 = vadd.f32 %v11909_v61, %v11908_v25 }
 0xa8c   :  { %12341 = vmatmul.mubr.bf16.vlgmr.msra.gmra.mrb[92].mxu0 %v17845_v58 }
 0xa8d   :  { %v18389_v47 = vadd.f32 %v11910_v63, %v10523_v45  ;;  %12344 = vmatprep.mubr.msk.bf16.mxu0 %vm13729_vm14, %v13728_v12 }
 0xa8f   :  { %v11911_v36 = vpop.f32.mrb[244].mxu0 }
 0xa90   :  { %v11912_v51 = vpop.f32.mrb[245].mxu0 }
 0xa91   :  { %v11913_v60 = vadd.f32 %v11912_v51, %v11911_v36  ;;  %v11914_v38 = vpop.f32.mrb[246].mxu0 }
 0xa92   :  { %v11915_v50 = vpop.f32.mrb[247].mxu0 }
 0xa93   :  { %v18397_v1 = vadd.f32 %v11913_v60, %v10528_v62  ;;  %v11916_v43 = vadd.f32 %v11915_v50, %v11914_v38 }
 0xa94   :  { %12345 = vmatmul.mubr.bf16.gmra.mrb[96].mxu0 %v17914_v44 }
 0xa95   :  { %v18400_v58 = vadd.f32 %v11916_v43, %v10531_v48  ;;  %12348 = vmatprep.mubr.msk.bf16.mxu0 %vm13729_vm14, %v13728_v12 }
 0xa97   :  { %v11917_v5 = vpop.f32.mrb[248].mxu0 }
 0xa98   :  { %v11918_v14 = vpop.f32.mrb[249].mxu0 }
 0xa99   :  { %v11919_v23 = vadd.f32 %v11918_v14, %v11917_v5  ;;  %v11920_v33 = vpop.f32.mrb[250].mxu0 }
 0xa9a   :  { %v11921_v6 = vpop.f32.mrb[251].mxu0 }
 0xa9b   :  { %v18408_v26 = vadd.f32 %v11919_v23, %v10536_v9  ;;  %v11922_v46 = vadd.f32 %v11921_v6, %v11920_v33 }
 0xa9c   :  { %12349 = vmatmul.mubr.bf16.gmra.mrb[100].mxu0 %v17983_v57 }
 0xa9d   :  { %v18411_v44 = vadd.f32 %v11922_v46, %v10539_v35  ;;  %12352 = vmatprep.mubr.msk.bf16.mxu0 %vm13729_vm14, %v13728_v12 }
 0xa9f   :  { %v11923_v0 = vpop.f32.mrb[252].mxu0 }
 0xaa0   :  { %v11924_v37 = vpop.f32.mrb[253].mxu0 }
 0xaa1   :  { %v11925_v28 = vadd.f32 %v11924_v37, %v11923_v0  ;;  %v11926_v27 = vpop.f32.mrb[254].mxu0 }
 0xaa2   :  { %v11927_v32 = vpop.f32.mrb[255].mxu0 }
 0xaa3   :  { %v18419_v42 = vadd.f32 %v11925_v28, %v10544_v54  ;;  %v11928_v19 = vadd.f32 %v11927_v32, %v11926_v27 }
 0xaa4   :  { %12353 = vmatmul.mubr.bf16.gmra.mrb[104].mxu0 %v18044_v11 }
 0xaa5   :  { %v18422_v57 = vadd.f32 %v11928_v19, %v10547_v34  ;;  %12356 = vmatprep.mubr.msk.bf16.mxu0 %vm13729_vm14, %v13728_v12 }
 0xaa7   :  { %v11929_v22 = vpop.f32.mrb[0].mxu0 }
 0xaa8   :  { %v11930_v18 = vpop.f32.mrb[1].mxu0 }
 0xaa9   :  { %v11931_v17 = vadd.f32 %v11930_v18, %v11929_v22  ;;  %v11932_v7 = vpop.f32.mrb[2].mxu0 }
 0xaaa   :  { %v11933_v3 = vpop.f32.mrb[3].mxu0 }
 0xaab   :  { %v18430_v29 = vadd.f32 %v11931_v17, %v10552_v31  ;;  %v11934_v56 = vadd.f32 %v11933_v3, %v11932_v7 }
 0xaac   :  { %12357 = vmatmul.mubr.bf16.gmra.mrb[108].mxu0 %v18087_v20 }
 0xaad   :  { %v18433_v11 = vadd.f32 %v11934_v56, %v10555_v40  ;;  %12360 = vmatprep.mubr.msk.bf16.mxu0 %vm13729_vm14, %v13728_v12 }
 0xaaf   :  { %v11935_v30 = vpop.f32.mrb[4].mxu0 }
 0xab0   :  { %v11936_v25 = vpop.f32.mrb[5].mxu0 }
 0xab1   :  { %v11937_v61 = vadd.f32 %v11936_v25, %v11935_v30  ;;  %v11938_v45 = vpop.f32.mrb[6].mxu0 }
 0xab2   :  { %v11939_v63 = vpop.f32.mrb[7].mxu0 }
 0xab3   :  { %v18441_v36 = vadd.f32 %v11937_v61, %v10560_v39  ;;  %v11940_v51 = vadd.f32 %v11939_v63, %v11938_v45 }
 0xab4   :  { %12361 = vmatmul.mubr.bf16.gmra.mrb[112].mxu0 %v18138_v41 }
 0xab5   :  { %v18444_v20 = vadd.f32 %v11940_v51, %v10563_v21  ;;  %12364 = vmatprep.mubr.msk.bf16.mxu0 %vm13729_vm14, %v13728_v12 }
 0xab7   :  { %v11941_v62 = vpop.f32.mrb[8].mxu0 }
 0xab8   :  { %v11942_v60 = vpop.f32.mrb[9].mxu0 }
 0xab9   :  { %v11943_v38 = vadd.f32 %v11942_v60, %v11941_v62  ;;  %v11944_v50 = vpop.f32.mrb[10].mxu0 }
 0xaba   :  { %v11945_v48 = vpop.f32.mrb[11].mxu0 }
 0xabb   :  { %v18452_v43 = vadd.f32 %v11943_v38, %v10568_v53  ;;  %v11946_v5 = vadd.f32 %v11945_v48, %v11944_v50 }
 0xabc   :  { %12365 = vmatmul.mubr.bf16.gmra.mrb[116].mxu0 %v18180_v59 }
 0xabd   :  { %v18455_v41 = vadd.f32 %v11946_v5, %v10571_v49  ;;  %12368 = vmatprep.mubr.msk.bf16.mxu0 %vm13729_vm14, %v13728_v12 }
 0xabf   :  { %v11947_v14 = vpop.f32.mrb[12].mxu0 }
 0xac0   :  { %v11948_v9 = vpop.f32.mrb[13].mxu0 }
 0xac1   :  { %v11949_v23 = vadd.f32 %v11948_v9, %v11947_v14  ;;  %v11950_v33 = vpop.f32.mrb[14].mxu0 }
 0xac2   :  { %v11951_v6 = vpop.f32.mrb[15].mxu0 }
 0xac3   :  { %v18463_v35 = vadd.f32 %v11949_v23, %v10576_v16  ;;  %v11952_v46 = vadd.f32 %v11951_v6, %v11950_v33 }
 0xac4   :  { %12369 = vmatmul.mubr.bf16.gmra.mrb[120].mxu0 %v18196_v55 }
 0xac5   :  { %v18466_v59 = vadd.f32 %v11952_v46, %v10579_v13  ;;  %12372 = vmatprep.mubr.msk.bf16.mxu0 %vm13729_vm14, %v13728_v12 }
 0xac7   :  { %v11953_v0 = vpop.f32.mrb[16].mxu0 }
 0xac8   :  { %v11954_v37 = vpop.f32.mrb[17].mxu0 }
 0xac9   :  { %v11955_v54 = vadd.f32 %v11954_v37, %v11953_v0  ;;  %v11956_v28 = vpop.f32.mrb[18].mxu0 }
 0xaca   :  { %v11957_v27 = vpop.f32.mrb[19].mxu0 }
 0xacb   :  { %v18474_v32 = vadd.f32 %v11955_v54, %v10584_v2  ;;  %v11958_v34 = vadd.f32 %v11957_v27, %v11956_v28 }
 0xacc   :  { %12373 = vmatmul.mubr.bf16.gmra.mrb[124].mxu0 %v18202_v15 }
 0xacd   :  { %v18477_v55 = vadd.f32 %v11958_v34, %v10587_v10 }
 0xacf   :  { %v11975_v19 = vpop.f32.mrb[20].mxu0 }
 0xad0   :  { %v11976_v12 = vpop.f32.mrb[21].mxu0 }
 0xad1   :  { %v11977_v22 = vadd.f32 %v11976_v12, %v11975_v19  ;;  %v11978_v18 = vpop.f32.mrb[22].mxu0 }
 0xad2   :  { %v11979_v31 = vpop.f32.mrb[23].mxu0 }
 0xad3   :  { %v18480_v52 = vadd.f32 %v11977_v22, %v18386_v4  ;;  %v11980_v17 = vadd.f32 %v11979_v31, %v11978_v18 }
 0xad5   :  { %v18483_v7 = vadd.f32 %v11980_v17, %v18389_v47 }
 0xad7   :  { %v11981_v24 = vpop.f32.mrb[24].mxu0 }
 0xad8   :  { %v11982_v8 = vpop.f32.mrb[25].mxu0 }
 0xad9   :  { %v11983_v3 = vadd.f32 %v11982_v8, %v11981_v24  ;;  %v11984_v40 = vpop.f32.mrb[26].mxu0 }
 0xada   :  { %v11985_v56 = vpop.f32.mrb[27].mxu0 }
 0xadb   :  { %v18486_v15 = vadd.f32 %v11983_v3, %v18397_v1  ;;  %v11986_v30 = vadd.f32 %v11985_v56, %v11984_v40 }
 0xadd   :  { %v18489_v25 = vadd.f32 %v11986_v30, %v18400_v58 }
 0xadf   :  { %v11987_v39 = vpop.f32.mrb[28].mxu0 }
 0xae0   :  { %v11988_v61 = vpop.f32.mrb[29].mxu0 }
 0xae1   :  { %v11989_v4 = vadd.f32 %v11988_v61, %v11987_v39  ;;  %v11990_v45 = vpop.f32.mrb[30].mxu0 }
 0xae2   :  { %v11991_v63 = vpop.f32.mrb[31].mxu0 }
 0xae3   :  { %v18492_v47 = vadd.f32 %v11989_v4, %v18408_v26  ;;  %v11992_v21 = vadd.f32 %v11991_v63, %v11990_v45 }
 0xae5   :  { %v18495_v51 = vadd.f32 %v11992_v21, %v18411_v44 }
 0xae7   :  { %v11993_v62 = vpop.f32.mrb[32].mxu0 }
 0xae8   :  { %v11994_v60 = vpop.f32.mrb[33].mxu0 }
 0xae9   :  { %v11995_v1 = vadd.f32 %v11994_v60, %v11993_v62  ;;  %v11996_v53 = vpop.f32.mrb[34].mxu0 }
 0xaea   :  { %v11997_v38 = vpop.f32.mrb[35].mxu0 }
 0xaeb   :  { %v18498_v58 = vadd.f32 %v11995_v1, %v18419_v42  ;;  %v11998_v50 = vadd.f32 %v11997_v38, %v11996_v53 }
 0xaed   :  { %v18501_v48 = vadd.f32 %v11998_v50, %v18422_v57 }
 0xaef   :  { %v11999_v49 = vpop.f32.mrb[36].mxu0 }
 0xaf0   :  { %v12000_v5 = vpop.f32.mrb[37].mxu0 }
 0xaf1   :  { %v12001_v26 = vadd.f32 %v12000_v5, %v11999_v49  ;;  %v12002_v14 = vpop.f32.mrb[38].mxu0 }
 0xaf2   :  { %v12003_v9 = vpop.f32.mrb[39].mxu0 }
 0xaf3   :  { %v18504_v44 = vadd.f32 %v12001_v26, %v18430_v29  ;;  %v12004_v16 = vadd.f32 %v12003_v9, %v12002_v14 }
 0xaf5   :  { %v18507_v23 = vadd.f32 %v12004_v16, %v18433_v11 }
 0xaf7   :  { %v12005_v33 = vpop.f32.mrb[40].mxu0 }
 0xaf8   :  { %v12006_v6 = vpop.f32.mrb[41].mxu0 }
 0xaf9   :  { %v12007_v42 = vadd.f32 %v12006_v6, %v12005_v33  ;;  %v12008_v13 = vpop.f32.mrb[42].mxu0 }
 0xafa   :  { %v12009_v46 = vpop.f32.mrb[43].mxu0 }
 0xafb   :  { %v18510_v57 = vadd.f32 %v12007_v42, %v18441_v36  ;;  %v12010_v0 = vadd.f32 %v12009_v46, %v12008_v13 }
 0xafd   :  { %v18513_v37 = vadd.f32 %v12010_v0, %v18444_v20 }
 0xaff   :  { %v12011_v2 = vpop.f32.mrb[44].mxu0 }
 0xb00   :  { %v12012_v54 = vpop.f32.mrb[45].mxu0 }
 0xb01   :  { %v12013_v29 = vadd.f32 %v12012_v54, %v12011_v2  ;;  %v12014_v28 = vpop.f32.mrb[46].mxu0 }
 0xb02   :  { %v12015_v27 = vpop.f32.mrb[47].mxu0 }
 0xb03   :  { %v18516_v11 = vadd.f32 %v12013_v29, %v18452_v43  ;;  %v12016_v10 = vadd.f32 %v12015_v27, %v12014_v28 }
 0xb05   :  { %v18519_v34 = vadd.f32 %v12016_v10, %v18455_v41 }
 0xb07   :  { %v12017_v19 = vpop.f32.mrb[48].mxu0 }
 0xb08   :  { %v12018_v12 = vpop.f32.mrb[49].mxu0 }
 0xb09   :  { %v12019_v36 = vadd.f32 %v12018_v12, %v12017_v19  ;;  %v12020_v22 = vpop.f32.mrb[50].mxu0 }
 0xb0a   :  { %v12021_v18 = vpop.f32.mrb[51].mxu0 }
 0xb0b   :  { %v18522_v20 = vadd.f32 %v12019_v36, %v18463_v35  ;;  %v12022_v31 = vadd.f32 %v12021_v18, %v12020_v22 }
 0xb0d   :  { %v18525_v17 = vadd.f32 %v12022_v31, %v18466_v59 }
 0xb0f   :  { %v12023_v24 = vpop.f32.mrb[52].mxu0 }
 0xb10   :  { %v12024_v8 = vpop.f32.mrb[53].mxu0 }
 0xb11   :  { %v12025_v43 = vadd.f32 %v12024_v8, %v12023_v24  ;;  %v12026_v3 = vpop.f32.mrb[54].mxu0 }
 0xb12   :  { %v12027_v40 = vpop.f32.mrb[55].mxu0 }
 0xb13   :  { %v18528_v41 = vadd.f32 %v12025_v43, %v18474_v32  ;;  %v12028_v56 = vadd.f32 %v12027_v40, %v12026_v3 }
 0xb15   :  { %v18531_v30 = vadd.f32 %v12028_v56, %v18477_v55 }
 0xb17   :  { %v12045_v39 = vpop.f32.mrb[56].mxu0 }
 0xb18   :  { %v12046_v61 = vpop.f32.mrb[57].mxu0 }
 0xb19   :  { %v12047_v35 = vadd.f32 %v12046_v61, %v12045_v39  ;;  %v12048_v4 = vpop.f32.mrb[58].mxu0 }
 0xb1a   :  { %v12049_v45 = vpop.f32.mrb[59].mxu0 }
 0xb1b   :  { %v12050_v63 = vadd.f32 %v12049_v45, %v12048_v4  ;;  %v18534_v59 = vadd.f32 %v12047_v35, %v18480_v52 }
 0xb1d   :  { %v18537_v21 = vadd.f32 %v12050_v63, %v18483_v7 }
 0xb1f   :  { %v12051_v62 = vpop.f32.mrb[60].mxu0 }
 0xb20   :  { %v12052_v60 = vpop.f32.mrb[61].mxu0 }
 0xb21   :  { %v12053_v32 = vadd.f32 %v12052_v60, %v12051_v62  ;;  %v12054_v1 = vpop.f32.mrb[62].mxu0 }
 0xb22   :  { %v12055_v53 = vpop.f32.mrb[63].mxu0 }
 0xb23   :  { %v12056_v38 = vadd.f32 %v12055_v53, %v12054_v1  ;;  %v18540_v55 = vadd.f32 %v12053_v32, %v18486_v15 }
 0xb25   :  { %v18543_v50 = vadd.f32 %v12056_v38, %v18489_v25 }
 0xb27   :  { %v12057_v49 = vpop.f32.mrb[64].mxu0 }
 0xb28   :  { %v12058_v5 = vpop.f32.mrb[65].mxu0 }
 0xb29   :  { %v12059_v26 = vadd.f32 %v12058_v5, %v12057_v49  ;;  %v12060_v52 = vpop.f32.mrb[66].mxu0 }
 0xb2a   :  { %v12061_v14 = vpop.f32.mrb[67].mxu0 }
 0xb2b   :  { %v12062_v9 = vadd.f32 %v12061_v14, %v12060_v52  ;;  %v18546_v7 = vadd.f32 %v12059_v26, %v18492_v47 }
 0xb2d   :  { %v18549_v16 = vadd.f32 %v12062_v9, %v18495_v51 }
 0xb2f   :  { %v12063_v33 = vpop.f32.mrb[68].mxu0 }
 0xb30   :  { %v12064_v6 = vpop.f32.mrb[69].mxu0 }
 0xb31   :  { %v12065_v42 = vadd.f32 %v12064_v6, %v12063_v33  ;;  %v12066_v15 = vpop.f32.mrb[70].mxu0 }
 0xb32   :  { %v12067_v13 = vpop.f32.mrb[71].mxu0 }
 0xb33   :  { %v12068_v46 = vadd.f32 %v12067_v13, %v12066_v15  ;;  %v18552_v25 = vadd.f32 %v12065_v42, %v18498_v58 }
 0xb35   :  { %v18555_v0 = vadd.f32 %v12068_v46, %v18501_v48 }
 0xb37   :  { %v12069_v2 = vpop.f32.mrb[72].mxu0 }
 0xb38   :  { %v12070_v54 = vpop.f32.mrb[73].mxu0 }
 0xb39   :  { %v12071_v29 = vadd.f32 %v12070_v54, %v12069_v2  ;;  %v12072_v47 = vpop.f32.mrb[74].mxu0 }
 0xb3a   :  { %v12073_v28 = vpop.f32.mrb[75].mxu0 }
 0xb3b   :  { %v12074_v27 = vadd.f32 %v12073_v28, %v12072_v47  ;;  %v18558_v51 = vadd.f32 %v12071_v29, %v18504_v44 }
 0xb3d   :  { %v18561_v10 = vadd.f32 %v12074_v27, %v18507_v23 }
 0xb3f   :  { %v12075_v19 = vpop.f32.mrb[76].mxu0 }
 0xb40   :  { %v12076_v12 = vpop.f32.mrb[77].mxu0 }
 0xb41   :  { %v12077_v36 = vadd.f32 %v12076_v12, %v12075_v19  ;;  %v12078_v58 = vpop.f32.mrb[78].mxu0 }
 0xb42   :  { %v12079_v22 = vpop.f32.mrb[79].mxu0 }
 0xb43   :  { %v12080_v18 = vadd.f32 %v12079_v22, %v12078_v58  ;;  %v18564_v48 = vadd.f32 %v12077_v36, %v18510_v57 }
 0xb45   :  { %v18567_v31 = vadd.f32 %v12080_v18, %v18513_v37 }
 0xb47   :  { %v12081_v24 = vpop.f32.mrb[80].mxu0 }
 0xb48   :  { %v12082_v8 = vpop.f32.mrb[81].mxu0 }
 0xb49   :  { %v12083_v43 = vadd.f32 %v12082_v8, %v12081_v24  ;;  %v12084_v44 = vpop.f32.mrb[82].mxu0 }
 0xb4a   :  { %v12085_v3 = vpop.f32.mrb[83].mxu0 }
 0xb4b   :  { %v12086_v40 = vadd.f32 %v12085_v3, %v12084_v44  ;;  %v18570_v23 = vadd.f32 %v12083_v43, %v18516_v11 }
 0xb4d   :  { %v18573_v56 = vadd.f32 %v12086_v40, %v18519_v34 }
 0xb4f   :  { %v12087_v39 = vpop.f32.mrb[84].mxu0 }
 0xb50   :  { %v12088_v61 = vpop.f32.mrb[85].mxu0 }
 0xb51   :  { %v12089_v35 = vadd.f32 %v12088_v61, %v12087_v39  ;;  %v12090_v57 = vpop.f32.mrb[86].mxu0 }
 0xb52   :  { %v12091_v4 = vpop.f32.mrb[87].mxu0 }
 0xb53   :  { %v12092_v45 = vadd.f32 %v12091_v4, %v12090_v57  ;;  %v18576_v37 = vadd.f32 %v12089_v35, %v18522_v20 }
 0xb55   :  { %v18579_v63 = vadd.f32 %v12092_v45, %v18525_v17 }
 0xb57   :  { %v12093_v62 = vpop.f32.mrb[88].mxu0 }
 0xb58   :  { %v12094_v60 = vpop.f32.mrb[89].mxu0 }
 0xb59   :  { %v12095_v32 = vadd.f32 %v12094_v60, %v12093_v62  ;;  %v12096_v11 = vpop.f32.mrb[90].mxu0 }
 0xb5a   :  { %v12097_v1 = vpop.f32.mrb[91].mxu0 }
 0xb5b   :  { %v12098_v53 = vadd.f32 %v12097_v1, %v12096_v11  ;;  %v18582_v34 = vadd.f32 %v12095_v32, %v18528_v41 }
 0xb5d   :  { %v18585_v38 = vadd.f32 %v12098_v53, %v18531_v30 }
 0xb5f   :  { %v10939_v49 = vpop.f32.mrb[92].mxu0 }
 0xb60   :  { %v10940_v5 = vadd.f32 %v10939_v49, %v18534_v59  ;;  %v12342_v20 = vpop.f32.mrb[93].mxu0 }
 0xb61   :  { %v10942_v26 = vpop.f32.mrb[94].mxu0 }
 0xb62   :  { %11010 = vst [vmem:[%s18672_s13] sm:$0xff] %v10940_v5  ;;  %v10943_v17 = vadd.f32 %v10942_v26, %v18537_v21  ;;  %v12343_v52 = vpop.f32.mrb[95].mxu0 }
 0xb64   :  { %11011 = vst [vmem:[%s18672_s13 + $0x8] sm:$0xff] %v10943_v17 }
 0xb67   :  { %v10947_v41 = vpop.f32.mrb[96].mxu0 }
 0xb68   :  { %v10948_v30 = vadd.f32 %v10947_v41, %v18540_v55  ;;  %v12346_v14 = vpop.f32.mrb[97].mxu0 }
 0xb69   :  { %v10950_v9 = vpop.f32.mrb[98].mxu0 }
 0xb6a   :  { %11012 = vst [vmem:[%s18672_s13 + $0x10] sm:$0xff] %v10948_v30  ;;  %v10951_v59 = vadd.f32 %v10950_v9, %v18543_v50  ;;  %v12347_v33 = vpop.f32.mrb[99].mxu0 }
 0xb6c   :  { %11013 = vst [vmem:[%s18672_s13 + $0x18] sm:$0xff] %v10951_v59 }
 0xb6f   :  { %v10955_v21 = vpop.f32.mrb[100].mxu0 }
 0xb70   :  { %v10956_v6 = vadd.f32 %v10955_v21, %v18546_v7  ;;  %v12350_v42 = vpop.f32.mrb[101].mxu0 }
 0xb71   :  { %v10958_v15 = vpop.f32.mrb[102].mxu0 }
 0xb72   :  { %11014 = vst [vmem:[%s18672_s13 + $0x20] sm:$0xff] %v10956_v6  ;;  %v10959_v55 = vadd.f32 %v10958_v15, %v18549_v16  ;;  %v12351_v13 = vpop.f32.mrb[103].mxu0 }
 0xb74   :  { %11015 = vst [vmem:[%s18672_s13 + $0x28] sm:$0xff] %v10959_v55 }
 0xb77   :  { %v10963_v50 = vpop.f32.mrb[104].mxu0 }
 0xb78   :  { %v10964_v46 = vadd.f32 %v10963_v50, %v18552_v25  ;;  %v12354_v2 = vpop.f32.mrb[105].mxu0 }
 0xb79   :  { %v10966_v54 = vpop.f32.mrb[106].mxu0 }
 0xb7a   :  { %11016 = vst [vmem:[%s18672_s13 + $0x30] sm:$0xff] %v10964_v46  ;;  %v10967_v7 = vadd.f32 %v10966_v54, %v18555_v0  ;;  %v12355_v29 = vpop.f32.mrb[107].mxu0 }
 0xb7c   :  { %11017 = vst [vmem:[%s18672_s13 + $0x38] sm:$0xff] %v10967_v7 }
 0xb7f   :  { %v10971_v16 = vpop.f32.mrb[108].mxu0 }
 0xb80   :  { %v10972_v47 = vadd.f32 %v10971_v16, %v18558_v51  ;;  %v12358_v28 = vpop.f32.mrb[109].mxu0 }
 0xb81   :  { %v10974_v27 = vpop.f32.mrb[110].mxu0 }
 0xb82   :  { %11018 = vst [vmem:[%s18672_s13 + $0x40] sm:$0xff] %v10972_v47  ;;  %v10975_v25 = vadd.f32 %v10974_v27, %v18561_v10  ;;  %v12359_v19 = vpop.f32.mrb[111].mxu0 }
 0xb84   :  { %11019 = vst [vmem:[%s18672_s13 + $0x48] sm:$0xff] %v10975_v25 }
 0xb87   :  { %v10979_v0 = vpop.f32.mrb[112].mxu0 }
 0xb88   :  { %v10980_v12 = vadd.f32 %v10979_v0, %v18564_v48  ;;  %v12362_v36 = vpop.f32.mrb[113].mxu0 }
 0xb89   :  { %v10982_v58 = vpop.f32.mrb[114].mxu0 }
 0xb8a   :  { %11020 = vst [vmem:[%s18672_s13 + $0x50] sm:$0xff] %v10980_v12  ;;  %v10983_v51 = vadd.f32 %v10982_v58, %v18567_v31  ;;  %v12363_v22 = vpop.f32.mrb[115].mxu0 }
 0xb8c   :  { %11021 = vst [vmem:[%s18672_s13 + $0x58] sm:$0xff] %v10983_v51 }
 0xb8f   :  { %v10987_v10 = vpop.f32.mrb[116].mxu0 }
 0xb90   :  { %v10988_v18 = vadd.f32 %v10987_v10, %v18570_v23  ;;  %v12366_v24 = vpop.f32.mrb[117].mxu0 }
 0xb91   :  { %v10990_v8 = vpop.f32.mrb[118].mxu0 }
 0xb92   :  { %11022 = vst [vmem:[%s18672_s13 + $0x60] sm:$0xff] %v10988_v18  ;;  %v10991_v48 = vadd.f32 %v10990_v8, %v18573_v56  ;;  %v12367_v43 = vpop.f32.mrb[119].mxu0 }
 0xb94   :  { %11023 = vst [vmem:[%s18672_s13 + $0x68] sm:$0xff] %v10991_v48 }
 0xb97   :  { %v10995_v31 = vpop.f32.mrb[120].mxu0 }
 0xb98   :  { %v10996_v44 = vadd.f32 %v10995_v31, %v18576_v37  ;;  %v12370_v3 = vpop.f32.mrb[121].mxu0 }
 0xb99   :  { %v10998_v40 = vpop.f32.mrb[122].mxu0 }
 0xb9a   :  { %11024 = vst [vmem:[%s18672_s13 + $0x70] sm:$0xff] %v10996_v44  ;;  %v10999_v23 = vadd.f32 %v10998_v40, %v18579_v63  ;;  %v12371_v39 = vpop.f32.mrb[123].mxu0 }
 0xb9c   :  { %11025 = vst [vmem:[%s18672_s13 + $0x78] sm:$0xff] %v10999_v23 }
 0xb9f   :  { %v11003_v56 = vpop.f32.mrb[124].mxu0 }
 0xba0   :  { %v11004_v61 = vadd.f32 %v11003_v56, %v18582_v34  ;;  %v12374_v35 = vpop.f32.mrb[125].mxu0 }
 0xba1   :  { %v11006_v57 = vpop.f32.mrb[126].mxu0 }
 0xba2   :  { %11026 = vst [vmem:[%s18672_s13 + $0x80] sm:$0xff] %v11004_v61  ;;  %v11007_v4 = vadd.f32 %v11006_v57, %v18585_v38  ;;  %v12375_v45 = vpop.f32.mrb[127].mxu0 }
 0xba4   :  { %11027 = vst [vmem:[%s18672_s13 + $0x88] sm:$0xff] %v11007_v4 }
 0xba5   :  { %11032 = vsyncpa [#allocation7], 1 }

</bundles_post_ra>
